<compile_context>
chip_gen: v7x
topology: tpu7x:2x2x1
jax: 0.10.0
libtpu: 0.0.40
codegen_flags: <defaults>
</compile_context>

<pallas_src>
import functools
import math

import jax
import jax.numpy as jnp
from jax.experimental import pallas as pl
from jax.experimental.pallas import tpu as pltpu

_BN_EPS = 1e-5
_W_PAD = 8          # sublane-aligned offset of the interior columns in the halo scratch


def _vmem_limit_bytes():
    """Per-generation VMEM budget: ~3/4 of physical, capped at 100 MiB."""
    cap = 128 * 1024 * 1024
    try:
        cap = int(pltpu.get_tpu_info().vmem_capacity_bytes)
    except Exception:
        pass
    return min((cap * 3) // 4, 100 * 1024 * 1024)


def _pick_row_tile(H, W, C):
    """Largest row tile (divisor of H) whose f32 tile stays ~<=2 MiB; keeps TR*W a
    multiple of 128 (lane-dense final store) and TR a multiple of 8 when tiling."""
    target = 2 * 1024 * 1024
    if H * W * C * 4 <= target:
        return H
    cands = [d for d in range(8, H, 8) if H % d == 0 and (d * W) % 128 == 0]
    fitting = [d for d in cands if d * W * C * 4 <= target]
    if fitting:
        return max(fitting)
    if cands:
        return min(cands)
    return H


# ---------------------------------------------------------------------------
# Kernel: one depthwise-separable conv stage (composed 3x3xC->O conv), with
#   - optional fused BN+ReLU of the *previous* stage on the input tile (prologue)
#   - in-kernel zero halo (padding=1) in a bf16 VMEM scratch
#   - 9 accumulated tap matmuls on the MXU (no im2col materialization)
#   - per-tile BN partial sums emitted as extra outputs (epilogue)
# ---------------------------------------------------------------------------
def _ds_conv_stage_kernel(x_ref, xtop_ref, xbot_ref, scale_ref, shift_ref,
                          w_ref, b_ref, y_ref, sum_ref, sumsq_ref, xpad_ref,
                          *, TR, W, apply_input_bn_relu):
    """
    x_ref     : (1, TR, W, C_in)    row tile of the flattened-NHWC input
    xtop_ref  : (1, 1, W, C_in)     row just above the tile (clamped; masked at r==0)
    xbot_ref  : (1, 1, W, C_in)     row just below the tile (clamped; masked at last r)
    scale_ref : (1, C_in)           previous stage BN scale = gamma * rsqrt(var + eps)
    shift_ref : (1, C_in)           previous stage BN shift = beta - mean * scale
    w_ref     : (9*C_in, C_out)     composed depthwise+pointwise weight, rows = (tap, c)
    b_ref     : (1, C_out)          composed bias (b_pw + W_pw @ b_dw)
    y_ref     : (1, TR, W, C_out)   pre-BN conv output tile
    sum_ref   : (1, 1, 1, C_out)    per-tile sum(y)   (BN batch-stat partial)
    sumsq_ref : (1, 1, 1, C_out)    per-tile sum(y*y) (BN batch-stat partial)
    xpad_ref  : VMEM scratch (TR+2, W + 2*_W_PAD, C_in), MXU dtype, 1-pixel halo
    """
    C_in = x_ref.shape[-1]
    C_out = w_ref.shape[-1]
    r = pl.program_id(1)
    last_r = pl.num_programs(1) - 1

    def prep(v):
        v = v.astype(jnp.float32)
        if apply_input_bn_relu:
            # BN + ReLU of the previous stage, fused into this stage's prologue.
            v = jnp.maximum(v * scale_ref[...] + shift_ref[...], 0.0)
        return v.astype(xpad_ref.dtype)

    # Zero only the left/right halo slabs; interior and top/bottom halo rows are fully
    # rewritten below each step (no full-scratch clear).
    zslab = jnp.zeros((TR + 2, _W_PAD, C_in), xpad_ref.dtype)
    xpad_ref[:, 0:_W_PAD, :] = zslab
    xpad_ref[:, _W_PAD + W:, :] = zslab

    top = prep(xtop_ref[0])                                     # (1, W, C_in)
    bot = prep(xbot_ref[0])
    top = jnp.where(r > 0, top, jnp.zeros_like(top))             # image-border padding
    bot = jnp.where(r < last_r, bot, jnp.zeros_like(bot))
    xpad_ref[0:1, _W_PAD:_W_PAD + W, :] = top
    xpad_ref[TR + 1:TR + 2, _W_PAD:_W_PAD + W, :] = bot
    xpad_ref[1:TR + 1, _W_PAD:_W_PAD + W, :] = prep(x_ref[0])    # (TR, W, C_in)

    # 9 accumulated tap matmuls (static unrolled loop); contraction depth C_in each.
    # TODO(synk): if vld/XLU slots saturate, handle dx in {0,2} with pltpu.roll on the
    # loaded tile instead of sublane-misaligned scratch slices.
    acc = jnp.zeros((TR * W, C_out), jnp.float32)
    t = 0
    for dy in range(3):
        for dx in range(3):
            tap = xpad_ref[dy:dy + TR, _W_PAD - 1 + dx:_W_PAD - 1 + dx + W, :]
            acc = acc + jnp.dot(tap.reshape(TR * W, C_in),
                                w_ref[t * C_in:(t + 1) * C_in, :],
                                preferred_element_type=jnp.float32)
            t += 1

    y = acc + b_ref[...].astype(jnp.float32)                     # (TR*W, C_out), f32
    # TODO(synk): for C_out < 128, pack (W, C_out) jointly on the lane axis to avoid
    # masked partial stores; for UNet-sized C_out (>=128) the store is already lane-dense.
    y_ref[0] = y.reshape(TR, W, C_out).astype(y_ref.dtype)

    # BN batch-statistic partials for this tile (reduced over N and row tiles outside).
    sum_ref[0, 0] = jnp.sum(y, axis=0, keepdims=True)            # (1, C_out)
    sumsq_ref[0, 0] = jnp.sum(y * y, axis=0, keepdims=True)      # (1, C_out)


def _ds_conv_stage(x, scale_in, shift_in, w_eff, b_eff, TR, *,
                   apply_input_bn_relu, mxu_dtype, act_dtype):
    """One pallas_call per DS-conv stage; grid = (batch, row tiles), both parallel."""
    N, H, W, C_in = x.shape
    KC, C_out = w_eff.shape                                      # KC = 9 * C_in
    R = H // TR
    kernel = functools.partial(_ds_conv_stage_kernel, TR=TR, W=W,
                               apply_input_bn_relu=apply_input_bn_relu)
    # TODO(synk): on v5e (128 MiB VMEM, lowest HBM BW) use pipeline_mode=pl.Buffered(3)
    # on the main activation spec for deeper prefetch.
    y, ysum, ysumsq = pl.pallas_call(
        kernel,
        out_shape=(jax.ShapeDtypeStruct((N, H, W, C_out), act_dtype),
                   jax.ShapeDtypeStruct((N, R, 1, C_out), jnp.float32),
                   jax.ShapeDtypeStruct((N, R, 1, C_out), jnp.float32)),
        grid=(N, R),
        in_specs=[
            pl.BlockSpec((1, TR, W, C_in), lambda n, r: (n, r, 0, 0)),
            pl.BlockSpec((1, 1, W, C_in),
                         lambda n, r: (n, jnp.maximum(r * TR - 1, 0), 0, 0)),
            pl.BlockSpec((1, 1, W, C_in),
                         lambda n, r: (n, jnp.minimum(r * TR + TR, H - 1), 0, 0)),
            pl.BlockSpec((1, C_in), lambda n, r: (0, 0)),
            pl.BlockSpec((1, C_in), lambda n, r: (0, 0)),
            pl.BlockSpec((KC, C_out), lambda n, r: (0, 0)),
            pl.BlockSpec((1, C_out), lambda n, r: (0, 0)),
        ],
        out_specs=(
            pl.BlockSpec((1, TR, W, C_out), lambda n, r: (n, r, 0, 0)),
            pl.BlockSpec((1, 1, 1, C_out), lambda n, r: (n, r, 0, 0)),
            pl.BlockSpec((1, 1, 1, C_out), lambda n, r: (n, r, 0, 0)),
        ),
        scratch_shapes=[pltpu.VMEM((TR + 2, W + 2 * _W_PAD, C_in), mxu_dtype)],
        compiler_params=pltpu.CompilerParams(
            dimension_semantics=("parallel", "parallel"),
            vmem_limit_bytes=_vmem_limit_bytes()),
    )(x, x, x, scale_in, shift_in, w_eff.astype(mxu_dtype), b_eff)
    return y, ysum, ysumsq


# ---------------------------------------------------------------------------
# Kernel: final BN(affine) + ReLU, writing the result directly in NCHW layout
# (in-VMEM transpose) so no separate XLA transpose pass over HBM is needed.
# ---------------------------------------------------------------------------
def _bn_relu_nchw_kernel(y_ref, scale_ref, shift_ref, o_ref):
    TR, W, C = y_ref.shape[1], y_ref.shape[2], y_ref.shape[3]
    y = y_ref[0].astype(jnp.float32).reshape(TR * W, C)
    y = jnp.maximum(y * scale_ref[...] + shift_ref[...], 0.0)
    o_ref[0] = y.T.astype(o_ref.dtype)                           # (C, TR*W), lane-dense


def _bn_relu_nchw(y, scale, shift, TR):
    N, H, W, C = y.shape
    R = H // TR
    return pl.pallas_call(
        _bn_relu_nchw_kernel,
        out_shape=jax.ShapeDtypeStruct((N, C, H * W), jnp.float32),
        grid=(N, R),
        in_specs=[
            pl.BlockSpec((1, TR, W, C), lambda n, r: (n, r, 0, 0)),
            pl.BlockSpec((1, C), lambda n, r: (0, 0)),
            pl.BlockSpec((1, C), lambda n, r: (0, 0)),
        ],
        out_specs=pl.BlockSpec((1, C, TR * W), lambda n, r: (n, 0, r)),
        compiler_params=pltpu.CompilerParams(
            dimension_semantics=("parallel", "parallel"),
            vmem_limit_bytes=_vmem_limit_bytes()),
    )(y, scale, shift)


# ---------------------------------------------------------------------------
# BN batch statistics -> affine scale/shift (O(C) glue on the partial sums).
# ---------------------------------------------------------------------------
def _bn_scale_shift(ysum, ysumsq, gamma, beta, count):
    s = jnp.sum(ysum, axis=(0, 1, 2))                            # (C,)
    ss = jnp.sum(ysumsq, axis=(0, 1, 2))                         # (C,)
    mean = s / count
    var = jnp.maximum(ss / count - mean * mean, 0.0)             # biased var (torch train)
    scale = gamma * jax.lax.rsqrt(var + _BN_EPS)
    shift = beta - mean * scale
    return scale.reshape(1, -1), shift.reshape(1, -1)


# ---------------------------------------------------------------------------
# Parameter construction: PyTorch-shaped dw/pw params, composed offline.
# ---------------------------------------------------------------------------
def compose_ds_weights(w_dw, b_dw, w_pw, b_pw, c_in, kernels_per_layer):
    """Fold depthwise(3x3, groups=c_in) + pointwise(1x1) into one (9*C, O) weight.
    Exact: there is no nonlinearity between the two convolutions."""
    C, K = c_in, kernels_per_layer
    O = w_pw.shape[0]
    w_dw4 = w_dw[:, 0, :, :].reshape(C, K, 3, 3)                 # (C, K, 3, 3)
    w_pw2 = w_pw[:, :, 0, 0]                                     # (O, C*K)
    w_eff = jnp.einsum('ckyx,ock->yxco', w_dw4, w_pw2.reshape(O, C, K))
    w_eff = w_eff.reshape(9 * C, O)                              # row = (dy*3+dx)*C + c
    b_eff = b_pw + w_pw2 @ b_dw                                  # (O,)
    return dict(w=w_eff, b=b_eff.reshape(1, O))


def init_ds_params(key, c_in, c_out, kernels_per_layer):
    """Deterministic params matching PyTorch Conv2d shapes/init, then composed."""
    M = c_in * kernels_per_layer
    k1, k2, k3, k4 = jax.random.split(key, 4)
    bound_dw = 1.0 / math.sqrt(9.0)                              # depthwise fan_in = 1*3*3
    w_dw = jax.random.uniform(k1, (M, 1, 3, 3), jnp.float32, -bound_dw, bound_dw)
    b_dw = jax.random.uniform(k2, (M,), jnp.float32, -bound_dw, bound_dw)
    bound_pw = 1.0 / math.sqrt(M)                                # pointwise fan_in = M
    w_pw = jax.random.uniform(k3, (c_out, M, 1, 1), jnp.float32, -bound_pw, bound_pw)
    b_pw = jax.random.uniform(k4, (c_out,), jnp.float32, -bound_pw, bound_pw)
    return compose_ds_weights(w_dw, b_dw, w_pw, b_pw, c_in, kernels_per_layer)


# ---------------------------------------------------------------------------
# Public forward: DoubleConvDS (NCHW in / NCHW out, like the PyTorch module).
# ---------------------------------------------------------------------------
def double_conv_ds(x_nchw, p1, bn1, p2, bn2, *,
                   mxu_dtype=jnp.bfloat16, act_dtype=jnp.bfloat16):
    N, C_in, H, W = x_nchw.shape
    C_mid = p1['w'].shape[1]
    C_out = p2['w'].shape[1]
    count = N * H * W
    TR = _pick_row_tile(H, W, max(C_in, C_mid, C_out))

    # NCHW -> NHWC once at the outer boundary (channels on the lane axis).
    x = jnp.transpose(x_nchw, (0, 2, 3, 1))                      # (N, H, W, C_in)

    # Stage 1: conv (no input BN/ReLU), emit BN1 partials.
    one = jnp.ones((1, C_in), jnp.float32)
    zero = jnp.zeros((1, C_in), jnp.float32)
    y1, s1, ss1 = _ds_conv_stage(x, one, zero, p1['w'], p1['b'], TR,
                                 apply_input_bn_relu=False,
                                 mxu_dtype=mxu_dtype, act_dtype=act_dtype)
    scale1, shift1 = _bn_scale_shift(s1, ss1, bn1['gamma'], bn1['beta'], count)

    # Stage 2: BN1+ReLU fused into the prologue, conv, emit BN2 partials.
    y2, s2, ss2 = _ds_conv_stage(y1, scale1, shift1, p2['w'], p2['b'], TR,
                                 apply_input_bn_relu=True,
                                 mxu_dtype=mxu_dtype, act_dtype=act_dtype)
    scale2, shift2 = _bn_scale_shift(s2, ss2, bn2['gamma'], bn2['beta'], count)

    # Final BN2 + ReLU pass, written directly in NCHW.
    out = _bn_relu_nchw(y2, scale2, shift2, TR)                  # (N, C_out, H*W) f32
    return out.reshape(N, C_out, H, W)


if __name__ == "__main__":
    key = jax.random.PRNGKey(0)
    kx, k1, k2 = jax.random.split(key, 3)

    N, C_in, H, W = 2, 4, 16, 16
    C_out = 8            # mid_channels defaults to out_channels
    KPL = 2              # kernels_per_layer

    x = jax.random.normal(kx, (N, C_in, H, W), jnp.float32)
    p1 = init_ds_params(k1, C_in, C_out, KPL)
    p2 = init_ds_params(k2, C_out, C_out, KPL)
    # Fresh nn.BatchNorm2d: weight=1, bias=0; training mode -> batch statistics.
    bn1 = dict(gamma=jnp.ones((C_out,), jnp.float32), beta=jnp.zeros((C_out,), jnp.float32))
    bn2 = dict(gamma=jnp.ones((C_out,), jnp.float32), beta=jnp.zeros((C_out,), jnp.float32))

    fwd = jax.jit(double_conv_ds)
    out = fwd(x, p1, bn1, p2, bn2)
    jax.block_until_ready(out)

    assert out.shape == (N, C_out, H, W)
    assert out.dtype == jnp.float32
    assert bool(jnp.all(jnp.isfinite(out)))
    assert bool(jnp.all(out >= 0.0))          # ReLU output
    print("KERNEL_OK")
</pallas_src>

<mosaic_0001>
module attributes {stable_mosaic.version = 11 : i64} {
  func.func @_bn_relu_nchw_kernel(%arg0: i32, %arg1: i32, %arg2: memref<1x16x16x8xbf16, #tpu.memory_space<vmem>>, %arg3: memref<1x8xf32, #tpu.memory_space<vmem>>, %arg4: memref<1x8xf32, #tpu.memory_space<vmem>>, %arg5: memref<1x8x256xf32, #tpu.memory_space<vmem>>) attributes {dimension_semantics = [#tpu.dimension_semantics<parallel>, #tpu.dimension_semantics<parallel>], iteration_bounds = array<i64: 2, 1>, scalar_prefetch = 0 : i64, scratch_operands = 0 : i64, tpu.core_type = #tpu.core_type<tc>, window_params = [{transform_indices = @transform_0, window_bounds = array<i64: 1, 16, 16, 8>}, {pipeline_mode = #tpu.pipeline_mode<synchronous>, transform_indices = @transform_1, window_bounds = array<i64: 1, 8>}, {pipeline_mode = #tpu.pipeline_mode<synchronous>, transform_indices = @transform_2, window_bounds = array<i64: 1, 8>}, {transform_indices = @transform_3, window_bounds = array<i64: 1, 8, 256>}]} {
    %c0 = arith.constant 0 : index
    %c0_0 = arith.constant 0 : index
    %c0_1 = arith.constant 0 : index
    %c0_2 = arith.constant 0 : index
    %0 = vector.load %arg2[%c0, %c0_0, %c0_1, %c0_2] : memref<1x16x16x8xbf16, #tpu.memory_space<vmem>>, vector<1x16x16x8xbf16>
    %1 = vector.shape_cast %0 : vector<1x16x16x8xbf16> to vector<16x16x8xbf16>
    %2 = arith.extf %1 : vector<16x16x8xbf16> to vector<16x16x8xf32>
    %3 = vector.shape_cast %2 : vector<16x16x8xf32> to vector<256x8xf32>
    %c0_3 = arith.constant 0 : index
    %c0_4 = arith.constant 0 : index
    %4 = vector.load %arg3[%c0_3, %c0_4] : memref<1x8xf32, #tpu.memory_space<vmem>>, vector<1x8xf32>
    %5 = vector.broadcast %4 : vector<1x8xf32> to vector<256x8xf32>
    %6 = arith.mulf %3, %5 : vector<256x8xf32>
    %c0_5 = arith.constant 0 : index
    %c0_6 = arith.constant 0 : index
    %7 = vector.load %arg4[%c0_5, %c0_6] : memref<1x8xf32, #tpu.memory_space<vmem>>, vector<1x8xf32>
    %8 = vector.broadcast %7 : vector<1x8xf32> to vector<256x8xf32>
    %9 = arith.addf %6, %8 : vector<256x8xf32>
    %cst = arith.constant 0.000000e+00 : f32
    %10 = vector.broadcast %cst : f32 to vector<256x8xf32>
    %11 = arith.maximumf %9, %10 : vector<256x8xf32>
    %12 = tpu.transpose %11, [1, 0] : vector<256x8xf32> -> vector<8x256xf32>
    %c0_7 = arith.constant 0 : index
    %c0_8 = arith.constant 0 : index
    %c0_9 = arith.constant 0 : index
    %13 = vector.load %arg5[%c0_7, %c0_8, %c0_9] : memref<1x8x256xf32, #tpu.memory_space<vmem>>, vector<1x8x256xf32>
    %14 = vector.shape_cast %13 : vector<1x8x256xf32> to vector<8x256xf32>
    %15 = vector.shape_cast %12 : vector<8x256xf32> to vector<1x8x256xf32>
    tpu.vector_store %arg5[%c0_7, %c0_8, %c0_9], %15 {strides = array<i32>} : memref<1x8x256xf32, #tpu.memory_space<vmem>>, vector<1x8x256xf32>,
    return
  }
  func.func @transform_0(%arg0: i32, %arg1: i32) -> (i32, i32, i32, i32) {
    %c0_i32 = arith.constant 0 : i32
    %c0_i32_0 = arith.constant 0 : i32
    %c0_i32_1 = arith.constant 0 : i32
    return %arg0, %arg1, %c0_i32, %c0_i32_0 : i32, i32, i32, i32
  }
  func.func @transform_1(%arg0: i32, %arg1: i32) -> (i32, i32) {
    %c0_i32 = arith.constant 0 : i32
    %c0_i32_0 = arith.constant 0 : i32
    %c0_i32_1 = arith.constant 0 : i32
    return %c0_i32, %c0_i32_0 : i32, i32
  }
  func.func @transform_2(%arg0: i32, %arg1: i32) -> (i32, i32) {
    %c0_i32 = arith.constant 0 : i32
    %c0_i32_0 = arith.constant 0 : i32
    %c0_i32_1 = arith.constant 0 : i32
    return %c0_i32, %c0_i32_0 : i32, i32
  }
  func.func @transform_3(%arg0: i32, %arg1: i32) -> (i32, i32, i32) {
    %c0_i32 = arith.constant 0 : i32
    %c0_i32_0 = arith.constant 0 : i32
    return %arg0, %c0_i32, %arg1 : i32, i32, i32
  }
}

module attributes {stable_mosaic.version = 11 : i64} {
  func.func @_ds_conv_stage_kernel(%arg0: i32, %arg1: i32, %arg2: memref<1x16x16x4xf32, #tpu.memory_space<vmem>>, %arg3: memref<1x1x16x4xf32, #tpu.memory_space<vmem>>, %arg4: memref<1x1x16x4xf32, #tpu.memory_space<vmem>>, %arg5: memref<1x4xf32, #tpu.memory_space<vmem>>, %arg6: memref<1x4xf32, #tpu.memory_space<vmem>>, %arg7: memref<36x8xbf16, #tpu.memory_space<vmem>>, %arg8: memref<1x8xf32, #tpu.memory_space<vmem>>, %arg9: memref<1x16x16x8xbf16, #tpu.memory_space<vmem>>, %arg10: memref<1x1x1x8xf32, #tpu.memory_space<vmem>>, %arg11: memref<1x1x1x8xf32, #tpu.memory_space<vmem>>, %arg12: memref<18x32x4xbf16, #tpu.memory_space<vmem>>) attributes {dimension_semantics = [#tpu.dimension_semantics<parallel>, #tpu.dimension_semantics<parallel>], iteration_bounds = array<i64: 2, 1>, scalar_prefetch = 0 : i64, scratch_operands = 1 : i64, tpu.core_type = #tpu.core_type<tc>, window_params = [{transform_indices = @transform_0, window_bounds = array<i64: 1, 16, 16, 4>}, {transform_indices = @transform_1, window_bounds = array<i64: 1, 1, 16, 4>}, {transform_indices = @transform_2, window_bounds = array<i64: 1, 1, 16, 4>}, {pipeline_mode = #tpu.pipeline_mode<synchronous>, transform_indices = @transform_3, window_bounds = array<i64: 1, 4>}, {pipeline_mode = #tpu.pipeline_mode<synchronous>, transform_indices = @transform_4, window_bounds = array<i64: 1, 4>}, {pipeline_mode = #tpu.pipeline_mode<synchronous>, transform_indices = @transform_5, window_bounds = array<i64: 36, 8>}, {pipeline_mode = #tpu.pipeline_mode<synchronous>, transform_indices = @transform_6, window_bounds = array<i64: 1, 8>}, {transform_indices = @transform_7, window_bounds = array<i64: 1, 16, 16, 8>}, {transform_indices = @transform_8, window_bounds = array<i64: 1, 1, 1, 8>}, {transform_indices = @transform_9, window_bounds = array<i64: 1, 1, 1, 8>}]} {
    %cst = arith.constant 0.000000e+00 : bf16
    %0 = vector.broadcast %cst : bf16 to vector<18x8x4xbf16>
    %c0 = arith.constant 0 : index
    %c0_0 = arith.constant 0 : index
    %c0_1 = arith.constant 0 : index
    %1 = vector.load %arg12[%c0, %c0_0, %c0_1] : memref<18x32x4xbf16, #tpu.memory_space<vmem>>, vector<18x8x4xbf16>
    tpu.vector_store %arg12[%c0, %c0_0, %c0_1], %0 {strides = array<i32>} : memref<18x32x4xbf16, #tpu.memory_space<vmem>>, vector<18x8x4xbf16>,
    %c0_2 = arith.constant 0 : index
    %c24 = arith.constant 24 : index
    %c0_3 = arith.constant 0 : index
    %2 = vector.load %arg12[%c0_2, %c24, %c0_3] : memref<18x32x4xbf16, #tpu.memory_space<vmem>>, vector<18x8x4xbf16>
    tpu.vector_store %arg12[%c0_2, %c24, %c0_3], %0 {strides = array<i32>} : memref<18x32x4xbf16, #tpu.memory_space<vmem>>, vector<18x8x4xbf16>,
    %c0_4 = arith.constant 0 : index
    %c0_5 = arith.constant 0 : index
    %c0_6 = arith.constant 0 : index
    %c0_7 = arith.constant 0 : index
    %3 = vector.load %arg3[%c0_4, %c0_5, %c0_6, %c0_7] : memref<1x1x16x4xf32, #tpu.memory_space<vmem>>, vector<1x1x16x4xf32>
    %4 = vector.shape_cast %3 : vector<1x1x16x4xf32> to vector<1x16x4xf32>
    %5 = arith.truncf %4 : vector<1x16x4xf32> to vector<1x16x4xbf16>
    %c0_8 = arith.constant 0 : index
    %c0_9 = arith.constant 0 : index
    %c0_10 = arith.constant 0 : index
    %c0_11 = arith.constant 0 : index
    %6 = vector.load %arg4[%c0_8, %c0_9, %c0_10, %c0_11] : memref<1x1x16x4xf32, #tpu.memory_space<vmem>>, vector<1x1x16x4xf32>
    %7 = vector.shape_cast %6 : vector<1x1x16x4xf32> to vector<1x16x4xf32>
    %8 = arith.truncf %7 : vector<1x16x4xf32> to vector<1x16x4xbf16>
    %c0_i32 = arith.constant 0 : i32
    %9 = arith.cmpi sgt, %arg1, %c0_i32 : i32
    %cst_12 = arith.constant 0.000000e+00 : bf16
    %10 = vector.broadcast %cst_12 : bf16 to vector<1x16x4xbf16>
    %11 = arith.select %9, %5, %10 : vector<1x16x4xbf16>
    %c0_i32_13 = arith.constant 0 : i32
    %12 = arith.cmpi slt, %arg1, %c0_i32_13 : i32
    %cst_14 = arith.constant 0.000000e+00 : bf16
    %13 = vector.broadcast %cst_14 : bf16 to vector<1x16x4xbf16>
    %14 = arith.select %12, %8, %13 : vector<1x16x4xbf16>
    %c0_15 = arith.constant 0 : index
    %c8 = arith.constant 8 : index
    %c0_16 = arith.constant 0 : index
    %15 = vector.load %arg12[%c0_15, %c8, %c0_16] : memref<18x32x4xbf16, #tpu.memory_space<vmem>>, vector<1x16x4xbf16>
    tpu.vector_store %arg12[%c0_15, %c8, %c0_16], %11 {strides = array<i32>} : memref<18x32x4xbf16, #tpu.memory_space<vmem>>, vector<1x16x4xbf16>,
    %c17 = arith.constant 17 : index
    %c8_17 = arith.constant 8 : index
    %c0_18 = arith.constant 0 : index
    %16 = vector.load %arg12[%c17, %c8_17, %c0_18] : memref<18x32x4xbf16, #tpu.memory_space<vmem>>, vector<1x16x4xbf16>
    tpu.vector_store %arg12[%c17, %c8_17, %c0_18], %14 {strides = array<i32>} : memref<18x32x4xbf16, #tpu.memory_space<vmem>>, vector<1x16x4xbf16>,
    %c0_19 = arith.constant 0 : index
    %c0_20 = arith.constant 0 : index
    %c0_21 = arith.constant 0 : index
    %c0_22 = arith.constant 0 : index
    %17 = vector.load %arg2[%c0_19, %c0_20, %c0_21, %c0_22] : memref<1x16x16x4xf32, #tpu.memory_space<vmem>>, vector<1x16x16x4xf32>
    %18 = vector.shape_cast %17 : vector<1x16x16x4xf32> to vector<16x16x4xf32>
    %19 = arith.truncf %18 : vector<16x16x4xf32> to vector<16x16x4xbf16>
    %c1 = arith.constant 1 : index
    %c8_23 = arith.constant 8 : index
    %c0_24 = arith.constant 0 : index
    %20 = vector.load %arg12[%c1, %c8_23, %c0_24] : memref<18x32x4xbf16, #tpu.memory_space<vmem>>, vector<16x16x4xbf16>
    tpu.vector_store %arg12[%c1, %c8_23, %c0_24], %19 {strides = array<i32>} : memref<18x32x4xbf16, #tpu.memory_space<vmem>>, vector<16x16x4xbf16>,
    %cst_25 = arith.constant 0.000000e+00 : f32
    %21 = vector.broadcast %cst_25 : f32 to vector<256x8xf32>
    %c0_26 = arith.constant 0 : index
    %c7 = arith.constant 7 : index
    %c0_27 = arith.constant 0 : index
    %22 = vector.load %arg12[%c0_26, %c7, %c0_27] : memref<18x32x4xbf16, #tpu.memory_space<vmem>>, vector<16x16x4xbf16>
    %23 = vector.shape_cast %22 : vector<16x16x4xbf16> to vector<256x4xbf16>
    %c0_28 = arith.constant 0 : index
    %c0_29 = arith.constant 0 : index
    %24 = vector.load %arg7[%c0_28, %c0_29] : memref<36x8xbf16, #tpu.memory_space<vmem>>, vector<4x8xbf16>
    %cst_30 = arith.constant dense<0.000000e+00> : vector<256x8xf32>
    %25 = tpu.matmul %23, %24, %cst_30 {dimension_numbers = #tpu.dot_dimension_numbers<[1], [0], [0], [1], [0, 0, 1, 1], [], []>} : vector<256x4xbf16>, vector<4x8xbf16>, vector<256x8xf32> -> vector<256x8xf32>
    %26 = arith.addf %21, %25 : vector<256x8xf32>
    %c0_31 = arith.constant 0 : index
    %c8_32 = arith.constant 8 : index
    %c0_33 = arith.constant 0 : index
    %27 = vector.load %arg12[%c0_31, %c8_32, %c0_33] : memref<18x32x4xbf16, #tpu.memory_space<vmem>>, vector<16x16x4xbf16>
    %28 = vector.shape_cast %27 : vector<16x16x4xbf16> to vector<256x4xbf16>
    %c4 = arith.constant 4 : index
    %c0_34 = arith.constant 0 : index
    %29 = vector.load %arg7[%c4, %c0_34] : memref<36x8xbf16, #tpu.memory_space<vmem>>, vector<4x8xbf16>
    %cst_35 = arith.constant dense<0.000000e+00> : vector<256x8xf32>
    %30 = tpu.matmul %28, %29, %cst_35 {dimension_numbers = #tpu.dot_dimension_numbers<[1], [0], [0], [1], [0, 0, 1, 1], [], []>} : vector<256x4xbf16>, vector<4x8xbf16>, vector<256x8xf32> -> vector<256x8xf32>
    %31 = arith.addf %26, %30 : vector<256x8xf32>
    %c0_36 = arith.constant 0 : index
    %c9 = arith.constant 9 : index
    %c0_37 = arith.constant 0 : index
    %32 = vector.load %arg12[%c0_36, %c9, %c0_37] : memref<18x32x4xbf16, #tpu.memory_space<vmem>>, vector<16x16x4xbf16>
    %33 = vector.shape_cast %32 : vector<16x16x4xbf16> to vector<256x4xbf16>
    %c8_38 = arith.constant 8 : index
    %c0_39 = arith.constant 0 : index
    %34 = vector.load %arg7[%c8_38, %c0_39] : memref<36x8xbf16, #tpu.memory_space<vmem>>, vector<4x8xbf16>
    %cst_40 = arith.constant dense<0.000000e+00> : vector<256x8xf32>
    %35 = tpu.matmul %33, %34, %cst_40 {dimension_numbers = #tpu.dot_dimension_numbers<[1], [0], [0], [1], [0, 0, 1, 1], [], []>} : vector<256x4xbf16>, vector<4x8xbf16>, vector<256x8xf32> -> vector<256x8xf32>
    %36 = arith.addf %31, %35 : vector<256x8xf32>
    %c1_41 = arith.constant 1 : index
    %c7_42 = arith.constant 7 : index
    %c0_43 = arith.constant 0 : index
    %37 = vector.load %arg12[%c1_41, %c7_42, %c0_43] : memref<18x32x4xbf16, #tpu.memory_space<vmem>>, vector<16x16x4xbf16>
    %38 = vector.shape_cast %37 : vector<16x16x4xbf16> to vector<256x4xbf16>
    %c12 = arith.constant 12 : index
    %c0_44 = arith.constant 0 : index
    %39 = vector.load %arg7[%c12, %c0_44] : memref<36x8xbf16, #tpu.memory_space<vmem>>, vector<4x8xbf16>
    %cst_45 = arith.constant dense<0.000000e+00> : vector<256x8xf32>
    %40 = tpu.matmul %38, %39, %cst_45 {dimension_numbers = #tpu.dot_dimension_numbers<[1], [0], [0], [1], [0, 0, 1, 1], [], []>} : vector<256x4xbf16>, vector<4x8xbf16>, vector<256x8xf32> -> vector<256x8xf32>
    %41 = arith.addf %36, %40 : vector<256x8xf32>
    %c1_46 = arith.constant 1 : index
    %c8_47 = arith.constant 8 : index
    %c0_48 = arith.constant 0 : index
    %42 = vector.load %arg12[%c1_46, %c8_47, %c0_48] : memref<18x32x4xbf16, #tpu.memory_space<vmem>>, vector<16x16x4xbf16>
    %43 = vector.shape_cast %42 : vector<16x16x4xbf16> to vector<256x4xbf16>
    %c16 = arith.constant 16 : index
    %c0_49 = arith.constant 0 : index
    %44 = vector.load %arg7[%c16, %c0_49] : memref<36x8xbf16, #tpu.memory_space<vmem>>, vector<4x8xbf16>
    %cst_50 = arith.constant dense<0.000000e+00> : vector<256x8xf32>
    %45 = tpu.matmul %43, %44, %cst_50 {dimension_numbers = #tpu.dot_dimension_numbers<[1], [0], [0], [1], [0, 0, 1, 1], [], []>} : vector<256x4xbf16>, vector<4x8xbf16>, vector<256x8xf32> -> vector<256x8xf32>
    %46 = arith.addf %41, %45 : vector<256x8xf32>
    %c1_51 = arith.constant 1 : index
    %c9_52 = arith.constant 9 : index
    %c0_53 = arith.constant 0 : index
    %47 = vector.load %arg12[%c1_51, %c9_52, %c0_53] : memref<18x32x4xbf16, #tpu.memory_space<vmem>>, vector<16x16x4xbf16>
    %48 = vector.shape_cast %47 : vector<16x16x4xbf16> to vector<256x4xbf16>
    %c20 = arith.constant 20 : index
    %c0_54 = arith.constant 0 : index
    %49 = vector.load %arg7[%c20, %c0_54] : memref<36x8xbf16, #tpu.memory_space<vmem>>, vector<4x8xbf16>
    %cst_55 = arith.constant dense<0.000000e+00> : vector<256x8xf32>
    %50 = tpu.matmul %48, %49, %cst_55 {dimension_numbers = #tpu.dot_dimension_numbers<[1], [0], [0], [1], [0, 0, 1, 1], [], []>} : vector<256x4xbf16>, vector<4x8xbf16>, vector<256x8xf32> -> vector<256x8xf32>
    %51 = arith.addf %46, %50 : vector<256x8xf32>
    %c2 = arith.constant 2 : index
    %c7_56 = arith.constant 7 : index
    %c0_57 = arith.constant 0 : index
    %52 = vector.load %arg12[%c2, %c7_56, %c0_57] : memref<18x32x4xbf16, #tpu.memory_space<vmem>>, vector<16x16x4xbf16>
    %53 = vector.shape_cast %52 : vector<16x16x4xbf16> to vector<256x4xbf16>
    %c24_58 = arith.constant 24 : index
    %c0_59 = arith.constant 0 : index
    %54 = vector.load %arg7[%c24_58, %c0_59] : memref<36x8xbf16, #tpu.memory_space<vmem>>, vector<4x8xbf16>
    %cst_60 = arith.constant dense<0.000000e+00> : vector<256x8xf32>
    %55 = tpu.matmul %53, %54, %cst_60 {dimension_numbers = #tpu.dot_dimension_numbers<[1], [0], [0], [1], [0, 0, 1, 1], [], []>} : vector<256x4xbf16>, vector<4x8xbf16>, vector<256x8xf32> -> vector<256x8xf32>
    %56 = arith.addf %51, %55 : vector<256x8xf32>
    %c2_61 = arith.constant 2 : index
    %c8_62 = arith.constant 8 : index
    %c0_63 = arith.constant 0 : index
    %57 = vector.load %arg12[%c2_61, %c8_62, %c0_63] : memref<18x32x4xbf16, #tpu.memory_space<vmem>>, vector<16x16x4xbf16>
    %58 = vector.shape_cast %57 : vector<16x16x4xbf16> to vector<256x4xbf16>
    %c28 = arith.constant 28 : index
    %c0_64 = arith.constant 0 : index
    %59 = vector.load %arg7[%c28, %c0_64] : memref<36x8xbf16, #tpu.memory_space<vmem>>, vector<4x8xbf16>
    %cst_65 = arith.constant dense<0.000000e+00> : vector<256x8xf32>
    %60 = tpu.matmul %58, %59, %cst_65 {dimension_numbers = #tpu.dot_dimension_numbers<[1], [0], [0], [1], [0, 0, 1, 1], [], []>} : vector<256x4xbf16>, vector<4x8xbf16>, vector<256x8xf32> -> vector<256x8xf32>
    %61 = arith.addf %56, %60 : vector<256x8xf32>
    %c2_66 = arith.constant 2 : index
    %c9_67 = arith.constant 9 : index
    %c0_68 = arith.constant 0 : index
    %62 = vector.load %arg12[%c2_66, %c9_67, %c0_68] : memref<18x32x4xbf16, #tpu.memory_space<vmem>>, vector<16x16x4xbf16>
    %63 = vector.shape_cast %62 : vector<16x16x4xbf16> to vector<256x4xbf16>
    %c32 = arith.constant 32 : index
    %c0_69 = arith.constant 0 : index
    %64 = vector.load %arg7[%c32, %c0_69] : memref<36x8xbf16, #tpu.memory_space<vmem>>, vector<4x8xbf16>
    %cst_70 = arith.constant dense<0.000000e+00> : vector<256x8xf32>
    %65 = tpu.matmul %63, %64, %cst_70 {dimension_numbers = #tpu.dot_dimension_numbers<[1], [0], [0], [1], [0, 0, 1, 1], [], []>} : vector<256x4xbf16>, vector<4x8xbf16>, vector<256x8xf32> -> vector<256x8xf32>
    %66 = arith.addf %61, %65 : vector<256x8xf32>
    %c0_71 = arith.constant 0 : index
    %c0_72 = arith.constant 0 : index
    %67 = vector.load %arg8[%c0_71, %c0_72] : memref<1x8xf32, #tpu.memory_space<vmem>>, vector<1x8xf32>
    %68 = vector.broadcast %67 : vector<1x8xf32> to vector<256x8xf32>
    %69 = arith.addf %66, %68 : vector<256x8xf32>
    %70 = vector.shape_cast %69 : vector<256x8xf32> to vector<16x16x8xf32>
    %71 = arith.truncf %70 : vector<16x16x8xf32> to vector<16x16x8xbf16>
    %c0_73 = arith.constant 0 : index
    %c0_74 = arith.constant 0 : index
    %c0_75 = arith.constant 0 : index
    %c0_76 = arith.constant 0 : index
    %72 = vector.load %arg9[%c0_73, %c0_74, %c0_75, %c0_76] : memref<1x16x16x8xbf16, #tpu.memory_space<vmem>>, vector<1x16x16x8xbf16>
    %73 = vector.shape_cast %72 : vector<1x16x16x8xbf16> to vector<16x16x8xbf16>
    %74 = vector.shape_cast %71 : vector<16x16x8xbf16> to vector<1x16x16x8xbf16>
    tpu.vector_store %arg9[%c0_73, %c0_74, %c0_75, %c0_76], %74 {strides = array<i32>} : memref<1x16x16x8xbf16, #tpu.memory_space<vmem>>, vector<1x16x16x8xbf16>,
    %cst_77 = arith.constant dense<0.000000e+00> : vector<8xf32>
    %75 = vector.multi_reduction <add>, %69, %cst_77 [0] : vector<256x8xf32> to vector<8xf32>
    %76 = vector.shape_cast %75 : vector<8xf32> to vector<1x8xf32>
    %c0_78 = arith.constant 0 : index
    %c0_79 = arith.constant 0 : index
    %c0_80 = arith.constant 0 : index
    %c0_81 = arith.constant 0 : index
    %77 = vector.load %arg10[%c0_78, %c0_79, %c0_80, %c0_81] : memref<1x1x1x8xf32, #tpu.memory_space<vmem>>, vector<1x1x1x8xf32>
    %78 = vector.shape_cast %77 : vector<1x1x1x8xf32> to vector<1x8xf32>
    %79 = vector.shape_cast %76 : vector<1x8xf32> to vector<1x1x1x8xf32>
    tpu.vector_store %arg10[%c0_78, %c0_79, %c0_80, %c0_81], %79 {strides = array<i32>} : memref<1x1x1x8xf32, #tpu.memory_space<vmem>>, vector<1x1x1x8xf32>,
    %80 = arith.mulf %69, %69 : vector<256x8xf32>
    %cst_82 = arith.constant dense<0.000000e+00> : vector<8xf32>
    %81 = vector.multi_reduction <add>, %80, %cst_82 [0] : vector<256x8xf32> to vector<8xf32>
    %82 = vector.shape_cast %81 : vector<8xf32> to vector<1x8xf32>
    %c0_83 = arith.constant 0 : index
    %c0_84 = arith.constant 0 : index
    %c0_85 = arith.constant 0 : index
    %c0_86 = arith.constant 0 : index
    %83 = vector.load %arg11[%c0_83, %c0_84, %c0_85, %c0_86] : memref<1x1x1x8xf32, #tpu.memory_space<vmem>>, vector<1x1x1x8xf32>
    %84 = vector.shape_cast %83 : vector<1x1x1x8xf32> to vector<1x8xf32>
    %85 = vector.shape_cast %82 : vector<1x8xf32> to vector<1x1x1x8xf32>
    tpu.vector_store %arg11[%c0_83, %c0_84, %c0_85, %c0_86], %85 {strides = array<i32>} : memref<1x1x1x8xf32, #tpu.memory_space<vmem>>, vector<1x1x1x8xf32>,
    return
  }
  func.func @transform_0(%arg0: i32, %arg1: i32) -> (i32, i32, i32, i32) {
    %c0_i32 = arith.constant 0 : i32
    %c0_i32_0 = arith.constant 0 : i32
    %c0_i32_1 = arith.constant 0 : i32
    return %arg0, %arg1, %c0_i32, %c0_i32_0 : i32, i32, i32, i32
  }
  func.func @transform_1(%arg0: i32, %arg1: i32) -> (i32, i32, i32, i32) {
    %c16_i32 = arith.constant 16 : i32
    %0 = arith.muli %arg1, %c16_i32 : i32
    %c1_i32 = arith.constant 1 : i32
    %1 = arith.subi %0, %c1_i32 : i32
    %c0_i32 = arith.constant 0 : i32
    %2 = arith.maxsi %1, %c0_i32 : i32
    %c0_i32_0 = arith.constant 0 : i32
    %c0_i32_1 = arith.constant 0 : i32
    %c0_i32_2 = arith.constant 0 : i32
    return %arg0, %2, %c0_i32_0, %c0_i32_1 : i32, i32, i32, i32
  }
  func.func @transform_2(%arg0: i32, %arg1: i32) -> (i32, i32, i32, i32) {
    %c16_i32 = arith.constant 16 : i32
    %0 = arith.muli %arg1, %c16_i32 : i32
    %c16_i32_0 = arith.constant 16 : i32
    %1 = arith.addi %0, %c16_i32_0 : i32
    %c15_i32 = arith.constant 15 : i32
    %2 = arith.minsi %1, %c15_i32 : i32
    %c0_i32 = arith.constant 0 : i32
    %c0_i32_1 = arith.constant 0 : i32
    %c0_i32_2 = arith.constant 0 : i32
    return %arg0, %2, %c0_i32, %c0_i32_1 : i32, i32, i32, i32
  }
  func.func @transform_3(%arg0: i32, %arg1: i32) -> (i32, i32) {
    %c0_i32 = arith.constant 0 : i32
    %c0_i32_0 = arith.constant 0 : i32
    %c0_i32_1 = arith.constant 0 : i32
    return %c0_i32, %c0_i32_0 : i32, i32
  }
  func.func @transform_4(%arg0: i32, %arg1: i32) -> (i32, i32) {
    %c0_i32 = arith.constant 0 : i32
    %c0_i32_0 = arith.constant 0 : i32
    %c0_i32_1 = arith.constant 0 : i32
    return %c0_i32, %c0_i32_0 : i32, i32
  }
  func.func @transform_5(%arg0: i32, %arg1: i32) -> (i32, i32) {
    %c0_i32 = arith.constant 0 : i32
    %c0_i32_0 = arith.constant 0 : i32
    %c0_i32_1 = arith.constant 0 : i32
    return %c0_i32, %c0_i32_0 : i32, i32
  }
  func.func @transform_6(%arg0: i32, %arg1: i32) -> (i32, i32) {
    %c0_i32 = arith.constant 0 : i32
    %c0_i32_0 = arith.constant 0 : i32
    %c0_i32_1 = arith.constant 0 : i32
    return %c0_i32, %c0_i32_0 : i32, i32
  }
  func.func @transform_7(%arg0: i32, %arg1: i32) -> (i32, i32, i32, i32) {
    %c0_i32 = arith.constant 0 : i32
    %c0_i32_0 = arith.constant 0 : i32
    %c0_i32_1 = arith.constant 0 : i32
    return %arg0, %arg1, %c0_i32, %c0_i32_0 : i32, i32, i32, i32
  }
  func.func @transform_8(%arg0: i32, %arg1: i32) -> (i32, i32, i32, i32) {
    %c0_i32 = arith.constant 0 : i32
    %c0_i32_0 = arith.constant 0 : i32
    %c0_i32_1 = arith.constant 0 : i32
    return %arg0, %arg1, %c0_i32, %c0_i32_0 : i32, i32, i32, i32
  }
  func.func @transform_9(%arg0: i32, %arg1: i32) -> (i32, i32, i32, i32) {
    %c0_i32 = arith.constant 0 : i32
    %c0_i32_0 = arith.constant 0 : i32
    %c0_i32_1 = arith.constant 0 : i32
    return %arg0, %arg1, %c0_i32, %c0_i32_0 : i32, i32, i32, i32
  }
}

module attributes {stable_mosaic.version = 11 : i64} {
  func.func @_ds_conv_stage_kernel(%arg0: i32, %arg1: i32, %arg2: memref<1x16x16x8xbf16, #tpu.memory_space<vmem>>, %arg3: memref<1x1x16x8xbf16, #tpu.memory_space<vmem>>, %arg4: memref<1x1x16x8xbf16, #tpu.memory_space<vmem>>, %arg5: memref<1x8xf32, #tpu.memory_space<vmem>>, %arg6: memref<1x8xf32, #tpu.memory_space<vmem>>, %arg7: memref<72x8xbf16, #tpu.memory_space<vmem>>, %arg8: memref<1x8xf32, #tpu.memory_space<vmem>>, %arg9: memref<1x16x16x8xbf16, #tpu.memory_space<vmem>>, %arg10: memref<1x1x1x8xf32, #tpu.memory_space<vmem>>, %arg11: memref<1x1x1x8xf32, #tpu.memory_space<vmem>>, %arg12: memref<18x32x8xbf16, #tpu.memory_space<vmem>>) attributes {dimension_semantics = [#tpu.dimension_semantics<parallel>, #tpu.dimension_semantics<parallel>], iteration_bounds = array<i64: 2, 1>, scalar_prefetch = 0 : i64, scratch_operands = 1 : i64, tpu.core_type = #tpu.core_type<tc>, window_params = [{transform_indices = @transform_0, window_bounds = array<i64: 1, 16, 16, 8>}, {transform_indices = @transform_1, window_bounds = array<i64: 1, 1, 16, 8>}, {transform_indices = @transform_2, window_bounds = array<i64: 1, 1, 16, 8>}, {pipeline_mode = #tpu.pipeline_mode<synchronous>, transform_indices = @transform_3, window_bounds = array<i64: 1, 8>}, {pipeline_mode = #tpu.pipeline_mode<synchronous>, transform_indices = @transform_4, window_bounds = array<i64: 1, 8>}, {pipeline_mode = #tpu.pipeline_mode<synchronous>, transform_indices = @transform_5, window_bounds = array<i64: 72, 8>}, {pipeline_mode = #tpu.pipeline_mode<synchronous>, transform_indices = @transform_6, window_bounds = array<i64: 1, 8>}, {transform_indices = @transform_7, window_bounds = array<i64: 1, 16, 16, 8>}, {transform_indices = @transform_8, window_bounds = array<i64: 1, 1, 1, 8>}, {transform_indices = @transform_9, window_bounds = array<i64: 1, 1, 1, 8>}]} {
    %cst = arith.constant 0.000000e+00 : bf16
    %0 = vector.broadcast %cst : bf16 to vector<18x8x8xbf16>
    %c0 = arith.constant 0 : index
    %c0_0 = arith.constant 0 : index
    %c0_1 = arith.constant 0 : index
    %1 = vector.load %arg12[%c0, %c0_0, %c0_1] : memref<18x32x8xbf16, #tpu.memory_space<vmem>>, vector<18x8x8xbf16>
    tpu.vector_store %arg12[%c0, %c0_0, %c0_1], %0 {strides = array<i32>} : memref<18x32x8xbf16, #tpu.memory_space<vmem>>, vector<18x8x8xbf16>,
    %c0_2 = arith.constant 0 : index
    %c24 = arith.constant 24 : index
    %c0_3 = arith.constant 0 : index
    %2 = vector.load %arg12[%c0_2, %c24, %c0_3] : memref<18x32x8xbf16, #tpu.memory_space<vmem>>, vector<18x8x8xbf16>
    tpu.vector_store %arg12[%c0_2, %c24, %c0_3], %0 {strides = array<i32>} : memref<18x32x8xbf16, #tpu.memory_space<vmem>>, vector<18x8x8xbf16>,
    %c0_4 = arith.constant 0 : index
    %c0_5 = arith.constant 0 : index
    %c0_6 = arith.constant 0 : index
    %c0_7 = arith.constant 0 : index
    %3 = vector.load %arg3[%c0_4, %c0_5, %c0_6, %c0_7] : memref<1x1x16x8xbf16, #tpu.memory_space<vmem>>, vector<1x1x16x8xbf16>
    %4 = vector.shape_cast %3 : vector<1x1x16x8xbf16> to vector<1x16x8xbf16>
    %5 = arith.extf %4 : vector<1x16x8xbf16> to vector<1x16x8xf32>
    %c0_8 = arith.constant 0 : index
    %c0_9 = arith.constant 0 : index
    %6 = vector.load %arg5[%c0_8, %c0_9] : memref<1x8xf32, #tpu.memory_space<vmem>>, vector<1x8xf32>
    %7 = vector.shape_cast %6 : vector<1x8xf32> to vector<1x1x8xf32>
    %8 = vector.broadcast %7 : vector<1x1x8xf32> to vector<1x16x8xf32>
    %9 = arith.mulf %5, %8 : vector<1x16x8xf32>
    %c0_10 = arith.constant 0 : index
    %c0_11 = arith.constant 0 : index
    %10 = vector.load %arg6[%c0_10, %c0_11] : memref<1x8xf32, #tpu.memory_space<vmem>>, vector<1x8xf32>
    %11 = vector.shape_cast %10 : vector<1x8xf32> to vector<1x1x8xf32>
    %12 = vector.broadcast %11 : vector<1x1x8xf32> to vector<1x16x8xf32>
    %13 = arith.addf %9, %12 : vector<1x16x8xf32>
    %cst_12 = arith.constant 0.000000e+00 : f32
    %14 = vector.broadcast %cst_12 : f32 to vector<1x16x8xf32>
    %15 = arith.maximumf %13, %14 : vector<1x16x8xf32>
    %16 = arith.truncf %15 : vector<1x16x8xf32> to vector<1x16x8xbf16>
    %c0_13 = arith.constant 0 : index
    %c0_14 = arith.constant 0 : index
    %c0_15 = arith.constant 0 : index
    %c0_16 = arith.constant 0 : index
    %17 = vector.load %arg4[%c0_13, %c0_14, %c0_15, %c0_16] : memref<1x1x16x8xbf16, #tpu.memory_space<vmem>>, vector<1x1x16x8xbf16>
    %18 = vector.shape_cast %17 : vector<1x1x16x8xbf16> to vector<1x16x8xbf16>
    %19 = arith.extf %18 : vector<1x16x8xbf16> to vector<1x16x8xf32>
    %c0_17 = arith.constant 0 : index
    %c0_18 = arith.constant 0 : index
    %20 = vector.load %arg5[%c0_17, %c0_18] : memref<1x8xf32, #tpu.memory_space<vmem>>, vector<1x8xf32>
    %21 = vector.shape_cast %20 : vector<1x8xf32> to vector<1x1x8xf32>
    %22 = vector.broadcast %21 : vector<1x1x8xf32> to vector<1x16x8xf32>
    %23 = arith.mulf %19, %22 : vector<1x16x8xf32>
    %c0_19 = arith.constant 0 : index
    %c0_20 = arith.constant 0 : index
    %24 = vector.load %arg6[%c0_19, %c0_20] : memref<1x8xf32, #tpu.memory_space<vmem>>, vector<1x8xf32>
    %25 = vector.shape_cast %24 : vector<1x8xf32> to vector<1x1x8xf32>
    %26 = vector.broadcast %25 : vector<1x1x8xf32> to vector<1x16x8xf32>
    %27 = arith.addf %23, %26 : vector<1x16x8xf32>
    %cst_21 = arith.constant 0.000000e+00 : f32
    %28 = vector.broadcast %cst_21 : f32 to vector<1x16x8xf32>
    %29 = arith.maximumf %27, %28 : vector<1x16x8xf32>
    %30 = arith.truncf %29 : vector<1x16x8xf32> to vector<1x16x8xbf16>
    %c0_i32 = arith.constant 0 : i32
    %31 = arith.cmpi sgt, %arg1, %c0_i32 : i32
    %cst_22 = arith.constant 0.000000e+00 : bf16
    %32 = vector.broadcast %cst_22 : bf16 to vector<1x16x8xbf16>
    %33 = arith.select %31, %16, %32 : vector<1x16x8xbf16>
    %c0_i32_23 = arith.constant 0 : i32
    %34 = arith.cmpi slt, %arg1, %c0_i32_23 : i32
    %cst_24 = arith.constant 0.000000e+00 : bf16
    %35 = vector.broadcast %cst_24 : bf16 to vector<1x16x8xbf16>
    %36 = arith.select %34, %30, %35 : vector<1x16x8xbf16>
    %c0_25 = arith.constant 0 : index
    %c8 = arith.constant 8 : index
    %c0_26 = arith.constant 0 : index
    %37 = vector.load %arg12[%c0_25, %c8, %c0_26] : memref<18x32x8xbf16, #tpu.memory_space<vmem>>, vector<1x16x8xbf16>
    tpu.vector_store %arg12[%c0_25, %c8, %c0_26], %33 {strides = array<i32>} : memref<18x32x8xbf16, #tpu.memory_space<vmem>>, vector<1x16x8xbf16>,
    %c17 = arith.constant 17 : index
    %c8_27 = arith.constant 8 : index
    %c0_28 = arith.constant 0 : index
    %38 = vector.load %arg12[%c17, %c8_27, %c0_28] : memref<18x32x8xbf16, #tpu.memory_space<vmem>>, vector<1x16x8xbf16>
    tpu.vector_store %arg12[%c17, %c8_27, %c0_28], %36 {strides = array<i32>} : memref<18x32x8xbf16, #tpu.memory_space<vmem>>, vector<1x16x8xbf16>,
    %c0_29 = arith.constant 0 : index
    %c0_30 = arith.constant 0 : index
    %c0_31 = arith.constant 0 : index
    %c0_32 = arith.constant 0 : index
    %39 = vector.load %arg2[%c0_29, %c0_30, %c0_31, %c0_32] : memref<1x16x16x8xbf16, #tpu.memory_space<vmem>>, vector<1x16x16x8xbf16>
    %40 = vector.shape_cast %39 : vector<1x16x16x8xbf16> to vector<16x16x8xbf16>
    %41 = arith.extf %40 : vector<16x16x8xbf16> to vector<16x16x8xf32>
    %c0_33 = arith.constant 0 : index
    %c0_34 = arith.constant 0 : index
    %42 = vector.load %arg5[%c0_33, %c0_34] : memref<1x8xf32, #tpu.memory_space<vmem>>, vector<1x8xf32>
    %43 = vector.shape_cast %42 : vector<1x8xf32> to vector<1x1x8xf32>
    %44 = vector.broadcast %43 : vector<1x1x8xf32> to vector<16x16x8xf32>
    %45 = arith.mulf %41, %44 : vector<16x16x8xf32>
    %c0_35 = arith.constant 0 : index
    %c0_36 = arith.constant 0 : index
    %46 = vector.load %arg6[%c0_35, %c0_36] : memref<1x8xf32, #tpu.memory_space<vmem>>, vector<1x8xf32>
    %47 = vector.shape_cast %46 : vector<1x8xf32> to vector<1x1x8xf32>
    %48 = vector.broadcast %47 : vector<1x1x8xf32> to vector<16x16x8xf32>
    %49 = arith.addf %45, %48 : vector<16x16x8xf32>
    %cst_37 = arith.constant 0.000000e+00 : f32
    %50 = vector.broadcast %cst_37 : f32 to vector<16x16x8xf32>
    %51 = arith.maximumf %49, %50 : vector<16x16x8xf32>
    %52 = arith.truncf %51 : vector<16x16x8xf32> to vector<16x16x8xbf16>
    %c1 = arith.constant 1 : index
    %c8_38 = arith.constant 8 : index
    %c0_39 = arith.constant 0 : index
    %53 = vector.load %arg12[%c1, %c8_38, %c0_39] : memref<18x32x8xbf16, #tpu.memory_space<vmem>>, vector<16x16x8xbf16>
    tpu.vector_store %arg12[%c1, %c8_38, %c0_39], %52 {strides = array<i32>} : memref<18x32x8xbf16, #tpu.memory_space<vmem>>, vector<16x16x8xbf16>,
    %cst_40 = arith.constant 0.000000e+00 : f32
    %54 = vector.broadcast %cst_40 : f32 to vector<256x8xf32>
    %c0_41 = arith.constant 0 : index
    %c7 = arith.constant 7 : index
    %c0_42 = arith.constant 0 : index
    %55 = vector.load %arg12[%c0_41, %c7, %c0_42] : memref<18x32x8xbf16, #tpu.memory_space<vmem>>, vector<16x16x8xbf16>
    %56 = vector.shape_cast %55 : vector<16x16x8xbf16> to vector<256x8xbf16>
    %c0_43 = arith.constant 0 : index
    %c0_44 = arith.constant 0 : index
    %57 = vector.load %arg7[%c0_43, %c0_44] : memref<72x8xbf16, #tpu.memory_space<vmem>>, vector<8x8xbf16>
    %cst_45 = arith.constant dense<0.000000e+00> : vector<256x8xf32>
    %58 = tpu.matmul %56, %57, %cst_45 {dimension_numbers = #tpu.dot_dimension_numbers<[1], [0], [0], [1], [0, 0, 1, 1], [], []>} : vector<256x8xbf16>, vector<8x8xbf16>, vector<256x8xf32> -> vector<256x8xf32>
    %59 = arith.addf %54, %58 : vector<256x8xf32>
    %c0_46 = arith.constant 0 : index
    %c8_47 = arith.constant 8 : index
    %c0_48 = arith.constant 0 : index
    %60 = vector.load %arg12[%c0_46, %c8_47, %c0_48] : memref<18x32x8xbf16, #tpu.memory_space<vmem>>, vector<16x16x8xbf16>
    %61 = vector.shape_cast %60 : vector<16x16x8xbf16> to vector<256x8xbf16>
    %c8_49 = arith.constant 8 : index
    %c0_50 = arith.constant 0 : index
    %62 = vector.load %arg7[%c8_49, %c0_50] : memref<72x8xbf16, #tpu.memory_space<vmem>>, vector<8x8xbf16>
    %cst_51 = arith.constant dense<0.000000e+00> : vector<256x8xf32>
    %63 = tpu.matmul %61, %62, %cst_51 {dimension_numbers = #tpu.dot_dimension_numbers<[1], [0], [0], [1], [0, 0, 1, 1], [], []>} : vector<256x8xbf16>, vector<8x8xbf16>, vector<256x8xf32> -> vector<256x8xf32>
    %64 = arith.addf %59, %63 : vector<256x8xf32>
    %c0_52 = arith.constant 0 : index
    %c9 = arith.constant 9 : index
    %c0_53 = arith.constant 0 : index
    %65 = vector.load %arg12[%c0_52, %c9, %c0_53] : memref<18x32x8xbf16, #tpu.memory_space<vmem>>, vector<16x16x8xbf16>
    %66 = vector.shape_cast %65 : vector<16x16x8xbf16> to vector<256x8xbf16>
    %c16 = arith.constant 16 : index
    %c0_54 = arith.constant 0 : index
    %67 = vector.load %arg7[%c16, %c0_54] : memref<72x8xbf16, #tpu.memory_space<vmem>>, vector<8x8xbf16>
    %cst_55 = arith.constant dense<0.000000e+00> : vector<256x8xf32>
    %68 = tpu.matmul %66, %67, %cst_55 {dimension_numbers = #tpu.dot_dimension_numbers<[1], [0], [0], [1], [0, 0, 1, 1], [], []>} : vector<256x8xbf16>, vector<8x8xbf16>, vector<256x8xf32> -> vector<256x8xf32>
    %69 = arith.addf %64, %68 : vector<256x8xf32>
    %c1_56 = arith.constant 1 : index
    %c7_57 = arith.constant 7 : index
    %c0_58 = arith.constant 0 : index
    %70 = vector.load %arg12[%c1_56, %c7_57, %c0_58] : memref<18x32x8xbf16, #tpu.memory_space<vmem>>, vector<16x16x8xbf16>
    %71 = vector.shape_cast %70 : vector<16x16x8xbf16> to vector<256x8xbf16>
    %c24_59 = arith.constant 24 : index
    %c0_60 = arith.constant 0 : index
    %72 = vector.load %arg7[%c24_59, %c0_60] : memref<72x8xbf16, #tpu.memory_space<vmem>>, vector<8x8xbf16>
    %cst_61 = arith.constant dense<0.000000e+00> : vector<256x8xf32>
    %73 = tpu.matmul %71, %72, %cst_61 {dimension_numbers = #tpu.dot_dimension_numbers<[1], [0], [0], [1], [0, 0, 1, 1], [], []>} : vector<256x8xbf16>, vector<8x8xbf16>, vector<256x8xf32> -> vector<256x8xf32>
    %74 = arith.addf %69, %73 : vector<256x8xf32>
    %c1_62 = arith.constant 1 : index
    %c8_63 = arith.constant 8 : index
    %c0_64 = arith.constant 0 : index
    %75 = vector.load %arg12[%c1_62, %c8_63, %c0_64] : memref<18x32x8xbf16, #tpu.memory_space<vmem>>, vector<16x16x8xbf16>
    %76 = vector.shape_cast %75 : vector<16x16x8xbf16> to vector<256x8xbf16>
    %c32 = arith.constant 32 : index
    %c0_65 = arith.constant 0 : index
    %77 = vector.load %arg7[%c32, %c0_65] : memref<72x8xbf16, #tpu.memory_space<vmem>>, vector<8x8xbf16>
    %cst_66 = arith.constant dense<0.000000e+00> : vector<256x8xf32>
    %78 = tpu.matmul %76, %77, %cst_66 {dimension_numbers = #tpu.dot_dimension_numbers<[1], [0], [0], [1], [0, 0, 1, 1], [], []>} : vector<256x8xbf16>, vector<8x8xbf16>, vector<256x8xf32> -> vector<256x8xf32>
    %79 = arith.addf %74, %78 : vector<256x8xf32>
    %c1_67 = arith.constant 1 : index
    %c9_68 = arith.constant 9 : index
    %c0_69 = arith.constant 0 : index
    %80 = vector.load %arg12[%c1_67, %c9_68, %c0_69] : memref<18x32x8xbf16, #tpu.memory_space<vmem>>, vector<16x16x8xbf16>
    %81 = vector.shape_cast %80 : vector<16x16x8xbf16> to vector<256x8xbf16>
    %c40 = arith.constant 40 : index
    %c0_70 = arith.constant 0 : index
    %82 = vector.load %arg7[%c40, %c0_70] : memref<72x8xbf16, #tpu.memory_space<vmem>>, vector<8x8xbf16>
    %cst_71 = arith.constant dense<0.000000e+00> : vector<256x8xf32>
    %83 = tpu.matmul %81, %82, %cst_71 {dimension_numbers = #tpu.dot_dimension_numbers<[1], [0], [0], [1], [0, 0, 1, 1], [], []>} : vector<256x8xbf16>, vector<8x8xbf16>, vector<256x8xf32> -> vector<256x8xf32>
    %84 = arith.addf %79, %83 : vector<256x8xf32>
    %c2 = arith.constant 2 : index
    %c7_72 = arith.constant 7 : index
    %c0_73 = arith.constant 0 : index
    %85 = vector.load %arg12[%c2, %c7_72, %c0_73] : memref<18x32x8xbf16, #tpu.memory_space<vmem>>, vector<16x16x8xbf16>
    %86 = vector.shape_cast %85 : vector<16x16x8xbf16> to vector<256x8xbf16>
    %c48 = arith.constant 48 : index
    %c0_74 = arith.constant 0 : index
    %87 = vector.load %arg7[%c48, %c0_74] : memref<72x8xbf16, #tpu.memory_space<vmem>>, vector<8x8xbf16>
    %cst_75 = arith.constant dense<0.000000e+00> : vector<256x8xf32>
    %88 = tpu.matmul %86, %87, %cst_75 {dimension_numbers = #tpu.dot_dimension_numbers<[1], [0], [0], [1], [0, 0, 1, 1], [], []>} : vector<256x8xbf16>, vector<8x8xbf16>, vector<256x8xf32> -> vector<256x8xf32>
    %89 = arith.addf %84, %88 : vector<256x8xf32>
    %c2_76 = arith.constant 2 : index
    %c8_77 = arith.constant 8 : index
    %c0_78 = arith.constant 0 : index
    %90 = vector.load %arg12[%c2_76, %c8_77, %c0_78] : memref<18x32x8xbf16, #tpu.memory_space<vmem>>, vector<16x16x8xbf16>
    %91 = vector.shape_cast %90 : vector<16x16x8xbf16> to vector<256x8xbf16>
    %c56 = arith.constant 56 : index
    %c0_79 = arith.constant 0 : index
    %92 = vector.load %arg7[%c56, %c0_79] : memref<72x8xbf16, #tpu.memory_space<vmem>>, vector<8x8xbf16>
    %cst_80 = arith.constant dense<0.000000e+00> : vector<256x8xf32>
    %93 = tpu.matmul %91, %92, %cst_80 {dimension_numbers = #tpu.dot_dimension_numbers<[1], [0], [0], [1], [0, 0, 1, 1], [], []>} : vector<256x8xbf16>, vector<8x8xbf16>, vector<256x8xf32> -> vector<256x8xf32>
    %94 = arith.addf %89, %93 : vector<256x8xf32>
    %c2_81 = arith.constant 2 : index
    %c9_82 = arith.constant 9 : index
    %c0_83 = arith.constant 0 : index
    %95 = vector.load %arg12[%c2_81, %c9_82, %c0_83] : memref<18x32x8xbf16, #tpu.memory_space<vmem>>, vector<16x16x8xbf16>
    %96 = vector.shape_cast %95 : vector<16x16x8xbf16> to vector<256x8xbf16>
    %c64 = arith.constant 64 : index
    %c0_84 = arith.constant 0 : index
    %97 = vector.load %arg7[%c64, %c0_84] : memref<72x8xbf16, #tpu.memory_space<vmem>>, vector<8x8xbf16>
    %cst_85 = arith.constant dense<0.000000e+00> : vector<256x8xf32>
    %98 = tpu.matmul %96, %97, %cst_85 {dimension_numbers = #tpu.dot_dimension_numbers<[1], [0], [0], [1], [0, 0, 1, 1], [], []>} : vector<256x8xbf16>, vector<8x8xbf16>, vector<256x8xf32> -> vector<256x8xf32>
    %99 = arith.addf %94, %98 : vector<256x8xf32>
    %c0_86 = arith.constant 0 : index
    %c0_87 = arith.constant 0 : index
    %100 = vector.load %arg8[%c0_86, %c0_87] : memref<1x8xf32, #tpu.memory_space<vmem>>, vector<1x8xf32>
    %101 = vector.broadcast %100 : vector<1x8xf32> to vector<256x8xf32>
    %102 = arith.addf %99, %101 : vector<256x8xf32>
    %103 = vector.shape_cast %102 : vector<256x8xf32> to vector<16x16x8xf32>
    %104 = arith.truncf %103 : vector<16x16x8xf32> to vector<16x16x8xbf16>
    %c0_88 = arith.constant 0 : index
    %c0_89 = arith.constant 0 : index
    %c0_90 = arith.constant 0 : index
    %c0_91 = arith.constant 0 : index
    %105 = vector.load %arg9[%c0_88, %c0_89, %c0_90, %c0_91] : memref<1x16x16x8xbf16, #tpu.memory_space<vmem>>, vector<1x16x16x8xbf16>
    %106 = vector.shape_cast %105 : vector<1x16x16x8xbf16> to vector<16x16x8xbf16>
    %107 = vector.shape_cast %104 : vector<16x16x8xbf16> to vector<1x16x16x8xbf16>
    tpu.vector_store %arg9[%c0_88, %c0_89, %c0_90, %c0_91], %107 {strides = array<i32>} : memref<1x16x16x8xbf16, #tpu.memory_space<vmem>>, vector<1x16x16x8xbf16>,
    %cst_92 = arith.constant dense<0.000000e+00> : vector<8xf32>
    %108 = vector.multi_reduction <add>, %102, %cst_92 [0] : vector<256x8xf32> to vector<8xf32>
    %109 = vector.shape_cast %108 : vector<8xf32> to vector<1x8xf32>
    %c0_93 = arith.constant 0 : index
    %c0_94 = arith.constant 0 : index
    %c0_95 = arith.constant 0 : index
    %c0_96 = arith.constant 0 : index
    %110 = vector.load %arg10[%c0_93, %c0_94, %c0_95, %c0_96] : memref<1x1x1x8xf32, #tpu.memory_space<vmem>>, vector<1x1x1x8xf32>
    %111 = vector.shape_cast %110 : vector<1x1x1x8xf32> to vector<1x8xf32>
    %112 = vector.shape_cast %109 : vector<1x8xf32> to vector<1x1x1x8xf32>
    tpu.vector_store %arg10[%c0_93, %c0_94, %c0_95, %c0_96], %112 {strides = array<i32>} : memref<1x1x1x8xf32, #tpu.memory_space<vmem>>, vector<1x1x1x8xf32>,
    %113 = arith.mulf %102, %102 : vector<256x8xf32>
    %cst_97 = arith.constant dense<0.000000e+00> : vector<8xf32>
    %114 = vector.multi_reduction <add>, %113, %cst_97 [0] : vector<256x8xf32> to vector<8xf32>
    %115 = vector.shape_cast %114 : vector<8xf32> to vector<1x8xf32>
    %c0_98 = arith.constant 0 : index
    %c0_99 = arith.constant 0 : index
    %c0_100 = arith.constant 0 : index
    %c0_101 = arith.constant 0 : index
    %116 = vector.load %arg11[%c0_98, %c0_99, %c0_100, %c0_101] : memref<1x1x1x8xf32, #tpu.memory_space<vmem>>, vector<1x1x1x8xf32>
    %117 = vector.shape_cast %116 : vector<1x1x1x8xf32> to vector<1x8xf32>
    %118 = vector.shape_cast %115 : vector<1x8xf32> to vector<1x1x1x8xf32>
    tpu.vector_store %arg11[%c0_98, %c0_99, %c0_100, %c0_101], %118 {strides = array<i32>} : memref<1x1x1x8xf32, #tpu.memory_space<vmem>>, vector<1x1x1x8xf32>,
    return
  }
  func.func @transform_0(%arg0: i32, %arg1: i32) -> (i32, i32, i32, i32) {
    %c0_i32 = arith.constant 0 : i32
    %c0_i32_0 = arith.constant 0 : i32
    %c0_i32_1 = arith.constant 0 : i32
    return %arg0, %arg1, %c0_i32, %c0_i32_0 : i32, i32, i32, i32
  }
  func.func @transform_1(%arg0: i32, %arg1: i32) -> (i32, i32, i32, i32) {
    %c16_i32 = arith.constant 16 : i32
    %0 = arith.muli %arg1, %c16_i32 : i32
    %c1_i32 = arith.constant 1 : i32
    %1 = arith.subi %0, %c1_i32 : i32
    %c0_i32 = arith.constant 0 : i32
    %2 = arith.maxsi %1, %c0_i32 : i32
    %c0_i32_0 = arith.constant 0 : i32
    %c0_i32_1 = arith.constant 0 : i32
    %c0_i32_2 = arith.constant 0 : i32
    return %arg0, %2, %c0_i32_0, %c0_i32_1 : i32, i32, i32, i32
  }
  func.func @transform_2(%arg0: i32, %arg1: i32) -> (i32, i32, i32, i32) {
    %c16_i32 = arith.constant 16 : i32
    %0 = arith.muli %arg1, %c16_i32 : i32
    %c16_i32_0 = arith.constant 16 : i32
    %1 = arith.addi %0, %c16_i32_0 : i32
    %c15_i32 = arith.constant 15 : i32
    %2 = arith.minsi %1, %c15_i32 : i32
    %c0_i32 = arith.constant 0 : i32
    %c0_i32_1 = arith.constant 0 : i32
    %c0_i32_2 = arith.constant 0 : i32
    return %arg0, %2, %c0_i32, %c0_i32_1 : i32, i32, i32, i32
  }
  func.func @transform_3(%arg0: i32, %arg1: i32) -> (i32, i32) {
    %c0_i32 = arith.constant 0 : i32
    %c0_i32_0 = arith.constant 0 : i32
    %c0_i32_1 = arith.constant 0 : i32
    return %c0_i32, %c0_i32_0 : i32, i32
  }
  func.func @transform_4(%arg0: i32, %arg1: i32) -> (i32, i32) {
    %c0_i32 = arith.constant 0 : i32
    %c0_i32_0 = arith.constant 0 : i32
    %c0_i32_1 = arith.constant 0 : i32
    return %c0_i32, %c0_i32_0 : i32, i32
  }
  func.func @transform_5(%arg0: i32, %arg1: i32) -> (i32, i32) {
    %c0_i32 = arith.constant 0 : i32
    %c0_i32_0 = arith.constant 0 : i32
    %c0_i32_1 = arith.constant 0 : i32
    return %c0_i32, %c0_i32_0 : i32, i32
  }
  func.func @transform_6(%arg0: i32, %arg1: i32) -> (i32, i32) {
    %c0_i32 = arith.constant 0 : i32
    %c0_i32_0 = arith.constant 0 : i32
    %c0_i32_1 = arith.constant 0 : i32
    return %c0_i32, %c0_i32_0 : i32, i32
  }
  func.func @transform_7(%arg0: i32, %arg1: i32) -> (i32, i32, i32, i32) {
    %c0_i32 = arith.constant 0 : i32
    %c0_i32_0 = arith.constant 0 : i32
    %c0_i32_1 = arith.constant 0 : i32
    return %arg0, %arg1, %c0_i32, %c0_i32_0 : i32, i32, i32, i32
  }
  func.func @transform_8(%arg0: i32, %arg1: i32) -> (i32, i32, i32, i32) {
    %c0_i32 = arith.constant 0 : i32
    %c0_i32_0 = arith.constant 0 : i32
    %c0_i32_1 = arith.constant 0 : i32
    return %arg0, %arg1, %c0_i32, %c0_i32_0 : i32, i32, i32, i32
  }
  func.func @transform_9(%arg0: i32, %arg1: i32) -> (i32, i32, i32, i32) {
    %c0_i32 = arith.constant 0 : i32
    %c0_i32_0 = arith.constant 0 : i32
    %c0_i32_1 = arith.constant 0 : i32
    return %arg0, %arg1, %c0_i32, %c0_i32_0 : i32, i32, i32, i32
  }
}

</mosaic_0001>

<bundles_post_ra>
// kernel: double_conv_ds.5
= control target key start
LH: loop header
LB: loop body
LE: loop exit
PB: predicated region body
PF: predicated region fallthrough
CT: control target
= control target key end

     0   :  { %8 = vsyncpa [#allocation3], 0  ;;  %s1316_s0 = inlined_call_operand.hbm [shape: bf16[2,16,16,8], index: 0, kind: input, shape index: {}]   ;;  %s1317_s1 = inlined_call_operand.hbm [shape: f32[1,8], index: 1, kind: input, shape index: {}]   ;;  %s1318_s2 = inlined_call_operand.hbm [shape: f32[1,8], index: 2, kind: input, shape index: {}]   ;;  %s1319_s3 = inlined_call_operand.hbm [shape: f32[2,8,256], index: 3, kind: output, shape index: {}]  }
   0x1   :  { %10 = vsyncpa [#allocation3 + $0x1], 0 }
   0x2   :  { %11 = vsyncpa [#allocation6], 0 }
   0x3   :  { %12 = vsyncpa [#allocation4], 0 }
   0x4   :  { %14 = vsyncpa [#allocation4 + $0x1], 0  ;;  %s982_s12 = smov 0   ;;  %s984_s13 = smov 0  }
   0x5   :  { %s986_s14 = smov 0   ;;  %s988_s15 = smov 0  }
   0x6   :  { %s990_s16 = smov 0   ;;  %s992_s17 = smov 0  }
   0x7 LB: > { %s595_s18 = sadd.s32 4294967295, %s954_s17   ;;  %s596_s19 = sadd.s32 4294967294, %s954_s17   ;;  %s954_s17 = sphi %s992_s17, %s20_s17   ;;  %s950_s16 = sphi %s990_s16, %s1345_s16   ;;  %s946_s15 = sphi %s988_s15, %s1344_s15   ;;  %s942_s14 = sphi %s986_s14, %s1343_s14   ;;  %s938_s13 = sphi %s984_s13, %s1342_s13   ;;  %s934_s12 = sphi %s982_s12, %s1341_s12  }
   0x8   : > { %s41_s20 = sadd.s32 1, %s942_s14  ;;  %p48_p0 = scmp.ne.s32.totalorder %s942_s14, %s938_s13 }
   0x9   : > { %p49_p1 = scmp.eq.s32.totalorder %s954_s17, 0  ;;  %p54_p2 = scmp.ne.s32.totalorder %s938_s13, %s934_s12 }
   0xa   : > { %p1020_p3 = scmp.eq.s32.totalorder %s595_s18, 0  ;;  %p122_p4 = scmp.eq.s32.totalorder %s595_s18, 1 }
   0xb   : > { %p1024_p5 = por %p49_p1, %p48_p0  ;;  %p128_p6 = scmp.eq.s32.totalorder %s596_s19, 1 }
   0xc   : > { %s1326_s21 = scalar_select %p1020_p3, 1, 0 }
   0xd   : > { %p1030_p7 = por %p1020_p3, %p54_p2  ;;  %p1034_p8 = por %p122_p4, %p48_p0 }
   0xe   : > { %p1038_p9 = por %p128_p6, %p54_p2  ;;  %p597_p10 = scmp.ge.s32.totalorder %s954_s17, 1 }
   0xf   : > { %s1328_s23 = scalar_select %p1030_p7, 1, 0 }
  0x10   : > { %s1329_s24 = scalar_select %p1034_p8, 1, 0 }
  0x11   : > { %s1330_s25 = scalar_select %p1038_p9, 1, 0 }
  0x12   : > { %p135_p11 = scmp.lt.s32.totalorder %s954_s17, 3  ;;  %s956_s27 = smov [#allocation5]  }
  0x13   : > { %s148_s28 = sshll.u32 %s956_s27, 4  ;;  %p726_p1 = scmp.lt.s32.totalorder %s954_s17, 2  ;;  %s149_s28 = int_to_ptr.vmem [resolvable:$true] %s148_s28 }
  0x14   : > { %p1045_p13 = pnand %p597_p10, %p135_p11  ;;  %s957_s30 = smov [#allocation7]  }
  0x15   : > { %p1054_p4 = pnand %p726_p1, %p1024_p5  ;;  %s159_s4 = sshll.u32 %s957_s30, 4  ;;  %s1064_s4 = int_to_ptr.vmem [resolvable:$true] %s159_s4 }
  0x16   : > { %s1331_s26 = scalar_select %p1045_p13, 1, 0 }
  0x17   : > { %p709_p0 = pneg %p1045_p13  ;;  %s782_s8 = scalar_lea.hbm %s1317_s1, 16 }
  0x18   : > { %s1332_s29 = scalar_select %p1054_p4, 1, 0 }
  0x19   : > { %p1060_p2 = pnand %p709_p0, %p1020_p3  ;;  %p783_p5 = scmp.ne.s32.totalorder %s1317_s1, %s782_s8 }
  0x1a   : > { %p789_p1 = scmp.lt.u32.totalorder %s782_s8, %s1317_s1 }
  0x1b   : > { %p784_p6 = pneg %p1060_p2 }
  0x1d   : > { %p785_p10 = pnand %p784_p6, %p783_p5 }
  0x1f   : > { %p786_p11 = pneg %p785_p10 }
  0x21   : > { %p791_p0 = pnand %p789_p1, %p786_p11 }
  0x23   : > { %794 = shalt.err (!%p791_p0)
}
  0x24   : > { %s795_s19 = scalar_lea.vmem %s149_s28, 16  ;;  %s802_s22 = scalar_lea.vmem %s149_s28, 32 }
  0x25   : > { %p796_p12 = scmp.ne.s32.totalorder %s149_s28, %s795_s19  ;;  %p803_p3 = scmp.lt.s32.totalorder %s149_s28, %s149_s28 }
  0x26   : > { %p804_p7 = scmp.lt.s32.totalorder %s802_s22, %s795_s19 }
  0x27   : > { %p798_p9 = pnand %p796_p12, %p784_p6 }
  0x28   : > { %p805_p13 = por %p804_p7, %p803_p3 }
  0x29   : > { %p799_p8 = pneg %p798_p9 }
  0x2b   : > { %p806_p4 = pnand %p805_p13, %p799_p8 }
  0x2d   : > { %809 = shalt.err (!%p806_p4)
}
  0x2e   : > { %712 = dma.hbm_to_vmem [thread:$0]  (!%p1060_p2), %s1317_s1, 16, %s149_s28, [#allocation6]  }
  0x2f   : > { %s810_s8 = scalar_lea.hbm %s1318_s2, 16 }
  0x30   : > { %p811_p9 = scmp.ne.s32.totalorder %s1318_s2, %s810_s8  ;;  %p817_p8 = scmp.lt.u32.totalorder %s810_s8, %s1318_s2 }
  0x32   : > { %p813_p3 = pnand %p811_p9, %p784_p6 }
  0x34   : > { %p814_p7 = pneg %p813_p3 }
  0x36   : > { %p819_p12 = pnand %p817_p8, %p814_p7 }
  0x38   : > { %822 = shalt.err (!%p819_p12)
}
  0x39   : > { %s823_s28 = scalar_lea.vmem %s1064_s4, 16  ;;  %s830_s19 = scalar_lea.vmem %s1064_s4, 32 }
  0x3a   : > { %p824_p13 = scmp.ne.s32.totalorder %s1064_s4, %s823_s28  ;;  %p831_p10 = scmp.lt.s32.totalorder %s1064_s4, %s1064_s4 }
  0x3b   : > { %p832_p11 = scmp.lt.s32.totalorder %s830_s19, %s823_s28 }
  0x3c   : > { %p826_p4 = pnand %p824_p13, %p784_p6 }
  0x3d   : > { %p833_p1 = por %p832_p11, %p831_p10 }
  0x3e   : > { %p827_p5 = pneg %p826_p4 }
  0x40   : > { %p834_p0 = pnand %p833_p1, %p827_p5 }
  0x42   : > { %837 = shalt.err (!%p834_p0)
}
  0x43   : > { %715 = dma.hbm_to_vmem [thread:$0]  (!%p1060_p2), %s1318_s2, 16, %s1064_s4, [#allocation6]  }
  0x44   : > { %s32_s30 = sadd.s32 1, %s950_s16  ;;  %s170_s6 = sand.u32 1, %s942_s14  }
  0x45   : > { %p34_p6 = scmp.ge.s32.totalorder %s32_s30, 2  ;;  %s601_s7 = sshll.u32 %s170_s6, 7 }
  0x46   : > { %s616_s8 = sshll.u32 %s950_s16, 11  ;;  %s174_s4 = scalar_lea.vmem [#allocation2], %s601_s7 }
  0x47   : > { %s1347_s30 = smov (%p34_p6, %s32_s30), 0  ;;  %s1122_s10 = scalar_lea.hbm %s1316_s0, %s616_s8 }
  0x48   : > { %s36_s11 = ssub.s32 %s950_s16, %s1347_s30  ;;  %s184_s18 = sshll.u32 %s174_s4, 4  ;;  %s1126_s18 = int_to_ptr.vmem [resolvable:$true] %s184_s18 }
  0x49   : > { %p39_p2 = scmp.eq.s32.totalorder %s36_s11, 0  ;;  %s1133_s19 = scalar_lea.sflag [#allocation3], %s170_s6 }
  0x4a   : > { %s838_s22 = scalar_lea.hbm %s1122_s10, 2048  ;;  %p1334_p3 = scmp.ne.s32.totalorder %s1332_s29, 0 }
  0x4b   : > { %s1131_s28 = scalar_select %p39_p2, %s942_s14, %s41_s20  }
  0x4c   : > { %p839_p9 = scmp.ne.s32.totalorder %s1122_s10, %s838_s22  ;;  %p840_p7 = pneg %p1334_p3 }
  0x4d   : > { %s843_s7 = scalar_lea.hbm %s1316_s0, 4096  ;;  %p844_p13 = scmp.lt.u32.totalorder %s1122_s10, %s1316_s0 }
  0x4e   : > { %p841_p8 = pnand %p840_p7, %p839_p9  ;;  %p845_p4 = scmp.lt.u32.totalorder %s843_s7, %s838_s22 }
  0x4f   : > { %p847_p10 = scmp.lt.u32.totalorder %s838_s22, %s1122_s10 }
  0x50   : > { %p842_p12 = pneg %p841_p8  ;;  %p846_p5 = por %p845_p4, %p844_p13 }
  0x52   : > { %p848_p11 = por %p847_p10, %p846_p5 }
  0x54   : > { %p849_p1 = pnand %p848_p11, %p842_p12 }
  0x56   : > { %852 = shalt.err (!%p849_p1)
}
  0x57   : > { %s853_s20 = scalar_lea.vmem %s1126_s18, 2048  ;;  %s958_s6 = smov [#allocation2]  }
  0x58   : > { %p854_p0 = scmp.ne.s32.totalorder %s1126_s18, %s853_s20  ;;  %s858_s11 = sshll.u32 %s958_s6, 4  ;;  %s859_s11 = int_to_ptr.vmem [resolvable:$false] %s858_s11 }
  0x59   : > { %s860_s4 = scalar_lea.vmem %s859_s11, 4096  ;;  %p861_p9 = scmp.lt.s32.totalorder %s1126_s18, %s859_s11 }
  0x5a   : > { %p856_p6 = pnand %p854_p0, %p840_p7  ;;  %p862_p8 = scmp.lt.s32.totalorder %s860_s4, %s853_s20 }
  0x5c   : > { %p857_p2 = pneg %p856_p6  ;;  %p863_p13 = por %p862_p8, %p861_p9 }
  0x5e   : > { %p864_p4 = pnand %p863_p13, %p857_p2 }
  0x60   : > { %867 = shalt.err (!%p864_p4)
}
  0x61   : > { %s959_s22 = smov 64   ;;  %s960_s27 = smov 4  }
  0x62   : > { %719 = dma.hbm_to_vmem [thread:$0]  (!%p1334_p3), %s1122_s10, 2048, %s1126_s18, %s1133_s19, %s959_s22, %s959_s22, %s960_s27  }
  0x63   : > { %p1335_p7 = scmp.ne.s32.totalorder %s1331_s26, 0 }
  0x64   : > { %s1164_s8 = sand.u32 (!%p1335_p7), 1, %s938_s13   ;;  %p1336_p12 = scmp.ne.s32.totalorder (!%p1335_p7), %s1328_s23, 0 }
  0x65   : > { %196 = sbr.rel (%p1335_p7) target bundleno = 266 (0x10a), region = 32  ;;  %s605_s7 = sshll.u32 (!%p1335_p7), %s1164_s8, 7 }
  0x66   : > { %s199_s5 = scalar_lea.sflag (!%p1335_p7), [#allocation3], %s1164_s8  ;;  %s1168_s9 = scalar_lea.vmem (!%p1335_p7), [#allocation2], %s605_s7 }
  0x6c   : > { %921 = dma.done.wait (%p1336_p12), %s199_s5, 2048  }
  0x6d   : > { %923 = vsyncadd (%p1336_p12), %s199_s5, 4294965248  ;;  %p1337_p3 = scmp.ne.s32.totalorder %s1326_s21, 0 }
  0x6f   : > { %925 = dma.done.wait (%p1337_p3), [#allocation6], 32  }
  0x70   : > { %927 = vsyncadd (%p1337_p3), [#allocation6], 4294967264  ;;  %v689_v0 = vld [vmem:[%s1168_s9 + $0x40] sm:$0xff]   ;;  %v690_v5 = vld [vmem:[%s1168_s9 + $0x48] sm:$0xff]   ;;  %s608_s21 = sshll.u32 %s1164_s8, 4  ;;  %s617_s29 = sshll.u32 %s946_s15, 8 }
  0x71   : > { %v1179_v1 = vld [vmem:[#allocation5] ss:$0 sm:$0xff]  ;;  %v652_v2 = vunpack.c.l.bf16 %v689_v0  ;;  %v653_v4 = vunpack.c.h.bf16 %v689_v0  ;;  %v682_v6 = vld [vmem:[%s1168_s9 + $0x8] sm:$0xff]   ;;  %v1184_v7 = vld [vmem:[#allocation7] ss:$0 sm:$0xff]  ;;  %v656_v10 = vunpack.c.l.bf16 %v690_v5  ;;  %v657_v19 = vunpack.c.h.bf16 %v690_v5  ;;  %s232_s23 = scalar_lea.vmem [#allocation8], %s608_s21  ;;  %s1269_s19 = scalar_lea.hbm %s1319_s3, %s617_s29 }
  0x72   : > { %v619_v3 = vld [vmem:[%s1168_s9] sm:$0xff]   ;;  %v624_v11 = vunpack.c.l.bf16 %v682_v6  ;;  %v625_v23 = vunpack.c.h.bf16 %v682_v6  ;;  %v691_v24 = vld [vmem:[%s1168_s9 + $0x50] sm:$0xff]   ;;  %v692_v44 = vld [vmem:[%s1168_s9 + $0x58] sm:$0xff]   ;;  %s492_s26 = sshll.u32 %s232_s23, 4  ;;  %s476_s20 = scalar_lea.sflag [#allocation4], %s1164_s8  ;;  %s1264_s26 = int_to_ptr.vmem [resolvable:$true] %s492_s26 }
  0x73   : > { %v620_v8 = vunpack.c.l.bf16 %v619_v3  ;;  %v621_v9 = vunpack.c.h.bf16 %v619_v3  ;;  %v322_v12 = vmul.f32 %v652_v2, %v1179_v1  ;;  %v323_v13 = vmul.f32 %v653_v4, %v1179_v1  ;;  %v683_v26 = vld [vmem:[%s1168_s9 + $0x10] sm:$0xff]   ;;  %v684_v45 = vld [vmem:[%s1168_s9 + $0x18] sm:$0xff]   ;;  %v693_v62 = vld [vmem:[%s1168_s9 + $0x60] sm:$0xff]   ;;  %s868_s6 = scalar_lea.vmem %s1264_s26, 256  ;;  %p1338_p10 = scmp.ne.s32.totalorder %s1329_s24, 0 }
  0x74   : > { %v324_v18 = vmul.f32 %v656_v10, %v1179_v1  ;;  %v308_v22 = vmul.f32 %v624_v11, %v1179_v1  ;;  %v325_v30 = vmul.f32 %v657_v19, %v1179_v1  ;;  %v660_v31 = vunpack.c.l.bf16 %v691_v24  ;;  %v685_v63 = vld [vmem:[%s1168_s9 + $0x20] sm:$0xff]   ;;  %v686_v19 = vld [vmem:[%s1168_s9 + $0x28] sm:$0xff]   ;;  %p869_p5 = scmp.ne.s32.totalorder %s1264_s26, %s868_s6  ;;  %s961_s15 = smov [#allocation8]  }
  0x75   : > { %v306_v14 = vmul.f32 %v620_v8, %v1179_v1  ;;  %v307_v15 = vmul.f32 %v621_v9, %v1179_v1  ;;  %v361_v16 = vadd.f32 %v1184_v7, %v322_v12  ;;  %v362_v17 = vadd.f32 %v1184_v7, %v323_v13  ;;  %s872_s11 = sshll.u32 %s961_s15, 4  ;;  %s873_s11 = int_to_ptr.vmem [resolvable:$false] %s872_s11 }
  0x76   : > { %v363_v29 = vadd.f32 %v1184_v7, %v324_v18  ;;  %v347_v33 = vadd.f32 %v1184_v7, %v308_v22  ;;  %v309_v34 = vmul.f32 %v625_v23, %v1179_v1  ;;  %v628_v35 = vunpack.c.l.bf16 %v683_v26  ;;  %v694_v18 = vld [vmem:[%s1168_s9 + $0x68] sm:$0xff]   ;;  %p870_p11 = pnand %p869_p5, %p1338_p10  ;;  %s874_s4 = scalar_lea.vmem %s873_s11, 512 }
  0x77   : > { %v345_v20 = vadd.f32 %v1184_v7, %v306_v14  ;;  %v346_v21 = vadd.f32 %v1184_v7, %v307_v15  ;;  %v393_v25 = vmax.f32 %v361_v16, 0.0  ;;  %v394_v28 = vmax.f32 %v362_v17, 0.0  ;;  %p875_p0 = scmp.lt.s32.totalorder %s1264_s26, %s873_s11  ;;  %p876_p6 = scmp.lt.s32.totalorder %s874_s4, %s868_s6 }
  0x78   : > { %v395_v36 = vmax.f32 %v363_v29, 0.0  ;;  %v364_v37 = vadd.f32 %v1184_v7, %v325_v30  ;;  %v326_v38 = vmul.f32 %v660_v31, %v1179_v1  ;;  %v661_v39 = vunpack.c.h.bf16 %v691_v24  ;;  %p871_p1 = pneg %p870_p11 }
  0x79   : > { %v377_v27 = vmax.f32 %v345_v20, 0.0  ;;  %441 = vxpose.xlu1.b32.start [1/16] (narrow) %v393_v25, 8  ;;  %v378_v32 = vmax.f32 %v346_v21, 0.0  ;;  %v379_v40 = vmax.f32 %v347_v33, 0.0  ;;  %v348_v41 = vadd.f32 %v1184_v7, %v309_v34  ;;  %p877_p2 = por %p876_p6, %p875_p0 }
  0x7a   : > { %v310_v42 = vmul.f32 %v628_v35, %v1179_v1  ;;  %v629_v43 = vunpack.c.h.bf16 %v683_v26  ;;  %v396_v46 = vmax.f32 %v364_v37, 0.0  ;;  %v365_v47 = vadd.f32 %v1184_v7, %v326_v38  ;;  %v687_v37 = vld [vmem:[%s1168_s9 + $0x30] sm:$0xff]  }
  0x7b   : > { %409 = vxpose.xlu0.b32.start [1/16] (narrow) %v377_v27, 8  ;;  %v327_v48 = vmul.f32 %v661_v39, %v1179_v1  ;;  %v664_v49 = vunpack.c.l.bf16 %v692_v44  ;;  %v380_v50 = vmax.f32 %v348_v41, 0.0  ;;  %v632_v53 = vunpack.c.l.bf16 %v684_v45  ;;  %p878_p9 = pnand %p877_p2, %p871_p1 }
  0x7c   : > { %v349_v51 = vadd.f32 %v1184_v7, %v310_v42  ;;  %v311_v52 = vmul.f32 %v629_v43, %v1179_v1  ;;  %v397_v54 = vmax.f32 %v365_v47, 0.0  ;;  %v665_v57 = vunpack.c.h.bf16 %v692_v44 }
  0x7d   : > { %442 = vxpose.xlu1.b32.cont [2/16] (narrow) %v394_v28, 8  ;;  %v366_v55 = vadd.f32 %v1184_v7, %v327_v48  ;;  %v328_v56 = vmul.f32 %v664_v49, %v1179_v1  ;;  %v312_v60 = vmul.f32 %v632_v53, %v1179_v1  ;;  %v633_v61 = vunpack.c.h.bf16 %v684_v45 }
  0x7e   : > { %v381_v58 = vmax.f32 %v349_v51, 0.0  ;;  %v350_v59 = vadd.f32 %v1184_v7, %v311_v52  ;;  %v329_v3 = vmul.f32 %v665_v57, %v1179_v1  ;;  %v668_v4 = vunpack.c.l.bf16 %v693_v62 }
  0x7f   : > { %410 = vxpose.xlu0.b32.cont [2/16] (narrow) %v378_v32, 8  ;;  %v398_v0 = vmax.f32 %v366_v55, 0.0  ;;  %v367_v2 = vadd.f32 %v1184_v7, %v328_v56  ;;  %v351_v6 = vadd.f32 %v1184_v7, %v312_v60  ;;  %v313_v8 = vmul.f32 %v633_v61, %v1179_v1  ;;  %v688_v55 = vld [vmem:[%s1168_s9 + $0x38] sm:$0xff]  }
  0x80   : > { %v382_v5 = vmax.f32 %v350_v59, 0.0  ;;  %v636_v9 = vunpack.c.l.bf16 %v685_v63  ;;  %v368_v11 = vadd.f32 %v1184_v7, %v329_v3  ;;  %v330_v12 = vmul.f32 %v668_v4, %v1179_v1 }
  0x81   : > { %443 = vxpose.xlu1.b32.cont [3/16] (narrow) %v395_v36, 8  ;;  %v399_v10 = vmax.f32 %v367_v2, 0.0  ;;  %v669_v13 = vunpack.c.h.bf16 %v693_v62  ;;  %v383_v14 = vmax.f32 %v351_v6, 0.0  ;;  %v352_v15 = vadd.f32 %v1184_v7, %v313_v8  ;;  %v695_v36 = vld [vmem:[%s1168_s9 + $0x70] sm:$0xff]  }
  0x82   : > { %v314_v16 = vmul.f32 %v636_v9, %v1179_v1  ;;  %v637_v17 = vunpack.c.h.bf16 %v685_v63  ;;  %v400_v20 = vmax.f32 %v368_v11, 0.0  ;;  %v369_v21 = vadd.f32 %v1184_v7, %v330_v12 }
  0x83   : > { %411 = vxpose.xlu0.b32.cont [3/16] (narrow) %v379_v40, 8  ;;  %v331_v22 = vmul.f32 %v669_v13, %v1179_v1  ;;  %v672_v23 = vunpack.c.l.bf16 %v694_v18  ;;  %v384_v24 = vmax.f32 %v352_v15, 0.0  ;;  %v640_v27 = vunpack.c.l.bf16 %v686_v19 }
  0x84   : > { %v353_v25 = vadd.f32 %v1184_v7, %v314_v16  ;;  %v315_v26 = vmul.f32 %v637_v17, %v1179_v1  ;;  %v401_v28 = vmax.f32 %v369_v21, 0.0  ;;  %v673_v31 = vunpack.c.h.bf16 %v694_v18 }
  0x85   : > { %444 = vxpose.xlu1.b32.cont [4/16] (narrow) %v396_v46, 8  ;;  %v370_v29 = vadd.f32 %v1184_v7, %v331_v22  ;;  %v332_v30 = vmul.f32 %v672_v23, %v1179_v1  ;;  %v316_v34 = vmul.f32 %v640_v27, %v1179_v1  ;;  %v641_v35 = vunpack.c.h.bf16 %v686_v19 }
  0x86   : > { %v385_v32 = vmax.f32 %v353_v25, 0.0  ;;  %v354_v33 = vadd.f32 %v1184_v7, %v315_v26  ;;  %v333_v40 = vmul.f32 %v673_v31, %v1179_v1  ;;  %v676_v41 = vunpack.c.l.bf16 %v695_v36 }
  0x87   : > { %412 = vxpose.xlu0.b32.cont [4/16] (narrow) %v380_v50, 8  ;;  %v402_v38 = vmax.f32 %v370_v29, 0.0  ;;  %v371_v39 = vadd.f32 %v1184_v7, %v332_v30  ;;  %v355_v43 = vadd.f32 %v1184_v7, %v316_v34  ;;  %v317_v44 = vmul.f32 %v641_v35, %v1179_v1 }
  0x88   : > { %v386_v42 = vmax.f32 %v354_v33, 0.0  ;;  %v644_v45 = vunpack.c.l.bf16 %v687_v37  ;;  %v372_v47 = vadd.f32 %v1184_v7, %v333_v40  ;;  %v334_v48 = vmul.f32 %v676_v41, %v1179_v1 }
  0x89   : > { %445 = vxpose.xlu1.b32.cont [5/16] (narrow) %v397_v54, 8  ;;  %v403_v46 = vmax.f32 %v371_v39, 0.0  ;;  %v677_v49 = vunpack.c.h.bf16 %v695_v36  ;;  %v387_v50 = vmax.f32 %v355_v43, 0.0  ;;  %v356_v51 = vadd.f32 %v1184_v7, %v317_v44  ;;  %v696_v54 = vld [vmem:[%s1168_s9 + $0x78] sm:$0xff]  }
  0x8a   : > { %v318_v52 = vmul.f32 %v644_v45, %v1179_v1  ;;  %v645_v53 = vunpack.c.h.bf16 %v687_v37  ;;  %v404_v56 = vmax.f32 %v372_v47, 0.0  ;;  %v373_v57 = vadd.f32 %v1184_v7, %v334_v48 }
  0x8b   : > { %413 = vxpose.xlu0.b32.cont [5/16] (narrow) %v381_v58, 8  ;;  %v335_v58 = vmul.f32 %v677_v49, %v1179_v1  ;;  %v680_v59 = vunpack.c.l.bf16 %v696_v54  ;;  %v388_v60 = vmax.f32 %v356_v51, 0.0  ;;  %v648_v63 = vunpack.c.l.bf16 %v688_v55 }
  0x8c   : > { %v357_v61 = vadd.f32 %v1184_v7, %v318_v52  ;;  %v319_v62 = vmul.f32 %v645_v53, %v1179_v1  ;;  %v681_v4 = vunpack.c.h.bf16 %v696_v54  ;;  %v649_v9 = vunpack.c.h.bf16 %v688_v55 }
  0x8d   : > { %446 = vxpose.xlu1.b32.cont [6/16] (narrow) %v398_v0, 8  ;;  %v405_v0 = vmax.f32 %v373_v57, 0.0  ;;  %v374_v2 = vadd.f32 %v1184_v7, %v335_v58  ;;  %v336_v3 = vmul.f32 %v680_v59, %v1179_v1  ;;  %v320_v8 = vmul.f32 %v648_v63, %v1179_v1 }
  0x8e   : > { %v358_v6 = vadd.f32 %v1184_v7, %v319_v62  ;;  %v337_v12 = vmul.f32 %v681_v4, %v1179_v1  ;;  %v321_v15 = vmul.f32 %v649_v9, %v1179_v1 }
  0x8f   : > { %414 = vxpose.xlu0.b32.cont [6/16] (narrow) %v382_v5, 8  ;;  %v389_v5 = vmax.f32 %v357_v61, 0.0  ;;  %v375_v11 = vadd.f32 %v1184_v7, %v336_v3 }
  0x90   : > { %v390_v13 = vmax.f32 %v358_v6, 0.0  ;;  %v376_v17 = vadd.f32 %v1184_v7, %v337_v12  ;;  %v360_v19 = vadd.f32 %v1184_v7, %v321_v15 }
  0x91   : > { %447 = vxpose.xlu1.b32.cont [7/16] (narrow) %v399_v10, 8  ;;  %v406_v10 = vmax.f32 %v374_v2, 0.0  ;;  %v407_v16 = vmax.f32 %v375_v11, 0.0 }
  0x92   : > { %v392_v21 = vmax.f32 %v360_v19, 0.0 }
  0x93   : > { %415 = vxpose.xlu0.b32.cont [7/16] (narrow) %v383_v14, 8  ;;  %v359_v14 = vadd.f32 %v1184_v7, %v320_v8 }
  0x95   : > { %448 = vxpose.xlu1.b32.cont [8/16] (narrow) %v400_v20, 8  ;;  %v391_v18 = vmax.f32 %v359_v14, 0.0  ;;  %v408_v20 = vmax.f32 %v376_v17, 0.0 }
  0x97   : > { %416 = vxpose.xlu0.b32.cont [8/16] (narrow) %v384_v24, 8 }
  0x99   : > { %449 = vxpose.xlu1.b32.cont [9/16] (narrow) %v401_v28, 8 }
  0x9b   : > { %417 = vxpose.xlu0.b32.cont [9/16] (narrow) %v385_v32, 8 }
  0x9d   : > { %450 = vxpose.xlu1.b32.cont [10/16] (narrow) %v402_v38, 8 }
  0x9f   : > { %418 = vxpose.xlu0.b32.cont [10/16] (narrow) %v386_v42, 8 }
  0xa1   : > { %451 = vxpose.xlu1.b32.cont [11/16] (narrow) %v403_v46, 8 }
  0xa3   : > { %419 = vxpose.xlu0.b32.cont [11/16] (narrow) %v387_v50, 8 }
  0xa5   : > { %452 = vxpose.xlu1.b32.cont [12/16] (narrow) %v404_v56, 8 }
  0xa7   : > { %420 = vxpose.xlu0.b32.cont [12/16] (narrow) %v388_v60, 8 }
  0xa9   : > { %453 = vxpose.xlu1.b32.cont [13/16] (narrow) %v405_v0, 8 }
  0xab   : > { %421 = vxpose.xlu0.b32.cont [13/16] (narrow) %v389_v5, 8 }
  0xad   : > { %454 = vxpose.xlu1.b32.cont [14/16] (narrow) %v406_v10, 8 }
  0xaf   : > { %422 = vxpose.xlu0.b32.cont [14/16] (narrow) %v390_v13, 8 }
  0xb1   : > { %455 = vxpose.xlu1.b32.cont [15/16] (narrow) %v407_v16, 8 }
  0xb3   : > { %423 = vxpose.xlu0.b32.cont [15/16] (narrow) %v391_v18, 8 }
  0xb5   : > { %456 = vxpose.xlu1.b32.end [16/16] (narrow) %v408_v20, 8 }
  0xb7   : > { %424 = vxpose.xlu0.b32.end [16/16] (narrow) %v392_v21, 8 }
  0xf9   : > { %v457_v1 = vpop.trf.xlu1 }
  0xfa   : > { %474 = vst [vmem:[%s232_s23 + $0x8] sm:$0xff] %v457_v1 }
  0xfb   : > { %v425_v7 = vpop.trf.xlu0 }
  0xfc   : > { %473 = vst [vmem:[%s232_s23] sm:$0xff] %v425_v7 }
  0xfd   : > { %881 = shalt.err (!%p878_p9)
}
  0xfe   : > { %s882_s22 = scalar_lea.hbm %s1269_s19, 256  ;;  %s886_s7 = scalar_lea.hbm %s1319_s3, 512 }
  0xff   : > { %p883_p8 = scmp.ne.s32.totalorder %s1269_s19, %s882_s22  ;;  %p887_p7 = scmp.lt.u32.totalorder %s1269_s19, %s1319_s3 }
 0x100   : > { %p888_p12 = scmp.lt.u32.totalorder %s886_s7, %s882_s22  ;;  %p890_p5 = scmp.lt.u32.totalorder %s882_s22, %s1269_s19 }
 0x101   : > { %p884_p13 = pnand %p883_p8, %p1338_p10 }
 0x102   : > { %p889_p3 = por %p888_p12, %p887_p7 }
 0x103   : > { %p885_p4 = pneg %p884_p13 }
 0x104   : > { %p891_p11 = por %p890_p5, %p889_p3 }
 0x106   : > { %p892_p1 = pnand %p891_p11, %p885_p4 }
 0x108   : > { %895 = shalt.err (!%p892_p1)
}
 0x109   : > { %707 = dma.vmem_to_hbm [thread:$0]  (%p1338_p10), %s1264_s26, 256, %s1269_s19, %s476_s20  }
 0x10a PF: > { %s504_s21 = sand.u32 1, %s934_s12   ;;  %p1339_p0 = scmp.ne.s32.totalorder %s1330_s25, 0 }
 0x10b   : > { %p1340_p6 = scmp.ge.s32.totalorder %s954_s17, 2  ;;  %s505_s23 = scalar_lea.sflag [#allocation4], %s504_s21 }
 0x10d   : > { %p721_p2 = pnand %p1340_p6, %p1339_p0 }
 0x10f   : > { %929 = dma.done.wait (!%p721_p2), %s505_s23, 256  }
 0x110   : > { %931 = vsyncadd (!%p721_p2), %s505_s23, 4294967040  ;;  %s20_s17 = sadd.s32 1, %s954_s17   ;;  %s1341_s12 = smov %s938_s13 }
 0x111   : > { %p17_p9 = scmp.ge.s32.totalorder %s20_s17, 4   ;;  %s1342_s13 = smov %s942_s14 }
 0x112   : > { %s1343_s14 = smov %s1131_s28  ;;  %s1344_s15 = smov %s950_s16 }
 0x113   : > { %s1345_s16 = smov %s1347_s30  ;;  %19 = sbr.rel (!%p17_p9) target bundleno = 7 (0x7), region = 85 }
 0x11a   :  { %510 = vsyncpa [#allocation3], 1 }
 0x11b   :  { %512 = vsyncpa [#allocation3 + $0x1], 1 }
 0x11c   :  { %513 = vsyncpa [#allocation6], 1 }
 0x11d   :  { %514 = vsyncpa [#allocation4], 1 }
 0x11e   :  { %516 = vsyncpa [#allocation4 + $0x1], 1 }

// kernel: double_conv_ds.4
= control target key start
LH: loop header
LB: loop body
LE: loop exit
PB: predicated region body
PF: predicated region fallthrough
CT: control target
= control target key end

     0   :  { %s9005_s0 = inlined_call_operand.hbm [shape: bf16[2,16,16,8], index: 0, kind: input, shape index: {}, may-alias: {0,1,2}]   ;;  %s9006_s1 = inlined_call_operand.hbm [shape: bf16[2,16,16,8], index: 1, kind: input, shape index: {}, may-alias: {0,1,2}]   ;;  %s9007_s2 = inlined_call_operand.hbm [shape: bf16[2,16,16,8], index: 2, kind: input, shape index: {}, may-alias: {0,1,2}]   ;;  %s9008_s3 = inlined_call_operand.hbm [shape: f32[1,8], index: 3, kind: input, shape index: {}]   ;;  %s9009_s4 = inlined_call_operand.hbm [shape: f32[1,8], index: 4, kind: input, shape index: {}]   ;;  %s9010_s5 = inlined_call_operand.hbm [shape: bf16[72,8], index: 5, kind: input, shape index: {}]   ;;  %s9011_s6 = inlined_call_operand.hbm [shape: f32[1,8], index: 6, kind: input, shape index: {}]   ;;  %s9012_s7 = inlined_call_operand.hbm [shape: bf16[2,16,16,8], index: 7, kind: output, shape index: {0}]   ;;  %s9013_s8 = inlined_call_operand.hbm [shape: f32[2,1,1,8], index: 8, kind: output, shape index: {1}]   ;;  %s9014_s9 = inlined_call_operand.hbm [shape: f32[2,1,1,8], index: 9, kind: output, shape index: {2}]  }
   0x1   :  { %9042 = sst [smem:[#allocation33_spill]] %s9006_s1 }
   0x2   :  { %9043 = sst [smem:[#allocation34_spill]] %s9008_s3 }
   0x3   :  { %9044 = sst [smem:[#allocation35_spill]] %s9010_s5 }
   0x4   :  { %9045 = sst [smem:[#allocation36_spill]] %s9012_s7 }
   0x5   :  { %9046 = sst [smem:[#allocation37_spill]] %s9013_s8 }
   0x6   :  { %9047 = sst [smem:[#allocation38_spill]] %s9014_s9 }
   0x7   :  { %15 = vsyncpa [#allocation4], 0 }
   0x8   :  { %17 = vsyncpa [#allocation4 + $0x1], 0 }
   0x9   :  { %18 = vsyncpa [#allocation7], 0 }
   0xa   :  { %20 = vsyncpa [#allocation7 + $0x1], 0 }
   0xb   :  { %21 = vsyncpa [#allocation10], 0 }
   0xc   :  { %22 = vsyncpa [#allocation13], 0 }
   0xd   :  { %23 = vsyncpa [#allocation5], 0 }
   0xe   :  { %25 = vsyncpa [#allocation5 + $0x1], 0 }
   0xf   :  { %26 = vsyncpa [#allocation17], 0 }
  0x10   :  { %28 = vsyncpa [#allocation17 + $0x1], 0  ;;  %s7433_s30 = smov 0   ;;  %s7435_s10 = smov 0  }
  0x11   :  { %s7437_s11 = smov 0   ;;  %s7439_s12 = smov 0  }
  0x12   :  { %s7441_s13 = smov 0   ;;  %s7443_s14 = smov 0  }
  0x13 LB: > { %9048 = sst [smem:[#allocation25_spill]] %s7346_s30  ;;  %s7464_s15 = sadd.s32 4294967295, %s7366_s14   ;;  %s7366_s14 = sphi %s7443_s14, %s34_s14   ;;  %s7362_s13 = sphi %s7441_s13, %s9093_s13   ;;  %s7358_s12 = sphi %s7439_s12, %s9092_s12   ;;  %s7354_s11 = sphi %s7437_s11, %s9091_s11   ;;  %s7350_s10 = sphi %s7435_s10, %s9095_s10   ;;  %s7346_s30 = sphi %s7433_s30, %s9094_s30  }
  0x14   : > { %9049 = sst [smem:[#allocation26_spill]] %s7354_s11  ;;  %s9015_s16 = sadd.s32 4294967294, %s7366_s14  }
  0x15   : > { %9050 = sst [smem:[#allocation27_spill]] %s7362_s13  ;;  %p68_p0 = scmp.ne.s32.totalorder %s7350_s10, %s7346_s30 }
  0x16   : > { %9051 = sst [smem:[#allocation28_spill]] %s7366_s14  ;;  %p9016_p1 = scmp.eq.s32.totalorder %s7464_s15, 0 }
  0x17   : > { %p256_p3 = scmp.eq.s32.totalorder %s9015_s16, 1  ;;  %p5795_p5 = scmp.ge.s32.totalorder %s7366_s14, 1 }
  0x18   : > { %p7475_p4 = por %p9016_p1, %p68_p0  ;;  %p319_p7 = scmp.lt.s32.totalorder %s7366_s14, 3 }
  0x19   : > { %p7480_p6 = por %p256_p3, %p68_p0  ;;  %s7368_s20 = smov [#allocation9]  }
  0x1a   : > { %s9052_s17 = scalar_select %p7475_p4, 1, 0 }
  0x1b   : > { %s9053_s18 = scalar_select %p7480_p6, 1, 0 }
  0x1c   : > { %p7485_p8 = pnand %p5795_p5, %p319_p7  ;;  %s332_s21 = sshll.u32 %s7368_s20, 4  ;;  %s333_s21 = int_to_ptr.vmem [resolvable:$true] %s332_s21 }
  0x1d   : > { %9054 = sst [smem:[#allocation29_spill]] %s9053_s18  ;;  %s7369_s22 = smov [#allocation12]  }
  0x1e   : > { %s9055_s19 = scalar_select %p7485_p8, 1, 0 }
  0x1f   : > { %p6879_p10 = pneg %p7485_p8  ;;  %s353_s23 = sshll.u32 %s7369_s22, 4  ;;  %s7498_s23 = int_to_ptr.vmem [resolvable:$true] %s353_s23 }
  0x20   : > { %s9057_s3 = sld [smem:[#allocation34_spill]] }
  0x21   : > { %p7494_p11 = pnand %p6879_p10, %p9016_p1 }
  0x23   : > { %s9056_s24 = scalar_select %p7494_p11, 1, 0 }
  0x24   : > { %p7508_p13 = pneg %p7494_p11 }
  0x26   : > { %s7010_s27 = scalar_lea.hbm %s9057_s3, 16 }
  0x27   : > { %p7011_p12 = scmp.ne.s32.totalorder %s9057_s3, %s7010_s27  ;;  %p7017_p5 = scmp.lt.u32.totalorder %s7010_s27, %s9057_s3 }
  0x28   : > { %s9058_s20 = scalar_select %p7508_p13, 1, 0 }
  0x29   : > { %p7013_p0 = pnand %p7508_p13, %p7011_p12 }
  0x2b   : > { %p7014_p3 = pneg %p7013_p0 }
  0x2d   : > { %p7019_p7 = pnand %p7017_p5, %p7014_p3 }
  0x2f   : > { %7022 = shalt.err (!%p7019_p7)
}
  0x30   : > { %s7023_s25 = scalar_lea.vmem %s333_s21, 16  ;;  %s7030_s26 = scalar_lea.vmem %s333_s21, 32 }
  0x31   : > { %p7024_p10 = scmp.ne.s32.totalorder %s333_s21, %s7023_s25  ;;  %p7031_p2 = scmp.lt.s32.totalorder %s333_s21, %s333_s21 }
  0x32   : > { %p7032_p6 = scmp.lt.s32.totalorder %s7030_s26, %s7023_s25 }
  0x33   : > { %p7026_p9 = pnand %p7024_p10, %p7508_p13 }
  0x34   : > { %p7033_p4 = por %p7032_p6, %p7031_p2 }
  0x35   : > { %p7027_p1 = pneg %p7026_p9 }
  0x37   : > { %p7034_p8 = pnand %p7033_p4, %p7027_p1 }
  0x39   : > { %7037 = shalt.err (!%p7034_p8)
}
  0x3a   : > { %6882 = dma.hbm_to_vmem [thread:$0]  (!%p7494_p11), %s9057_s3, 16, %s333_s21, [#allocation10]  }
  0x3b   : > { %s9059_s5 = sld [smem:[#allocation35_spill]] }
  0x41   : > { %s7038_s22 = scalar_lea.hbm %s9059_s5, 576 }
  0x42   : > { %p7039_p9 = scmp.ne.s32.totalorder %s9059_s5, %s7038_s22  ;;  %p7045_p1 = scmp.lt.u32.totalorder %s7038_s22, %s9059_s5 }
  0x44   : > { %p7041_p12 = pnand %p7039_p9, %p7508_p13 }
  0x46   : > { %p7042_p2 = pneg %p7041_p12 }
  0x48   : > { %p7047_p4 = pnand %p7045_p1, %p7042_p2 }
  0x4a   : > { %7050 = shalt.err (!%p7047_p4)
}
  0x4b   : > { %s7051_s21 = scalar_lea.vmem %s7498_s23, 576  ;;  %p7059_p3 = scmp.lt.s32.totalorder %s7498_s23, %s7498_s23 }
  0x4c   : > { %p7052_p6 = scmp.ne.s32.totalorder %s7498_s23, %s7051_s21  ;;  %p7060_p5 = scmp.lt.s32.totalorder %s7051_s21, %s7051_s21 }
  0x4e   : > { %p7054_p8 = pnand %p7052_p6, %p7508_p13  ;;  %p7061_p7 = por %p7060_p5, %p7059_p3 }
  0x50   : > { %p7055_p0 = pneg %p7054_p8 }
  0x52   : > { %p7062_p10 = pnand %p7061_p7, %p7055_p0 }
  0x54   : > { %7065 = shalt.err (!%p7062_p10)
}
  0x55   : > { %s9021_s30 = smov 64   ;;  %s9023_s18 = smov 4  }
  0x56   : > { %6888 = dma.hbm_to_vmem [thread:$0]  (!%p7494_p11), %s9059_s5, 576, %s7498_s23, [#allocation13], %s9021_s30, %s9021_s30, %s9023_s18  }
  0x57   : > { %s46_s16 = sadd.s32 1, %s7362_s13  ;;  %s55_s27 = sadd.s32 1, %s7354_s11 }
  0x58   : > { %p48_p9 = scmp.ge.s32.totalorder %s46_s16, 2  ;;  %p62_p12 = scmp.ne.s32.totalorder %s7354_s11, %s7350_s10 }
  0x59   : > { %p63_p2 = scmp.eq.s32.totalorder %s7366_s14, 0  ;;  %p6916_p1 = scmp.lt.s32.totalorder %s7366_s14, 2 }
  0x5a   : > { %s9097_s16 = smov (%p48_p9, %s46_s16), 0  ;;  %p9061_p6 = scmp.eq.s32.totalorder %s7464_s15, 1 }
  0x5b   : > { %9060 = sst [smem:[#allocation30_spill]] %s9097_s16  ;;  %p64_p4 = por %p63_p2, %p62_p12 }
  0x5c   : > { %p7560_p8 = por %p9061_p6, %p62_p12  ;;  %s50_s25 = ssub.s32 %s7362_s13, %s9097_s16 }
  0x5d   : > { %s7567_s26 = sand.u32 1, %s7354_s11   ;;  %p53_p0 = scmp.eq.s32.totalorder %s50_s25, 0 }
  0x5e   : > { %s9062_s22 = scalar_select %p7560_p8, 1, 0 }
  0x5f   : > { %s7570_s23 = sshll.u32 %s7362_s13, 11  ;;  %p7572_p3 = pnand %p6916_p1, %p64_p4 }
  0x60   : > { %9063 = sst [smem:[#allocation31_spill]] %s9062_s22  ;;  %s402_s28 = sand.u32 1, %s7366_s14  }
  0x61   : > { %s9064_s21 = scalar_select %p7572_p3, 1, 0 }
  0x62   : > { %s7578_s29 = scalar_select %p53_p0, %s7354_s11, %s55_s27  }
  0x63   : > { %s5804_s30 = sshll.u32 %s7567_s26, 3  ;;  %s9066_s1 = sld [smem:[#allocation33_spill]] }
  0x64   : > { %9065 = sst [smem:[#allocation32_spill]] %s7578_s29  ;;  %s406_s25 = scalar_lea.vmem [#allocation6], %s5804_s30 }
  0x65   : > { %s419_s16 = sshll.u32 %s406_s25, 4  ;;  %s433_s13 = scalar_lea.vmem [#allocation8], %s5804_s30  ;;  %s7587_s16 = int_to_ptr.vmem [resolvable:$true] %s419_s16 }
  0x66   : > { %s446_s9 = sshll.u32 %s433_s13, 4  ;;  %s7591_s27 = scalar_lea.sflag [#allocation7], %s402_s28  ;;  %s7589_s9 = int_to_ptr.vmem [resolvable:$true] %s446_s9 }
  0x67   : > { %p7597_p7 = pneg %p7572_p3 }
  0x69   : > { %s7585_s5 = scalar_lea.hbm %s9066_s1, %s7570_s23  ;;  %s7071_s13 = scalar_lea.hbm %s9066_s1, 4096 }
  0x6a   : > { %s7066_s29 = scalar_lea.hbm %s7585_s5, 128  ;;  %p7072_p12 = scmp.lt.u32.totalorder %s7585_s5, %s9066_s1 }
  0x6b   : > { %p7067_p5 = scmp.ne.s32.totalorder %s7585_s5, %s7066_s29  ;;  %p7073_p2 = scmp.lt.u32.totalorder %s7071_s13, %s7066_s29 }
  0x6c   : > { %p7075_p4 = scmp.lt.u32.totalorder %s7066_s29, %s7585_s5 }
  0x6d   : > { %p7069_p10 = pnand %p7597_p7, %p7067_p5  ;;  %p7074_p1 = por %p7073_p2, %p7072_p12 }
  0x6f   : > { %p7070_p9 = pneg %p7069_p10  ;;  %p7076_p6 = por %p7075_p4, %p7074_p1 }
  0x71   : > { %p7077_p0 = pnand %p7076_p6, %p7070_p9 }
  0x73   : > { %7080 = shalt.err (!%p7077_p0)
}
  0x74   : > { %s7081_s28 = scalar_lea.vmem %s7587_s16, 128  ;;  %s7372_s18 = smov [#allocation6]  }
  0x75   : > { %p7082_p5 = scmp.ne.s32.totalorder %s7587_s16, %s7081_s28  ;;  %s7086_s30 = sshll.u32 %s7372_s18, 4  ;;  %s7087_s30 = int_to_ptr.vmem [resolvable:$false] %s7086_s30 }
  0x76   : > { %s7088_s11 = scalar_lea.vmem %s7087_s30, 256  ;;  %p7089_p11 = scmp.lt.s32.totalorder %s7587_s16, %s7087_s30 }
  0x77   : > { %p7084_p10 = pnand %p7082_p5, %p7597_p7  ;;  %p7090_p13 = scmp.lt.s32.totalorder %s7088_s11, %s7081_s28 }
  0x79   : > { %p7085_p8 = pneg %p7084_p10  ;;  %p7091_p12 = por %p7090_p13, %p7089_p11 }
  0x7b   : > { %p7092_p2 = pnand %p7091_p12, %p7085_p8 }
  0x7d   : > { %7095 = shalt.err (!%p7092_p2)
}
  0x7e   : > { %s9068_s29 = smov 4   ;;  %s9069_s13 = smov 64  }
  0x7f   : > { %6898 = dma.hbm_to_vmem [thread:$0]  (!%p7572_p3), %s7585_s5, 128, %s7587_s16, %s7591_s27, %s9069_s13, %s9069_s13, %s9068_s29  }
  0x80   : > { %s7373_s25 = smov [#allocation11]   ;;  %s7374_s18 = smov [#allocation14]  }
  0x81   : > { %s343_s1 = sshll.u32 %s7373_s25, 4  ;;  %s367_s14 = sshll.u32 %s7374_s18, 4  ;;  %s344_s1 = int_to_ptr.vmem [resolvable:$true] %s343_s1  ;;  %s7624_s14 = int_to_ptr.vmem [resolvable:$true] %s367_s14 }
  0x82   : > { %s7096_s11 = scalar_lea.hbm %s9009_s4, 16  ;;  %p9070_p13 = scmp.ne.s32.totalorder %s9058_s20, 0 }
  0x83   : > { %p7097_p11 = scmp.ne.s32.totalorder %s9009_s4, %s7096_s11  ;;  %p7103_p1 = scmp.lt.u32.totalorder %s7096_s11, %s9009_s4 }
  0x85   : > { %p7099_p8 = pnand %p7097_p11, %p9070_p13 }
  0x87   : > { %p7100_p9 = pneg %p7099_p8 }
  0x89   : > { %p7105_p4 = pnand %p7103_p1, %p7100_p9 }
  0x8b   : > { %7108 = shalt.err (!%p7105_p4)
}
  0x8c   : > { %s7109_s16 = scalar_lea.vmem %s344_s1, 16  ;;  %s7116_s25 = scalar_lea.vmem %s344_s1, 32 }
  0x8d   : > { %p7110_p6 = scmp.ne.s32.totalorder %s344_s1, %s7109_s16  ;;  %p7117_p10 = scmp.lt.s32.totalorder %s344_s1, %s344_s1 }
  0x8e   : > { %p7118_p12 = scmp.lt.s32.totalorder %s7116_s25, %s7109_s16 }
  0x8f   : > { %p7112_p0 = pnand %p7110_p6, %p9070_p13 }
  0x90   : > { %p7119_p2 = por %p7118_p12, %p7117_p10 }
  0x91   : > { %p7113_p5 = pneg %p7112_p0 }
  0x93   : > { %p7120_p3 = pnand %p7119_p2, %p7113_p5 }
  0x95   : > { %7123 = shalt.err (!%p7120_p3)
}
  0x96   : > { %p9071_p11 = scmp.ne.s32.totalorder %s9056_s24, 0  ;;  %s7124_s28 = scalar_lea.hbm %s9011_s6, 16 }
  0x97   : > { %p7125_p8 = scmp.ne.s32.totalorder %s9011_s6, %s7124_s28  ;;  %p7131_p3 = scmp.lt.u32.totalorder %s7124_s28, %s9011_s6 }
  0x98   : > { %6885 = dma.hbm_to_vmem [thread:$0]  (!%p9071_p11), %s9009_s4, 16, %s344_s1, [#allocation10]  }
  0x99   : > { %p7127_p9 = pnand %p7125_p8, %p9070_p13 }
  0x9b   : > { %p7128_p1 = pneg %p7127_p9 }
  0x9d   : > { %p7133_p4 = pnand %p7131_p3, %p7128_p1 }
  0x9f   : > { %7136 = shalt.err (!%p7133_p4)
}
  0xa0   : > { %s7137_s1 = scalar_lea.vmem %s7624_s14, 16  ;;  %s7144_s25 = scalar_lea.vmem %s7624_s14, 32 }
  0xa1   : > { %p7138_p6 = scmp.ne.s32.totalorder %s7624_s14, %s7137_s1  ;;  %p7145_p10 = scmp.lt.s32.totalorder %s7624_s14, %s7624_s14 }
  0xa2   : > { %p7146_p12 = scmp.lt.s32.totalorder %s7144_s25, %s7137_s1 }
  0xa3   : > { %p7140_p0 = pnand %p7138_p6, %p9070_p13 }
  0xa4   : > { %p7147_p2 = por %p7146_p12, %p7145_p10 }
  0xa5   : > { %p7141_p5 = pneg %p7140_p0 }
  0xa7   : > { %p7148_p8 = pnand %p7147_p2, %p7141_p5 }
  0xa9   : > { %7151 = shalt.err (!%p7148_p8)
}
  0xaa   : > { %6891 = dma.hbm_to_vmem [thread:$0]  (!%p9071_p11), %s9011_s6, 16, %s7624_s14, [#allocation13]  }
  0xab   : > { %s5801_s20 = sshll.u32 %s7567_s26, 7  ;;  %s7673_s28 = scalar_lea.hbm %s9005_s0, %s7570_s23 }
  0xac   : > { %s382_s24 = scalar_lea.vmem [#allocation3], %s5801_s20  ;;  %s6010_s11 = sadd.s32 1920, %s7570_s23 }
  0xad   : > { %s392_s30 = sshll.u32 %s382_s24, 4  ;;  %s7681_s1 = scalar_lea.hbm %s9007_s2, %s6010_s11  ;;  %s7676_s30 = int_to_ptr.vmem [resolvable:$true] %s392_s30 }
  0xae   : > { %s379_s14 = scalar_lea.sflag [#allocation4], %s7567_s26  ;;  %s7152_s25 = scalar_lea.hbm %s7673_s28, 2048 }
  0xaf   : > { %p7153_p13 = scmp.ne.s32.totalorder %s7673_s28, %s7152_s25  ;;  %s7157_s7 = scalar_lea.hbm %s9005_s0, 4096 }
  0xb0   : > { %p7158_p1 = scmp.lt.u32.totalorder %s7673_s28, %s9005_s0  ;;  %p7159_p3 = scmp.lt.u32.totalorder %s7157_s7, %s7152_s25 }
  0xb1   : > { %p7155_p11 = pnand %p7153_p13, %p7597_p7  ;;  %p7161_p6 = scmp.lt.u32.totalorder %s7152_s25, %s7673_s28 }
  0xb2   : > { %p7160_p4 = por %p7159_p3, %p7158_p1 }
  0xb3   : > { %p7156_p9 = pneg %p7155_p11 }
  0xb4   : > { %p7162_p0 = por %p7161_p6, %p7160_p4 }
  0xb6   : > { %p7163_p5 = pnand %p7162_p0, %p7156_p9 }
  0xb8   : > { %7166 = shalt.err (!%p7163_p5)
}
  0xb9   : > { %s7167_s23 = scalar_lea.vmem %s7676_s30, 2048  ;;  %s7375_s24 = smov [#allocation3]  }
  0xba   : > { %p7168_p10 = scmp.ne.s32.totalorder %s7676_s30, %s7167_s23  ;;  %s7172_s11 = sshll.u32 %s7375_s24, 4  ;;  %s7173_s11 = int_to_ptr.vmem [resolvable:$false] %s7172_s11 }
  0xbb   : > { %s7174_s5 = scalar_lea.vmem %s7173_s11, 4096  ;;  %p7175_p8 = scmp.lt.s32.totalorder %s7676_s30, %s7173_s11 }
  0xbc   : > { %p7170_p12 = pnand %p7168_p10, %p7597_p7  ;;  %p7176_p13 = scmp.lt.s32.totalorder %s7174_s5, %s7167_s23 }
  0xbe   : > { %p7171_p2 = pneg %p7170_p12  ;;  %p7177_p11 = por %p7176_p13, %p7175_p8 }
  0xc0   : > { %p7178_p1 = pnand %p7177_p11, %p7171_p2 }
  0xc2   : > { %7181 = shalt.err (!%p7178_p1)
}
  0xc3   : > { %p9072_p9 = scmp.ne.s32.totalorder %s9064_s21, 0  ;;  %s7182_s16 = scalar_lea.hbm %s7681_s1, 128 }
  0xc4   : > { %p7183_p3 = scmp.ne.s32.totalorder %s7681_s1, %s7182_s16  ;;  %s7187_s22 = scalar_lea.hbm %s9007_s2, 4096 }
  0xc5   : > { %6895 = dma.hbm_to_vmem [thread:$0]  (!%p9072_p9), %s7673_s28, 2048, %s7676_s30, %s379_s14, %s9069_s13, %s9069_s13, %s9068_s29  }
  0xc6   : > { %p7185_p4 = pnand %p7183_p3, %p7597_p7  ;;  %p7188_p0 = scmp.lt.u32.totalorder %s7681_s1, %s9007_s2 }
  0xc7   : > { %p7189_p5 = scmp.lt.u32.totalorder %s7187_s22, %s7182_s16  ;;  %p7191_p12 = scmp.lt.u32.totalorder %s7182_s16, %s7681_s1 }
  0xc8   : > { %p7186_p6 = pneg %p7185_p4 }
  0xc9   : > { %p7190_p10 = por %p7189_p5, %p7188_p0 }
  0xcb   : > { %p7192_p2 = por %p7191_p12, %p7190_p10 }
  0xcd   : > { %p7193_p8 = pnand %p7192_p2, %p7186_p6 }
  0xcf   : > { %7196 = shalt.err (!%p7193_p8)
}
  0xd0   : > { %s7197_s26 = scalar_lea.vmem %s7589_s9, 128  ;;  %s7376_s28 = smov [#allocation8]  }
  0xd1   : > { %p7198_p13 = scmp.ne.s32.totalorder %s7589_s9, %s7197_s26  ;;  %s7202_s30 = sshll.u32 %s7376_s28, 4  ;;  %s7203_s30 = int_to_ptr.vmem [resolvable:$false] %s7202_s30 }
  0xd2   : > { %s7204_s14 = scalar_lea.vmem %s7203_s30, 256  ;;  %p7205_p3 = scmp.lt.s32.totalorder %s7589_s9, %s7203_s30 }
  0xd3   : > { %p7200_p11 = pnand %p7198_p13, %p7597_p7  ;;  %p7206_p4 = scmp.lt.s32.totalorder %s7204_s14, %s7197_s26 }
  0xd5   : > { %p7201_p1 = pneg %p7200_p11  ;;  %p7207_p0 = por %p7206_p4, %p7205_p3 }
  0xd7   : > { %p7208_p5 = pnand %p7207_p0, %p7201_p1 }
  0xd9   : > { %7211 = shalt.err (!%p7208_p5)
}
  0xda   : > { %6901 = dma.hbm_to_vmem [thread:$0]  (!%p9072_p9), %s7681_s1, 128, %s7589_s9, %s7591_s27, %s9069_s13, %s9069_s13, %s9068_s29  }
  0xdb   : > { %p9073_p7 = scmp.ne.s32.totalorder %s9055_s19, 0 }
  0xdc   : > { %s7738_s3 = sand.u32 (!%p9073_p7), 1, %s7350_s10   ;;  %p9074_p6 = scmp.ne.s32.totalorder (!%p9073_p7), %s9052_s17, 0 }
  0xdd   : > { %458 = sbr.rel (%p9073_p7) target bundleno = 889 (0x379), region = 48  ;;  %s5811_s18 = sshll.u32 (!%p9073_p7), %s7738_s3, 7 }
  0xde   : > { %s461_s23 = scalar_lea.sflag (!%p9073_p7), [#allocation4], %s7738_s3  ;;  %s7744_s21 = scalar_lea.vmem (!%p9073_p7), [#allocation3], %s5811_s18 }
  0xe4   : > { %7321 = dma.done.wait (%p9074_p6), %s461_s23, 2048  }
  0xe5   : > { %7323 = vsyncadd (%p9074_p6), %s461_s23, 4294965248  ;;  %s469_s9 = sand.u32 1, %s7464_s15  }
  0xe6   : > { %s470_s19 = scalar_lea.sflag [#allocation7], %s469_s9 }
  0xe7   : > { %7325 = dma.done.wait (%p9074_p6), %s470_s19, 256  }
  0xe8   : > { %7327 = vsyncadd (%p9074_p6), %s470_s19, 4294967040  ;;  %p9075_p9 = scmp.eq.s32.totalorder %s7464_s15, 0 }
  0xea   : > { %7329 = dma.done.wait (%p9075_p9), [#allocation10], 32   ;;  %p9076_p10 = pmov %p9075_p9 }
  0xeb   : > { %p9077_p12 = pmov %p9075_p9 }
  0xec   : > { %7331 = vsyncadd (%p9076_p10), [#allocation10], 4294967264 }
  0xed   : > { %7333 = dma.done.wait (%p9077_p12), [#allocation13], 592   ;;  %p9078_p2 = pmov %p9075_p9 }
  0xee   : > { %vm562_vm0 = vcmask 60416   ;;  %vm581_vm1 = vcmask 64516   ;;  %v7377_v0 = vmov 0   ;;  %vm1282_vm2 = vcmask 1043456   ;;  %v1331_v2 = vld [vmem:[#allocation12 + $0x4] sm:$0xf] }
  0xef   : > { %7335 = vsyncadd (%p9078_p2), [#allocation13], 4294966704  ;;  %v647_v1 = vrot.slane %v7377_v0, 4  ;;  %563 = vst.msk [vmem:[#allocation2] sm:$0xf] %vm562_vm0, %v7377_v0  ;;  %v6045_v4 = vld [vmem:[%s7744_s21] sm:$0xff]   ;;  %6841 = vmatprep.subr.msk.bf16.mxu1 %vm1282_vm2, %v1331_v2 }
  0xf0   : > { %564 = vst.msk [vmem:[#allocation2 + $0x10] sm:$0xf] %vm562_vm0, %v7377_v0  ;;  %565 = vst.msk [vmem:[#allocation2 + $0x20] sm:$0xf] %vm562_vm0, %v7377_v0  ;;  %v2937_v3 = vld [vmem:[#allocation12 + $0x10] sm:$0xf]  ;;  %v6046_v7 = vunpack.c.l.bf16 %v6045_v4  ;;  %v6047_v8 = vunpack.c.h.bf16 %v6045_v4 }
  0xf1   : > { %566 = vst.msk [vmem:[#allocation2 + $0x30] sm:$0xf] %vm562_vm0, %v7377_v0  ;;  %567 = vst.msk [vmem:[#allocation2 + $0x40] sm:$0xf] %vm562_vm0, %v7377_v0  ;;  %6845 = vmatprep.subr.msk.bf16.mxu0 %vm1282_vm2, %v2937_v3  ;;  %v1383_v5 = vsel %vm1282_vm2, %v1331_v2, 0  ;;  %v7810_v6 = vsel %vm1282_vm2, %v2937_v3, 0 }
  0xf2   : > { %568 = vst.msk [vmem:[#allocation2 + $0x50] sm:$0xf] %vm562_vm0, %v7377_v0  ;;  %569 = vst.msk [vmem:[#allocation2 + $0x60] sm:$0xf] %vm562_vm0, %v7377_v0  ;;  %v7812_v9 = vld [vmem:[#allocation9] ss:$0 sm:$0xff]  ;;  %6278 = vmatpush3.bf16.msra.mxu1 %v1383_v5  ;;  %6414 = vmatpush3.bf16.msra.mxu0 %v7810_v6 }
  0xf3   : > { %570 = vst.msk [vmem:[#allocation2 + $0x70] sm:$0xf] %vm562_vm0, %v7377_v0  ;;  %571 = vst.msk [vmem:[#allocation2 + $0x80] sm:$0xf] %vm562_vm0, %v7377_v0  ;;  %v7814_v10 = vld [vmem:[#allocation11] ss:$0 sm:$0xff]  ;;  %v728_v16 = vmul.f32 %v6046_v7, %v7812_v9  ;;  %v729_v17 = vmul.f32 %v6047_v8, %v7812_v9 }
  0xf4   : > { %572 = vst.msk [vmem:[#allocation2 + $0x90] sm:$0xf] %vm562_vm0, %v7377_v0  ;;  %573 = vst.msk [vmem:[#allocation2 + $0xa0] sm:$0xf] %vm562_vm0, %v7377_v0  ;;  %vm1332_vm3 = vcmask 64512   ;;  %v6109_v13 = vld [vmem:[%s7744_s21 + $0x8] sm:$0xff]  }
  0xf5   : > { %574 = vst.msk [vmem:[#allocation2 + $0xb0] sm:$0xf] %vm562_vm0, %v7377_v0  ;;  %575 = vst.msk [vmem:[#allocation2 + $0xc0] sm:$0xf] %vm562_vm0, %v7377_v0  ;;  %v1233_v11 = vld [vmem:[#allocation12] sm:$0xf]  ;;  %v6050_v19 = vunpack.c.l.bf16 %v6109_v13  ;;  %v767_v27 = vadd.f32 %v7814_v10, %v728_v16  ;;  %v768_v28 = vadd.f32 %v7814_v10, %v729_v17  ;;  %v6051_v31 = vunpack.c.h.bf16 %v6109_v13 }
  0xf6   : > { %576 = vst.msk [vmem:[#allocation2 + $0xd0] sm:$0xf] %vm562_vm0, %v7377_v0  ;;  %577 = vst.msk [vmem:[#allocation2 + $0xe0] sm:$0xf] %vm562_vm0, %v7377_v0  ;;  %v3470_v12 = vld [vmem:[#allocation12 + $0x14] sm:$0xf]  ;;  %6842 = vmatprep.subr.msk.bf16.mxu1 %vm1282_vm2, %v1233_v11 }
  0xf7   : > { %578 = vst.msk [vmem:[#allocation2 + $0xf0] sm:$0xf] %vm562_vm0, %v7377_v0  ;;  %579 = vst.msk [vmem:[#allocation2 + $0x100] sm:$0xf] %vm562_vm0, %v7377_v0  ;;  %6847 = vmatprep.subr.msk.bf16.mxu0 %vm1282_vm2, %v3470_v12  ;;  %v7827_v18 = vsel %vm1282_vm2, %v1233_v11, 0  ;;  %v6110_v24 = vld [vmem:[%s7744_s21 + $0x10] sm:$0xff]   ;;  %v730_v32 = vmul.f32 %v6050_v19, %v7812_v9  ;;  %v731_v39 = vmul.f32 %v6051_v31, %v7812_v9 }
  0xf8   : > { %580 = vst.msk [vmem:[#allocation2 + $0x110] sm:$0xf] %vm562_vm0, %v7377_v0  ;;  %650 = vst.msk [vmem:[#allocation2 + $0x8] sm:$0xf] %vm562_vm0, %v647_v1  ;;  %v6111_v29 = vld [vmem:[%s7744_s21 + $0x18] sm:$0xff]   ;;  %v7842_v33 = vsel %vm1282_vm2, %v3470_v12, 0  ;;  %v6054_v37 = vunpack.c.l.bf16 %v6110_v24  ;;  %v6055_v38 = vunpack.c.h.bf16 %v6110_v24 }
  0xf9   : > { %582 = vst.msk [vmem:[#allocation2 + $0x8] sm:$0xf0] %vm581_vm1, %v7377_v0  ;;  %583 = vst.msk [vmem:[#allocation2 + $0x18] sm:$0xf0] %vm581_vm1, %v7377_v0  ;;  %v6112_v34 = vld [vmem:[%s7744_s21 + $0x20] sm:$0xff]   ;;  %v799_v35 = vmax.f32 %v767_v27, 0.0  ;;  %v769_v40 = vadd.f32 %v7814_v10, %v730_v32  ;;  %v6058_v41 = vunpack.c.l.bf16 %v6111_v29  ;;  %v6059_v42 = vunpack.c.h.bf16 %v6111_v29 }
  0xfa   : > { %584 = vst.msk [vmem:[#allocation2 + $0x28] sm:$0xf0] %vm581_vm1, %v7377_v0  ;;  %585 = vst.msk [vmem:[#allocation2 + $0x38] sm:$0xf0] %vm581_vm1, %v7377_v0  ;;  %v800_v36 = vmax.f32 %v768_v28, 0.0  ;;  %v732_v44 = vmul.f32 %v6054_v37, %v7812_v9  ;;  %v733_v45 = vmul.f32 %v6055_v38, %v7812_v9  ;;  %v6062_v46 = vunpack.c.l.bf16 %v6112_v34  ;;  %v6113_v51 = vld [vmem:[%s7744_s21 + $0x28] sm:$0xff]  }
  0xfb   : > { %586 = vst.msk [vmem:[#allocation2 + $0x48] sm:$0xf0] %vm581_vm1, %v7377_v0  ;;  %587 = vst.msk [vmem:[#allocation2 + $0x58] sm:$0xf0] %vm581_vm1, %v7377_v0  ;;  %v770_v47 = vadd.f32 %v7814_v10, %v731_v39  ;;  %v801_v48 = vmax.f32 %v769_v40, 0.0  ;;  %v734_v49 = vmul.f32 %v6058_v41, %v7812_v9  ;;  %v735_v50 = vmul.f32 %v6059_v42, %v7812_v9  ;;  %v6115_v12 = vld [vmem:[%s7744_s21 + $0x38] sm:$0xff]  }
  0xfc   : > { %588 = vst.msk [vmem:[#allocation2 + $0x68] sm:$0xf0] %vm581_vm1, %v7377_v0  ;;  %589 = vst.msk [vmem:[#allocation2 + $0x78] sm:$0xf0] %vm581_vm1, %v7377_v0  ;;  %v831_v43 = vpack.c.bf16 %v800_v36, %v799_v35  ;;  %v771_v53 = vadd.f32 %v7814_v10, %v732_v44  ;;  %v772_v54 = vadd.f32 %v7814_v10, %v733_v45  ;;  %v6063_v55 = vunpack.c.h.bf16 %v6112_v34  ;;  %v7872_v28 = vld [vmem:[%s7744_s21 + $0x40] sm:$0xff]   ;;  %s8703_s17 = scalar_lea.vmem [#allocation15], %s5811_s18 }
  0xfd   : > { %590 = vst.msk [vmem:[#allocation2 + $0x88] sm:$0xf0] %vm581_vm1, %v7377_v0  ;;  %591 = vst.msk [vmem:[#allocation2 + $0x98] sm:$0xf0] %vm581_vm1, %v7377_v0  ;;  %v802_v56 = vmax.f32 %v770_v47, 0.0  ;;  %v773_v57 = vadd.f32 %v7814_v10, %v734_v49  ;;  %v774_v58 = vadd.f32 %v7814_v10, %v735_v50  ;;  %v736_v59 = vmul.f32 %v6062_v46, %v7812_v9  ;;  %s6043_s27 = sshll.u32 %s7358_s12, 11 }
  0xfe   : > { %592 = vst.msk [vmem:[#allocation2 + $0xa8] sm:$0xf0] %vm581_vm1, %v7377_v0  ;;  %593 = vst.msk [vmem:[#allocation2 + $0xb8] sm:$0xf0] %vm581_vm1, %v7377_v0  ;;  %v863_v52 = vrot.slane %v831_v43, 4  ;;  %v803_v60 = vmax.f32 %v771_v53, 0.0  ;;  %v737_v62 = vmul.f32 %v6063_v55, %v7812_v9  ;;  %v6066_v63 = vunpack.c.l.bf16 %v6113_v51 }
  0xff   : > { %594 = vst.msk [vmem:[#allocation2 + $0xc8] sm:$0xf0] %vm581_vm1, %v7377_v0  ;;  %595 = vst.msk [vmem:[#allocation2 + $0xd8] sm:$0xf0] %vm581_vm1, %v7377_v0  ;;  %v7818_v14 = vld [vmem:[#allocation2 + $0x8] sm:$0xf]  ;;  %v775_v4 = vadd.f32 %v7814_v10, %v736_v59  ;;  %v6067_v8 = vunpack.c.h.bf16 %v6113_v51  ;;  %v6074_v32 = vunpack.c.l.bf16 %v6115_v12  ;;  %v6075_v37 = vunpack.c.h.bf16 %v6115_v12 }
 0x100   : > { %596 = vst.msk [vmem:[#allocation2 + $0xe8] sm:$0xf0] %vm581_vm1, %v7377_v0  ;;  %597 = vst.msk [vmem:[#allocation2 + $0xf8] sm:$0xf0] %vm581_vm1, %v7377_v0  ;;  %v970_v20 = vshrl.u32 %v7818_v14, 16  ;;  %v973_v21 = vshll.u32 %v7818_v14, 16  ;;  %v776_v7 = vadd.f32 %v7814_v10, %v737_v62  ;;  %v738_v11 = vmul.f32 %v6066_v63, %v7812_v9 }
 0x101   : > { %598 = vst.msk [vmem:[#allocation2 + $0x108] sm:$0xf0] %vm581_vm1, %v7377_v0  ;;  %599 = vst.msk [vmem:[#allocation2 + $0x118] sm:$0xf0] %vm581_vm1, %v7377_v0  ;;  %v1284_v23 = vrot.slane %v7818_v14, 4  ;;  %v804_v61 = vmax.f32 %v772_v54, 0.0  ;;  %v739_v24 = vmul.f32 %v6067_v8, %v7812_v9  ;;  %v7892_v43 = vmul.f32 %v6074_v32, %v7812_v9 }
 0x102   : > { %649 = vst.msk [vmem:[#allocation2] sm:$0xf0] %vm581_vm1, %v647_v1  ;;  %655 = vst.msk [vmem:[#allocation2 + $0x110] sm:$0xf0] %vm581_vm1, %v647_v1  ;;  %v6114_v0 = vld [vmem:[%s7744_s21 + $0x30] sm:$0xff]   ;;  %v805_v2 = vmax.f32 %v773_v57, 0.0  ;;  %v7869_v27 = vadd.f32 %v7814_v10, %v738_v11  ;;  %v6078_v44 = vunpack.c.l.bf16 %v7872_v28 }
 0x103   : > { %656 = vst.msk [vmem:[#allocation2 + $0x118] sm:$0xf] %vm562_vm0, %v647_v1  ;;  %897 = vst.msk [vmem:[#allocation2 + $0x18] sm:$0xf] %vm562_vm0, %v863_v52  ;;  %v832_v1 = vpack.c.bf16 %v802_v56, %v801_v48  ;;  %v806_v3 = vmax.f32 %v774_v58, 0.0  ;;  %v833_v5 = vpack.c.bf16 %v804_v61, %v803_v60  ;;  %v807_v17 = vmax.f32 %v775_v4, 0.0 }
 0x104   : > { %896 = vst.msk [vmem:[#allocation2 + $0x10] sm:$0xf0] %vm581_vm1, %v863_v52  ;;  %v6070_v19 = vunpack.c.l.bf16 %v6114_v0  ;;  %v7880_v35 = vadd.f32 %v7814_v10, %v739_v24  ;;  %v809_v36 = vmax.f32 %v7869_v27, 0.0  ;;  %v7905_v58 = vld [vmem:[#allocation12 + $0x8] sm:$0xf]  ;;  %v743_v4 = vmul.f32 %v6075_v37, %v7812_v9  ;;  %s5536_s29 = sshll.u32 %s8703_s17, 4  ;;  %s8872_s29 = int_to_ptr.vmem [resolvable:$true] %s5536_s29 }
 0x105   : > { %v864_v13 = vrot.slane %v832_v1, 4  ;;  %v834_v16 = vpack.c.bf16 %v806_v3, %v805_v2  ;;  %vm1774_vm4 = vsmask.f32 3328  ;;  %vm960_vm5 = vsmask.f32 4352  ;;  %s9079_s24 = sld [smem:[#allocation36_spill]] }
 0x106   : > { %v740_v31 = vmul.f32 %v6070_v19, %v7812_v9  ;;  %s9080_s5 = sld [smem:[#allocation31_spill]]  ;;  %s5512_s16 = scalar_lea.sflag [#allocation5], %s7738_s3 }
 0x107   : > { %898 = vst.msk [vmem:[#allocation2 + $0x20] sm:$0xf0] %vm581_vm1, %v864_v13  ;;  %v866_v29 = vrot.slane %v834_v16, 4  ;;  %s7212_s25 = scalar_lea.vmem %s8872_s29, 2048  ;;  %s7378_s8 = smov [#allocation15]  }
 0x108   : > { %899 = vst.msk [vmem:[#allocation2 + $0x28] sm:$0xf] %vm562_vm0, %v864_v13  ;;  %v7889_v42 = vadd.f32 %v7814_v10, %v740_v31  ;;  %v810_v31 = vmax.f32 %v7880_v35, 0.0  ;;  %p7213_p8 = scmp.ne.s32.totalorder %s8872_s29, %s7212_s25  ;;  %s7216_s22 = sshll.u32 %s7378_s8, 4  ;;  %s7217_s22 = int_to_ptr.vmem [resolvable:$false] %s7216_s22 }
 0x109   : > { %v7820_v15 = vld [vmem:[#allocation2] sm:$0xf0]  ;;  %902 = vst.msk [vmem:[#allocation2 + $0x40] sm:$0xf0] %vm581_vm1, %v866_v29  ;;  %s7218_s7 = scalar_lea.vmem %s7217_s22, 4096  ;;  %p7219_p3 = scmp.lt.s32.totalorder %s8872_s29, %s7217_s22 }
 0x10a   : > { %v1283_v22 = vrot.slane %v7820_v15, 4  ;;  %v1776_v25 = vshrl.u32 %v7820_v15, 16  ;;  %v1779_v26 = vshll.u32 %v7820_v15, 16  ;;  %v931_v38 = vld [vmem:[#allocation2 + $0x18] sm:$0xf]  ;;  %v836_v35 = vpack.c.bf16 %v810_v31, %v809_v36  ;;  %p7220_p4 = scmp.lt.s32.totalorder %s7218_s7, %s7212_s25 }
 0x10b   : > { %v1235_v39 = vld [vmem:[#allocation2 + $0x10] sm:$0xf0]  ;;  %v7883_v40 = vld [vmem:[#allocation2 + $0x18] sm:$0xf]  ;;  %903 = vst.msk [vmem:[#allocation2 + $0x48] sm:$0xf] %vm562_vm0, %v866_v29  ;;  %s8870_s11 = scalar_lea.hbm %s9079_s24, %s6043_s27 }
 0x10c   : > { %v1285_v30 = vsel %vm1282_vm2, %v1283_v22, %v1284_v23  ;;  %v865_v22 = vrot.slane %v833_v5, 4  ;;  %v808_v23 = vmax.f32 %v776_v7, 0.0  ;;  %v987_v45 = vshrl.u32 %v931_v38, 16  ;;  %v7895_v49 = vld [vmem:[#allocation2 + $0x10] sm:$0xf0]  ;;  %p9081_p13 = scmp.ne.s32.totalorder %s9080_s5, 0  ;;  %p7221_p0 = por %p7220_p4, %p7219_p3 }
 0x10d   : > { %6279 = vmatprep.mubr.msk.bf16.mxu1 %vm1332_vm3, %v1285_v30  ;;  %v6071_v30 = vunpack.c.h.bf16 %v6114_v0  ;;  %v990_v46 = vshll.u32 %v931_v38, 16  ;;  %v1286_v47 = vrot.slane %v1235_v39, 4  ;;  %v1287_v48 = vrot.slane %v931_v38, 4 }
 0x10e   : > { %900 = vst.msk [vmem:[#allocation2 + $0x30] sm:$0xf0] %vm581_vm1, %v865_v22  ;;  %v835_v34 = vpack.c.bf16 %v808_v23, %v807_v17  ;;  %v1793_v50 = vshrl.u32 %v1235_v39, 16  ;;  %v1796_v51 = vshll.u32 %v1235_v39, 16  ;;  %v2333_v52 = vshrl.u32 %v7883_v40, 16  ;;  %p7214_p11 = pnand %p7213_p8, %p9081_p13 }
 0x10f   : > { %901 = vst.msk [vmem:[#allocation2 + $0x38] sm:$0xf] %vm562_vm0, %v865_v22  ;;  %v741_v41 = vmul.f32 %v6071_v30, %v7812_v9  ;;  %v2336_v53 = vshll.u32 %v7883_v40, 16  ;;  %v7899_v54 = vrot.slane %v987_v45, 3  ;;  %v7901_v55 = vrot.slane %v990_v46, 4 }
 0x110   : > { %v1288_v56 = vsel %vm1282_vm2, %v1286_v47, %v1287_v48  ;;  %v2889_v57 = vrot.slane %v7895_v49, 4  ;;  %v7908_v59 = vrot.slane %v1793_v50, 4  ;;  %v7910_v60 = vrot.slane %v1796_v51, 5  ;;  %v2295_v0 = vld [vmem:[#allocation2 + $0x28] sm:$0xf]  ;;  %p7215_p1 = pneg %p7214_p11 }
 0x111   : > { %6280 = vmatmul.mubr.msk.bf16.vlgmr.msra.gmra.mrb[0].mxu1 %vm1332_vm3, %v1288_v56  ;;  %v2890_v61 = vrot.slane %v7883_v40, 4  ;;  %v3199_v62 = vshrl.u32 %v7895_v49, 16  ;;  %v3202_v63 = vshll.u32 %v7895_v49, 16  ;;  %v2842_v1 = vld [vmem:[#allocation2 + $0x20] sm:$0xf0]  ;;  %v867_v2 = vrot.slane %v835_v34, 4 }
 0x112   : > { %6312 = vmatpush3.bf16.msra.mxu1 %v7827_v18  ;;  %v7917_v3 = vadd.f32 %v7814_v10, %v741_v41  ;;  %v2350_v7 = vshrl.u32 %v2295_v0, 16  ;;  %v2353_v8 = vshll.u32 %v2295_v0, 16  ;;  %v2892_v11 = vrot.slane %v2842_v1, 4  ;;  %v7921_v12 = vld [vmem:[#allocation2 + $0x28] sm:$0xf]  ;;  %p7222_p5 = pnand %p7221_p0, %p7215_p1 }
 0x113   : > { %v2891_v5 = vsel %vm1282_vm2, %v2889_v57, %v2890_v61  ;;  %6843 = vmatprep.subr.msk.bf16.mxu1 %vm1282_vm2, %v7905_v58  ;;  %v2893_v18 = vrot.slane %v2295_v0, 4  ;;  %v3216_v13 = vshrl.u32 %v2842_v1, 16  ;;  %v3219_v16 = vshll.u32 %v2842_v1, 16  ;;  %v1236_v17 = vld [vmem:[#allocation2 + $0x20] sm:$0xf0] }
 0x114   : > { %6415 = vmatprep.mubr.msk.bf16.mxu0 %vm1332_vm3, %v2891_v5  ;;  %v1290_v19 = vrot.slane %v7921_v12, 4  ;;  %904 = vst.msk [vmem:[#allocation2 + $0x50] sm:$0xf0] %vm581_vm1, %v867_v2  ;;  %v7929_v22 = vld [vmem:[#allocation12 + $0x18] sm:$0xf]  ;;  %v7931_v23 = vrot.slane %v2350_v7, 3  ;;  %v781_v61 = vadd.f32 %v7814_v10, %v7892_v43  ;;  %v782_v0 = vadd.f32 %v7814_v10, %v743_v4 }
 0x115   : > { %905 = vst.msk [vmem:[#allocation2 + $0x58] sm:$0xf] %vm562_vm0, %v867_v2  ;;  %v7933_v24 = vrot.slane %v2353_v8, 4  ;;  %v1289_v29 = vrot.slane %v1236_v17, 4  ;;  %v2894_v32 = vsel %vm1282_vm2, %v2892_v11, %v2893_v18  ;;  %v7939_v34 = vrot.slane %v3216_v13, 4 }
 0x116   : > { %v7935_v30 = vld [vmem:[#allocation2 + $0x38] sm:$0xf]  ;;  %v7941_v37 = vrot.slane %v3219_v16, 5  ;;  %v1237_v38 = vld [vmem:[#allocation2 + $0x30] sm:$0xf0]  ;;  %6416 = vmatmul.mubr.msk.bf16.vlgmr.msra.gmra.mrb[0].mxu0 %vm1332_vm3, %v2894_v32  ;;  %v811_v48 = vmax.f32 %v7889_v42, 0.0  ;;  %v6079_v2 = vunpack.c.h.bf16 %v7872_v28  ;;  %v744_v16 = vmul.f32 %v6078_v44, %v7812_v9 }
 0x117   : > { %v1293_v39 = vrot.slane %v7935_v30, 4  ;;  %v1291_v41 = vsel %vm1282_vm2, %v1289_v29, %v1290_v19  ;;  %v1292_v45 = vrot.slane %v1237_v38, 4  ;;  %v2297_v46 = vld [vmem:[#allocation2 + $0x38] sm:$0xf]  ;;  %v7946_v47 = vld [vmem:[#allocation2 + $0x30] sm:$0xf0]  ;;  %6448 = vmatpush3.bf16.msra.mxu0 %v7842_v33 }
 0x118   : > { %6283 = vmatprep.mubr.msk.bf16.mxu1 %vm1332_vm3, %v1291_v41  ;;  %v2895_v50 = vrot.slane %v7946_v47, 4  ;;  %v2896_v51 = vrot.slane %v2297_v46, 4  ;;  %v2299_v56 = vld [vmem:[#allocation2 + $0x48] sm:$0xf]  ;;  %v7954_v57 = vld [vmem:[#allocation2 + $0x40] sm:$0xf0]  ;;  %6848 = vmatprep.subr.msk.bf16.mxu0 %vm1282_vm2, %v7929_v22  ;;  %v745_v17 = vmul.f32 %v6079_v2, %v7812_v9  ;;  %v3222_v19 = vor.u32 %v7941_v37, %v7939_v34 }
 0x119   : > { %v1294_v27 = vsel %vm1282_vm2, %v1292_v45, %v1293_v39  ;;  %v2898_v36 = vrot.slane %v7954_v57, 4  ;;  %v2899_v42 = vrot.slane %v2299_v56, 4  ;;  %v7961_v1 = vld [vmem:[#allocation2 + $0x48] sm:$0xf]  ;;  %v1238_v33 = vld [vmem:[#allocation2 + $0x40] sm:$0xf0] }
 0x11a   : > { %6284 = vmatmul.mubr.msk.bf16.gmra.mrb[4].mxu1 %vm1332_vm3, %v1294_v27  ;;  %v2897_v5 = vsel %vm1282_vm2, %v2895_v50, %v2896_v51  ;;  %v1295_v43 = vrot.slane %v1238_v33, 4  ;;  %v1296_v4 = vrot.slane %v7961_v1, 4  ;;  %v868_v7 = vrot.slane %v836_v35, 4  ;;  %v3182_v46 = vld [vmem:[#allocation2 + $0x18] sm:$0x1f] }
 0x11b   : > { %6419 = vmatprep.mubr.msk.bf16.mxu0 %vm1332_vm3, %v2897_v5  ;;  %v2900_v8 = vsel %vm1282_vm2, %v2898_v36, %v2899_v42  ;;  %v1239_v18 = vld [vmem:[#allocation2 + $0x50] sm:$0xf0]  ;;  %v812_v44 = vmax.f32 %v7917_v3, 0.0  ;;  %v813_v41 = vmax.f32 %v781_v61, 0.0  ;;  %v814_v45 = vmax.f32 %v782_v0, 0.0 }
 0x11c   : > { %v7971_v11 = vld [vmem:[#allocation2 + $0x58] sm:$0xf]  ;;  %v1297_v29 = vsel %vm1282_vm2, %v1295_v43, %v1296_v4  ;;  %v1298_v31 = vrot.slane %v1239_v18, 4  ;;  %v7981_v38 = vld [vmem:[#allocation2 + $0x50] sm:$0xf0]  ;;  %v783_v50 = vadd.f32 %v7814_v10, %v744_v16  ;;  %v784_v51 = vadd.f32 %v7814_v10, %v745_v17  ;;  %v6117_v43 = vld [vmem:[%s7744_s21 + $0x48] sm:$0xff]  }
 0x11d   : > { %v2301_v13 = vld [vmem:[#allocation2 + $0x58] sm:$0xf]  ;;  %v1299_v32 = vrot.slane %v7971_v11, 4  ;;  %906 = vst.msk [vmem:[#allocation2 + $0x60] sm:$0xf0] %vm581_vm1, %v868_v7  ;;  %6287 = vmatprep.mubr.msk.bf16.mxu1 %vm1332_vm3, %v1297_v29  ;;  %v2901_v28 = vrot.slane %v7981_v38, 4  ;;  %v837_v3 = vpack.c.bf16 %v812_v44, %v811_v48  ;;  %v838_v61 = vpack.c.bf16 %v814_v45, %v813_v41 }
 0x11e   : > { %v2902_v39 = vrot.slane %v2301_v13, 4  ;;  %907 = vst.msk [vmem:[#allocation2 + $0x68] sm:$0xf] %vm562_vm0, %v868_v7  ;;  %v3201_v56 = vrot.slane %v3199_v62, 4  ;;  %v3183_v27 = vld [vmem:[#allocation2 + $0x28] sm:$0x1f]  ;;  %6420 = vmatmul.mubr.msk.bf16.gmra.mrb[4].mxu0 %vm1332_vm3, %v2900_v8 }
 0x11f   : > { %v1300_v35 = vsel %vm1282_vm2, %v1298_v31, %v1299_v32  ;;  %v3204_v0 = vrot.slane %v3202_v63, 5  ;;  %v815_v42 = vmax.f32 %v783_v50, 0.0  ;;  %v816_v33 = vmax.f32 %v784_v51, 0.0  ;;  %v6118_v4 = vld [vmem:[%s7744_s21 + $0x50] sm:$0xff]  }
 0x120   : > { %v2903_v36 = vsel %vm1282_vm2, %v2901_v28, %v2902_v39  ;;  %v3207_v2 = vshrl.u32 %v3182_v46, 16  ;;  %v3210_v5 = vshll.u32 %v3182_v46, 16  ;;  %v869_v7 = vrot.slane %v837_v3, 4 }
 0x121   : > { %6423 = vmatprep.mubr.msk.bf16.mxu0 %vm1332_vm3, %v2903_v36  ;;  %v870_v62 = vrot.slane %v838_v61, 4  ;;  %v3205_v18 = vor.u32 %v3204_v0, %v3201_v56  ;;  %v3224_v13 = vshrl.u32 %v3183_v27, 16  ;;  %v839_v8 = vpack.c.bf16 %v816_v33, %v815_v42  ;;  %v8020_v42 = vld [vmem:[#allocation2 + $0x38] sm:$0x1f] }
 0x122   : > { %6288 = vmatmul.mubr.msk.bf16.gmra.mrb[8].mxu1 %vm1332_vm3, %v1300_v35  ;;  %v3209_v48 = vrot.slane %v3207_v2, 4  ;;  %v3212_v16 = vrot.slane %v3210_v5, 5  ;;  %v3227_v17 = vshll.u32 %v3183_v27, 16  ;;  %908 = vst.msk [vmem:[#allocation2 + $0x70] sm:$0xf0] %vm581_vm1, %v869_v7  ;;  %v6082_v31 = vunpack.c.l.bf16 %v6117_v43 }
 0x123   : > { %909 = vst.msk [vmem:[#allocation2 + $0x78] sm:$0xf] %vm562_vm0, %v869_v7  ;;  %911 = vst.msk [vmem:[#allocation2 + $0x88] sm:$0xf] %vm562_vm0, %v870_v62  ;;  %v6083_v32 = vunpack.c.h.bf16 %v6117_v43  ;;  %v6086_v39 = vunpack.c.l.bf16 %v6118_v4  ;;  %v6087_v28 = vunpack.c.h.bf16 %v6118_v4  ;;  %v871_v35 = vrot.slane %v839_v8, 4  ;;  %v6119_v4 = vld [vmem:[%s7744_s21 + $0x58] sm:$0xff]  }
 0x124   : > { %v8001_v63 = vld [vmem:[#allocation2 + $0x60] sm:$0xf0]  ;;  %910 = vst.msk [vmem:[#allocation2 + $0x80] sm:$0xf0] %vm581_vm1, %v870_v62  ;;  %v3213_v51 = vor.u32 %v3212_v16, %v3209_v48  ;;  %v3226_v56 = vrot.slane %v3224_v13, 4  ;;  %v3229_v27 = vrot.slane %v3227_v17, 5  ;;  %v746_v61 = vmul.f32 %v6082_v31, %v7812_v9 }
 0x125   : > { %v2303_v49 = vld [vmem:[#allocation2 + $0x68] sm:$0xf]  ;;  %v2904_v44 = vrot.slane %v8001_v63, 4  ;;  %v1240_v45 = vld [vmem:[#allocation2 + $0x60] sm:$0xf0]  ;;  %v8016_v3 = vsel %vm1282_vm2, %v7929_v22, 0  ;;  %v747_v0 = vmul.f32 %v6083_v32, %v7812_v9  ;;  %v748_v43 = vmul.f32 %v6086_v39, %v7812_v9 }
 0x126   : > { %v8003_v29 = vld [vmem:[#allocation2 + $0x68] sm:$0xf]  ;;  %v2905_v41 = vrot.slane %v2303_v49, 4  ;;  %v1301_v50 = vrot.slane %v1240_v45, 4  ;;  %912 = vst.msk [vmem:[#allocation2 + $0x90] sm:$0xf0] %vm581_vm1, %v871_v35  ;;  %v3214_v2 = vsel %vm1774_vm4, %v3205_v18, %v3213_v51  ;;  %v3230_v5 = vor.u32 %v3229_v27, %v3226_v56 }
 0x127   : > { %v1302_v46 = vrot.slane %v8003_v29, 4  ;;  %913 = vst.msk [vmem:[#allocation2 + $0x98] sm:$0xf] %vm562_vm0, %v871_v35  ;;  %v8028_v7 = vld [vmem:[%s7744_s21 + $0x60] sm:$0xff]   ;;  %v785_v22 = vadd.f32 %v7814_v10, %v746_v61  ;;  %v786_v62 = vadd.f32 %v7814_v10, %v747_v0  ;;  %v749_v13 = vmul.f32 %v6087_v28, %v7812_v9 }
 0x128   : > { %v2906_v36 = vsel %vm1282_vm2, %v2904_v44, %v2905_v41  ;;  %v3233_v8 = vshrl.u32 %v7946_v47, 16  ;;  %v8039_v18 = vsel %vm1774_vm4, %v3222_v19, %v3230_v5  ;;  %v787_v48 = vadd.f32 %v7814_v10, %v748_v43 }
 0x129   : > { %6424 = vmatmul.mubr.msk.bf16.gmra.mrb[8].mxu0 %vm1332_vm3, %v2906_v36  ;;  %v1303_v33 = vsel %vm1282_vm2, %v1301_v50, %v1302_v46  ;;  %v3236_v16 = vshll.u32 %v7946_v47, 16  ;;  %v3241_v17 = vshrl.u32 %v8020_v42, 16  ;;  %v1241_v31 = vld [vmem:[#allocation2 + $0x70] sm:$0xf0]  ;;  %v788_v39 = vadd.f32 %v7814_v10, %v749_v13 }
 0x12a   : > { %6291 = vmatprep.mubr.msk.bf16.mxu1 %vm1332_vm3, %v1303_v33  ;;  %v8044_v49 = vld [vmem:[#allocation2 + $0x78] sm:$0xf]  ;;  %v6090_v28 = vunpack.c.l.bf16 %v6119_v4  ;;  %v6091_v44 = vunpack.c.h.bf16 %v6119_v4  ;;  %v6094_v41 = vunpack.c.l.bf16 %v8028_v7  ;;  %v1304_v34 = vrot.slane %v1241_v31, 4  ;;  %v8049_v19 = vld [vmem:[#allocation2 + $0x70] sm:$0xf0] }
 0x12b   : > { %v2305_v32 = vld [vmem:[#allocation2 + $0x78] sm:$0xf]  ;;  %v1305_v37 = vrot.slane %v8044_v49, 4  ;;  %v817_v46 = vmax.f32 %v785_v22, 0.0  ;;  %v2907_v47 = vrot.slane %v8049_v19, 4  ;;  %v818_v51 = vmax.f32 %v786_v62, 0.0 }
 0x12c   : > { %v2908_v45 = vrot.slane %v2305_v32, 4  ;;  %v2307_v35 = vld [vmem:[#allocation2 + $0x88] sm:$0xf]  ;;  %v8052_v50 = vld [vmem:[#allocation2 + $0x80] sm:$0xf0]  ;;  %v750_v56 = vmul.f32 %v6090_v28, %v7812_v9  ;;  %v751_v27 = vmul.f32 %v6091_v44, %v7812_v9  ;;  %v6095_v43 = vunpack.c.h.bf16 %v8028_v7 }
 0x12d   : > { %v1306_v36 = vsel %vm1282_vm2, %v1304_v34, %v1305_v37  ;;  %v2910_v61 = vrot.slane %v8052_v50, 4  ;;  %v2911_v0 = vrot.slane %v2307_v35, 4  ;;  %v8058_v33 = vld [vmem:[#allocation2 + $0x88] sm:$0xf]  ;;  %v1242_v5 = vld [vmem:[#allocation2 + $0x80] sm:$0xf0]  ;;  %v840_v32 = vpack.c.bf16 %v818_v51, %v817_v46 }
 0x12e   : > { %6292 = vmatmul.mubr.msk.bf16.gmra.mrb[12].mxu1 %vm1332_vm3, %v1306_v36  ;;  %v2909_v4 = vsel %vm1282_vm2, %v2907_v47, %v2908_v45  ;;  %v1307_v22 = vrot.slane %v1242_v5, 4  ;;  %v1308_v62 = vrot.slane %v8058_v33, 4  ;;  %v8064_v13 = vld [vmem:[#allocation2 + $0x98] sm:$0xf]  ;;  %v1243_v31 = vld [vmem:[#allocation2 + $0x90] sm:$0xf0] }
 0x12f   : > { %6427 = vmatprep.mubr.msk.bf16.mxu0 %vm1332_vm3, %v2909_v4  ;;  %v2912_v28 = vsel %vm1282_vm2, %v2910_v61, %v2911_v0  ;;  %v1310_v44 = vrot.slane %v1243_v31, 4  ;;  %v1311_v34 = vrot.slane %v8064_v13, 4  ;;  %v819_v37 = vmax.f32 %v787_v48, 0.0  ;;  %v3185_v35 = vld [vmem:[#allocation2 + $0x48] sm:$0x1f] }
 0x130   : > { %v1309_v45 = vsel %vm1282_vm2, %v1307_v22, %v1308_v62  ;;  %v872_v47 = vrot.slane %v840_v32, 4  ;;  %v820_v36 = vmax.f32 %v788_v39, 0.0  ;;  %v3235_v5 = vrot.slane %v3233_v8, 4 }
 0x131   : > { %6428 = vmatmul.mubr.msk.bf16.gmra.mrb[12].mxu0 %vm1332_vm3, %v2912_v28  ;;  %6295 = vmatprep.mubr.msk.bf16.mxu1 %vm1332_vm3, %v1309_v45  ;;  %v1312_v46 = vsel %vm1282_vm2, %v1310_v44, %v1311_v34  ;;  %v3238_v51 = vrot.slane %v3236_v16, 5  ;;  %v3243_v61 = vrot.slane %v3241_v17, 4  ;;  %v3244_v0 = vshll.u32 %v8020_v42, 16 }
 0x132   : > { %6449 = vmatprep.mubr.msk.bf16.mxu0 %vm1332_vm3, %v3214_v2  ;;  %914 = vst.msk [vmem:[#allocation2 + $0xa0] sm:$0xf0] %vm581_vm1, %v872_v47  ;;  %v841_v48 = vpack.c.bf16 %v820_v36, %v819_v37  ;;  %v3250_v4 = vshrl.u32 %v7954_v57, 16  ;;  %v3253_v39 = vshll.u32 %v7954_v57, 16  ;;  %v3258_v8 = vshrl.u32 %v3185_v35, 16 }
 0x133   : > { %915 = vst.msk [vmem:[#allocation2 + $0xa8] sm:$0xf] %vm562_vm0, %v872_v47  ;;  %v3239_v22 = vor.u32 %v3238_v51, %v3235_v5  ;;  %v3246_v62 = vrot.slane %v3244_v0, 5  ;;  %v3261_v31 = vshll.u32 %v3185_v35, 16  ;;  %v789_v32 = vadd.f32 %v7814_v10, %v750_v56  ;;  %v3186_v37 = vld [vmem:[#allocation2 + $0x58] sm:$0x1f] }
 0x134   : > { %v873_v2 = vrot.slane %v841_v48, 4  ;;  %v3252_v16 = vrot.slane %v3250_v4, 4  ;;  %v3255_v17 = vrot.slane %v3253_v39, 5  ;;  %v3260_v28 = vrot.slane %v3258_v8, 4  ;;  %v8091_v51 = vld [vmem:[#allocation12 + $0x1c] sm:$0xf] }
 0x135   : > { %v3247_v42 = vor.u32 %v3246_v62, %v3243_v61  ;;  %v3263_v44 = vrot.slane %v3261_v31, 5  ;;  %v790_v34 = vadd.f32 %v7814_v10, %v751_v27  ;;  %v821_v45 = vmax.f32 %v789_v32, 0.0 }
 0x136   : > { %6296 = vmatmul.mubr.msk.bf16.gmra.mrb[16].mxu1 %vm1332_vm3, %v1312_v46  ;;  %916 = vst.msk [vmem:[#allocation2 + $0xb0] sm:$0xf0] %vm581_vm1, %v873_v2  ;;  %v3256_v57 = vor.u32 %v3255_v17, %v3252_v16  ;;  %v752_v56 = vmul.f32 %v6094_v41, %v7812_v9  ;;  %v753_v35 = vmul.f32 %v6095_v43, %v7812_v9  ;;  %v3267_v47 = vshrl.u32 %v7981_v38, 16  ;;  %v6121_v43 = vld [vmem:[%s7744_s21 + $0x68] sm:$0xff]  }
 0x137   : > { %917 = vst.msk [vmem:[#allocation2 + $0xb8] sm:$0xf] %vm562_vm0, %v873_v2  ;;  %v3248_v27 = vsel %vm1774_vm4, %v3239_v22, %v3247_v42  ;;  %v3264_v36 = vor.u32 %v3263_v44, %v3260_v28  ;;  %v822_v5 = vmax.f32 %v790_v34, 0.0  ;;  %v3270_v46 = vshll.u32 %v7981_v38, 16  ;;  %v3187_v2 = vld [vmem:[#allocation2 + $0x68] sm:$0x1f] }
 0x138   : > { %v791_v61 = vadd.f32 %v7814_v10, %v752_v56  ;;  %v792_v7 = vadd.f32 %v7814_v10, %v753_v35  ;;  %v3269_v41 = vrot.slane %v3267_v47, 4  ;;  %v3275_v0 = vshrl.u32 %v3186_v37, 16 }
 0x139   : > { %6450 = vmatmul.mubr.msk.bf16.vlgmr.msra.gmra.mrb[0].mxu0 %vm1332_vm3, %v8039_v18  ;;  %v1244_v4 = vld [vmem:[#allocation2 + $0xa0] sm:$0xf0]  ;;  %v3265_v38 = vsel %vm1774_vm4, %v3256_v57, %v3264_v36  ;;  %v842_v39 = vpack.c.bf16 %v822_v5, %v821_v45  ;;  %v3272_v8 = vrot.slane %v3270_v46, 5  ;;  %v3278_v18 = vshll.u32 %v3186_v37, 16  ;;  %v6122_v37 = vld [vmem:[%s7744_s21 + $0x70] sm:$0xff]  }
 0x13a   : > { %6482 = vmatpush3.bf16.msra.mxu0 %v8016_v3  ;;  %v8099_v48 = vld [vmem:[#allocation2 + $0xa8] sm:$0xf]  ;;  %6453 = vmatprep.mubr.msk.bf16.mxu0 %vm1332_vm3, %v3248_v27  ;;  %v1313_v22 = vrot.slane %v1244_v4, 4  ;;  %v823_v31 = vmax.f32 %v791_v61, 0.0  ;;  %v824_v32 = vmax.f32 %v792_v7, 0.0  ;;  %v3277_v17 = vrot.slane %v3275_v0, 4 }
 0x13b   : > { %v1314_v62 = vrot.slane %v8099_v48, 4  ;;  %6849 = vmatprep.subr.msk.bf16.mxu0 %vm1282_vm2, %v8091_v51  ;;  %v874_v3 = vrot.slane %v842_v39, 4  ;;  %v3273_v16 = vor.u32 %v3272_v8, %v3269_v41  ;;  %v3280_v28 = vrot.slane %v3278_v18, 5 }
 0x13c   : > { %v843_v44 = vpack.c.bf16 %v824_v32, %v823_v31  ;;  %v3284_v34 = vshrl.u32 %v8001_v63, 16  ;;  %v3287_v45 = vshll.u32 %v8001_v63, 16  ;;  %v3292_v47 = vshrl.u32 %v3187_v2, 16 }
 0x13d   : > { %v1315_v42 = vsel %vm1282_vm2, %v1313_v22, %v1314_v62  ;;  %v1245_v56 = vld [vmem:[#allocation2 + $0xb0] sm:$0xf0]  ;;  %918 = vst.msk [vmem:[#allocation2 + $0xc0] sm:$0xf0] %vm581_vm1, %v874_v3  ;;  %v3281_v35 = vor.u32 %v3280_v28, %v3277_v17  ;;  %v3295_v27 = vshll.u32 %v3187_v2, 16  ;;  %v6098_v36 = vunpack.c.l.bf16 %v6121_v43 }
 0x13e   : > { %6299 = vmatprep.mubr.msk.bf16.mxu1 %vm1332_vm3, %v1315_v42  ;;  %v8111_v57 = vld [vmem:[#allocation2 + $0xb8] sm:$0xf]  ;;  %919 = vst.msk [vmem:[#allocation2 + $0xc8] sm:$0xf] %vm562_vm0, %v874_v3  ;;  %v1316_v5 = vrot.slane %v1245_v56, 4  ;;  %v875_v61 = vrot.slane %v843_v44, 4  ;;  %v6099_v8 = vunpack.c.h.bf16 %v6121_v43  ;;  %v6102_v22 = vunpack.c.l.bf16 %v6122_v37 }
 0x13f   : > { %v1317_v46 = vrot.slane %v8111_v57, 4  ;;  %v3286_v7 = vrot.slane %v3284_v34, 4  ;;  %v3282_v63 = vsel %vm1774_vm4, %v3273_v16, %v3281_v35  ;;  %v3289_v41 = vrot.slane %v3287_v45, 5  ;;  %v3188_v62 = vld [vmem:[#allocation2 + $0x78] sm:$0x1f] }
 0x140   : > { %v3294_v0 = vrot.slane %v3292_v47, 4  ;;  %v3297_v4 = vrot.slane %v3295_v27, 5  ;;  %920 = vst.msk [vmem:[#allocation2 + $0xd0] sm:$0xf0] %vm581_vm1, %v875_v61  ;;  %v754_v18 = vmul.f32 %v6098_v36, %v7812_v9  ;;  %v6103_v2 = vunpack.c.h.bf16 %v6122_v37 }
 0x141   : > { %v1318_v39 = vsel %vm1282_vm2, %v1316_v5, %v1317_v46  ;;  %6454 = vmatmul.mubr.msk.bf16.gmra.mrb[4].mxu0 %vm1332_vm3, %v3265_v38  ;;  %921 = vst.msk [vmem:[#allocation2 + $0xd8] sm:$0xf] %vm562_vm0, %v875_v61  ;;  %v3290_v31 = vor.u32 %v3289_v41, %v3286_v7  ;;  %v3301_v3 = vshrl.u32 %v8049_v19, 16  ;;  %v755_v38 = vmul.f32 %v6099_v8, %v7812_v9  ;;  %v3189_v41 = vld [vmem:[#allocation2 + $0x88] sm:$0x1f] }
 0x142   : > { %6300 = vmatmul.mubr.msk.bf16.gmra.mrb[20].mxu1 %vm1332_vm3, %v1318_v39  ;;  %6457 = vmatprep.mubr.msk.bf16.mxu0 %vm1332_vm3, %v3282_v63  ;;  %v3298_v32 = vor.u32 %v3297_v4, %v3294_v0  ;;  %v793_v16 = vadd.f32 %v7814_v10, %v754_v18  ;;  %v756_v17 = vmul.f32 %v6102_v22, %v7812_v9  ;;  %v3304_v43 = vshll.u32 %v8049_v19, 16 }
 0x143   : > { %v757_v42 = vmul.f32 %v6103_v2, %v7812_v9  ;;  %v3303_v44 = vrot.slane %v3301_v3, 4  ;;  %v3309_v34 = vshrl.u32 %v3188_v62, 16  ;;  %v794_v37 = vadd.f32 %v7814_v10, %v755_v38  ;;  %v928_v2 = vld [vmem:[#allocation2] sm:$0xf8] }
 0x144   : > { %v3299_v28 = vsel %vm1774_vm4, %v3290_v31, %v3298_v32  ;;  %v1246_v56 = vld [vmem:[#allocation2 + $0xc0] sm:$0xf0]  ;;  %v825_v35 = vmax.f32 %v793_v16, 0.0  ;;  %v795_v47 = vadd.f32 %v7814_v10, %v756_v17  ;;  %v3306_v27 = vrot.slane %v3304_v43, 5 }
 0x145   : > { %v8131_v45 = vld [vmem:[#allocation2 + $0xc8] sm:$0xf]  ;;  %v1319_v36 = vrot.slane %v1246_v56, 4  ;;  %v796_v19 = vadd.f32 %v7814_v10, %v757_v42  ;;  %v3311_v46 = vrot.slane %v3309_v34, 4  ;;  %v826_v61 = vmax.f32 %v794_v37, 0.0 }
 0x146   : > { %v1320_v5 = vrot.slane %v8131_v45, 4  ;;  %v827_v7 = vmax.f32 %v795_v47, 0.0  ;;  %v3307_v9 = vor.u32 %v3306_v27, %v3303_v44  ;;  %v3312_v63 = vshll.u32 %v3188_v62, 16  ;;  %v930_v56 = vld [vmem:[#allocation2 + $0x10] sm:$0xf8] }
 0x147   : > { %v1247_v39 = vld [vmem:[#allocation2 + $0xd0] sm:$0xf0]  ;;  %v828_v8 = vmax.f32 %v796_v19, 0.0  ;;  %v3318_v18 = vshrl.u32 %v8052_v50, 16  ;;  %v993_v22 = vor.u32 %v7901_v55, %v7899_v54  ;;  %v844_v62 = vpack.c.bf16 %v826_v61, %v825_v35 }
 0x148   : > { %v1321_v0 = vsel %vm1282_vm2, %v1319_v36, %v1320_v5  ;;  %v8138_v4 = vld [vmem:[#allocation2 + $0xd8] sm:$0xf]  ;;  %v1322_v10 = vrot.slane %v1247_v39, 4  ;;  %v3314_v32 = vrot.slane %v3312_v63, 5  ;;  %v3321_v16 = vshll.u32 %v8052_v50, 16 }
 0x149   : > { %6303 = vmatprep.mubr.msk.bf16.mxu1 %vm1332_vm3, %v1321_v0  ;;  %v1323_v31 = vrot.slane %v8138_v4, 4  ;;  %6458 = vmatmul.mubr.msk.bf16.gmra.mrb[8].mxu0 %vm1332_vm3, %v3299_v28  ;;  %v845_v3 = vpack.c.bf16 %v828_v8, %v827_v7  ;;  %v3320_v38 = vrot.slane %v3318_v18, 4  ;;  %v3326_v17 = vshrl.u32 %v3189_v41, 16  ;;  %v2849_v35 = vld [vmem:[#allocation2 + $0x90] sm:$0xf0] }
 0x14a   : > { %v876_v42 = vrot.slane %v844_v62, 4  ;;  %v3315_v44 = vor.u32 %v3314_v32, %v3311_v46  ;;  %v3329_v34 = vshll.u32 %v3189_v41, 16  ;;  %v3323_v47 = vrot.slane %v3321_v16, 5  ;;  %v3190_v46 = vld [vmem:[#allocation2 + $0x98] sm:$0x1f] }
 0x14b   : > { %v1324_v43 = vsel %vm1282_vm2, %v1322_v10, %v1323_v31  ;;  %v877_v37 = vrot.slane %v845_v3, 4  ;;  %v3328_v27 = vrot.slane %v3326_v17, 4  ;;  %v962_v28 = vshrl.u32 %v928_v2, 16  ;;  %v2850_v62 = vld [vmem:[#allocation2 + $0xa0] sm:$0xf0]  ;;  %v8161_v17 = vld [vmem:[%s7744_s21 + $0x78] sm:$0xff]  }
 0x14c   : > { %6304 = vmatmul.mubr.msk.bf16.gmra.mrb[24].mxu1 %vm1332_vm3, %v1324_v43  ;;  %922 = vst.msk [vmem:[#allocation2 + $0xe0] sm:$0xf0] %vm581_vm1, %v876_v42  ;;  %v3316_v50 = vsel %vm1774_vm4, %v3307_v9, %v3315_v44  ;;  %v3331_v36 = vrot.slane %v3329_v34, 5  ;;  %v965_v5 = vshll.u32 %v928_v2, 16  ;;  %v972_v19 = vrot.slane %v970_v20, 3 }
 0x14d   : > { %923 = vst.msk [vmem:[#allocation2 + $0xe8] sm:$0xf] %vm562_vm0, %v876_v42  ;;  %925 = vst.msk [vmem:[#allocation2 + $0xf8] sm:$0xf] %vm562_vm0, %v877_v37  ;;  %6461 = vmatprep.mubr.msk.bf16.mxu0 %vm1332_vm3, %v3316_v50  ;;  %v3324_v61 = vor.u32 %v3323_v47, %v3320_v38  ;;  %v964_v7 = vrot.slane %v962_v28, 3  ;;  %v975_v63 = vrot.slane %v973_v21, 4 }
 0x14e   : > { %924 = vst.msk [vmem:[#allocation2 + $0xf0] sm:$0xf0] %vm581_vm1, %v877_v37  ;;  %v979_v41 = vshrl.u32 %v930_v56, 16  ;;  %v3332_v9 = vor.u32 %v3331_v36, %v3328_v27  ;;  %v967_v0 = vrot.slane %v965_v5, 4  ;;  %v982_v39 = vshll.u32 %v930_v56, 16 }
 0x14f   : > { %v3335_v8 = vshrl.u32 %v2849_v35, 16  ;;  %v976_v18 = vor.u32 %v975_v63, %v972_v19  ;;  %v3338_v10 = vshll.u32 %v2849_v35, 16  ;;  %v3343_v31 = vshrl.u32 %v3190_v46, 16  ;;  %v3191_v16 = vld [vmem:[#allocation2 + $0xa8] sm:$0x1f] }
 0x150   : > { %v981_v20 = vrot.slane %v979_v41, 3  ;;  %v3333_v32 = vsel %vm1774_vm4, %v3324_v61, %v3332_v9  ;;  %v968_v2 = vor.u32 %v967_v0, %v964_v7  ;;  %v984_v3 = vrot.slane %v982_v39, 4  ;;  %v932_v47 = vld [vmem:[#allocation2 + $0x20] sm:$0xf8] }
 0x151   : > { %v3337_v38 = vrot.slane %v3335_v8, 4  ;;  %6462 = vmatmul.mubr.msk.bf16.gmra.mrb[12].mxu0 %vm1332_vm3, %v3333_v32  ;;  %v3340_v14 = vrot.slane %v3338_v10, 5  ;;  %v3345_v21 = vrot.slane %v3343_v31, 4  ;;  %v3346_v43 = vshll.u32 %v3190_v46, 16  ;;  %v934_v31 = vld [vmem:[#allocation2 + $0x30] sm:$0xf8] }
 0x152   : > { %v8166_v42 = vsel %vm1282_vm2, %v7905_v58, 0  ;;  %v977_v44 = vsel %vm960_vm5, %v968_v2, %v976_v18  ;;  %v985_v34 = vor.u32 %v984_v3, %v981_v20  ;;  %v3352_v56 = vshrl.u32 %v2850_v62, 16 }
 0x153   : > { %v3355_v37 = vshll.u32 %v2850_v62, 16  ;;  %v1248_v28 = vld [vmem:[#allocation2 + $0xe0] sm:$0xf0]  ;;  %v3341_v35 = vor.u32 %v3340_v14, %v3337_v38  ;;  %v3348_v50 = vrot.slane %v3346_v43, 5  ;;  %v3360_v36 = vshrl.u32 %v3191_v16, 16 }
 0x154   : > { %v8169_v27 = vld [vmem:[#allocation2 + $0xe8] sm:$0xf]  ;;  %v6106_v5 = vunpack.c.l.bf16 %v8161_v17  ;;  %v1325_v19 = vrot.slane %v1248_v28, 4  ;;  %v8173_v61 = vld [vmem:[#allocation2 + $0xf8] sm:$0xf]  ;;  %v994_v7 = vsel %vm960_vm5, %v985_v34, %v993_v22  ;;  %v6107_v63 = vunpack.c.h.bf16 %v8161_v17 }
 0x155   : > { %v1326_v46 = vrot.slane %v8169_v27, 4  ;;  %v1249_v58 = vld [vmem:[#allocation2 + $0xf0] sm:$0xf0]  ;;  %v1329_v9 = vrot.slane %v8173_v61, 4  ;;  %v3349_v0 = vor.u32 %v3348_v50, %v3345_v21  ;;  %v3354_v39 = vrot.slane %v3352_v56, 4 }
 0x156   : > { %v1328_v41 = vrot.slane %v1249_v58, 4  ;;  %v3357_v18 = vrot.slane %v3355_v37, 5  ;;  %v3362_v20 = vrot.slane %v3360_v36, 4  ;;  %v3363_v10 = vshll.u32 %v3191_v16, 16  ;;  %v2851_v34 = vld [vmem:[#allocation2 + $0xb0] sm:$0xf0] }
 0x157   : > { %v1327_v8 = vsel %vm1282_vm2, %v1325_v19, %v1326_v46  ;;  %v3350_v54 = vsel %vm1774_vm4, %v3341_v35, %v3349_v0  ;;  %v996_v55 = vshrl.u32 %v932_v47, 16  ;;  %v999_v22 = vshll.u32 %v932_v47, 16  ;;  %v3192_v35 = vld [vmem:[#allocation2 + $0xb8] sm:$0x1f]  ;;  %v2852_v58 = vld [vmem:[#allocation2 + $0xc0] sm:$0xf0] }
 0x158   : > { %6307 = vmatprep.mubr.msk.bf16.mxu1 %vm1332_vm3, %v1327_v8  ;;  %v1330_v62 = vsel %vm1282_vm2, %v1328_v41, %v1329_v9  ;;  %6465 = vmatprep.mubr.msk.bf16.mxu0 %vm1332_vm3, %v3350_v54  ;;  %v3358_v32 = vor.u32 %v3357_v18, %v3354_v39  ;;  %v3365_v2 = vrot.slane %v3363_v10, 5  ;;  %v1004_v3 = vshrl.u32 %v7921_v12, 16 }
 0x159   : > { %6308 = vmatmul.mubr.msk.bf16.gmra.mrb[28].mxu1 %vm1332_vm3, %v1330_v62  ;;  %v1007_v38 = vshll.u32 %v7921_v12, 16  ;;  %v998_v16 = vrot.slane %v996_v55, 3  ;;  %v1001_v14 = vrot.slane %v999_v22, 4  ;;  %v1013_v21 = vshrl.u32 %v934_v31, 16  ;;  %v936_v55 = vld [vmem:[#allocation2 + $0x40] sm:$0xf8] }
 0x15a   : > { %6313 = vmatprep.mubr.msk.bf16.mxu1 %vm1332_vm3, %v977_v44  ;;  %v1016_v43 = vshll.u32 %v934_v31, 16  ;;  %v3366_v56 = vor.u32 %v3365_v2, %v3362_v20  ;;  %v1006_v37 = vrot.slane %v1004_v3, 3  ;;  %v1021_v28 = vshrl.u32 %v7935_v30, 16  ;;  %v3193_v20 = vld [vmem:[#allocation2 + $0xc8] sm:$0x1f] }
 0x15b   : > { %v1009_v47 = vrot.slane %v1007_v38, 4  ;;  %v1002_v50 = vor.u32 %v1001_v14, %v998_v16  ;;  %v1015_v36 = vrot.slane %v1013_v21, 3  ;;  %v1024_v46 = vshll.u32 %v7935_v30, 16  ;;  %v8195_v3 = vld [vmem:[#allocation12 + $0xc] sm:$0xf] }
 0x15c   : > { %v1018_v19 = vrot.slane %v1016_v43, 4  ;;  %v3367_v12 = vsel %vm1774_vm4, %v3358_v32, %v3366_v56  ;;  %v1023_v41 = vrot.slane %v1021_v28, 3  ;;  %v3369_v9 = vshrl.u32 %v2851_v34, 16 }
 0x15d   : > { %v1010_v44 = vor.u32 %v1009_v47, %v1006_v37  ;;  %6466 = vmatmul.mubr.msk.bf16.gmra.mrb[16].mxu0 %vm1332_vm3, %v3367_v12  ;;  %v1026_v39 = vrot.slane %v1024_v46, 4  ;;  %v3372_v8 = vshll.u32 %v2851_v34, 16  ;;  %v3377_v18 = vshrl.u32 %v3192_v35, 16  ;;  %v938_v47 = vld [vmem:[#allocation2 + $0x50] sm:$0xf8] }
 0x15e   : > { %v1019_v0 = vor.u32 %v1018_v19, %v1015_v36  ;;  %v3371_v31 = vrot.slane %v3369_v9, 4  ;;  %v3380_v62 = vshll.u32 %v3192_v35, 16  ;;  %v3386_v54 = vshrl.u32 %v2852_v58, 16  ;;  %v2853_v9 = vld [vmem:[#allocation2 + $0xd0] sm:$0xf0] }
 0x15f   : > { %v1011_v10 = vsel %vm960_vm5, %v1002_v50, %v1010_v44  ;;  %v1027_v30 = vor.u32 %v1026_v39, %v1023_v41  ;;  %v3374_v22 = vrot.slane %v3372_v8, 5  ;;  %v3379_v2 = vrot.slane %v3377_v18, 4 }
 0x160   : > { %v3389_v32 = vshll.u32 %v2852_v58, 16  ;;  %v3382_v38 = vrot.slane %v3380_v62, 5  ;;  %v3388_v16 = vrot.slane %v3386_v54, 4  ;;  %v3394_v14 = vshrl.u32 %v3193_v20, 16  ;;  %v2854_v54 = vld [vmem:[#allocation2 + $0xe0] sm:$0xf0] }
 0x161   : > { %6314 = vmatmul.mubr.msk.bf16.vlgmr.msra.gmra.mrb[0].mxu1 %vm1332_vm3, %v994_v7  ;;  %v3397_v21 = vshll.u32 %v3193_v20, 16  ;;  %v1028_v43 = vsel %vm960_vm5, %v1019_v0, %v1027_v30  ;;  %v3375_v34 = vor.u32 %v3374_v22, %v3371_v31  ;;  %v1030_v37 = vshrl.u32 %v936_v55, 16  ;;  %v3194_v20 = vld [vmem:[#allocation2 + $0xd8] sm:$0x1f] }
 0x162   : > { %6346 = vmatpush3.bf16.msra.mxu1 %v8166_v42  ;;  %6317 = vmatprep.mubr.msk.bf16.mxu1 %vm1332_vm3, %v1011_v10  ;;  %v3391_v56 = vrot.slane %v3389_v32, 5  ;;  %v3383_v28 = vor.u32 %v3382_v38, %v3379_v2  ;;  %v3396_v35 = vrot.slane %v3394_v14, 4  ;;  %v1033_v36 = vshll.u32 %v936_v55, 16 }
 0x163   : > { %v3399_v50 = vrot.slane %v3397_v21, 5  ;;  %6844 = vmatprep.subr.msk.bf16.mxu1 %vm1282_vm2, %v8195_v3  ;;  %v1032_v19 = vrot.slane %v1030_v37, 3  ;;  %v1038_v46 = vshrl.u32 %v7961_v1, 16  ;;  %v1041_v42 = vshll.u32 %v7961_v1, 16  ;;  %v3195_v21 = vld [vmem:[#allocation2 + $0xe8] sm:$0x1f] }
 0x164   : > { %v3392_v7 = vor.u32 %v3391_v56, %v3388_v16  ;;  %v3384_v58 = vsel %vm1774_vm4, %v3375_v34, %v3383_v28  ;;  %v1035_v44 = vrot.slane %v1033_v36, 4  ;;  %v1047_v41 = vshrl.u32 %v938_v47, 16 }
 0x165   : > { %v3400_v12 = vor.u32 %v3399_v50, %v3396_v35  ;;  %6469 = vmatprep.mubr.msk.bf16.mxu0 %vm1332_vm3, %v3384_v58  ;;  %v1040_v0 = vrot.slane %v1038_v46, 3  ;;  %v1043_v39 = vrot.slane %v1041_v42, 4  ;;  %v1050_v8 = vshll.u32 %v938_v47, 16 }
 0x166   : > { %v1055_v18 = vshrl.u32 %v7971_v11, 16  ;;  %v1036_v31 = vor.u32 %v1035_v44, %v1032_v19  ;;  %v1049_v62 = vrot.slane %v1047_v41, 3  ;;  %v1058_v1 = vshll.u32 %v7971_v11, 16  ;;  %v940_v11 = vld [vmem:[#allocation2 + $0x60] sm:$0xf8] }
 0x167   : > { %v3401_v10 = vsel %vm1774_vm4, %v3392_v7, %v3400_v12  ;;  %v1044_v55 = vor.u32 %v1043_v39, %v1040_v0  ;;  %v1052_v30 = vrot.slane %v1050_v8, 4  ;;  %v3403_v2 = vshrl.u32 %v2853_v9, 16  ;;  %v942_v41 = vld [vmem:[#allocation2 + $0x70] sm:$0xf8] }
 0x168   : > { %6470 = vmatmul.mubr.msk.bf16.gmra.mrb[20].mxu0 %vm1332_vm3, %v3401_v10  ;;  %v1057_v22 = vrot.slane %v1055_v18, 3  ;;  %v1060_v32 = vrot.slane %v1058_v1, 4  ;;  %v3406_v38 = vshll.u32 %v2853_v9, 16  ;;  %v3411_v16 = vshrl.u32 %v3194_v20, 16 }
 0x169   : > { %6318 = vmatmul.mubr.msk.bf16.gmra.mrb[4].mxu1 %vm1332_vm3, %v1028_v43  ;;  %v3414_v14 = vshll.u32 %v3194_v20, 16  ;;  %v1045_v34 = vsel %vm960_vm5, %v1036_v31, %v1044_v55  ;;  %v1053_v56 = vor.u32 %v1052_v30, %v1049_v62  ;;  %v3405_v37 = vrot.slane %v3403_v2, 4  ;;  %v2855_v30 = vld [vmem:[#allocation2 + $0xf0] sm:$0xf0] }
 0x16a   : > { %v3420_v47 = vshrl.u32 %v2854_v54, 16  ;;  %6321 = vmatprep.mubr.msk.bf16.mxu1 %vm1332_vm3, %v1045_v34  ;;  %v1061_v28 = vor.u32 %v1060_v32, %v1057_v22  ;;  %v3408_v35 = vrot.slane %v3406_v38, 5  ;;  %v3413_v50 = vrot.slane %v3411_v16, 4  ;;  %v3196_v16 = vld [vmem:[#allocation2 + $0xf8] sm:$0x1f] }
 0x16b   : > { %v3416_v36 = vrot.slane %v3414_v14, 5  ;;  %v3423_v19 = vshll.u32 %v2854_v54, 16  ;;  %v3428_v43 = vshrl.u32 %v3195_v21, 16  ;;  %v3431_v46 = vshll.u32 %v3195_v21, 16 }
 0x16c   : > { %v3422_v7 = vrot.slane %v3420_v47, 4  ;;  %v1062_v42 = vsel %vm960_vm5, %v1053_v56, %v1061_v28  ;;  %v3409_v58 = vor.u32 %v3408_v35, %v3405_v37  ;;  %v1064_v44 = vshrl.u32 %v940_v11, 16 }
 0x16d   : > { %v3417_v12 = vor.u32 %v3416_v36, %v3413_v50  ;;  %v3425_v9 = vrot.slane %v3423_v19, 5  ;;  %v3430_v0 = vrot.slane %v3428_v43, 4  ;;  %v3433_v39 = vrot.slane %v3431_v46, 5 }
 0x16e   : > { %v1067_v8 = vshll.u32 %v940_v11, 16  ;;  %v1066_v20 = vrot.slane %v1064_v44, 3  ;;  %v1072_v10 = vshrl.u32 %v8003_v29, 16  ;;  %v1075_v31 = vshll.u32 %v8003_v29, 16 }
 0x16f   : > { %v3418_v18 = vsel %vm1774_vm4, %v3409_v58, %v3417_v12  ;;  %v3426_v62 = vor.u32 %v3425_v9, %v3422_v7  ;;  %v3434_v1 = vor.u32 %v3433_v39, %v3430_v0  ;;  %v1081_v55 = vshrl.u32 %v942_v41, 16  ;;  %v944_v7 = vld [vmem:[#allocation2 + $0x80] sm:$0xf8]  ;;  %v6980_v0 = vld [vmem:[#allocation11] ss:$0 sm:$0xff] }
 0x170   : > { %6473 = vmatprep.mubr.msk.bf16.mxu0 %vm1332_vm3, %v3418_v18  ;;  %v1069_v54 = vrot.slane %v1067_v8, 4  ;;  %v1074_v22 = vrot.slane %v1072_v10, 3  ;;  %v1077_v2 = vrot.slane %v1075_v31, 4  ;;  %v1084_v32 = vshll.u32 %v942_v41, 16 }
 0x171   : > { %6322 = vmatmul.mubr.msk.bf16.gmra.mrb[8].mxu1 %vm1332_vm3, %v1062_v42  ;;  %v1089_v38 = vshrl.u32 %v8044_v49, 16  ;;  %v3435_v14 = vsel %vm1774_vm4, %v3426_v62, %v3434_v1  ;;  %v1083_v34 = vrot.slane %v1081_v55, 3  ;;  %v1092_v29 = vshll.u32 %v8044_v49, 16  ;;  %v6979_v42 = vld [vmem:[#allocation9] ss:$0 sm:$0xff] }
 0x172   : > { %v1070_v21 = vor.u32 %v1069_v54, %v1066_v20  ;;  %6474 = vmatmul.mubr.msk.bf16.gmra.mrb[24].mxu0 %vm1332_vm3, %v3435_v14  ;;  %v1078_v56 = vor.u32 %v1077_v2, %v1074_v22  ;;  %v1086_v37 = vrot.slane %v1084_v32, 4  ;;  %v3437_v11 = vshrl.u32 %v2855_v30, 16  ;;  %v946_v20 = vld [vmem:[#allocation2 + $0x90] sm:$0xf8]  ;;  %v3716_v22 = vld [vmem:[#allocation2 + $0x20] sm:$0xf8] }
 0x173   : > { %v1091_v47 = vrot.slane %v1089_v38, 3  ;;  %v1094_v28 = vrot.slane %v1092_v29, 4  ;;  %v3440_v35 = vshll.u32 %v2855_v30, 16  ;;  %v3445_v50 = vshrl.u32 %v3196_v16, 16 }
 0x174   : > { %v3448_v36 = vshll.u32 %v3196_v16, 16  ;;  %v1079_v19 = vsel %vm960_vm5, %v1070_v21, %v1078_v56  ;;  %v1087_v43 = vor.u32 %v1086_v37, %v1083_v34  ;;  %v3439_v46 = vrot.slane %v3437_v11, 4  ;;  %v8237_v34 = vld [vmem:[#allocation2 + $0x28] sm:$0xf] }
 0x175   : > { %v758_v58 = vmul.f32 %v6979_v42, %v6106_v5  ;;  %6325 = vmatprep.mubr.msk.bf16.mxu1 %vm1332_vm3, %v1079_v19  ;;  %v1095_v49 = vor.u32 %v1094_v28, %v1091_v47  ;;  %v3442_v12 = vrot.slane %v3440_v35, 5  ;;  %v3447_v44 = vrot.slane %v3445_v50, 4 }
 0x176   : > { %v3450_v41 = vrot.slane %v3448_v36, 5  ;;  %v759_v9 = vmul.f32 %v6979_v42, %v6107_v63  ;;  %v1098_v8 = vshrl.u32 %v944_v7, 16  ;;  %v1101_v18 = vshll.u32 %v944_v7, 16 }
 0x177   : > { %v797_v39 = vadd.f32 %v6980_v0, %v758_v58  ;;  %v1096_v10 = vsel %vm960_vm5, %v1087_v43, %v1095_v49  ;;  %v3443_v31 = vor.u32 %v3442_v12, %v3439_v46  ;;  %v1106_v5 = vshrl.u32 %v8058_v33, 16  ;;  %v8241_v46 = vld [vmem:[#allocation2 + $0x38] sm:$0xf] }
 0x178   : > { %v3451_v62 = vor.u32 %v3450_v41, %v3447_v44  ;;  %v798_v1 = vadd.f32 %v6980_v0, %v759_v9  ;;  %v1100_v55 = vrot.slane %v1098_v8, 3  ;;  %v1103_v30 = vrot.slane %v1101_v18, 4  ;;  %v948_v0 = vld [vmem:[#allocation2 + $0xa0] sm:$0xf8] }
 0x179   : > { %6326 = vmatmul.mubr.msk.bf16.gmra.mrb[12].mxu1 %vm1332_vm3, %v1096_v10  ;;  %v829_v54 = vmax.f32 %v797_v39, 0.0  ;;  %v1108_v63 = vrot.slane %v1106_v5, 3  ;;  %v1109_v2 = vshll.u32 %v8058_v33, 16  ;;  %v1115_v32 = vshrl.u32 %v946_v20, 16  ;;  %v3718_v33 = vld [vmem:[#allocation2 + $0x30] sm:$0xf8] }
 0x17a   : > { %v3452_v17 = vsel %vm1774_vm4, %v3443_v31, %v3451_v62  ;;  %v830_v38 = vmax.f32 %v798_v1, 0.0  ;;  %v1104_v16 = vor.u32 %v1103_v30, %v1100_v55  ;;  %v1118_v14 = vshll.u32 %v946_v20, 16  ;;  %v950_v1 = vld [vmem:[#allocation2 + $0xb0] sm:$0xf8] }
 0x17b   : > { %6477 = vmatprep.mubr.msk.bf16.mxu0 %vm1332_vm3, %v3452_v17  ;;  %v1123_v21 = vshrl.u32 %v8064_v13, 16  ;;  %v1111_v29 = vrot.slane %v1109_v2, 4  ;;  %v1117_v56 = vrot.slane %v1115_v32, 3  ;;  %v1126_v37 = vshll.u32 %v8064_v13, 16 }
 0x17c   : > { %v3749_v47 = vshrl.u32 %v3716_v22, 16  ;;  %v846_v11 = vpack.c.bf16 %v830_v38, %v829_v54  ;;  %v1120_v28 = vrot.slane %v1118_v14, 4  ;;  %v3752_v50 = vshll.u32 %v3716_v22, 16 }
 0x17d   : > { %v1125_v35 = vrot.slane %v1123_v21, 3  ;;  %v1112_v36 = vor.u32 %v1111_v29, %v1108_v63  ;;  %v1128_v7 = vrot.slane %v1126_v37, 4  ;;  %v3757_v43 = vshrl.u32 %v8237_v34, 16 }
 0x17e   : > { %v3751_v19 = vrot.slane %v3749_v47, 3  ;;  %v878_v42 = vrot.slane %v846_v11, 4  ;;  %v1121_v58 = vor.u32 %v1120_v28, %v1117_v56  ;;  %v3754_v49 = vrot.slane %v3752_v50, 4 }
 0x17f   : > { %v3760_v12 = vshll.u32 %v8237_v34, 16  ;;  %v1113_v13 = vsel %vm960_vm5, %v1104_v16, %v1112_v36  ;;  %v1129_v44 = vor.u32 %v1128_v7, %v1125_v35  ;;  %v3759_v41 = vrot.slane %v3757_v43, 3 }
 0x180   : > { %v3766_v9 = vshrl.u32 %v3718_v33, 16  ;;  %926 = vst.msk [vmem:[#allocation2 + $0x100] sm:$0xf0] %vm581_vm1, %v878_v42  ;;  %6329 = vmatprep.mubr.msk.bf16.mxu1 %vm1332_vm3, %v1113_v13  ;;  %v3755_v39 = vor.u32 %v3754_v49, %v3751_v19  ;;  %v3769_v18 = vshll.u32 %v3718_v33, 16  ;;  %v3774_v20 = vshrl.u32 %v8241_v46, 16 }
 0x181   : > { %927 = vst.msk [vmem:[#allocation2 + $0x108] sm:$0xf] %vm562_vm0, %v878_v42  ;;  %v3762_v8 = vrot.slane %v3760_v12, 4  ;;  %v1130_v10 = vsel %vm960_vm5, %v1121_v58, %v1129_v44  ;;  %v3777_v62 = vshll.u32 %v8241_v46, 16  ;;  %v8253_v5 = vsel %vm1282_vm2, %v8091_v51, 0 }
 0x182   : > { %v3768_v31 = vrot.slane %v3766_v9, 3  ;;  %6330 = vmatmul.mubr.msk.bf16.gmra.mrb[16].mxu1 %vm1332_vm3, %v1130_v10  ;;  %v3771_v55 = vrot.slane %v3769_v18, 4  ;;  %v3776_v30 = vrot.slane %v3774_v20, 3  ;;  %v1132_v22 = vshrl.u32 %v948_v0, 16  ;;  %v3720_v51 = vld [vmem:[#allocation2 + $0x40] sm:$0xf8] }
 0x183   : > { %v3763_v54 = vor.u32 %v3762_v8, %v3759_v41  ;;  %v3779_v17 = vrot.slane %v3777_v62, 4  ;;  %v1135_v63 = vshll.u32 %v948_v0, 16  ;;  %v1140_v2 = vshrl.u32 %v8099_v48, 16  ;;  %v8265_v0 = vld [vmem:[#allocation2 + $0x48] sm:$0xf] }
 0x184   : > { %v1143_v32 = vshll.u32 %v8099_v48, 16  ;;  %v3772_v16 = vor.u32 %v3771_v55, %v3768_v31  ;;  %v1134_v14 = vrot.slane %v1132_v22, 3  ;;  %v1149_v21 = vshrl.u32 %v950_v1, 16  ;;  %v3722_v20 = vld [vmem:[#allocation2 + $0x50] sm:$0xf8] }
 0x185   : > { %v3764_v38 = vsel %vm960_vm5, %v3755_v39, %v3763_v54  ;;  %v3780_v29 = vor.u32 %v3779_v17, %v3776_v30  ;;  %v1137_v56 = vrot.slane %v1135_v63, 4  ;;  %v1142_v37 = vrot.slane %v1140_v2, 3  ;;  %v8268_v54 = vld [vmem:[#allocation2 + $0x58] sm:$0xf] }
 0x186   : > { %v1145_v47 = vrot.slane %v1143_v32, 4  ;;  %v1151_v11 = vrot.slane %v1149_v21, 3  ;;  %v1152_v28 = vshll.u32 %v950_v1, 16  ;;  %v1157_v35 = vshrl.u32 %v8111_v57, 16 }
 0x187   : > { %v1160_v50 = vshll.u32 %v8111_v57, 16  ;;  %v2856_v33 = vld [vmem:[#allocation2 + $0x100] sm:$0xf0]  ;;  %v8262_v48 = vsel %vm960_vm5, %v3772_v16, %v3780_v29  ;;  %v1138_v7 = vor.u32 %v1137_v56, %v1134_v14  ;;  %v3783_v43 = vshrl.u32 %v3720_v51, 16 }
 0x188   : > { %v3197_v36 = vld [vmem:[#allocation2 + $0x108] sm:$0x1f]  ;;  %v1146_v19 = vor.u32 %v1145_v47, %v1142_v37  ;;  %v3454_v42 = vshrl.u32 %v2856_v33, 16  ;;  %v3457_v58 = vshll.u32 %v2856_v33, 16  ;;  %v1154_v44 = vrot.slane %v1152_v28, 4 }
 0x189   : > { %v3462_v49 = vshrl.u32 %v3197_v36, 16  ;;  %v3465_v12 = vshll.u32 %v3197_v36, 16  ;;  %v1159_v41 = vrot.slane %v1157_v35, 3  ;;  %v1162_v9 = vrot.slane %v1160_v50, 4  ;;  %v952_v14 = vld [vmem:[#allocation2 + $0xc0] sm:$0xf8] }
 0x18a   : > { %v1147_v13 = vsel %vm960_vm5, %v1138_v7, %v1146_v19  ;;  %v3456_v57 = vrot.slane %v3454_v42, 4  ;;  %v3459_v39 = vrot.slane %v3457_v58, 5  ;;  %v1155_v10 = vor.u32 %v1154_v44, %v1151_v11  ;;  %v954_v35 = vld [vmem:[#allocation2 + $0xd0] sm:$0xf8] }
 0x18b   : > { %v3464_v8 = vrot.slane %v3462_v49, 4  ;;  %v3467_v18 = vrot.slane %v3465_v12, 5  ;;  %6333 = vmatprep.mubr.msk.bf16.mxu1 %vm1332_vm3, %v1147_v13  ;;  %v1163_v31 = vor.u32 %v1162_v9, %v1159_v41  ;;  %v3785_v62 = vrot.slane %v3783_v43, 3  ;;  %v3724_v41 = vld [vmem:[#allocation2 + $0x60] sm:$0xf8] }
 0x18c   : > { %v3786_v1 = vshll.u32 %v3720_v51, 16  ;;  %v3460_v55 = vor.u32 %v3459_v39, %v3456_v57  ;;  %v3791_v22 = vshrl.u32 %v8265_v0, 16  ;;  %v3794_v17 = vshll.u32 %v8265_v0, 16 }
 0x18d   : > { %v3468_v30 = vor.u32 %v3467_v18, %v3464_v8  ;;  %v1164_v63 = vsel %vm960_vm5, %v1155_v10, %v1163_v31  ;;  %v3800_v32 = vshrl.u32 %v3722_v20, 16  ;;  %v3803_v16 = vshll.u32 %v3722_v20, 16  ;;  %v8282_v8 = vld [vmem:[#allocation2 + $0x68] sm:$0xf] }
 0x18e   : > { %v3788_v2 = vrot.slane %v3786_v1, 4  ;;  %6334 = vmatmul.mubr.msk.bf16.gmra.mrb[20].mxu1 %vm1332_vm3, %v1164_v63  ;;  %v3793_v29 = vrot.slane %v3791_v22, 3  ;;  %v3796_v51 = vrot.slane %v3794_v17, 4  ;;  %v3808_v56 = vshrl.u32 %v8268_v54, 16  ;;  %v8287_v22 = vld [vmem:[#allocation2 + $0x78] sm:$0xf] }
 0x18f   : > { %v3469_v21 = vsel %vm1774_vm4, %v3460_v55, %v3468_v30  ;;  %v3802_v47 = vrot.slane %v3800_v32, 3  ;;  %v3805_v11 = vrot.slane %v3803_v16, 4  ;;  %v3811_v28 = vshll.u32 %v8268_v54, 16  ;;  %v3726_v30 = vld [vmem:[#allocation2 + $0x70] sm:$0xf8] }
 0x190   : > { %6478 = vmatmul.mubr.msk.bf16.gmra.mrb[28].mxu0 %vm1332_vm3, %v3469_v21  ;;  %v3789_v37 = vor.u32 %v3788_v2, %v3785_v62  ;;  %v3797_v50 = vor.u32 %v3796_v51, %v3793_v29  ;;  %v3810_v33 = vrot.slane %v3808_v56, 3  ;;  %v1166_v36 = vshrl.u32 %v952_v14, 16  ;;  %v8290_v16 = vld [vmem:[#allocation12 + $0x20] sm:$0xf] }
 0x191   : > { %6483 = vmatprep.mubr.msk.bf16.mxu0 %vm1332_vm3, %v3764_v38  ;;  %v1169_v7 = vshll.u32 %v952_v14, 16  ;;  %v3806_v19 = vor.u32 %v3805_v11, %v3802_v47  ;;  %v3813_v43 = vrot.slane %v3811_v28, 4  ;;  %v1174_v42 = vshrl.u32 %v8131_v45, 16  ;;  %v956_v51 = vld [vmem:[#allocation2 + $0xe0] sm:$0xf8] }
 0x192   : > { %v1177_v58 = vshll.u32 %v8131_v45, 16  ;;  %v3798_v49 = vsel %vm960_vm5, %v3789_v37, %v3797_v50  ;;  %v1168_v12 = vrot.slane %v1166_v36, 3  ;;  %v1183_v44 = vshrl.u32 %v954_v35, 16 }
 0x193   : > { %v1171_v13 = vrot.slane %v1169_v7, 4  ;;  %v3814_v9 = vor.u32 %v3813_v43, %v3810_v33  ;;  %v1176_v57 = vrot.slane %v1174_v42, 3  ;;  %v1186_v38 = vshll.u32 %v954_v35, 16 }
 0x194   : > { %v1179_v39 = vrot.slane %v1177_v58, 4  ;;  %v1185_v20 = vrot.slane %v1183_v44, 3  ;;  %v1191_v10 = vshrl.u32 %v8138_v4, 16  ;;  %v1194_v31 = vshll.u32 %v8138_v4, 16 }
 0x195   : > { %v1172_v18 = vor.u32 %v1171_v13, %v1168_v12  ;;  %v3815_v45 = vsel %vm960_vm5, %v3806_v19, %v3814_v9  ;;  %v1188_v1 = vrot.slane %v1186_v38, 4  ;;  %v3817_v55 = vshrl.u32 %v3724_v41, 16  ;;  %v958_v19 = vld [vmem:[#allocation2 + $0xf0] sm:$0xf8] }
 0x196   : > { %v1180_v62 = vor.u32 %v1179_v39, %v1176_v57  ;;  %v1193_v17 = vrot.slane %v1191_v10, 3  ;;  %v1196_v63 = vrot.slane %v1194_v31, 4  ;;  %v3820_v2 = vshll.u32 %v3724_v41, 16 }
 0x197   : > { %v3825_v32 = vshrl.u32 %v8282_v8, 16  ;;  %v1189_v14 = vor.u32 %v1188_v1, %v1185_v20  ;;  %v3819_v21 = vrot.slane %v3817_v55, 3  ;;  %v3828_v29 = vshll.u32 %v8282_v8, 16  ;;  %v8308_v1 = vld [vmem:[#allocation2 + $0x88] sm:$0xf] }
 0x198   : > { %6484 = vmatmul.mubr.msk.bf16.vlgmr.msra.gmra.mrb[0].mxu0 %vm1332_vm3, %v8262_v48  ;;  %v1181_v4 = vsel %vm960_vm5, %v1172_v18, %v1180_v62  ;;  %v1197_v56 = vor.u32 %v1196_v63, %v1193_v17  ;;  %v3822_v37 = vrot.slane %v3820_v2, 4  ;;  %v3834_v11 = vshrl.u32 %v3726_v30, 16  ;;  %v3728_v18 = vld [vmem:[#allocation2 + $0x80] sm:$0xf8] }
 0x199   : > { %6516 = vmatpush3.bf16.msra.mxu0 %v8253_v5  ;;  %6487 = vmatprep.mubr.msk.bf16.mxu0 %vm1332_vm3, %v3798_v49  ;;  %v3827_v47 = vrot.slane %v3825_v32, 3  ;;  %v3830_v28 = vrot.slane %v3828_v29, 4  ;;  %v3837_v35 = vshll.u32 %v3726_v30, 16  ;;  %v3842_v48 = vshrl.u32 %v8287_v22, 16 }
 0x19a   : > { %6337 = vmatprep.mubr.msk.bf16.mxu1 %vm1332_vm3, %v1181_v4  ;;  %v3845_v50 = vshll.u32 %v8287_v22, 16  ;;  %6850 = vmatprep.subr.msk.bf16.mxu0 %vm1282_vm2, %v8290_v16  ;;  %v1198_v33 = vsel %vm960_vm5, %v1189_v14, %v1197_v56  ;;  %v3823_v5 = vor.u32 %v3822_v37, %v3819_v21  ;;  %v3836_v36 = vrot.slane %v3834_v11, 3  ;;  %v3730_v14 = vld [vmem:[#allocation2 + $0x90] sm:$0xf8] }
 0x19b   : > { %v1200_v7 = vshrl.u32 %v956_v51, 16  ;;  %6338 = vmatmul.mubr.msk.bf16.gmra.mrb[24].mxu1 %vm1332_vm3, %v1198_v33  ;;  %v3831_v43 = vor.u32 %v3830_v28, %v3827_v47  ;;  %v3839_v42 = vrot.slane %v3837_v35, 4  ;;  %v3844_v58 = vrot.slane %v3842_v48, 3 }
 0x19c   : > { %v3847_v49 = vrot.slane %v3845_v50, 4  ;;  %v1203_v13 = vshll.u32 %v956_v51, 16  ;;  %v1208_v44 = vshrl.u32 %v8169_v27, 16  ;;  %v1211_v41 = vshll.u32 %v8169_v27, 16 }
 0x19d   : > { %v1202_v12 = vrot.slane %v1200_v7, 3  ;;  %v3832_v9 = vsel %vm960_vm5, %v3823_v5, %v3831_v43  ;;  %v3840_v57 = vor.u32 %v3839_v42, %v3836_v36  ;;  %v1217_v38 = vshrl.u32 %v958_v19, 16 }
 0x19e   : > { %v3848_v39 = vor.u32 %v3847_v49, %v3844_v58  ;;  %v1205_v20 = vrot.slane %v1203_v13, 4  ;;  %v1210_v10 = vrot.slane %v1208_v44, 3  ;;  %v1213_v31 = vrot.slane %v1211_v41, 4 }
 0x19f   : > { %v1220_v62 = vshll.u32 %v958_v19, 16  ;;  %v1219_v30 = vrot.slane %v1217_v38, 3  ;;  %v1225_v17 = vshrl.u32 %v8173_v61, 16  ;;  %v1228_v27 = vshll.u32 %v8173_v61, 16  ;;  %v1758_v19 = vld [vmem:[#allocation2 + $0x8] sm:$0x1f] }
 0x1a0   : > { %6488 = vmatmul.mubr.msk.bf16.gmra.mrb[4].mxu0 %vm1332_vm3, %v3815_v45  ;;  %v3849_v55 = vsel %vm960_vm5, %v3840_v57, %v3848_v39  ;;  %v1206_v63 = vor.u32 %v1205_v20, %v1202_v12  ;;  %v1214_v2 = vor.u32 %v1213_v31, %v1210_v10  ;;  %v3851_v4 = vshrl.u32 %v3728_v18, 16  ;;  %v8316_v45 = vld [vmem:[#allocation2 + $0x98] sm:$0xf]  ;;  %v3732_v20 = vld [vmem:[#allocation2 + $0xa0] sm:$0xf8] }
 0x1a1   : > { %6491 = vmatprep.mubr.msk.bf16.mxu0 %vm1332_vm3, %v3832_v9  ;;  %v1222_v32 = vrot.slane %v1220_v62, 4  ;;  %v1227_v21 = vrot.slane %v1225_v17, 3  ;;  %v1230_v29 = vrot.slane %v1228_v27, 4  ;;  %v3854_v51 = vshll.u32 %v3728_v18, 16  ;;  %v1759_v12 = vld [vmem:[#allocation2 + $0x18] sm:$0x1f] }
 0x1a2   : > { %v3859_v56 = vshrl.u32 %v8308_v1, 16  ;;  %v1215_v37 = vsel %vm960_vm5, %v1206_v63, %v1214_v2  ;;  %v3853_v11 = vrot.slane %v3851_v4, 3  ;;  %v3862_v61 = vshll.u32 %v8308_v1, 16 }
 0x1a3   : > { %v1223_v47 = vor.u32 %v1222_v32, %v1219_v30  ;;  %6341 = vmatprep.mubr.msk.bf16.mxu1 %vm1332_vm3, %v1215_v37  ;;  %v1231_v28 = vor.u32 %v1230_v29, %v1227_v21  ;;  %v3856_v35 = vrot.slane %v3854_v51, 4  ;;  %v3868_v50 = vshrl.u32 %v3730_v14, 16  ;;  %v8333_v30 = vld [vmem:[#allocation2 + $0xa8] sm:$0xf]  ;;  %v8339_v29 = vld [vmem:[#allocation2 + $0xb8] sm:$0xf] }
 0x1a4   : > { %v3861_v48 = vrot.slane %v3859_v56, 3  ;;  %v3864_v33 = vrot.slane %v3862_v61, 4  ;;  %v3871_v5 = vshll.u32 %v3730_v14, 16  ;;  %v3876_v36 = vshrl.u32 %v8316_v45, 16 }
 0x1a5   : > { %v3879_v7 = vshll.u32 %v8316_v45, 16  ;;  %v1232_v43 = vsel %vm960_vm5, %v1223_v47, %v1231_v28  ;;  %v3857_v42 = vor.u32 %v3856_v35, %v3853_v11  ;;  %v3870_v58 = vrot.slane %v3868_v50, 3 }
 0x1a6   : > { %v1778_v49 = vrot.slane %v1776_v25, 4  ;;  %6342 = vmatmul.mubr.msk.bf16.gmra.mrb[28].mxu1 %vm1332_vm3, %v1232_v43  ;;  %v3865_v13 = vor.u32 %v3864_v33, %v3861_v48  ;;  %v3873_v44 = vrot.slane %v3871_v5, 4  ;;  %v3878_v41 = vrot.slane %v3876_v36, 3  ;;  %v1760_v48 = vld [vmem:[#allocation2 + $0x28] sm:$0x1f] }
 0x1a7   : > { %v3881_v9 = vrot.slane %v3879_v7, 4  ;;  %v1781_v57 = vrot.slane %v1779_v26, 5  ;;  %v1784_v39 = vshrl.u32 %v1758_v19, 16  ;;  %v1787_v38 = vshll.u32 %v1758_v19, 16  ;;  %v3734_v26 = vld [vmem:[#allocation2 + $0xb0] sm:$0xf8] }
 0x1a8   : > { %6492 = vmatmul.mubr.msk.bf16.gmra.mrb[8].mxu0 %vm1332_vm3, %v3849_v55  ;;  %v1799_v18 = vor.u32 %v7910_v60, %v7908_v59  ;;  %v3866_v25 = vsel %vm960_vm5, %v3857_v42, %v3865_v13  ;;  %v3874_v10 = vor.u32 %v3873_v44, %v3870_v58  ;;  %v1801_v62 = vshrl.u32 %v1759_v12, 16  ;;  %v6981_v43 = vld [vmem:[#allocation2 + $0x20] sm:$0xf0]  ;;  %v1761_v44 = vld [vmem:[#allocation2 + $0x38] sm:$0x1f] }
 0x1a9   : > { %v3882_v31 = vor.u32 %v3881_v9, %v3878_v41  ;;  %6495 = vmatprep.mubr.msk.bf16.mxu0 %vm1332_vm3, %v3866_v25  ;;  %v1782_v17 = vor.u32 %v1781_v57, %v1778_v49  ;;  %v1786_v55 = vrot.slane %v1784_v39, 4  ;;  %v1789_v27 = vrot.slane %v1787_v38, 5  ;;  %v3736_v38 = vld [vmem:[#allocation2 + $0xc0] sm:$0xf8] }
 0x1aa   : > { %v1804_v15 = vshll.u32 %v1759_v12, 16  ;;  %v1803_v2 = vrot.slane %v1801_v62, 4  ;;  %v3885_v32 = vshrl.u32 %v3732_v20, 16  ;;  %v3888_v59 = vshll.u32 %v3732_v20, 16  ;;  %v6983_v62 = vld [vmem:[#allocation12 + $0x10] sm:$0xf] }
 0x1ab   : > { %v3883_v63 = vsel %vm960_vm5, %v3874_v10, %v3882_v31  ;;  %v1790_v60 = vor.u32 %v1789_v27, %v1786_v55  ;;  %v3893_v14 = vshrl.u32 %v8333_v30, 16  ;;  %v3896_v21 = vshll.u32 %v8333_v30, 16  ;;  %v6982_v10 = vld [vmem:[#allocation2 + $0x30] sm:$0xf0] }
 0x1ac   : > { %v1806_v4 = vrot.slane %v1804_v15, 5  ;;  %v3887_v51 = vrot.slane %v3885_v32, 3  ;;  %v3890_v56 = vrot.slane %v3888_v59, 4  ;;  %v2646_v37 = vsel %vm1282_vm2, %v8195_v3, 0 }
 0x1ad   : > { %v3902_v47 = vshrl.u32 %v3734_v26, 16  ;;  %v1791_v11 = vsel %vm1774_vm4, %v1782_v17, %v1790_v60  ;;  %v3895_v28 = vrot.slane %v3893_v14, 3  ;;  %v3898_v35 = vrot.slane %v3896_v21, 4  ;;  %v3738_v60 = vld [vmem:[#allocation2 + $0xd0] sm:$0xf8] }
 0x1ae   : > { %v1807_v61 = vor.u32 %v1806_v4, %v1803_v2  ;;  %6347 = vmatprep.mubr.msk.bf16.mxu1 %vm1332_vm3, %v1791_v11  ;;  %v3891_v50 = vor.u32 %v3890_v56, %v3887_v51  ;;  %v3905_v5 = vshll.u32 %v3734_v26, 16  ;;  %v3910_v36 = vshrl.u32 %v8339_v29, 16  ;;  %v8353_v26 = vld [vmem:[#allocation2 + $0xc8] sm:$0xf] }
 0x1af   : > { %v3904_v33 = vrot.slane %v3902_v47, 3  ;;  %v3899_v19 = vor.u32 %v3898_v35, %v3895_v28  ;;  %v3913_v3 = vshll.u32 %v8339_v29, 16  ;;  %v1810_v42 = vshrl.u32 %v6981_v43, 16 }
 0x1b0   : > { %6496 = vmatmul.mubr.msk.bf16.gmra.mrb[12].mxu0 %vm1332_vm3, %v3883_v63  ;;  %v1808_v7 = vsel %vm1774_vm4, %v1799_v18, %v1807_v61  ;;  %v3907_v58 = vrot.slane %v3905_v5, 4  ;;  %v3912_v49 = vrot.slane %v3910_v36, 3  ;;  %v1813_v12 = vshll.u32 %v6981_v43, 16  ;;  %v8357_v61 = vld [vmem:[#allocation2 + $0xd8] sm:$0xf] }
 0x1b1   : > { %6348 = vmatmul.mubr.msk.bf16.vlgmr.msra.gmra.mrb[0].mxu1 %vm1332_vm3, %v1808_v7  ;;  %v1818_v13 = vshrl.u32 %v1760_v48, 16  ;;  %v3900_v41 = vsel %vm960_vm5, %v3891_v50, %v3899_v19  ;;  %v3915_v9 = vrot.slane %v3913_v3, 4  ;;  %v1812_v57 = vrot.slane %v1810_v42, 4 }
 0x1b2   : > { %6380 = vmatpush3.bf16.msra.mxu1 %v2646_v37  ;;  %v1821_v39 = vshll.u32 %v1760_v48, 16  ;;  %6499 = vmatprep.mubr.msk.bf16.mxu0 %vm1332_vm3, %v3900_v41  ;;  %v3908_v18 = vor.u32 %v3907_v58, %v3904_v33  ;;  %v1815_v20 = vrot.slane %v1813_v12, 5  ;;  %v1827_v31 = vshrl.u32 %v6982_v10, 16  ;;  %v1762_v58 = vld [vmem:[#allocation2 + $0x48] sm:$0x1f] }
 0x1b3   : > { %v1820_v25 = vrot.slane %v1818_v13, 4  ;;  %6846 = vmatprep.subr.msk.bf16.mxu1 %vm1282_vm2, %v6983_v62  ;;  %v3916_v17 = vor.u32 %v3915_v9, %v3912_v49  ;;  %v1830_v27 = vshll.u32 %v6982_v10, 16  ;;  %v1835_v15 = vshrl.u32 %v1761_v44, 16 }
 0x1b4   : > { %v1823_v55 = vrot.slane %v1821_v39, 5  ;;  %v1816_v63 = vor.u32 %v1815_v20, %v1812_v57  ;;  %v1829_v2 = vrot.slane %v1827_v31, 4  ;;  %v1838_v32 = vshll.u32 %v1761_v44, 16  ;;  %v6984_v44 = vld [vmem:[#allocation2 + $0x40] sm:$0xf0] }
 0x1b5   : > { %v3919_v59 = vshrl.u32 %v3736_v38, 16  ;;  %v3917_v4 = vsel %vm960_vm5, %v3908_v18, %v3916_v17  ;;  %v1832_v21 = vrot.slane %v1830_v27, 5  ;;  %v1837_v51 = vrot.slane %v1835_v15, 4  ;;  %v1763_v18 = vld [vmem:[#allocation2 + $0x58] sm:$0x1f] }
 0x1b6   : > { %v1824_v14 = vor.u32 %v1823_v55, %v1820_v25  ;;  %v1840_v56 = vrot.slane %v1838_v32, 5  ;;  %v3922_v47 = vshll.u32 %v3736_v38, 16  ;;  %v3927_v11 = vshrl.u32 %v8353_v26, 16  ;;  %v6985_v27 = vld [vmem:[#allocation2 + $0x50] sm:$0xf0] }
 0x1b7   : > { %v3921_v37 = vrot.slane %v3919_v59, 3  ;;  %v1833_v35 = vor.u32 %v1832_v21, %v1829_v2  ;;  %v3930_v48 = vshll.u32 %v8353_v26, 16  ;;  %v3936_v50 = vshrl.u32 %v3738_v60, 16 }
 0x1b8   : > { %6500 = vmatmul.mubr.msk.bf16.gmra.mrb[16].mxu0 %vm1332_vm3, %v3917_v4  ;;  %v1825_v28 = vsel %vm1774_vm4, %v1816_v63, %v1824_v14  ;;  %v1841_v33 = vor.u32 %v1840_v56, %v1837_v51  ;;  %v3924_v5 = vrot.slane %v3922_v47, 4  ;;  %v3929_v36 = vrot.slane %v3927_v11, 3  ;;  %v3740_v63 = vld [vmem:[#allocation2 + $0xe0] sm:$0xf8]  ;;  %v8369_v4 = vld [vmem:[#allocation2 + $0xe8] sm:$0xf] }
 0x1b9   : > { %6351 = vmatprep.mubr.msk.bf16.mxu1 %vm1332_vm3, %v1825_v28  ;;  %v3939_v7 = vshll.u32 %v3738_v60, 16  ;;  %v3932_v19 = vrot.slane %v3930_v48, 4  ;;  %v3938_v3 = vrot.slane %v3936_v50, 3  ;;  %v3944_v43 = vshrl.u32 %v8357_v61, 16 }
 0x1ba   : > { %v3947_v42 = vshll.u32 %v8357_v61, 16  ;;  %v1842_v49 = vsel %vm1774_vm4, %v1833_v35, %v1841_v33  ;;  %v3925_v12 = vor.u32 %v3924_v5, %v3921_v37  ;;  %v1844_v41 = vshrl.u32 %v6984_v44, 16  ;;  %v3742_v37 = vld [vmem:[#allocation2 + $0xf0] sm:$0xf8] }
 0x1bb   : > { %v3941_v13 = vrot.slane %v3939_v7, 4  ;;  %6352 = vmatmul.mubr.msk.bf16.gmra.mrb[4].mxu1 %vm1332_vm3, %v1842_v49  ;;  %v3933_v9 = vor.u32 %v3932_v19, %v3929_v36  ;;  %v3946_v57 = vrot.slane %v3944_v43, 3  ;;  %v1847_v38 = vshll.u32 %v6984_v44, 16  ;;  %v8375_v36 = vld [vmem:[#allocation2 + $0xf8] sm:$0xf] }
 0x1bc   : > { %v3949_v39 = vrot.slane %v3947_v42, 4  ;;  %v1846_v25 = vrot.slane %v1844_v41, 4  ;;  %v1852_v10 = vshrl.u32 %v1762_v58, 16  ;;  %v1855_v31 = vshll.u32 %v1762_v58, 16 }
 0x1bd   : > { %v3942_v20 = vor.u32 %v3941_v13, %v3938_v3  ;;  %v3934_v62 = vsel %vm960_vm5, %v3925_v12, %v3933_v9  ;;  %v1849_v55 = vrot.slane %v1847_v38, 5  ;;  %v1861_v15 = vshrl.u32 %v6985_v27, 16 }
 0x1be   : > { %v3950_v17 = vor.u32 %v3949_v39, %v3946_v57  ;;  %6503 = vmatprep.mubr.msk.bf16.mxu0 %vm1332_vm3, %v3934_v62  ;;  %v1854_v2 = vrot.slane %v1852_v10, 4  ;;  %v1857_v32 = vrot.slane %v1855_v31, 5  ;;  %v1864_v59 = vshll.u32 %v6985_v27, 16  ;;  %v1764_v57 = vld [vmem:[#allocation2 + $0x68] sm:$0x1f] }
 0x1bf   : > { %v1869_v60 = vshrl.u32 %v1763_v18, 16  ;;  %v1850_v21 = vor.u32 %v1849_v55, %v1846_v25  ;;  %v1863_v51 = vrot.slane %v1861_v15, 4  ;;  %v1872_v56 = vshll.u32 %v1763_v18, 16  ;;  %v1765_v55 = vld [vmem:[#allocation2 + $0x78] sm:$0x1f] }
 0x1c0   : > { %v3951_v14 = vsel %vm960_vm5, %v3942_v20, %v3950_v17  ;;  %v1858_v47 = vor.u32 %v1857_v32, %v1854_v2  ;;  %v1866_v11 = vrot.slane %v1864_v59, 5  ;;  %v3953_v35 = vshrl.u32 %v3740_v63, 16  ;;  %v6986_v20 = vld [vmem:[#allocation2 + $0x60] sm:$0xf0] }
 0x1c1   : > { %6504 = vmatmul.mubr.msk.bf16.gmra.mrb[20].mxu0 %vm1332_vm3, %v3951_v14  ;;  %v1871_v28 = vrot.slane %v1869_v60, 4  ;;  %v1874_v48 = vrot.slane %v1872_v56, 5  ;;  %v3956_v50 = vshll.u32 %v3740_v63, 16  ;;  %v3961_v33 = vshrl.u32 %v8369_v4, 16  ;;  %v6987_v14 = vld [vmem:[#allocation2 + $0x70] sm:$0xf0] }
 0x1c2   : > { %v3964_v5 = vshll.u32 %v8369_v4, 16  ;;  %v1859_v7 = vsel %vm1774_vm4, %v1850_v21, %v1858_v47  ;;  %v1867_v19 = vor.u32 %v1866_v11, %v1863_v51  ;;  %v3955_v3 = vrot.slane %v3953_v35, 3  ;;  %v3744_v51 = vld [vmem:[#allocation2 + $0x100] sm:$0xf8] }
 0x1c3   : > { %v3970_v43 = vshrl.u32 %v3742_v37, 16  ;;  %6355 = vmatprep.mubr.msk.bf16.mxu1 %vm1332_vm3, %v1859_v7  ;;  %v1875_v42 = vor.u32 %v1874_v48, %v1871_v28  ;;  %v3958_v58 = vrot.slane %v3956_v50, 4  ;;  %v3963_v49 = vrot.slane %v3961_v33, 3  ;;  %v8385_v28 = vld [vmem:[#allocation2 + $0x108] sm:$0xf] }
 0x1c4   : > { %v3966_v12 = vrot.slane %v3964_v5, 4  ;;  %v3973_v44 = vshll.u32 %v3742_v37, 16  ;;  %v3978_v41 = vshrl.u32 %v8375_v36, 16  ;;  %v3981_v9 = vshll.u32 %v8375_v36, 16  ;;  %v3746_v5 = vld [vmem:[#allocation2 + $0x110] sm:$0xf8] }
 0x1c5   : > { %v3972_v13 = vrot.slane %v3970_v43, 3  ;;  %v1876_v39 = vsel %vm1774_vm4, %v1867_v19, %v1875_v42  ;;  %v3959_v38 = vor.u32 %v3958_v58, %v3955_v3  ;;  %v1878_v25 = vshrl.u32 %v6986_v20, 16 }
 0x1c6   : > { %v3967_v18 = vor.u32 %v3966_v12, %v3963_v49  ;;  %6356 = vmatmul.mubr.msk.bf16.gmra.mrb[8].mxu1 %vm1332_vm3, %v1876_v39  ;;  %v3975_v10 = vrot.slane %v3973_v44, 4  ;;  %v3980_v31 = vrot.slane %v3978_v41, 3  ;;  %v3983_v62 = vrot.slane %v3981_v9, 4 }
 0x1c7   : > { %v1881_v17 = vshll.u32 %v6986_v20, 16  ;;  %v1880_v15 = vrot.slane %v1878_v25, 4  ;;  %v1886_v63 = vshrl.u32 %v1764_v57, 16  ;;  %v1889_v2 = vshll.u32 %v1764_v57, 16 }
 0x1c8   : > { %v3968_v27 = vsel %vm960_vm5, %v3959_v38, %v3967_v18  ;;  %v3976_v32 = vor.u32 %v3975_v10, %v3972_v13  ;;  %v3984_v59 = vor.u32 %v3983_v62, %v3980_v31  ;;  %v1895_v21 = vshrl.u32 %v6987_v14, 16  ;;  %v8391_v13 = vld [vmem:[#allocation2 + $0x118] sm:$0xf] }
 0x1c9   : > { %6507 = vmatprep.mubr.msk.bf16.mxu0 %vm1332_vm3, %v3968_v27  ;;  %v1883_v60 = vrot.slane %v1881_v17, 5  ;;  %v1888_v56 = vrot.slane %v1886_v63, 4  ;;  %v1891_v37 = vrot.slane %v1889_v2, 5  ;;  %v1898_v47 = vshll.u32 %v6987_v14, 16  ;;  %v1766_v17 = vld [vmem:[#allocation2 + $0x88] sm:$0x1f] }
 0x1ca   : > { %v1903_v11 = vshrl.u32 %v1765_v55, 16  ;;  %v3985_v35 = vsel %vm960_vm5, %v3976_v32, %v3984_v59  ;;  %v1897_v50 = vrot.slane %v1895_v21, 4  ;;  %v1906_v33 = vshll.u32 %v1765_v55, 16  ;;  %v6988_v63 = vld [vmem:[#allocation2 + $0x80] sm:$0xf0] }
 0x1cb   : > { %v1884_v48 = vor.u32 %v1883_v60, %v1880_v15  ;;  %6508 = vmatmul.mubr.msk.bf16.gmra.mrb[24].mxu0 %vm1332_vm3, %v3985_v35  ;;  %v1892_v7 = vor.u32 %v1891_v37, %v1888_v56  ;;  %v1900_v19 = vrot.slane %v1898_v47, 5  ;;  %v3987_v43 = vshrl.u32 %v3744_v51, 16  ;;  %v1767_v21 = vld [vmem:[#allocation2 + $0x98] sm:$0x1f] }
 0x1cc   : > { %v1905_v3 = vrot.slane %v1903_v11, 4  ;;  %v1908_v42 = vrot.slane %v1906_v33, 5  ;;  %v3990_v58 = vshll.u32 %v3744_v51, 16  ;;  %v3995_v49 = vshrl.u32 %v8385_v28, 16 }
 0x1cd   : > { %v3998_v12 = vshll.u32 %v8385_v28, 16  ;;  %v1893_v44 = vsel %vm1774_vm4, %v1884_v48, %v1892_v7  ;;  %v1901_v41 = vor.u32 %v1900_v19, %v1897_v50  ;;  %v3989_v9 = vrot.slane %v3987_v43, 3  ;;  %v6989_v50 = vld [vmem:[#allocation2 + $0x90] sm:$0xf0] }
 0x1ce   : > { %v4004_v57 = vshrl.u32 %v3746_v5, 16  ;;  %6359 = vmatprep.mubr.msk.bf16.mxu1 %vm1332_vm3, %v1893_v44  ;;  %v1909_v39 = vor.u32 %v1908_v42, %v1905_v3  ;;  %v3992_v38 = vrot.slane %v3990_v58, 4  ;;  %v3997_v18 = vrot.slane %v3995_v49, 3  ;;  %v8403_v42 = vld [vmem:[#allocation2 + $0x30] sm:$0xf0] }
 0x1cf   : > { %v4000_v20 = vrot.slane %v3998_v12, 4  ;;  %v4007_v10 = vshll.u32 %v3746_v5, 16  ;;  %v4012_v31 = vshrl.u32 %v8391_v13, 16  ;;  %v4015_v62 = vshll.u32 %v8391_v13, 16  ;;  %v8401_v5 = vld [vmem:[#allocation2 + $0x20] sm:$0xf0] }
 0x1d0   : > { %v4006_v25 = vrot.slane %v4004_v57, 3  ;;  %v1910_v55 = vsel %vm1774_vm4, %v1901_v41, %v1909_v39  ;;  %v3993_v27 = vor.u32 %v3992_v38, %v3989_v9  ;;  %v1912_v2 = vshrl.u32 %v6988_v63, 16 }
 0x1d1   : > { %v4001_v15 = vor.u32 %v4000_v20, %v3997_v18  ;;  %6360 = vmatmul.mubr.msk.bf16.gmra.mrb[12].mxu1 %vm1332_vm3, %v1910_v55  ;;  %v4009_v32 = vrot.slane %v4007_v10, 4  ;;  %v4014_v59 = vrot.slane %v4012_v31, 3  ;;  %v4017_v60 = vrot.slane %v4015_v62, 4  ;;  %v1768_v10 = vld [vmem:[#allocation2 + $0xa8] sm:$0x1f] }
 0x1d2   : > { %v1915_v14 = vshll.u32 %v6988_v63, 16  ;;  %v1914_v56 = vrot.slane %v1912_v2, 4  ;;  %v1920_v37 = vshrl.u32 %v1766_v17, 16  ;;  %v1923_v47 = vshll.u32 %v1766_v17, 16  ;;  %v6990_v55 = vld [vmem:[#allocation2 + $0xa0] sm:$0xf0] }
 0x1d3   : > { %v4002_v51 = vsel %vm960_vm5, %v3993_v27, %v4001_v15  ;;  %v4010_v11 = vor.u32 %v4009_v32, %v4006_v25  ;;  %v4018_v35 = vor.u32 %v4017_v60, %v4014_v59  ;;  %v1929_v33 = vshrl.u32 %v6989_v50, 16  ;;  %v1769_v15 = vld [vmem:[#allocation2 + $0xb8] sm:$0x1f] }
 0x1d4   : > { %6511 = vmatprep.mubr.msk.bf16.mxu0 %vm1332_vm3, %v4002_v51  ;;  %v1917_v48 = vrot.slane %v1915_v14, 5  ;;  %v1922_v7 = vrot.slane %v1920_v37, 4  ;;  %v1925_v19 = vrot.slane %v1923_v47, 5  ;;  %v1932_v3 = vshll.u32 %v6989_v50, 16  ;;  %v6991_v14 = vld [vmem:[#allocation2 + $0xb0] sm:$0xf0] }
 0x1d5   : > { %v1937_v43 = vshrl.u32 %v1767_v21, 16  ;;  %v4019_v58 = vsel %vm960_vm5, %v4010_v11, %v4018_v35  ;;  %v1931_v12 = vrot.slane %v1929_v33, 4  ;;  %v1940_v44 = vshll.u32 %v1767_v21, 16  ;;  %v8418_v51 = vld [vmem:[#allocation2 + $0x40] sm:$0xf0] }
 0x1d6   : > { %v1918_v49 = vor.u32 %v1917_v48, %v1914_v56  ;;  %6512 = vmatmul.mubr.msk.bf16.gmra.mrb[28].mxu0 %vm1332_vm3, %v4019_v58  ;;  %v1926_v41 = vor.u32 %v1925_v19, %v1922_v7  ;;  %v1934_v9 = vrot.slane %v1932_v3, 5  ;;  %v4313_v39 = vrot.slane %v8401_v5, 4  ;;  %v8421_v11 = vld [vmem:[#allocation2 + $0x50] sm:$0xf0]  ;;  %v1770_v58 = vld [vmem:[#allocation2 + $0xc8] sm:$0x1f] }
 0x1d7   : > { %v1939_v57 = vrot.slane %v1937_v43, 4  ;;  %v1942_v38 = vrot.slane %v1940_v44, 5  ;;  %v4314_v18 = vrot.slane %v8237_v34, 4  ;;  %v4316_v20 = vrot.slane %v8403_v42, 4 }
 0x1d8   : > { %v4317_v25 = vrot.slane %v8241_v46, 4  ;;  %v1927_v31 = vsel %vm1774_vm4, %v1918_v49, %v1926_v41  ;;  %v1935_v62 = vor.u32 %v1934_v9, %v1931_v12  ;;  %v4944_v17 = vsel %vm1282_vm2, %v8290_v16, 0 }
 0x1d9   : > { %v1946_v27 = vshrl.u32 %v6990_v55, 16  ;;  %6363 = vmatprep.mubr.msk.bf16.mxu1 %vm1332_vm3, %v1927_v31  ;;  %v1943_v63 = vor.u32 %v1942_v38, %v1939_v57  ;;  %v4315_v2 = vsel %vm1282_vm2, %v4313_v39, %v4314_v18  ;;  %v1949_v32 = vshll.u32 %v6990_v55, 16  ;;  %v6992_v39 = vld [vmem:[#allocation2 + $0xc0] sm:$0xf0] }
 0x1da   : > { %v4318_v34 = vsel %vm1282_vm2, %v4316_v20, %v4317_v25  ;;  %6517 = vmatprep.mubr.msk.bf16.mxu0 %vm1332_vm3, %v4315_v2  ;;  %v1954_v59 = vshrl.u32 %v1768_v10, 16  ;;  %v1957_v60 = vshll.u32 %v1768_v10, 16  ;;  %v1963_v21 = vshrl.u32 %v6991_v14, 16  ;;  %v6993_v2 = vld [vmem:[#allocation2 + $0xd0] sm:$0xf0] }
 0x1db   : > { %v1948_v46 = vrot.slane %v1946_v27, 4  ;;  %v1944_v16 = vsel %vm1774_vm4, %v1935_v62, %v1943_v63  ;;  %v1951_v56 = vrot.slane %v1949_v32, 5  ;;  %v1966_v37 = vshll.u32 %v6991_v14, 16  ;;  %v1771_v62 = vld [vmem:[#allocation2 + $0xd8] sm:$0x1f] }
 0x1dc   : > { %v1971_v47 = vshrl.u32 %v1769_v15, 16  ;;  %6364 = vmatmul.mubr.msk.bf16.gmra.mrb[16].mxu1 %vm1332_vm3, %v1944_v16  ;;  %v1956_v35 = vrot.slane %v1954_v59, 4  ;;  %v1959_v48 = vrot.slane %v1957_v60, 5  ;;  %v1965_v50 = vrot.slane %v1963_v21, 4 }
 0x1dd   : > { %v1974_v33 = vshll.u32 %v1769_v15, 16  ;;  %v1952_v7 = vor.u32 %v1951_v56, %v1948_v46  ;;  %v1968_v19 = vrot.slane %v1966_v37, 5  ;;  %v4319_v43 = vrot.slane %v8418_v51, 4  ;;  %v8437_v46 = vld [vmem:[#allocation2 + $0x70] sm:$0xf0] }
 0x1de   : > { %v1973_v3 = vrot.slane %v1971_v47, 4  ;;  %6518 = vmatmul.mubr.msk.bf16.vlgmr.msra.gmra.mrb[0].mxu0 %vm1332_vm3, %v4318_v34  ;;  %v1960_v49 = vor.u32 %v1959_v48, %v1956_v35  ;;  %v4320_v44 = vrot.slane %v8265_v0, 4  ;;  %v4322_v41 = vrot.slane %v8421_v11, 4  ;;  %v1772_v35 = vld [vmem:[#allocation2 + $0xe8] sm:$0x1f] }
 0x1df   : > { %v1976_v12 = vrot.slane %v1974_v33, 5  ;;  %6550 = vmatpush3.bf16.msra.mxu0 %v4944_v17  ;;  %v1969_v9 = vor.u32 %v1968_v19, %v1965_v50  ;;  %v4323_v57 = vrot.slane %v8268_v54, 4  ;;  %v1980_v38 = vshrl.u32 %v6992_v39, 16  ;;  %v8434_v54 = vld [vmem:[#allocation2 + $0x60] sm:$0xf0] }
 0x1e0   : > { %v1983_v18 = vshll.u32 %v6992_v39, 16  ;;  %v1961_v20 = vsel %vm1774_vm4, %v1952_v7, %v1960_v49  ;;  %v4321_v10 = vsel %vm1282_vm2, %v4319_v43, %v4320_v44  ;;  %v1988_v31 = vshrl.u32 %v1770_v58, 16 }
 0x1e1   : > { %v1977_v25 = vor.u32 %v1976_v12, %v1973_v3  ;;  %6367 = vmatprep.mubr.msk.bf16.mxu1 %vm1332_vm3, %v1961_v20  ;;  %6521 = vmatprep.mubr.msk.bf16.mxu0 %vm1332_vm3, %v4321_v10  ;;  %v4324_v0 = vsel %vm1282_vm2, %v4322_v41, %v4323_v57  ;;  %v1982_v17 = vrot.slane %v1980_v38, 4  ;;  %v1991_v27 = vshll.u32 %v1770_v58, 16  ;;  %v6994_v58 = vld [vmem:[#allocation2 + $0xe0] sm:$0xf0] }
 0x1e2   : > { %v1985_v55 = vrot.slane %v1983_v18, 5  ;;  %v1990_v63 = vrot.slane %v1988_v31, 4  ;;  %v1997_v34 = vshrl.u32 %v6993_v2, 16  ;;  %v2000_v32 = vshll.u32 %v6993_v2, 16  ;;  %v6995_v18 = vld [vmem:[#allocation2 + $0xf0] sm:$0xf0] }
 0x1e3   : > { %v1978_v15 = vsel %vm1774_vm4, %v1969_v9, %v1977_v25  ;;  %v1993_v60 = vrot.slane %v1991_v27, 5  ;;  %v2005_v14 = vshrl.u32 %v1771_v62, 16  ;;  %v2008_v21 = vshll.u32 %v1771_v62, 16  ;;  %v1773_v9 = vld [vmem:[#allocation2 + $0xf8] sm:$0x1f] }
 0x1e4   : > { %v1986_v59 = vor.u32 %v1985_v55, %v1982_v17  ;;  %6368 = vmatmul.mubr.msk.bf16.gmra.mrb[20].mxu1 %vm1332_vm3, %v1978_v15  ;;  %v1999_v16 = vrot.slane %v1997_v34, 4  ;;  %v2002_v56 = vrot.slane %v2000_v32, 5  ;;  %v4325_v37 = vrot.slane %v8434_v54, 4  ;;  %v8450_v25 = vld [vmem:[#allocation2 + $0x80] sm:$0xf0] }
 0x1e5   : > { %v4326_v47 = vrot.slane %v8282_v8, 4  ;;  %v1994_v48 = vor.u32 %v1993_v60, %v1990_v63  ;;  %v2007_v50 = vrot.slane %v2005_v14, 4  ;;  %v2010_v33 = vrot.slane %v2008_v21, 5  ;;  %v2292_v63 = vld [vmem:[#allocation2 + $0x10] sm:$0xf8] }
 0x1e6   : > { %v4328_v7 = vrot.slane %v8437_v46, 4  ;;  %6522 = vmatmul.mubr.msk.bf16.gmra.mrb[4].mxu0 %vm1332_vm3, %v4324_v0  ;;  %v2003_v19 = vor.u32 %v2002_v56, %v1999_v16  ;;  %v4329_v43 = vrot.slane %v8287_v22, 4  ;;  %v2014_v49 = vshrl.u32 %v6994_v58, 16  ;;  %v8453_v0 = vld [vmem:[#allocation2 + $0x90] sm:$0xf0] }
 0x1e7   : > { %v4327_v3 = vsel %vm1282_vm2, %v4325_v37, %v4326_v47  ;;  %v1995_v12 = vsel %vm1774_vm4, %v1986_v59, %v1994_v48  ;;  %v2011_v44 = vor.u32 %v2010_v33, %v2007_v50  ;;  %v2017_v8 = vshll.u32 %v6994_v58, 16  ;;  %v2294_v56 = vld [vmem:[#allocation2 + $0x20] sm:$0xf8] }
 0x1e8   : > { %6525 = vmatprep.mubr.msk.bf16.mxu0 %vm1332_vm3, %v4327_v3  ;;  %v2022_v41 = vshrl.u32 %v1772_v35, 16  ;;  %6371 = vmatprep.mubr.msk.bf16.mxu1 %vm1332_vm3, %v1995_v12  ;;  %v4330_v57 = vsel %vm1282_vm2, %v4328_v7, %v4329_v43  ;;  %v2016_v39 = vrot.slane %v2014_v49, 4  ;;  %v2025_v38 = vshll.u32 %v1772_v35, 16  ;;  %v8472_v49 = vld [vmem:[#allocation2 + $0xb0] sm:$0xf0] }
 0x1e9   : > { %v2031_v20 = vshrl.u32 %v6995_v18, 16  ;;  %v2012_v22 = vsel %vm1774_vm4, %v2003_v19, %v2011_v44  ;;  %v2019_v10 = vrot.slane %v2017_v8, 5  ;;  %v2034_v62 = vshll.u32 %v6995_v18, 16  ;;  %v8465_v19 = vld [vmem:[#allocation2 + $0xa0] sm:$0xf0] }
 0x1ea   : > { %v2024_v31 = vrot.slane %v2022_v41, 4  ;;  %v2027_v17 = vrot.slane %v2025_v38, 5  ;;  %v2039_v27 = vshrl.u32 %v1773_v9, 16  ;;  %v2042_v15 = vshll.u32 %v1773_v9, 16  ;;  %v2296_v41 = vld [vmem:[#allocation2 + $0x30] sm:$0xf8] }
 0x1eb   : > { %v2033_v55 = vrot.slane %v2031_v20, 4  ;;  %v2020_v2 = vor.u32 %v2019_v10, %v2016_v39  ;;  %v2036_v34 = vrot.slane %v2034_v62, 5  ;;  %v4331_v32 = vrot.slane %v8450_v25, 4 }
 0x1ec   : > { %v4332_v59 = vrot.slane %v8308_v1, 4  ;;  %6372 = vmatmul.mubr.msk.bf16.gmra.mrb[24].mxu1 %vm1332_vm3, %v2012_v22  ;;  %v2028_v60 = vor.u32 %v2027_v17, %v2024_v31  ;;  %v2041_v14 = vrot.slane %v2039_v27, 4  ;;  %v2044_v21 = vrot.slane %v2042_v15, 5  ;;  %v2298_v22 = vld [vmem:[#allocation2 + $0x40] sm:$0xf8] }
 0x1ed   : > { %v4334_v16 = vrot.slane %v8453_v0, 4  ;;  %v2037_v37 = vor.u32 %v2036_v34, %v2033_v55  ;;  %v4335_v35 = vrot.slane %v8316_v45, 4  ;;  %v2325_v48 = vshrl.u32 %v2292_v63, 16  ;;  %v6996_v17 = vld [vmem:[#allocation2 + $0x38] sm:$0xf] }
 0x1ee   : > { %v4333_v47 = vsel %vm1282_vm2, %v4331_v32, %v4332_v59  ;;  %6526 = vmatmul.mubr.msk.bf16.gmra.mrb[8].mxu0 %vm1332_vm3, %v4330_v57  ;;  %v2029_v50 = vsel %vm1774_vm4, %v2020_v2, %v2028_v60  ;;  %v2045_v33 = vor.u32 %v2044_v21, %v2041_v14  ;;  %v2328_v1 = vshll.u32 %v2292_v63, 16  ;;  %v8485_v15 = vld [vmem:[#allocation2 + $0xc0] sm:$0xf0]  ;;  %v8488_v32 = vld [vmem:[#allocation2 + $0xd0] sm:$0xf0] }
 0x1ef   : > { %v2335_v7 = vrot.slane %v2333_v52, 3  ;;  %6375 = vmatprep.mubr.msk.bf16.mxu1 %vm1332_vm3, %v2029_v50  ;;  %6529 = vmatprep.mubr.msk.bf16.mxu0 %vm1332_vm3, %v4333_v47  ;;  %v4336_v3 = vsel %vm1282_vm2, %v4334_v16, %v4335_v35  ;;  %v2327_v43 = vrot.slane %v2325_v48, 3  ;;  %v2338_v45 = vrot.slane %v2336_v53, 4  ;;  %v6997_v21 = vld [vmem:[#allocation2 + $0x48] sm:$0xf] }
 0x1f0   : > { %v2342_v58 = vshrl.u32 %v2294_v56, 16  ;;  %v2046_v12 = vsel %vm1774_vm4, %v2037_v37, %v2045_v33  ;;  %v2330_v44 = vrot.slane %v2328_v1, 4  ;;  %v2345_v8 = vshll.u32 %v2294_v56, 16  ;;  %v2300_v56 = vld [vmem:[#allocation2 + $0x50] sm:$0xf8] }
 0x1f1   : > { %v2356_v52 = vor.u32 %v7933_v24, %v7931_v23  ;;  %v2339_v9 = vor.u32 %v2338_v45, %v2335_v7  ;;  %v4337_v39 = vrot.slane %v8465_v19, 4  ;;  %v4338_v38 = vrot.slane %v8333_v30, 4 }
 0x1f2   : > { %v2344_v57 = vrot.slane %v2342_v58, 3  ;;  %v2331_v18 = vor.u32 %v2330_v44, %v2327_v43  ;;  %v2347_v40 = vrot.slane %v2345_v8, 4  ;;  %v4340_v53 = vrot.slane %v8472_v49, 4 }
 0x1f3   : > { %v4341_v20 = vrot.slane %v8339_v29, 4  ;;  %v4339_v10 = vsel %vm1282_vm2, %v4337_v39, %v4338_v38  ;;  %v2359_v31 = vshrl.u32 %v2296_v41, 16  ;;  %v2362_v62 = vshll.u32 %v2296_v41, 16  ;;  %v6998_v38 = vld [vmem:[#allocation2 + $0x58] sm:$0xf] }
 0x1f4   : > { %v2367_v23 = vshrl.u32 %v6996_v17, 16  ;;  %6376 = vmatmul.mubr.msk.bf16.gmra.mrb[28].mxu1 %vm1332_vm3, %v2046_v12  ;;  %v2340_v24 = vsel %vm960_vm5, %v2331_v18, %v2339_v9  ;;  %v2348_v55 = vor.u32 %v2347_v40, %v2344_v57  ;;  %v2370_v27 = vshll.u32 %v6996_v17, 16  ;;  %v2302_v12 = vld [vmem:[#allocation2 + $0x60] sm:$0xf8] }
 0x1f5   : > { %v4342_v30 = vsel %vm1282_vm2, %v4340_v53, %v4341_v20  ;;  %6381 = vmatprep.mubr.msk.bf16.mxu1 %vm1332_vm3, %v2340_v24  ;;  %v2361_v29 = vrot.slane %v2359_v31, 3  ;;  %v2364_v63 = vrot.slane %v2362_v62, 4  ;;  %v2376_v34 = vshrl.u32 %v2298_v22, 16  ;;  %v8501_v20 = vld [vmem:[#allocation2 + $0xe0] sm:$0xf0] }
 0x1f6   : > { %v2369_v2 = vrot.slane %v2367_v23, 3  ;;  %6530 = vmatmul.mubr.msk.bf16.gmra.mrb[12].mxu0 %vm1332_vm3, %v4336_v3  ;;  %v2357_v59 = vsel %vm960_vm5, %v2348_v55, %v2356_v52  ;;  %v2372_v60 = vrot.slane %v2370_v27, 4  ;;  %v2379_v14 = vshll.u32 %v2298_v22, 16  ;;  %v6999_v31 = vld [vmem:[#allocation2 + $0x68] sm:$0xf] }
 0x1f7   : > { %v2384_v16 = vshrl.u32 %v6997_v21, 16  ;;  %6533 = vmatprep.mubr.msk.bf16.mxu0 %vm1332_vm3, %v4339_v10  ;;  %v2365_v37 = vor.u32 %v2364_v63, %v2361_v29  ;;  %v2378_v47 = vrot.slane %v2376_v34, 3  ;;  %v2387_v35 = vshll.u32 %v6997_v21, 16  ;;  %v8506_v23 = vld [vmem:[#allocation2 + $0xf0] sm:$0xf0] }
 0x1f8   : > { %v4343_v48 = vrot.slane %v8485_v15, 4  ;;  %v2373_v50 = vor.u32 %v2372_v60, %v2369_v2  ;;  %v2381_v33 = vrot.slane %v2379_v14, 4  ;;  %v4344_v7 = vrot.slane %v8353_v26, 4  ;;  %v2304_v63 = vld [vmem:[#allocation2 + $0x70] sm:$0xf8] }
 0x1f9   : > { %v2386_v1 = vrot.slane %v2384_v16, 3  ;;  %v2389_v3 = vrot.slane %v2387_v35, 4  ;;  %v4346_v43 = vrot.slane %v8488_v32, 4  ;;  %v4347_v45 = vrot.slane %v8357_v61, 4 }
 0x1fa   : > { %v2393_v58 = vshrl.u32 %v2300_v56, 16  ;;  %v2374_v44 = vsel %vm960_vm5, %v2365_v37, %v2373_v50  ;;  %v2382_v8 = vor.u32 %v2381_v33, %v2378_v47  ;;  %v4345_v52 = vsel %vm1282_vm2, %v4343_v48, %v4344_v7  ;;  %v7000_v33 = vld [vmem:[#allocation2 + $0x78] sm:$0xf] }
 0x1fb   : > { %v2396_v41 = vshll.u32 %v2300_v56, 16  ;;  %v2390_v9 = vor.u32 %v2389_v3, %v2386_v1  ;;  %v4348_v57 = vsel %vm1282_vm2, %v4346_v43, %v4347_v45  ;;  %v2401_v18 = vshrl.u32 %v6998_v38, 16 }
 0x1fc   : > { %v2395_v39 = vrot.slane %v2393_v58, 3  ;;  %6382 = vmatmul.mubr.msk.bf16.vlgmr.msra.gmra.mrb[0].mxu1 %vm1332_vm3, %v2357_v59  ;;  %v2404_v40 = vshll.u32 %v6998_v38, 16  ;;  %v2410_v53 = vshrl.u32 %v2302_v12, 16  ;;  %v2413_v61 = vshll.u32 %v2302_v12, 16  ;;  %v8520_v58 = vld [vmem:[#allocation2 + $0x110] sm:$0xf0] }
 0x1fd   : > { %v2398_v26 = vrot.slane %v2396_v41, 4  ;;  %6584 = vmatpush3.bf16.msra.mxu1 %v7810_v6  ;;  %6385 = vmatprep.mubr.msk.bf16.mxu1 %vm1332_vm3, %v2374_v44  ;;  %v2391_v22 = vsel %vm960_vm5, %v2382_v8, %v2390_v9  ;;  %v2403_v10 = vrot.slane %v2401_v18, 3  ;;  %v2418_v62 = vshrl.u32 %v6999_v31, 16  ;;  %v2308_v9 = vld [vmem:[#allocation2 + $0x90] sm:$0xf8] }
 0x1fe   : > { %v2421_v17 = vshll.u32 %v6999_v31, 16  ;;  %6534 = vmatmul.mubr.msk.bf16.gmra.mrb[16].mxu0 %vm1332_vm3, %v4342_v30  ;;  %v2406_v55 = vrot.slane %v2404_v40, 4  ;;  %v2412_v27 = vrot.slane %v2410_v53, 3  ;;  %v2415_v29 = vrot.slane %v2413_v61, 4  ;;  %v2306_v30 = vld [vmem:[#allocation2 + $0x80] sm:$0xf8] }
 0x1ff   : > { %v2399_v24 = vor.u32 %v2398_v26, %v2395_v39  ;;  %6537 = vmatprep.mubr.msk.bf16.mxu0 %vm1332_vm3, %v4345_v52  ;;  %v2420_v6 = vrot.slane %v2418_v62, 3  ;;  %v4349_v34 = vrot.slane %v8501_v20, 4  ;;  %v4350_v59 = vrot.slane %v8369_v4, 4  ;;  %v8517_v4 = vld [vmem:[#allocation2 + $0x100] sm:$0xf0] }
 0x200   : > { %v2423_v2 = vrot.slane %v2421_v17, 4  ;;  %v2407_v60 = vor.u32 %v2406_v55, %v2403_v10  ;;  %v2416_v14 = vor.u32 %v2415_v29, %v2412_v27  ;;  %v4352_v21 = vrot.slane %v8506_v23, 4  ;;  %v7001_v52 = vld [vmem:[#allocation2 + $0x88] sm:$0xf]  ;;  %v8527_v10 = vld [vmem:[#allocation2 + $0x98] sm:$0xf] }
 0x201   : > { %v4353_v16 = vrot.slane %v8375_v36, 4  ;;  %v4351_v37 = vsel %vm1282_vm2, %v4349_v34, %v4350_v59  ;;  %v2427_v47 = vshrl.u32 %v2304_v63, 16  ;;  %v2430_v35 = vshll.u32 %v2304_v63, 16  ;;  %v2310_v55 = vld [vmem:[#allocation2 + $0xa0] sm:$0xf8] }
 0x202   : > { %v2424_v56 = vor.u32 %v2423_v2, %v2420_v6  ;;  %v2408_v48 = vsel %vm960_vm5, %v2399_v24, %v2407_v60  ;;  %v2435_v1 = vshrl.u32 %v7000_v33, 16  ;;  %v2438_v7 = vshll.u32 %v7000_v33, 16  ;;  %v8534_v6 = vld [vmem:[#allocation2 + $0xa8] sm:$0xf] }
 0x203   : > { %v4354_v50 = vsel %vm1282_vm2, %v4352_v21, %v4353_v16  ;;  %v2429_v43 = vrot.slane %v2427_v47, 3  ;;  %v2432_v45 = vrot.slane %v2430_v35, 4  ;;  %v2444_v36 = vshrl.u32 %v2306_v30, 16  ;;  %v4606_v47 = vld [vmem:[#allocation2 + $0x28] sm:$0x1f] }
 0x204   : > { %v2425_v3 = vsel %vm960_vm5, %v2416_v14, %v2424_v56  ;;  %6386 = vmatmul.mubr.msk.bf16.gmra.mrb[4].mxu1 %vm1332_vm3, %v2391_v22  ;;  %v2437_v12 = vrot.slane %v2435_v1, 3  ;;  %v2440_v44 = vrot.slane %v2438_v7, 4  ;;  %v2447_v8 = vshll.u32 %v2306_v30, 16 }
 0x205   : > { %v2452_v41 = vshrl.u32 %v7001_v52, 16  ;;  %6389 = vmatprep.mubr.msk.bf16.mxu1 %vm1332_vm3, %v2408_v48  ;;  %v2433_v39 = vor.u32 %v2432_v45, %v2429_v43  ;;  %v2446_v38 = vrot.slane %v2444_v36, 3  ;;  %v2455_v18 = vshll.u32 %v7001_v52, 16 }
 0x206   : > { %v4355_v26 = vrot.slane %v8517_v4, 4  ;;  %6538 = vmatmul.mubr.msk.bf16.gmra.mrb[20].mxu0 %vm1332_vm3, %v4348_v57  ;;  %v2441_v40 = vor.u32 %v2440_v44, %v2437_v12  ;;  %v2449_v53 = vrot.slane %v2447_v8, 4  ;;  %v4356_v22 = vrot.slane %v8385_v28, 4 }
 0x207   : > { %v2454_v61 = vrot.slane %v2452_v41, 3  ;;  %6541 = vmatprep.mubr.msk.bf16.mxu0 %vm1332_vm3, %v4351_v37  ;;  %v2457_v31 = vrot.slane %v2455_v18, 4  ;;  %v4358_v62 = vrot.slane %v8520_v58, 4  ;;  %v4359_v17 = vrot.slane %v8391_v13, 4  ;;  %v4607_v41 = vld [vmem:[#allocation2 + $0x38] sm:$0x1f] }
 0x208   : > { %v2461_v24 = vshrl.u32 %v2308_v9, 16  ;;  %v2442_v27 = vsel %vm960_vm5, %v2433_v39, %v2441_v40  ;;  %v2450_v29 = vor.u32 %v2449_v53, %v2446_v38  ;;  %v4357_v57 = vsel %vm1282_vm2, %v4355_v26, %v4356_v22  ;;  %v2312_v18 = vld [vmem:[#allocation2 + $0xb0] sm:$0xf8] }
 0x209   : > { %v2464_v63 = vshll.u32 %v2308_v9, 16  ;;  %v2458_v28 = vor.u32 %v2457_v31, %v2454_v61  ;;  %v8537_v2 = vsel %vm1282_vm2, %v4358_v62, %v4359_v17  ;;  %v2469_v59 = vshrl.u32 %v8527_v10, 16 }
 0x20a   : > { %v2463_v34 = vrot.slane %v2461_v24, 3  ;;  %v2472_v13 = vshll.u32 %v8527_v10, 16  ;;  %v2478_v14 = vshrl.u32 %v2310_v55, 16  ;;  %v2481_v21 = vshll.u32 %v2310_v55, 16 }
 0x20b   : > { %v2466_v60 = vrot.slane %v2464_v63, 4  ;;  %v2459_v16 = vsel %vm960_vm5, %v2450_v29, %v2458_v28  ;;  %v2471_v30 = vrot.slane %v2469_v59, 3  ;;  %v2486_v56 = vshrl.u32 %v8534_v6, 16  ;;  %v2314_v29 = vld [vmem:[#allocation2 + $0xc0] sm:$0xf8] }
 0x20c   : > { %v2489_v37 = vshll.u32 %v8534_v6, 16  ;;  %6390 = vmatmul.mubr.msk.bf16.gmra.mrb[8].mxu1 %vm1332_vm3, %v2425_v3  ;;  %v2474_v48 = vrot.slane %v2472_v13, 4  ;;  %v2480_v33 = vrot.slane %v2478_v14, 3  ;;  %v2483_v1 = vrot.slane %v2481_v21, 4  ;;  %v8558_v59 = vld [vmem:[#allocation2 + $0xc8] sm:$0xf] }
 0x20d   : > { %v2467_v35 = vor.u32 %v2466_v60, %v2463_v34  ;;  %6393 = vmatprep.mubr.msk.bf16.mxu1 %vm1332_vm3, %v2442_v27  ;;  %v2488_v7 = vrot.slane %v2486_v56, 3  ;;  %v4623_v45 = vshrl.u32 %v8401_v5, 16  ;;  %v4626_v36 = vshll.u32 %v8401_v5, 16 }
 0x20e   : > { %v2491_v43 = vrot.slane %v2489_v37, 4  ;;  %6542 = vmatmul.mubr.msk.bf16.gmra.mrb[24].mxu0 %vm1332_vm3, %v4354_v50  ;;  %v2475_v12 = vor.u32 %v2474_v48, %v2471_v30  ;;  %v2484_v44 = vor.u32 %v2483_v1, %v2480_v33  ;;  %v4631_v8 = vshrl.u32 %v4606_v47, 16  ;;  %v8553_v50 = vld [vmem:[#allocation2 + $0xb8] sm:$0xf]  ;;  %v4608_v33 = vld [vmem:[#allocation2 + $0x48] sm:$0x1f] }
 0x20f   : > { %v4634_v52 = vshll.u32 %v4606_v47, 16  ;;  %6545 = vmatprep.mubr.msk.bf16.mxu0 %vm1332_vm3, %v4357_v57  ;;  %v4625_v9 = vrot.slane %v4623_v45, 4  ;;  %v4628_v39 = vrot.slane %v4626_v36, 5  ;;  %v4640_v38 = vshrl.u32 %v8403_v42, 16 }
 0x210   : > { %v2492_v3 = vor.u32 %v2491_v43, %v2488_v7  ;;  %v2476_v26 = vsel %vm960_vm5, %v2467_v35, %v2475_v12  ;;  %v4633_v40 = vrot.slane %v4631_v8, 4  ;;  %v4643_v5 = vshll.u32 %v8403_v42, 16 }
 0x211   : > { %v4636_v53 = vrot.slane %v4634_v52, 5  ;;  %v4629_v22 = vor.u32 %v4628_v39, %v4625_v9  ;;  %v4642_v31 = vrot.slane %v4640_v38, 4  ;;  %v4648_v62 = vshrl.u32 %v4607_v41, 16 }
 0x212   : > { %v2493_v61 = vsel %vm960_vm5, %v2484_v44, %v2492_v3  ;;  %v4645_v24 = vrot.slane %v4643_v5, 5  ;;  %v4651_v55 = vshll.u32 %v4607_v41, 16  ;;  %v2495_v27 = vshrl.u32 %v2312_v18, 16 }
 0x213   : > { %v4637_v17 = vor.u32 %v4636_v53, %v4633_v40  ;;  %v4650_v57 = vrot.slane %v4648_v62, 4  ;;  %v2498_v63 = vshll.u32 %v2312_v18, 16  ;;  %v2503_v28 = vshrl.u32 %v8553_v50, 16  ;;  %v2316_v40 = vld [vmem:[#allocation2 + $0xd0] sm:$0xf8] }
 0x214   : > { %v2506_v34 = vshll.u32 %v8553_v50, 16  ;;  %6394 = vmatmul.mubr.msk.bf16.gmra.mrb[12].mxu1 %vm1332_vm3, %v2459_v16  ;;  %v4646_v60 = vor.u32 %v4645_v24, %v4642_v31  ;;  %v4653_v13 = vrot.slane %v4651_v55, 5  ;;  %v2497_v14 = vrot.slane %v2495_v27, 3  ;;  %v8574_v62 = vld [vmem:[#allocation2 + $0xd8] sm:$0xf] }
 0x215   : > { %v4638_v42 = vsel %vm1774_vm4, %v4629_v22, %v4637_v17  ;;  %6397 = vmatprep.mubr.msk.bf16.mxu1 %vm1332_vm3, %v2476_v26  ;;  %v2500_v21 = vrot.slane %v2498_v63, 4  ;;  %v2505_v30 = vrot.slane %v2503_v28, 3  ;;  %v2512_v37 = vshrl.u32 %v2314_v29, 16  ;;  %v2318_v27 = vld [vmem:[#allocation2 + $0xe0] sm:$0xf8] }
 0x216   : > { %v2508_v56 = vrot.slane %v2506_v34, 4  ;;  %6546 = vmatmul.mubr.msk.bf16.gmra.mrb[28].mxu0 %vm1332_vm3, %v8537_v2  ;;  %v4654_v47 = vor.u32 %v4653_v13, %v4650_v57  ;;  %v2515_v35 = vshll.u32 %v2314_v29, 16  ;;  %v2520_v48 = vshrl.u32 %v8558_v59, 16  ;;  %v4609_v2 = vld [vmem:[#allocation2 + $0x58] sm:$0x1f] }
 0x217   : > { %v2523_v16 = vshll.u32 %v8558_v59, 16  ;;  %6551 = vmatprep.mubr.msk.bf16.mxu0 %vm1332_vm3, %v4638_v42  ;;  %v2501_v1 = vor.u32 %v2500_v21, %v2497_v14  ;;  %v2514_v43 = vrot.slane %v2512_v37, 3  ;;  %v4657_v45 = vshrl.u32 %v8418_v51, 16 }
 0x218   : > { %v2509_v7 = vor.u32 %v2508_v56, %v2505_v30  ;;  %v4655_v36 = vsel %vm1774_vm4, %v4646_v60, %v4654_v47  ;;  %v2517_v12 = vrot.slane %v2515_v35, 4  ;;  %v2522_v44 = vrot.slane %v2520_v48, 3 }
 0x219   : > { %v2525_v8 = vrot.slane %v2523_v16, 4  ;;  %v4659_v41 = vrot.slane %v4657_v45, 4  ;;  %v4660_v3 = vshll.u32 %v8418_v51, 16  ;;  %v4665_v9 = vshrl.u32 %v4608_v33, 16 }
 0x21a   : > { %v2510_v52 = vsel %vm960_vm5, %v2501_v1, %v2509_v7  ;;  %v2518_v39 = vor.u32 %v2517_v12, %v2514_v43  ;;  %v4668_v18 = vshll.u32 %v4608_v33, 16  ;;  %v4674_v26 = vshrl.u32 %v8421_v11, 16  ;;  %v4610_v7 = vld [vmem:[#allocation2 + $0x68] sm:$0x1f] }
 0x21b   : > { %v2526_v38 = vor.u32 %v2525_v8, %v2522_v44  ;;  %v4662_v53 = vrot.slane %v4660_v3, 5  ;;  %v4667_v5 = vrot.slane %v4665_v9, 4  ;;  %v4677_v22 = vshll.u32 %v8421_v11, 16 }
 0x21c   : > { %v4682_v31 = vshrl.u32 %v4609_v2, 16  ;;  %6398 = vmatmul.mubr.msk.bf16.gmra.mrb[16].mxu1 %vm1332_vm3, %v2493_v61  ;;  %v4670_v24 = vrot.slane %v4668_v18, 5  ;;  %v4676_v51 = vrot.slane %v4674_v26, 4  ;;  %v4685_v55 = vshll.u32 %v4609_v2, 16  ;;  %v8581_v61 = vld [vmem:[#allocation2 + $0xe8] sm:$0xf] }
 0x21d   : > { %v2527_v17 = vsel %vm960_vm5, %v2518_v39, %v2526_v38  ;;  %6401 = vmatprep.mubr.msk.bf16.mxu1 %vm1332_vm3, %v2510_v52  ;;  %v4663_v29 = vor.u32 %v4662_v53, %v4659_v41  ;;  %v4679_v57 = vrot.slane %v4677_v22, 5  ;;  %v2529_v28 = vshrl.u32 %v2316_v40, 16  ;;  %v4611_v38 = vld [vmem:[#allocation2 + $0x78] sm:$0x1f] }
 0x21e   : > { %v4684_v63 = vrot.slane %v4682_v31, 4  ;;  %6552 = vmatmul.mubr.msk.bf16.vlgmr.msra.gmra.mrb[0].mxu0 %vm1332_vm3, %v4655_v36  ;;  %v4671_v11 = vor.u32 %v4670_v24, %v4667_v5  ;;  %v4687_v34 = vrot.slane %v4685_v55, 5  ;;  %v2532_v42 = vshll.u32 %v2316_v40, 16  ;;  %v2320_v5 = vld [vmem:[#allocation2 + $0xf0] sm:$0xf8] }
 0x21f   : > { %v2537_v60 = vshrl.u32 %v8574_v62, 16  ;;  %v4680_v13 = vor.u32 %v4679_v57, %v4676_v51  ;;  %v2531_v14 = vrot.slane %v2529_v28, 3  ;;  %v2540_v21 = vshll.u32 %v8574_v62, 16  ;;  %v8597_v24 = vld [vmem:[#allocation2 + $0xf8] sm:$0xf] }
 0x220   : > { %v2546_v30 = vshrl.u32 %v2318_v27, 16  ;;  %v4672_v56 = vsel %vm1774_vm4, %v4663_v29, %v4671_v11  ;;  %v4688_v37 = vor.u32 %v4687_v34, %v4684_v63  ;;  %v2534_v47 = vrot.slane %v2532_v42, 4  ;;  %v2322_v34 = vld [vmem:[#allocation2 + $0x100] sm:$0xf8] }
 0x221   : > { %v2539_v35 = vrot.slane %v2537_v60, 3  ;;  %6555 = vmatprep.mubr.msk.bf16.mxu0 %vm1332_vm3, %v4672_v56  ;;  %v2542_v48 = vrot.slane %v2540_v21, 4  ;;  %v2549_v33 = vshll.u32 %v2318_v27, 16  ;;  %v2554_v1 = vshrl.u32 %v8581_v61, 16  ;;  %v8601_v21 = vld [vmem:[#allocation2 + $0x108] sm:$0xf] }
 0x222   : > { %v2548_v16 = vrot.slane %v2546_v30, 3  ;;  %v4689_v43 = vsel %vm1774_vm4, %v4680_v13, %v4688_v37  ;;  %v2535_v45 = vor.u32 %v2534_v47, %v2531_v14  ;;  %v2557_v36 = vshll.u32 %v8581_v61, 16 }
 0x223   : > { %v4691_v12 = vshrl.u32 %v8434_v54, 16  ;;  %v2543_v44 = vor.u32 %v2542_v48, %v2539_v35  ;;  %v2551_v8 = vrot.slane %v2549_v33, 4  ;;  %v2556_v2 = vrot.slane %v2554_v1, 3 }
 0x224   : > { %v4694_v52 = vshll.u32 %v8434_v54, 16  ;;  %6402 = vmatmul.mubr.msk.bf16.gmra.mrb[20].mxu1 %vm1332_vm3, %v2527_v17  ;;  %v2559_v41 = vrot.slane %v2557_v36, 4  ;;  %v4699_v9 = vshrl.u32 %v4610_v7, 16  ;;  %v4702_v39 = vshll.u32 %v4610_v7, 16 }
 0x225   : > { %v4693_v3 = vrot.slane %v4691_v12, 4  ;;  %v2544_v18 = vsel %vm960_vm5, %v2535_v45, %v2543_v44  ;;  %v2552_v26 = vor.u32 %v2551_v8, %v2548_v16  ;;  %v4708_v53 = vshrl.u32 %v8437_v46, 16  ;;  %v4612_v45 = vld [vmem:[#allocation2 + $0x88] sm:$0x1f] }
 0x226   : > { %v4696_v40 = vrot.slane %v4694_v52, 5  ;;  %6556 = vmatmul.mubr.msk.bf16.gmra.mrb[4].mxu0 %vm1332_vm3, %v4689_v43  ;;  %6405 = vmatprep.mubr.msk.bf16.mxu1 %vm1332_vm3, %v2544_v18  ;;  %v2560_v22 = vor.u32 %v2559_v41, %v2556_v2  ;;  %v4701_v54 = vrot.slane %v4699_v9, 4  ;;  %v4704_v31 = vrot.slane %v4702_v39, 5 }
 0x227   : > { %v4711_v17 = vshll.u32 %v8437_v46, 16  ;;  %v4710_v55 = vrot.slane %v4708_v53, 4  ;;  %v4716_v27 = vshrl.u32 %v4611_v38, 16  ;;  %v4719_v29 = vshll.u32 %v4611_v38, 16 }
 0x228   : > { %v4697_v51 = vor.u32 %v4696_v40, %v4693_v3  ;;  %v2561_v57 = vsel %vm960_vm5, %v2552_v26, %v2560_v22  ;;  %v4705_v63 = vor.u32 %v4704_v31, %v4701_v54  ;;  %v2563_v11 = vshrl.u32 %v2320_v5, 16  ;;  %v4613_v26 = vld [vmem:[#allocation2 + $0x98] sm:$0x1f] }
 0x229   : > { %v4713_v28 = vrot.slane %v4711_v17, 5  ;;  %v4718_v42 = vrot.slane %v4716_v27, 4  ;;  %v4721_v60 = vrot.slane %v4719_v29, 5  ;;  %v2566_v13 = vshll.u32 %v2320_v5, 16 }
 0x22a   : > { %v2571_v14 = vshrl.u32 %v8597_v24, 16  ;;  %v4706_v46 = vsel %vm1774_vm4, %v4697_v51, %v4705_v63  ;;  %v2565_v56 = vrot.slane %v2563_v11, 3  ;;  %v2574_v37 = vshll.u32 %v8597_v24, 16  ;;  %v7002_v11 = vld [vmem:[#allocation2 + $0x90] sm:$0xf0] }
 0x22b   : > { %v4714_v30 = vor.u32 %v4713_v28, %v4710_v55  ;;  %6559 = vmatprep.mubr.msk.bf16.mxu0 %vm1332_vm3, %v4706_v46  ;;  %v4722_v47 = vor.u32 %v4721_v60, %v4718_v42  ;;  %v2568_v35 = vrot.slane %v2566_v13, 4  ;;  %v2580_v16 = vshrl.u32 %v2322_v34, 16  ;;  %v4614_v42 = vld [vmem:[#allocation2 + $0xa8] sm:$0x1f]  ;;  %v7003_v46 = vld [vmem:[#allocation2 + $0xa0] sm:$0xf0] }
 0x22c   : > { %v2573_v48 = vrot.slane %v2571_v14, 3  ;;  %6406 = vmatmul.mubr.msk.bf16.gmra.mrb[24].mxu1 %vm1332_vm3, %v2561_v57  ;;  %v2576_v33 = vrot.slane %v2574_v37, 4  ;;  %v2583_v1 = vshll.u32 %v2322_v34, 16  ;;  %v2588_v7 = vshrl.u32 %v8601_v21, 16 }
 0x22d   : > { %v2591_v43 = vshll.u32 %v8601_v21, 16  ;;  %v4723_v36 = vsel %vm1774_vm4, %v4714_v30, %v4722_v47  ;;  %v2569_v12 = vor.u32 %v2568_v35, %v2565_v56  ;;  %v2582_v44 = vrot.slane %v2580_v16, 3 }
 0x22e   : > { %v4725_v8 = vshrl.u32 %v8450_v25, 16  ;;  %6560 = vmatmul.mubr.msk.bf16.gmra.mrb[8].mxu0 %vm1332_vm3, %v4723_v36  ;;  %v2577_v2 = vor.u32 %v2576_v33, %v2573_v48  ;;  %v2585_v52 = vrot.slane %v2583_v1, 4  ;;  %v2590_v41 = vrot.slane %v2588_v7, 3  ;;  %v4615_v1 = vld [vmem:[#allocation2 + $0xb8] sm:$0x1f] }
 0x22f   : > { %v2593_v3 = vrot.slane %v2591_v43, 4  ;;  %v4728_v39 = vshll.u32 %v8450_v25, 16  ;;  %v4733_v38 = vshrl.u32 %v4612_v45, 16  ;;  %v4736_v18 = vshll.u32 %v4612_v45, 16 }
 0x230   : > { %v4727_v9 = vrot.slane %v4725_v8, 4  ;;  %v2578_v40 = vsel %vm960_vm5, %v2569_v12, %v2577_v2  ;;  %v2586_v53 = vor.u32 %v2585_v52, %v2582_v44  ;;  %v4742_v22 = vshrl.u32 %v8453_v0, 16 }
 0x231   : > { %v2594_v5 = vor.u32 %v2593_v3, %v2590_v41  ;;  %6409 = vmatprep.mubr.msk.bf16.mxu1 %vm1332_vm3, %v2578_v40  ;;  %v4730_v54 = vrot.slane %v4728_v39, 5  ;;  %v4735_v31 = vrot.slane %v4733_v38, 4  ;;  %v4738_v17 = vrot.slane %v4736_v18, 5  ;;  %v4616_v18 = vld [vmem:[#allocation2 + $0xc8] sm:$0x1f] }
 0x232   : > { %v4745_v51 = vshll.u32 %v8453_v0, 16  ;;  %v4744_v27 = vrot.slane %v4742_v22, 4  ;;  %v4750_v25 = vshrl.u32 %v4613_v26, 16  ;;  %v4753_v29 = vshll.u32 %v4613_v26, 16 }
 0x233   : > { %v2595_v55 = vsel %vm960_vm5, %v2586_v53, %v2594_v5  ;;  %v4731_v57 = vor.u32 %v4730_v54, %v4727_v9  ;;  %v4739_v63 = vor.u32 %v4738_v17, %v4735_v31  ;;  %v2913_v34 = vrot.slane %v7002_v11, 4  ;;  %v7004_v9 = vld [vmem:[#allocation2 + $0xb0] sm:$0xf0]  ;;  %v7005_v5 = vld [vmem:[#allocation2 + $0xc0] sm:$0xf0] }
 0x234   : > { %v4747_v28 = vrot.slane %v4745_v51, 5  ;;  %6410 = vmatmul.mubr.msk.bf16.gmra.mrb[28].mxu1 %vm1332_vm3, %v2595_v55  ;;  %v4752_v60 = vrot.slane %v4750_v25, 4  ;;  %v4755_v13 = vrot.slane %v4753_v29, 5  ;;  %v2914_v14 = vrot.slane %v8527_v10, 4  ;;  %v4617_v25 = vld [vmem:[#allocation2 + $0xd8] sm:$0x1f] }
 0x235   : > { %v2916_v30 = vrot.slane %v7003_v46, 4  ;;  %v4740_v0 = vsel %vm1774_vm4, %v4731_v57, %v4739_v63  ;;  %v2917_v37 = vrot.slane %v8534_v6, 4  ;;  %v4759_v47 = vshrl.u32 %v8465_v19, 16 }
 0x236   : > { %v4748_v56 = vor.u32 %v4747_v28, %v4744_v27  ;;  %6563 = vmatprep.mubr.msk.bf16.mxu0 %vm1332_vm3, %v4740_v0  ;;  %v4756_v35 = vor.u32 %v4755_v13, %v4752_v60  ;;  %v2915_v48 = vsel %vm1282_vm2, %v2913_v34, %v2914_v14  ;;  %v4762_v16 = vshll.u32 %v8465_v19, 16  ;;  %v7006_v0 = vld [vmem:[#allocation2 + $0xd0] sm:$0xf0] }
 0x237   : > { %v4767_v33 = vshrl.u32 %v4614_v42, 16  ;;  %6431 = vmatprep.mubr.msk.bf16.mxu1 %vm1332_vm3, %v2915_v48  ;;  %v2918_v10 = vsel %vm1282_vm2, %v2916_v30, %v2917_v37  ;;  %v4761_v7 = vrot.slane %v4759_v47, 4  ;;  %v4770_v43 = vshll.u32 %v4614_v42, 16  ;;  %v4618_v47 = vld [vmem:[#allocation2 + $0xe8] sm:$0x1f] }
 0x238   : > { %v4776_v45 = vshrl.u32 %v8472_v49, 16  ;;  %v4757_v6 = vsel %vm1774_vm4, %v4748_v56, %v4756_v35  ;;  %v4764_v36 = vrot.slane %v4762_v16, 5  ;;  %v4779_v44 = vshll.u32 %v8472_v49, 16 }
 0x239   : > { %v4769_v12 = vrot.slane %v4767_v33, 4  ;;  %6564 = vmatmul.mubr.msk.bf16.gmra.mrb[12].mxu0 %vm1332_vm3, %v4757_v6  ;;  %v4772_v8 = vrot.slane %v4770_v43, 5  ;;  %v4784_v2 = vshrl.u32 %v4615_v1, 16  ;;  %v4787_v52 = vshll.u32 %v4615_v1, 16 }
 0x23a   : > { %v4778_v19 = vrot.slane %v4776_v45, 4  ;;  %v4765_v41 = vor.u32 %v4764_v36, %v4761_v7  ;;  %v4781_v3 = vrot.slane %v4779_v44, 5  ;;  %v2919_v39 = vrot.slane %v7004_v9, 4 }
 0x23b   : > { %v2920_v38 = vrot.slane %v8553_v50, 4  ;;  %v4773_v26 = vor.u32 %v4772_v8, %v4769_v12  ;;  %v4786_v40 = vrot.slane %v4784_v2, 4  ;;  %v4789_v53 = vrot.slane %v4787_v52, 5 }
 0x23c   : > { %v2922_v22 = vrot.slane %v7005_v5, 4  ;;  %6432 = vmatmul.mubr.msk.bf16.vlgmr.msra.gmra.mrb[16].mxu1 %vm1332_vm3, %v2918_v10  ;;  %v4782_v49 = vor.u32 %v4781_v3, %v4778_v19  ;;  %v2923_v31 = vrot.slane %v8558_v59, 4  ;;  %v4793_v17 = vshrl.u32 %v8485_v15, 16  ;;  %v4620_v5 = vld [vmem:[#allocation2 + $0x108] sm:$0x1f] }
 0x23d   : > { %v2921_v54 = vsel %vm1282_vm2, %v2919_v39, %v2920_v38  ;;  %v4774_v51 = vsel %vm1774_vm4, %v4765_v41, %v4773_v26  ;;  %v4790_v55 = vor.u32 %v4789_v53, %v4786_v40  ;;  %v4796_v50 = vshll.u32 %v8485_v15, 16  ;;  %v7008_v40 = vld [vmem:[#allocation2 + $0xf0] sm:$0xf0] }
 0x23e   : > { %6435 = vmatprep.mubr.msk.bf16.mxu1 %vm1332_vm3, %v2921_v54  ;;  %v4801_v27 = vshrl.u32 %v4616_v18, 16  ;;  %6567 = vmatprep.mubr.msk.bf16.mxu0 %vm1332_vm3, %v4774_v51  ;;  %v2924_v29 = vsel %vm1282_vm2, %v2922_v22, %v2923_v31  ;;  %v4795_v57 = vrot.slane %v4793_v17, 4  ;;  %v4804_v63 = vshll.u32 %v4616_v18, 16  ;;  %v7009_v51 = vld [vmem:[#allocation2 + $0x100] sm:$0xf0] }
 0x23f   : > { %v4810_v28 = vshrl.u32 %v8488_v32, 16  ;;  %v4791_v59 = vsel %vm1774_vm4, %v4782_v49, %v4790_v55  ;;  %v4798_v11 = vrot.slane %v4796_v50, 5  ;;  %v4813_v42 = vshll.u32 %v8488_v32, 16  ;;  %v7007_v32 = vld [vmem:[#allocation2 + $0xe0] sm:$0xf0] }
 0x240   : > { %v4803_v34 = vrot.slane %v4801_v27, 4  ;;  %v4806_v60 = vrot.slane %v4804_v63, 5  ;;  %v4818_v14 = vshrl.u32 %v4617_v25, 16  ;;  %v4821_v15 = vshll.u32 %v4617_v25, 16 }
 0x241   : > { %v4812_v13 = vrot.slane %v4810_v28, 4  ;;  %6568 = vmatmul.mubr.msk.bf16.gmra.mrb[16].mxu0 %vm1332_vm3, %v4791_v59  ;;  %v4799_v46 = vor.u32 %v4798_v11, %v4795_v57  ;;  %v4815_v30 = vrot.slane %v4813_v42, 5  ;;  %v2925_v56 = vrot.slane %v7006_v0, 4  ;;  %v4621_v57 = vld [vmem:[#allocation2 + $0x118] sm:$0x1f] }
 0x242   : > { %v2926_v37 = vrot.slane %v8574_v62, 4  ;;  %v4807_v35 = vor.u32 %v4806_v60, %v4803_v34  ;;  %v4820_v48 = vrot.slane %v4818_v14, 4  ;;  %v4823_v16 = vrot.slane %v4821_v15, 5  ;;  %v4619_v62 = vld [vmem:[#allocation2 + $0xf8] sm:$0x1f] }
 0x243   : > { %v4816_v33 = vor.u32 %v4815_v30, %v4812_v13  ;;  %v2928_v10 = vrot.slane %v7007_v32, 4  ;;  %v4827_v7 = vshrl.u32 %v8501_v20, 16  ;;  %v4830_v6 = vshll.u32 %v8501_v20, 16 }
 0x244   : > { %v2927_v1 = vsel %vm1282_vm2, %v2925_v56, %v2926_v37  ;;  %6436 = vmatmul.mubr.msk.bf16.gmra.mrb[20].mxu1 %vm1332_vm3, %v2924_v29  ;;  %v4808_v43 = vsel %vm1774_vm4, %v4799_v46, %v4807_v35  ;;  %v4824_v45 = vor.u32 %v4823_v16, %v4820_v48  ;;  %v4835_v36 = vshrl.u32 %v4618_v47, 16 }
 0x245   : > { %6571 = vmatprep.mubr.msk.bf16.mxu0 %vm1332_vm3, %v4808_v43  ;;  %6439 = vmatprep.mubr.msk.bf16.mxu1 %vm1332_vm3, %v2927_v1  ;;  %v2929_v12 = vrot.slane %v8581_v61, 4  ;;  %v4829_v44 = vrot.slane %v4827_v7, 4  ;;  %v4838_v8 = vshll.u32 %v4618_v47, 16  ;;  %v4844_v19 = vshrl.u32 %v8506_v23, 16 }
 0x246   : > { %v4825_v2 = vsel %vm1774_vm4, %v4816_v33, %v4824_v45  ;;  %v4832_v52 = vrot.slane %v4830_v6, 5  ;;  %v4837_v41 = vrot.slane %v4835_v36, 4  ;;  %v4847_v3 = vshll.u32 %v8506_v23, 16 }
 0x247   : > { %v4840_v9 = vrot.slane %v4838_v8, 5  ;;  %v4846_v20 = vrot.slane %v4844_v19, 4  ;;  %v4852_v39 = vshrl.u32 %v4619_v62, 16  ;;  %v4855_v38 = vshll.u32 %v4619_v62, 16 }
 0x248   : > { %v4833_v18 = vor.u32 %v4832_v52, %v4829_v44  ;;  %v4849_v26 = vrot.slane %v4847_v3, 5  ;;  %v2931_v53 = vrot.slane %v7008_v40, 4  ;;  %v2932_v61 = vrot.slane %v8597_v24, 4  ;;  %v8695_v3 = vld [vmem:[#allocation14] ss:$0 sm:$0xff] }
 0x249   : > { %6572 = vmatmul.mubr.msk.bf16.gmra.mrb[20].mxu0 %vm1332_vm3, %v4825_v2  ;;  %v2930_v22 = vsel %vm1282_vm2, %v2928_v10, %v2929_v12  ;;  %v4841_v49 = vor.u32 %v4840_v9, %v4837_v41  ;;  %v4854_v54 = vrot.slane %v4852_v39, 4  ;;  %v4857_v31 = vrot.slane %v4855_v38, 5 }
 0x24a   : > { %v4850_v17 = vor.u32 %v4849_v26, %v4846_v20  ;;  %v2933_v23 = vsel %vm1282_vm2, %v2931_v53, %v2932_v61  ;;  %v2934_v55 = vrot.slane %v7009_v51, 4  ;;  %v4861_v50 = vshrl.u32 %v8517_v4, 16 }
 0x24b   : > { %v4842_v27 = vsel %vm1774_vm4, %v4833_v18, %v4841_v49  ;;  %v4858_v25 = vor.u32 %v4857_v31, %v4854_v54  ;;  %v4864_v24 = vshll.u32 %v8517_v4, 16  ;;  %v4869_v29 = vshrl.u32 %v4620_v5, 16 }
 0x24c   : > { %6440 = vmatmul.mubr.msk.bf16.gmra.mrb[24].mxu1 %vm1332_vm3, %v2930_v22  ;;  %6575 = vmatprep.mubr.msk.bf16.mxu0 %vm1332_vm3, %v4842_v27  ;;  %v2935_v63 = vrot.slane %v8601_v21, 4  ;;  %v4863_v28 = vrot.slane %v4861_v50, 4  ;;  %v4872_v59 = vshll.u32 %v4620_v5, 16  ;;  %v4878_v11 = vshrl.u32 %v8520_v58, 16 }
 0x24d   : > { %v4859_v34 = vsel %vm1774_vm4, %v4850_v17, %v4858_v25  ;;  %6443 = vmatprep.mubr.msk.bf16.mxu1 %vm1332_vm3, %v2933_v23  ;;  %v4866_v42 = vrot.slane %v4864_v24, 5  ;;  %v4871_v60 = vrot.slane %v4869_v29, 4  ;;  %v4881_v4 = vshll.u32 %v8520_v58, 16 }
 0x24e   : > { %v4874_v13 = vrot.slane %v4872_v59, 5  ;;  %v4880_v14 = vrot.slane %v4878_v11, 4  ;;  %v4886_v15 = vshrl.u32 %v4621_v57, 16  ;;  %v4889_v46 = vshll.u32 %v4621_v57, 16 }
 0x24f   : > { %v4867_v30 = vor.u32 %v4866_v42, %v4863_v28  ;;  %v4883_v0 = vrot.slane %v4881_v4, 5  ;;  %v2936_v47 = vsel %vm1282_vm2, %v2934_v55, %v2935_v63 }
 0x250   : > { %v4875_v56 = vor.u32 %v4874_v13, %v4871_v60  ;;  %v4888_v21 = vrot.slane %v4886_v15, 4  ;;  %v4891_v37 = vrot.slane %v4889_v46, 5 }
 0x251   : > { %6576 = vmatmul.mubr.msk.bf16.gmra.mrb[24].mxu0 %vm1332_vm3, %v4859_v34  ;;  %v4884_v48 = vor.u32 %v4883_v0, %v4880_v14 }
 0x252   : > { %v4876_v35 = vsel %vm1774_vm4, %v4867_v30, %v4875_v56  ;;  %v4892_v16 = vor.u32 %v4891_v37, %v4888_v21 }
 0x253   : > { %6579 = vmatprep.mubr.msk.bf16.mxu0 %vm1332_vm3, %v4876_v35 }
 0x254   : > { %6444 = vmatmul.mubr.msk.bf16.gmra.mrb[28].mxu1 %vm1332_vm3, %v2936_v47  ;;  %v4893_v58 = vsel %vm1774_vm4, %v4884_v48, %v4892_v16 }
 0x259   : > { %6580 = vmatmul.mubr.msk.bf16.gmra.mrb[28].mxu0 %vm1332_vm3, %v4893_v58 }
 0x2cf   : > { %v6383_v33 = vpop.f32.mrb[0].mxu1 }
 0x2d0   : > { %v2682_v1 = vpop.f32.mrb[1].mxu1 }
 0x2d1   : > { %v6384_v32 = vpop.f32.mrb[2].mxu1 }
 0x2d2   : > { %v2685_v10 = vpop.f32.mrb[3].mxu1 }
 0x2d7   : > { %v6387_v7 = vpop.f32.mrb[4].mxu1 }
 0x2d8   : > { %v2698_v43 = vpop.f32.mrb[5].mxu1 }
 0x2d9   : > { %v6388_v45 = vpop.f32.mrb[6].mxu1 }
 0x2da   : > { %v2701_v6 = vpop.f32.mrb[7].mxu1 }
 0x2df   : > { %v8679_v36 = vpop.f32.mrb[8].mxu1 }
 0x2e0   : > { %v8681_v62 = vpop.f32.mrb[9].mxu1 }
 0x2e1   : > { %v8683_v12 = vpop.f32.mrb[10].mxu1 }
 0x2e2   : > { %v8685_v44 = vpop.f32.mrb[11].mxu1 }
 0x2e7   : > { %v8687_v8 = vpop.f32.mrb[12].mxu1 }
 0x2e8   : > { %v8689_v19 = vpop.f32.mrb[13].mxu1 }
 0x2e9   : > { %v8691_v2 = vpop.f32.mrb[14].mxu1 }
 0x2ea   : > { %v8693_v52 = vpop.f32.mrb[15].mxu1 }
 0x2f1   : > { %v6553_v41 = vpop.f32.mrb[0].mxu0 }
 0x2f2   : > { %v6585_v9 = vadd.f32 %v6553_v41, %v6383_v33  ;;  %v4980_v20 = vpop.f32.mrb[1].mxu0 }
 0x2f3   : > { %v6586_v39 = vadd.f32 %v4980_v20, %v2682_v1  ;;  %v6554_v38 = vpop.f32.mrb[2].mxu0 }
 0x2f4   : > { %v5148_v18 = vadd.f32 %v6585_v9, %v8695_v3  ;;  %v6587_v26 = vadd.f32 %v6554_v38, %v6384_v32  ;;  %v4983_v40 = vpop.f32.mrb[3].mxu0 }
 0x2f5   : > { %v5146_v53 = vadd.f32 %v6586_v39, %v8695_v3  ;;  %v6588_v61 = vadd.f32 %v4983_v40, %v2685_v10 }
 0x2f6   : > { %v6013_v5 = vpack.c.bf16 %v5148_v18, %v5148_v18  ;;  %v5149_v22 = vadd.f32 %v6587_v26, %v8695_v3  ;;  %v5411_v17 = vmul.f32 %v5148_v18, %v5148_v18  ;;  %v5341_v28 = vsel %vm1332_vm3, %v5148_v18, 0.0 }
 0x2f7   : > { %v6011_v49 = vpack.c.bf16 %v5146_v53, %v5146_v53  ;;  %v5409_v54 = vmul.f32 %v5146_v53, %v5146_v53  ;;  %v5147_v31 = vadd.f32 %v6588_v61, %v8695_v3  ;;  %v5338_v51 = vsel %vm1332_vm3, %v5146_v53, 0.0 }
 0x2f8   : > { %5308 = vst.msk [vmem:[%s8703_s17 + $0x8] sm:$0xf] %vm562_vm0, %v6013_v5  ;;  %v6014_v23 = vpack.c.bf16 %v5149_v22, %v5149_v22  ;;  %v5412_v24 = vmul.f32 %v5149_v22, %v5149_v22  ;;  %v5444_v46 = vsel %vm1332_vm3, %v5411_v17, 0.0  ;;  %v5343_v56 = vsel %vm1332_vm3, %v5149_v22, 0.0 }
 0x2f9   : > { %5306 = vst.msk [vmem:[%s8703_s17] sm:$0xf] %vm562_vm0, %v6011_v49  ;;  %v6012_v55 = vpack.c.bf16 %v5147_v31, %v5147_v31  ;;  %v5339_v50 = vsel %vm1332_vm3, %v5147_v31, 0.0  ;;  %v5410_v27 = vmul.f32 %v5147_v31, %v5147_v31  ;;  %v6557_v25 = vpop.f32.mrb[4].mxu0  ;;  %v5441_v59 = vsel %vm1332_vm3, %v5409_v54, 0.0 }
 0x2fa   : > { %5309 = vst.msk [vmem:[%s8703_s17 + $0xc] sm:$0xf] %vm562_vm0, %v6014_v23  ;;  %v5340_v29 = vadd.f32 %v5339_v50, %v5338_v51  ;;  %v6589_v57 = vadd.f32 %v6557_v25, %v6387_v7  ;;  %v4996_v63 = vpop.f32.mrb[5].mxu0  ;;  %v5446_v21 = vsel %vm1332_vm3, %v5412_v24, 0.0 }
 0x2fb   : > { %5307 = vst.msk [vmem:[%s8703_s17 + $0x4] sm:$0xf] %vm562_vm0, %v6012_v55  ;;  %v5442_v11 = vsel %vm1332_vm3, %v5410_v27, 0.0  ;;  %v6590_v34 = vadd.f32 %v4996_v63, %v2698_v43  ;;  %v6558_v42 = vpop.f32.mrb[6].mxu0 }
 0x2fc   : > { %v5342_v60 = vadd.f32 %v5341_v28, %v5340_v29  ;;  %v5443_v4 = vadd.f32 %v5442_v11, %v5441_v59  ;;  %v5152_v13 = vadd.f32 %v6589_v57, %v8695_v3  ;;  %v6591_v14 = vadd.f32 %v6558_v42, %v6388_v45  ;;  %v4999_v15 = vpop.f32.mrb[7].mxu0 }
 0x2fd   : > { %v5150_v30 = vadd.f32 %v6590_v34, %v8695_v3  ;;  %v6592_v0 = vadd.f32 %v4999_v15, %v2701_v6 }
 0x2fe   : > { %v5445_v37 = vadd.f32 %v5444_v46, %v5443_v4  ;;  %v6017_v47 = vpack.c.bf16 %v5152_v13, %v5152_v13  ;;  %v5344_v48 = vadd.f32 %v5343_v56, %v5342_v60  ;;  %v5153_v1 = vadd.f32 %v6591_v14, %v8695_v3 }
 0x2ff   : > { %v6015_v35 = vpack.c.bf16 %v5150_v30, %v5150_v30  ;;  %v5345_v16 = vsel %vm1332_vm3, %v5150_v30, 0.0  ;;  %v5413_v58 = vmul.f32 %v5150_v30, %v5150_v30  ;;  %v5151_v32 = vadd.f32 %v6592_v0, %v8695_v3 }
 0x300   : > { %5312 = vst.msk [vmem:[%s8703_s17 + $0x18] sm:$0xf] %vm562_vm0, %v6017_v47  ;;  %v5447_v33 = vadd.f32 %v5446_v21, %v5445_v37  ;;  %v5346_v10 = vadd.f32 %v5345_v16, %v5344_v48  ;;  %v5415_v45 = vmul.f32 %v5152_v13, %v5152_v13  ;;  %v6018_v41 = vpack.c.bf16 %v5153_v1, %v5153_v1 }
 0x301   : > { %5310 = vst.msk [vmem:[%s8703_s17 + $0x10] sm:$0xf] %vm562_vm0, %v6015_v35  ;;  %v5448_v7 = vsel %vm1332_vm3, %v5413_v58, 0.0  ;;  %v6561_v43 = vpop.f32.mrb[8].mxu0  ;;  %v6016_v20 = vpack.c.bf16 %v5151_v32, %v5151_v32  ;;  %v5347_v39 = vsel %vm1332_vm3, %v5151_v32, 0.0  ;;  %v5414_v38 = vmul.f32 %v5151_v32, %v5151_v32 }
 0x302   : > { %v5449_v6 = vadd.f32 %v5448_v7, %v5447_v33  ;;  %v5012_v9 = vpop.f32.mrb[9].mxu0  ;;  %v6593_v18 = vadd.f32 %v6561_v43, %v8679_v36  ;;  %v5349_v40 = vsel %vm1332_vm3, %v5152_v13, 0.0  ;;  %5313 = vst.msk [vmem:[%s8703_s17 + $0x1c] sm:$0xf] %vm562_vm0, %v6018_v41  ;;  %v5348_v53 = vadd.f32 %v5347_v39, %v5346_v10 }
 0x303   : > { %v6562_v26 = vpop.f32.mrb[10].mxu0  ;;  %v6594_v61 = vadd.f32 %v5012_v9, %v8681_v62  ;;  %v5416_v49 = vmul.f32 %v5153_v1, %v5153_v1  ;;  %5311 = vst.msk [vmem:[%s8703_s17 + $0x14] sm:$0xf] %vm562_vm0, %v6016_v20  ;;  %v5450_v54 = vsel %vm1332_vm3, %v5414_v38, 0.0  ;;  %v5351_v55 = vsel %vm1332_vm3, %v5153_v1, 0.0 }
 0x304   : > { %v6595_v5 = vadd.f32 %v6562_v26, %v8683_v12  ;;  %v5015_v22 = vpop.f32.mrb[11].mxu0  ;;  %v5156_v31 = vadd.f32 %v6593_v18, %v8695_v3  ;;  %v5350_v17 = vadd.f32 %v5349_v40, %v5348_v53  ;;  %v5451_v23 = vadd.f32 %v5450_v54, %v5449_v6 }
 0x305   : > { %v6596_v36 = vadd.f32 %v5015_v22, %v8685_v44  ;;  %v5154_v51 = vadd.f32 %v6594_v61, %v8695_v3  ;;  %v5452_v12 = vsel %vm1332_vm3, %v5415_v45, 0.0  ;;  %v5454_v57 = vsel %vm1332_vm3, %v5416_v49, 0.0 }
 0x306   : > { %v5157_v62 = vadd.f32 %v6595_v5, %v8695_v3  ;;  %v6021_v50 = vpack.c.bf16 %v5156_v31, %v5156_v31  ;;  %v5453_v25 = vadd.f32 %v5452_v12, %v5451_v23  ;;  %v5352_v29 = vadd.f32 %v5351_v55, %v5350_v17 }
 0x307   : > { %v5155_v27 = vadd.f32 %v6596_v36, %v8695_v3  ;;  %v6019_v24 = vpack.c.bf16 %v5154_v51, %v5154_v51  ;;  %v5353_v44 = vsel %vm1332_vm3, %v5154_v51, 0.0  ;;  %v5417_v63 = vmul.f32 %v5154_v51, %v5154_v51 }
 0x308   : > { %5316 = vst.msk [vmem:[%s8703_s17 + $0x28] sm:$0xf] %vm562_vm0, %v6021_v50  ;;  %v6022_v28 = vpack.c.bf16 %v5157_v62, %v5157_v62  ;;  %v5354_v59 = vadd.f32 %v5353_v44, %v5352_v29  ;;  %v5455_v11 = vadd.f32 %v5454_v57, %v5453_v25  ;;  %v5419_v42 = vmul.f32 %v5156_v31, %v5156_v31 }
 0x309   : > { %5314 = vst.msk [vmem:[%s8703_s17 + $0x20] sm:$0xf] %vm562_vm0, %v6019_v24  ;;  %v6020_v34 = vpack.c.bf16 %v5155_v27, %v5155_v27  ;;  %v5456_v60 = vsel %vm1332_vm3, %v5417_v63, 0.0  ;;  %v5355_v4 = vsel %vm1332_vm3, %v5155_v27, 0.0  ;;  %v5418_v13 = vmul.f32 %v5155_v27, %v5155_v27 }
 0x30a   : > { %5317 = vst.msk [vmem:[%s8703_s17 + $0x2c] sm:$0xf] %vm562_vm0, %v6022_v28  ;;  %v5457_v14 = vadd.f32 %v5456_v60, %v5455_v11  ;;  %v5356_v15 = vadd.f32 %v5355_v4, %v5354_v59  ;;  %v5357_v30 = vsel %vm1332_vm3, %v5156_v31, 0.0  ;;  %v5420_v0 = vmul.f32 %v5157_v62, %v5157_v62 }
 0x30b   : > { %5315 = vst.msk [vmem:[%s8703_s17 + $0x24] sm:$0xf] %vm562_vm0, %v6020_v34  ;;  %v5458_v56 = vsel %vm1332_vm3, %v5418_v13, 0.0  ;;  %v5460_v58 = vsel %vm1332_vm3, %v5419_v42, 0.0  ;;  %v5359_v33 = vsel %vm1332_vm3, %v5157_v62, 0.0 }
 0x30c   : > { %v6565_v46 = vpop.f32.mrb[12].mxu0  ;;  %v5358_v47 = vadd.f32 %v5357_v30, %v5356_v15  ;;  %v5459_v35 = vadd.f32 %v5458_v56, %v5457_v14  ;;  %v5462_v41 = vsel %vm1332_vm3, %v5420_v0, 0.0 }
 0x30d   : > { %v6597_v21 = vadd.f32 %v6565_v46, %v8687_v8  ;;  %v5028_v37 = vpop.f32.mrb[13].mxu0 }
 0x30e   : > { %v6598_v48 = vadd.f32 %v5028_v37, %v8689_v19  ;;  %v6566_v16 = vpop.f32.mrb[14].mxu0  ;;  %v5461_v43 = vadd.f32 %v5460_v58, %v5459_v35  ;;  %v5360_v45 = vadd.f32 %v5359_v33, %v5358_v47 }
 0x30f   : > { %v5160_v1 = vadd.f32 %v6597_v21, %v8695_v3  ;;  %v6599_v32 = vadd.f32 %v6566_v16, %v8691_v2  ;;  %v5031_v10 = vpop.f32.mrb[15].mxu0  ;;  %v6433_v7 = vpop.f32.mrb[16].mxu1 }
 0x310   : > { %v5158_v8 = vadd.f32 %v6598_v48, %v8695_v3  ;;  %v6600_v6 = vadd.f32 %v5031_v10, %v8693_v52  ;;  %v3087_v19 = vpop.f32.mrb[17].mxu1  ;;  %v5463_v26 = vadd.f32 %v5462_v41, %v5461_v43 }
 0x311   : > { %v6025_v9 = vpack.c.bf16 %v5160_v1, %v5160_v1  ;;  %v5161_v20 = vadd.f32 %v6599_v32, %v8695_v3  ;;  %v6434_v39 = vpop.f32.mrb[18].mxu1  ;;  %v5423_v49 = vmul.f32 %v5160_v1, %v5160_v1  ;;  %v5365_v29 = vsel %vm1332_vm3, %v5160_v1, 0.0 }
 0x312   : > { %v6023_v38 = vpack.c.bf16 %v5158_v8, %v5158_v8  ;;  %v5361_v2 = vsel %vm1332_vm3, %v5158_v8, 0.0  ;;  %v5421_v18 = vmul.f32 %v5158_v8, %v5158_v8  ;;  %v3090_v40 = vpop.f32.mrb[19].mxu1  ;;  %v5159_v5 = vadd.f32 %v6600_v6, %v8695_v3 }
 0x313   : > { %5320 = vst.msk [vmem:[%s8703_s17 + $0x38] sm:$0xf] %vm562_vm0, %v6025_v9  ;;  %v5362_v53 = vadd.f32 %v5361_v2, %v5360_v45  ;;  %v6026_v61 = vpack.c.bf16 %v5161_v20, %v5161_v20  ;;  %v5424_v44 = vmul.f32 %v5161_v20, %v5161_v20  ;;  %v5468_v59 = vsel %vm1332_vm3, %v5423_v49, 0.0 }
 0x314   : > { %5318 = vst.msk [vmem:[%s8703_s17 + $0x30] sm:$0xf] %vm562_vm0, %v6023_v38  ;;  %v5464_v52 = vsel %vm1332_vm3, %v5421_v18, 0.0  ;;  %v6569_v22 = vpop.f32.mrb[16].mxu0  ;;  %v6024_v17 = vpack.c.bf16 %v5159_v5, %v5159_v5  ;;  %v5363_v23 = vsel %vm1332_vm3, %v5159_v5, 0.0  ;;  %v5422_v51 = vmul.f32 %v5159_v5, %v5159_v5 }
 0x315   : > { %v5465_v54 = vadd.f32 %v5464_v52, %v5463_v26  ;;  %5321 = vst.msk [vmem:[%s8703_s17 + $0x3c] sm:$0xf] %vm562_vm0, %v6026_v61  ;;  %v6601_v31 = vadd.f32 %v6569_v22, %v6433_v7  ;;  %v5044_v36 = vpop.f32.mrb[17].mxu0  ;;  %v5364_v12 = vadd.f32 %v5363_v23, %v5362_v53  ;;  %v5367_v4 = vsel %vm1332_vm3, %v5161_v20, 0.0 }
 0x316   : > { %v6570_v62 = vpop.f32.mrb[18].mxu0  ;;  %v6602_v50 = vadd.f32 %v5044_v36, %v3087_v19  ;;  %5319 = vst.msk [vmem:[%s8703_s17 + $0x34] sm:$0xf] %vm562_vm0, %v6024_v17  ;;  %v5466_v57 = vsel %vm1332_vm3, %v5422_v51, 0.0  ;;  %v5470_v56 = vsel %vm1332_vm3, %v5424_v44, 0.0 }
 0x317   : > { %v5164_v55 = vadd.f32 %v6601_v31, %v8695_v3  ;;  %v6603_v27 = vadd.f32 %v6570_v62, %v6434_v39  ;;  %v5047_v25 = vpop.f32.mrb[19].mxu0  ;;  %v6437_v24 = vpop.f32.mrb[20].mxu1  ;;  %v5366_v11 = vadd.f32 %v5365_v29, %v5364_v12  ;;  %v5467_v34 = vadd.f32 %v5466_v57, %v5465_v54 }
 0x318   : > { %v6604_v63 = vadd.f32 %v5047_v25, %v3090_v40  ;;  %v3103_v28 = vpop.f32.mrb[21].mxu1  ;;  %v5162_v13 = vadd.f32 %v6602_v50, %v8695_v3 }
 0x319   : > { %v6029_v42 = vpack.c.bf16 %v5164_v55, %v5164_v55  ;;  %v6438_v60 = vpop.f32.mrb[22].mxu1  ;;  %v5165_v14 = vadd.f32 %v6603_v27, %v8695_v3  ;;  %v5469_v30 = vadd.f32 %v5468_v59, %v5467_v34  ;;  %v5368_v0 = vadd.f32 %v5367_v4, %v5366_v11 }
 0x31a   : > { %v5163_v15 = vadd.f32 %v6604_v63, %v8695_v3  ;;  %v3106_v46 = vpop.f32.mrb[23].mxu1  ;;  %v6027_v21 = vpack.c.bf16 %v5162_v13, %v5162_v13  ;;  %v5369_v37 = vsel %vm1332_vm3, %v5162_v13, 0.0  ;;  %v5425_v47 = vmul.f32 %v5162_v13, %v5162_v13 }
 0x31b   : > { %5324 = vst.msk [vmem:[%s8703_s17 + $0x48] sm:$0xf] %vm562_vm0, %v6029_v42  ;;  %v5373_v48 = vsel %vm1332_vm3, %v5164_v55, 0.0  ;;  %v5370_v16 = vadd.f32 %v5369_v37, %v5368_v0  ;;  %v5471_v58 = vadd.f32 %v5470_v56, %v5469_v30  ;;  %v6030_v33 = vpack.c.bf16 %v5165_v14, %v5165_v14 }
 0x31c   : > { %v6573_v35 = vpop.f32.mrb[20].mxu0  ;;  %v5427_v32 = vmul.f32 %v5164_v55, %v5164_v55  ;;  %5322 = vst.msk [vmem:[%s8703_s17 + $0x40] sm:$0xf] %vm562_vm0, %v6027_v21  ;;  %v5472_v10 = vsel %vm1332_vm3, %v5425_v47, 0.0  ;;  %v6028_v7 = vpack.c.bf16 %v5163_v15, %v5163_v15  ;;  %v5371_v43 = vsel %vm1332_vm3, %v5163_v15, 0.0 }
 0x31d   : > { %v5060_v1 = vpop.f32.mrb[21].mxu0  ;;  %v5473_v45 = vadd.f32 %v5472_v10, %v5471_v58  ;;  %5325 = vst.msk [vmem:[%s8703_s17 + $0x4c] sm:$0xf] %vm562_vm0, %v6030_v33  ;;  %v5372_v6 = vadd.f32 %v5371_v43, %v5370_v16  ;;  %v5426_v19 = vmul.f32 %v5163_v15, %v5163_v15  ;;  %v6605_v41 = vadd.f32 %v6573_v35, %v6437_v24 }
 0x31e   : > { %v6574_v8 = vpop.f32.mrb[22].mxu0  ;;  %v5375_v39 = vsel %vm1332_vm3, %v5165_v14, 0.0  ;;  %5323 = vst.msk [vmem:[%s8703_s17 + $0x44] sm:$0xf] %vm562_vm0, %v6028_v7  ;;  %v6606_v38 = vadd.f32 %v5060_v1, %v3103_v28  ;;  %v5428_v40 = vmul.f32 %v5165_v14, %v5165_v14  ;;  %v5476_v17 = vsel %vm1332_vm3, %v5427_v32, 0.0 }
 0x31f   : > { %v5063_v9 = vpop.f32.mrb[23].mxu0  ;;  %v6441_v20 = vpop.f32.mrb[24].mxu1  ;;  %v6607_v2 = vadd.f32 %v6574_v8, %v6438_v60  ;;  %v5374_v53 = vadd.f32 %v5373_v48, %v5372_v6  ;;  %v5474_v61 = vsel %vm1332_vm3, %v5426_v19, 0.0  ;;  %v5168_v52 = vadd.f32 %v6605_v41, %v8695_v3 }
 0x320   : > { %v6608_v18 = vadd.f32 %v5063_v9, %v3106_v46  ;;  %v3119_v26 = vpop.f32.mrb[25].mxu1  ;;  %v5475_v22 = vadd.f32 %v5474_v61, %v5473_v45  ;;  %v5166_v49 = vadd.f32 %v6606_v38, %v8695_v3  ;;  %v5478_v25 = vsel %vm1332_vm3, %v5428_v40, 0.0 }
 0x321   : > { %v6442_v5 = vpop.f32.mrb[26].mxu1  ;;  %v5169_v54 = vadd.f32 %v6607_v2, %v8695_v3  ;;  %v6033_v23 = vpack.c.bf16 %v5168_v52, %v5168_v52  ;;  %v5376_v51 = vadd.f32 %v5375_v39, %v5374_v53  ;;  %v5381_v24 = vsel %vm1332_vm3, %v5168_v52, 0.0 }
 0x322   : > { %v5167_v31 = vadd.f32 %v6608_v18, %v8695_v3  ;;  %v3122_v36 = vpop.f32.mrb[27].mxu1  ;;  %v5477_v62 = vadd.f32 %v5476_v17, %v5475_v22  ;;  %v6031_v12 = vpack.c.bf16 %v5166_v49, %v5166_v49  ;;  %v5377_v55 = vsel %vm1332_vm3, %v5166_v49, 0.0 }
 0x323   : > { %v5429_v50 = vmul.f32 %v5166_v49, %v5166_v49  ;;  %5328 = vst.msk [vmem:[%s8703_s17 + $0x58] sm:$0xf] %vm562_vm0, %v6033_v23  ;;  %v5378_v29 = vadd.f32 %v5377_v55, %v5376_v51  ;;  %v6034_v44 = vpack.c.bf16 %v5169_v54, %v5169_v54  ;;  %v5431_v63 = vmul.f32 %v5168_v52, %v5168_v52 }
 0x324   : > { %v6577_v27 = vpop.f32.mrb[24].mxu0  ;;  %5326 = vst.msk [vmem:[%s8703_s17 + $0x50] sm:$0xf] %vm562_vm0, %v6031_v12  ;;  %v5479_v28 = vadd.f32 %v5478_v25, %v5477_v62  ;;  %v6032_v11 = vpack.c.bf16 %v5167_v31, %v5167_v31  ;;  %v5379_v42 = vsel %vm1332_vm3, %v5167_v31, 0.0  ;;  %v5430_v60 = vmul.f32 %v5167_v31, %v5167_v31 }
 0x325   : > { %v5076_v57 = vpop.f32.mrb[25].mxu0  ;;  %v5480_v59 = vsel %vm1332_vm3, %v5429_v50, 0.0  ;;  %5329 = vst.msk [vmem:[%s8703_s17 + $0x5c] sm:$0xf] %vm562_vm0, %v6034_v44  ;;  %v6609_v4 = vadd.f32 %v6577_v27, %v6441_v20  ;;  %v5432_v30 = vmul.f32 %v5169_v54, %v5169_v54  ;;  %v5380_v0 = vadd.f32 %v5379_v42, %v5378_v29 }
 0x326   : > { %v6578_v34 = vpop.f32.mrb[26].mxu0  ;;  %v6610_v13 = vadd.f32 %v5076_v57, %v3119_v26  ;;  %v5481_v46 = vadd.f32 %v5480_v59, %v5479_v28  ;;  %5327 = vst.msk [vmem:[%s8703_s17 + $0x54] sm:$0xf] %vm562_vm0, %v6032_v11  ;;  %v5482_v37 = vsel %vm1332_vm3, %v5430_v60, 0.0  ;;  %v5484_v10 = vsel %vm1332_vm3, %v5431_v63, 0.0 }
 0x327   : > { %v5079_v14 = vpop.f32.mrb[27].mxu0  ;;  %v6445_v15 = vpop.f32.mrb[28].mxu1  ;;  %v6611_v56 = vadd.f32 %v6578_v34, %v6442_v5  ;;  %v5172_v47 = vadd.f32 %v6609_v4, %v8695_v3  ;;  %v5382_v58 = vadd.f32 %v5381_v24, %v5380_v0  ;;  %v5383_v7 = vsel %vm1332_vm3, %v5169_v54, 0.0 }
 0x328   : > { %v3135_v21 = vpop.f32.mrb[29].mxu1  ;;  %v5170_v35 = vadd.f32 %v6610_v13, %v8695_v3  ;;  %v6612_v48 = vadd.f32 %v5079_v14, %v3122_v36  ;;  %v5483_v33 = vadd.f32 %v5482_v37, %v5481_v46  ;;  %v5486_v20 = vsel %vm1332_vm3, %v5432_v30, 0.0 }
 0x329   : > { %v6446_v16 = vpop.f32.mrb[30].mxu1  ;;  %v5173_v1 = vadd.f32 %v6611_v56, %v8695_v3  ;;  %v6037_v43 = vpack.c.bf16 %v5172_v47, %v5172_v47  ;;  %v5384_v6 = vadd.f32 %v5383_v7, %v5382_v58  ;;  %v5435_v61 = vmul.f32 %v5172_v47, %v5172_v47 }
 0x32a   : > { %v3138_v32 = vpop.f32.mrb[31].mxu1  ;;  %v6035_v8 = vpack.c.bf16 %v5170_v35, %v5170_v35  ;;  %v5485_v45 = vadd.f32 %v5484_v10, %v5483_v33  ;;  %v5385_v19 = vsel %vm1332_vm3, %v5170_v35, 0.0  ;;  %v5433_v41 = vmul.f32 %v5170_v35, %v5170_v35 }
 0x32b   : > { %5332 = vst.msk [vmem:[%s8703_s17 + $0x68] sm:$0xf] %vm562_vm0, %v6037_v43  ;;  %v6038_v39 = vpack.c.bf16 %v5173_v1, %v5173_v1  ;;  %v5386_v2 = vadd.f32 %v5385_v19, %v5384_v6  ;;  %v5171_v40 = vadd.f32 %v6612_v48, %v8695_v3  ;;  %v5389_v55 = vsel %vm1332_vm3, %v5172_v47, 0.0 }
 0x32c   : > { %v6581_v9 = vpop.f32.mrb[28].mxu0  ;;  %5330 = vst.msk [vmem:[%s8703_s17 + $0x60] sm:$0xf] %vm562_vm0, %v6035_v8  ;;  %v5487_v18 = vadd.f32 %v5486_v20, %v5485_v45  ;;  %v5488_v26 = vsel %vm1332_vm3, %v5433_v41, 0.0  ;;  %v5436_v50 = vmul.f32 %v5173_v1, %v5173_v1  ;;  %v5492_v24 = vsel %vm1332_vm3, %v5435_v61, 0.0 }
 0x32d   : > { %v5092_v38 = vpop.f32.mrb[29].mxu0  ;;  %5333 = vst.msk [vmem:[%s8703_s17 + $0x6c] sm:$0xf] %vm562_vm0, %v6038_v39  ;;  %v6613_v52 = vadd.f32 %v6581_v9, %v6445_v15  ;;  %v6036_v31 = vpack.c.bf16 %v5171_v40, %v5171_v40  ;;  %v5387_v36 = vsel %vm1332_vm3, %v5171_v40, 0.0  ;;  %v5434_v17 = vmul.f32 %v5171_v40, %v5171_v40 }
 0x32e   : > { %v6582_v53 = vpop.f32.mrb[30].mxu0  ;;  %v6614_v5 = vadd.f32 %v5092_v38, %v3135_v21  ;;  %v5489_v54 = vadd.f32 %v5488_v26, %v5487_v18  ;;  %v5388_v23 = vadd.f32 %v5387_v36, %v5386_v2  ;;  %v5391_v63 = vsel %vm1332_vm3, %v5173_v1, 0.0 }
 0x32f   : > { %v6615_v22 = vadd.f32 %v6582_v53, %v6446_v16  ;;  %v5095_v49 = vpop.f32.mrb[31].mxu0  ;;  %v5176_v51 = vadd.f32 %v6613_v52, %v8695_v3  ;;  %5331 = vst.msk [vmem:[%s8703_s17 + $0x64] sm:$0xf] %vm562_vm0, %v6036_v31  ;;  %v5490_v27 = vsel %vm1332_vm3, %v5434_v17, 0.0  ;;  %v5494_v4 = vsel %vm1332_vm3, %v5436_v50, 0.0 }
 0x330   : > { %v5174_v62 = vadd.f32 %v6614_v5, %v8695_v3  ;;  %v6616_v25 = vadd.f32 %v5095_v49, %v3138_v32  ;;  %v5390_v29 = vadd.f32 %v5389_v55, %v5388_v23  ;;  %v5491_v44 = vadd.f32 %v5490_v27, %v5489_v54 }
 0x331   : > { %v8845_v12 = vadd.f32 %v6615_v22, %v8695_v3  ;;  %v6041_v57 = vpack.c.bf16 %v5176_v51, %v5176_v51  ;;  %v5439_v30 = vmul.f32 %v5176_v51, %v5176_v51  ;;  %v5397_v47 = vsel %vm1332_vm3, %v5176_v51, 0.0 }
 0x332   : > { %v6039_v28 = vpack.c.bf16 %v5174_v62, %v5174_v62  ;;  %v5393_v59 = vsel %vm1332_vm3, %v5174_v62, 0.0  ;;  %v5437_v11 = vmul.f32 %v5174_v62, %v5174_v62  ;;  %v5493_v34 = vadd.f32 %v5492_v24, %v5491_v44 }
 0x333   : > { %5336 = vst.msk [vmem:[%s8703_s17 + $0x78] sm:$0xf] %vm562_vm0, %v6041_v57  ;;  %v5392_v42 = vadd.f32 %v5391_v63, %v5390_v29  ;;  %v6042_v60 = vpack.c.bf16 %v8845_v12, %v8845_v12  ;;  %v5175_v14 = vadd.f32 %v6616_v25, %v8695_v3  ;;  %v5440_v35 = vmul.f32 %v8845_v12, %v8845_v12 }
 0x334   : > { %5334 = vst.msk [vmem:[%s8703_s17 + $0x70] sm:$0xf] %vm562_vm0, %v6039_v28  ;;  %v5496_v13 = vsel %vm1332_vm3, %v5437_v11, 0.0  ;;  %v5495_v46 = vadd.f32 %v5494_v4, %v5493_v34 }
 0x335   : > { %v5394_v15 = vadd.f32 %v5393_v59, %v5392_v42  ;;  %5337 = vst.msk [vmem:[%s8703_s17 + $0x7c] sm:$0xf] %vm562_vm0, %v6042_v60  ;;  %v6040_v0 = vpack.c.bf16 %v5175_v14, %v5175_v14  ;;  %v5395_v56 = vsel %vm1332_vm3, %v5175_v14, 0.0  ;;  %v5438_v3 = vmul.f32 %v5175_v14, %v5175_v14 }
 0x336   : > { %v5497_v21 = vadd.f32 %v5496_v13, %v5495_v46 }
 0x337   : > { %v5396_v37 = vadd.f32 %v5395_v56, %v5394_v15  ;;  %5335 = vst.msk [vmem:[%s8703_s17 + $0x74] sm:$0xf] %vm562_vm0, %v6040_v0  ;;  %v5498_v48 = vsel %vm1332_vm3, %v5438_v3, 0.0 }
 0x338   : > { %v5499_v58 = vadd.f32 %v5498_v48, %v5497_v21 }
 0x339   : > { %v5398_v16 = vadd.f32 %v5397_v47, %v5396_v37 }
 0x33a   : > { %7225 = shalt.err (!%p7222_p5)
}
 0x33b   : > { %s7226_s20 = scalar_lea.hbm %s8870_s11, 2048  ;;  %s7230_s30 = scalar_lea.hbm %s9079_s24, 4096 }
 0x33c   : > { %p7227_p7 = scmp.ne.s32.totalorder %s8870_s11, %s7226_s20  ;;  %p7231_p10 = scmp.lt.u32.totalorder %s8870_s11, %s9079_s24 }
 0x33d   : > { %p7232_p12 = scmp.lt.u32.totalorder %s7230_s30, %s7226_s20  ;;  %p7234_p8 = scmp.lt.u32.totalorder %s7226_s20, %s8870_s11 }
 0x33e   : > { %p7228_p6 = pnand %p7227_p7, %p9081_p13 }
 0x33f   : > { %p7233_p2 = por %p7232_p12, %p7231_p10 }
 0x340   : > { %p7229_p9 = pneg %p7228_p6 }
 0x341   : > { %p7235_p11 = por %p7234_p8, %p7233_p2 }
 0x343   : > { %p7236_p1 = pnand %p7235_p11, %p7229_p9 }
 0x345   : > { %7239 = shalt.err (!%p7236_p1)
}
 0x346   : > { %s7379_s23 = smov 64   ;;  %s7380_s21 = smov 4   ;;  %v5500_v33 = vsel %vm1332_vm3, %v5439_v30, 0.0  ;;  %v5399_v1 = vsel %vm1332_vm3, %v8845_v12, 0.0  ;;  %v5502_v7 = vsel %vm1332_vm3, %v5440_v35, 0.0  ;;  %vm5407_vm6 = vcmask 57344  }
 0x347   : > { %6873 = dma.vmem_to_hbm [thread:$0]  (%p9081_p13), %s8872_s29, 2048, %s8870_s11, %s5512_s16, %s7379_s23, %s7379_s23, %s7380_s21   ;;  %v5400_v32 = vadd.f32 %v5399_v1, %v5398_v16  ;;  %v5501_v10 = vadd.f32 %v5500_v33, %v5499_v58 }
 0x348   : > { %s6003_s19 = sshll.u32 %s7358_s12, 4  ;;  %s544_s17 = scalar_lea.vmem [#allocation16], %s7738_s3 }
 0x349   : > { %v5401_v43 = vrot.slane %v5400_v32, 4  ;;  %v5503_v8 = vadd.f32 %v5502_v7, %v5501_v10  ;;  %s5553_s27 = sshll.u32 %s544_s17, 4  ;;  %s550_s29 = scalar_lea.vmem [#allocation18], %s7738_s3  ;;  %s8919_s27 = int_to_ptr.vmem [resolvable:$true] %s5553_s27 }
 0x34a   : > { %s5567_s13 = sshll.u32 %s550_s29, 4  ;;  %s9082_s16 = sld [smem:[#allocation37_spill]]  ;;  %s8927_s13 = int_to_ptr.vmem [resolvable:$true] %s5567_s13 }
 0x34b   : > { %v5402_v45 = vadd.f32 %v5401_v43, %v5400_v32  ;;  %v5504_v6 = vrot.slane %v5503_v8, 4  ;;  %s9083_s22 = sld [smem:[#allocation38_spill]]  ;;  %s8931_s20 = scalar_lea.sflag [#allocation17], %s469_s9 }
 0x34c   : > { %s7240_s26 = scalar_lea.vmem %s8919_s27, 16  ;;  %s7381_s28 = smov [#allocation16]  }
 0x34d   : > { %v5403_v19 = vrot.slane %v5402_v45, 2  ;;  %v5505_v41 = vadd.f32 %v5504_v6, %v5503_v8  ;;  %p7241_p3 = scmp.ne.s32.totalorder %s8919_s27, %s7240_s26  ;;  %s7244_s30 = sshll.u32 %s7381_s28, 4  ;;  %s7245_s30 = int_to_ptr.vmem [resolvable:$false] %s7244_s30 }
 0x34e   : > { %s7246_s14 = scalar_lea.vmem %s7245_s30, 32  ;;  %p7247_p5 = scmp.lt.s32.totalorder %s8919_s27, %s7245_s30 }
 0x34f   : > { %v5506_v9 = vrot.slane %v5505_v41, 2  ;;  %v5404_v20 = vadd.f32 %v5403_v19, %v5402_v45  ;;  %p7242_p4 = pnand %p7241_p3, %p9081_p13  ;;  %p7248_p7 = scmp.lt.s32.totalorder %s7246_s14, %s7240_s26 }
 0x350   : > { %s8917_s25 = scalar_lea.hbm %s9082_s16, %s6003_s19 }
 0x351   : > { %v5507_v39 = vadd.f32 %v5506_v9, %v5505_v41  ;;  %v5405_v38 = vrot.slane %v5404_v20, 1  ;;  %s8925_s7 = scalar_lea.hbm %s9083_s22, %s6003_s19  ;;  %p7243_p0 = pneg %p7242_p4 }
 0x352   : > { %p7249_p6 = por %p7248_p7, %p7247_p5 }
 0x353   : > { %v5406_v2 = vadd.f32 %v5405_v38, %v5404_v20  ;;  %v5508_v18 = vrot.slane %v5507_v39, 1 }
 0x354   : > { %p7250_p9 = pnand %p7249_p6, %p7243_p0 }
 0x355   : > { %5408 = vst.msk [vmem:[%s544_s17] sm:$0x1] %vm5407_vm6, %v5406_v2  ;;  %v5509_v26 = vadd.f32 %v5508_v18, %v5507_v39 }
 0x356   : > { %7253 = shalt.err (!%p7250_p9)
}
 0x357   : > { %s7254_s15 = scalar_lea.hbm %s8917_s25, 16  ;;  %s7258_s23 = scalar_lea.hbm %s9082_s16, 32 }
 0x358   : > { %p7255_p10 = scmp.ne.s32.totalorder %s8917_s25, %s7254_s15  ;;  %p7259_p8 = scmp.lt.u32.totalorder %s8917_s25, %s9082_s16 }
 0x359   : > { %p7260_p11 = scmp.lt.u32.totalorder %s7258_s23, %s7254_s15  ;;  %p7262_p3 = scmp.lt.u32.totalorder %s7254_s15, %s8917_s25 }
 0x35a   : > { %p7256_p12 = pnand %p7255_p10, %p9081_p13 }
 0x35b   : > { %p7261_p1 = por %p7260_p11, %p7259_p8 }
 0x35c   : > { %p7257_p2 = pneg %p7256_p12 }
 0x35d   : > { %p7263_p4 = por %p7262_p3, %p7261_p1 }
 0x35f   : > { %p7264_p0 = pnand %p7263_p4, %p7257_p2 }
 0x361   : > { %7267 = shalt.err (!%p7264_p0)
}
 0x362   : > { %6874 = dma.vmem_to_hbm [thread:$0]  (%p9081_p13), %s8919_s27, 16, %s8917_s25, %s8931_s20   ;;  %5510 = vst.msk [vmem:[%s550_s29] sm:$0x1] %vm5407_vm6, %v5509_v26 }
 0x363   : > { %s7268_s17 = scalar_lea.vmem %s8927_s13, 16  ;;  %s7382_s1 = smov [#allocation18]  }
 0x364   : > { %p7269_p5 = scmp.ne.s32.totalorder %s8927_s13, %s7268_s17  ;;  %s7272_s11 = sshll.u32 %s7382_s1, 4  ;;  %s7273_s11 = int_to_ptr.vmem [resolvable:$false] %s7272_s11 }
 0x365   : > { %s7274_s12 = scalar_lea.vmem %s7273_s11, 32  ;;  %p7275_p9 = scmp.lt.s32.totalorder %s8927_s13, %s7273_s11 }
 0x366   : > { %p7270_p7 = pnand %p7269_p5, %p9081_p13  ;;  %p7276_p10 = scmp.lt.s32.totalorder %s7274_s12, %s7268_s17 }
 0x368   : > { %p7271_p6 = pneg %p7270_p7  ;;  %p7277_p12 = por %p7276_p10, %p7275_p9 }
 0x36a   : > { %p7278_p2 = pnand %p7277_p12, %p7271_p6 }
 0x36c   : > { %7281 = shalt.err (!%p7278_p2)
}
 0x36d   : > { %s7282_s3 = scalar_lea.hbm %s8925_s7, 16  ;;  %s7286_s25 = scalar_lea.hbm %s9083_s22, 32 }
 0x36e   : > { %p7283_p8 = scmp.ne.s32.totalorder %s8925_s7, %s7282_s3  ;;  %p7287_p3 = scmp.lt.u32.totalorder %s8925_s7, %s9083_s22 }
 0x36f   : > { %p7288_p4 = scmp.lt.u32.totalorder %s7286_s25, %s7282_s3  ;;  %p7290_p5 = scmp.lt.u32.totalorder %s7282_s3, %s8925_s7 }
 0x370   : > { %p7284_p11 = pnand %p7283_p8, %p9081_p13 }
 0x371   : > { %p7289_p0 = por %p7288_p4, %p7287_p3 }
 0x372   : > { %p7285_p1 = pneg %p7284_p11 }
 0x373   : > { %p7291_p7 = por %p7290_p5, %p7289_p0 }
 0x375   : > { %p7292_p6 = pnand %p7291_p7, %p7285_p1 }
 0x377   : > { %7295 = shalt.err (!%p7292_p6)
}
 0x378   : > { %6875 = dma.vmem_to_hbm [thread:$0]  (%p9081_p13), %s8927_s13, 16, %s8925_s7, %s8931_s20  }
 0x379 PF: > { %s9084_s28 = sld [smem:[#allocation25_spill]]  ;;  %s9085_s30 = sld [smem:[#allocation29_spill]] }
 0x37a   : > { %s9086_s14 = sld [smem:[#allocation28_spill]] }
 0x37f   : > { %s5579_s15 = sand.u32 1, %s9084_s28   ;;  %p9087_p9 = scmp.ne.s32.totalorder %s9085_s30, 0 }
 0x380   : > { %p9088_p10 = scmp.ge.s32.totalorder %s9086_s14, 2  ;;  %s5580_s9 = scalar_lea.sflag [#allocation5], %s5579_s15 }
 0x382   : > { %p6903_p12 = pnand %p9088_p10, %p9087_p9 }
 0x384   : > { %7337 = dma.done.wait (!%p6903_p12), %s5580_s9, 2048  }
 0x385   : > { %7339 = vsyncadd (!%p6903_p12), %s5580_s9, 4294965248  ;;  %s9089_s18 = sadd.s32 4294967294, %s9086_s14  }
 0x386   : > { %s5588_s23 = sand.u32 1, %s9089_s18  }
 0x387   : > { %s5589_s21 = scalar_lea.sflag [#allocation17], %s5588_s23 }
 0x388   : > { %7341 = dma.done.wait (!%p6903_p12), %s5589_s21, 32  }
 0x389   : > { %7343 = vsyncadd (!%p6903_p12), %s5589_s21, 4294967264  ;;  %s34_s14 = sadd.s32 1, %s9086_s14   ;;  %s9090_s5 = sld [smem:[#allocation26_spill]] }
 0x38a   : > { %p31_p13 = scmp.ge.s32.totalorder %s34_s14, 4   ;;  %s9091_s11 = sld [smem:[#allocation32_spill]] }
 0x38b   : > { %s9092_s12 = sld [smem:[#allocation27_spill]]  ;;  %s9093_s13 = sld [smem:[#allocation30_spill]] }
 0x38c   : > { %s9094_s30 = smov %s7350_s10  ;;  %33 = sbr.rel (!%p31_p13) target bundleno = 19 (0x13), region = 168 }
 0x38f   : > { %s9095_s10 = smov %s9090_s5 }
 0x393   :  { %5601 = vsyncpa [#allocation4], 1 }
 0x394   :  { %5603 = vsyncpa [#allocation4 + $0x1], 1 }
 0x395   :  { %5604 = vsyncpa [#allocation7], 1 }
 0x396   :  { %5606 = vsyncpa [#allocation7 + $0x1], 1 }
 0x397   :  { %5607 = vsyncpa [#allocation10], 1 }
 0x398   :  { %5608 = vsyncpa [#allocation13], 1 }
 0x399   :  { %5609 = vsyncpa [#allocation5], 1 }
 0x39a   :  { %5611 = vsyncpa [#allocation5 + $0x1], 1 }
 0x39b   :  { %5612 = vsyncpa [#allocation17], 1 }
 0x39c   :  { %5614 = vsyncpa [#allocation17 + $0x1], 1 }

// kernel: double_conv_ds.3
= control target key start
LH: loop header
LB: loop body
LE: loop exit
PB: predicated region body
PF: predicated region fallthrough
CT: control target
= control target key end

     0   :  { %s8727_s0 = inlined_call_operand.hbm [shape: f32[2,16,16,4], index: 0, kind: input, shape index: {}, may-alias: {0,1,2}]   ;;  %s8728_s1 = inlined_call_operand.hbm [shape: f32[2,16,16,4], index: 1, kind: input, shape index: {}, may-alias: {0,1,2}]   ;;  %s8729_s2 = inlined_call_operand.hbm [shape: f32[2,16,16,4], index: 2, kind: input, shape index: {}, may-alias: {0,1,2}]   ;;  %s8730_s3 = inlined_call_operand.hbm [shape: f32[1,4], index: 3, kind: input, shape index: {}]   ;;  %s8731_s4 = inlined_call_operand.hbm [shape: f32[1,4], index: 4, kind: input, shape index: {}]   ;;  %s8732_s5 = inlined_call_operand.hbm [shape: bf16[36,8], index: 5, kind: input, shape index: {}]   ;;  %s8733_s6 = inlined_call_operand.hbm [shape: f32[1,8], index: 6, kind: input, shape index: {}]   ;;  %s8734_s7 = inlined_call_operand.hbm [shape: bf16[2,16,16,8], index: 7, kind: output, shape index: {0}]   ;;  %s8735_s8 = inlined_call_operand.hbm [shape: f32[2,1,1,8], index: 8, kind: output, shape index: {1}]   ;;  %s8736_s9 = inlined_call_operand.hbm [shape: f32[2,1,1,8], index: 9, kind: output, shape index: {2}]  }
   0x1   :  { %8769 = sst [smem:[#allocation37_spill]] %s8728_s1 }
   0x2   :  { %8770 = sst [smem:[#allocation38_spill]] %s8730_s3 }
   0x3   :  { %8771 = sst [smem:[#allocation39_spill]] %s8732_s5 }
   0x4   :  { %8772 = sst [smem:[#allocation40_spill]] %s8735_s8 }
   0x5   :  { %8773 = sst [smem:[#allocation41_spill]] %s8736_s9 }
   0x6   :  { %15 = vsyncpa [#allocation4], 0 }
   0x7   :  { %17 = vsyncpa [#allocation4 + $0x1], 0 }
   0x8   :  { %18 = vsyncpa [#allocation7], 0 }
   0x9   :  { %20 = vsyncpa [#allocation7 + $0x1], 0 }
   0xa   :  { %21 = vsyncpa [#allocation10], 0 }
   0xb   :  { %22 = vsyncpa [#allocation13], 0 }
   0xc   :  { %23 = vsyncpa [#allocation5], 0 }
   0xd   :  { %25 = vsyncpa [#allocation5 + $0x1], 0 }
   0xe   :  { %26 = vsyncpa [#allocation17], 0 }
   0xf   :  { %28 = vsyncpa [#allocation17 + $0x1], 0  ;;  %s7206_s30 = smov 0   ;;  %s7208_s10 = smov 0  }
  0x10   :  { %s7210_s11 = smov 0   ;;  %s7212_s12 = smov 0  }
  0x11   :  { %s7214_s13 = smov 0   ;;  %s7216_s14 = smov 0  }
  0x12 LB: > { %8774 = sst [smem:[#allocation25_spill]] %s7117_s30  ;;  %s7237_s15 = sadd.s32 4294967295, %s7137_s14   ;;  %s7137_s14 = sphi %s7216_s14, %s34_s14   ;;  %s7133_s13 = sphi %s7214_s13, %s8840_s13   ;;  %s7129_s12 = sphi %s7212_s12, %s8839_s12   ;;  %s7125_s11 = sphi %s7210_s11, %s8843_s11   ;;  %s7121_s10 = sphi %s7208_s10, %s8842_s10   ;;  %s7117_s30 = sphi %s7206_s30, %s8841_s30  }
  0x13   : > { %8775 = sst [smem:[#allocation26_spill]] %s7125_s11  ;;  %s8737_s16 = sadd.s32 4294967294, %s7137_s14  }
  0x14   : > { %8776 = sst [smem:[#allocation27_spill]] %s7133_s13  ;;  %p68_p0 = scmp.ne.s32.totalorder %s7121_s10, %s7117_s30 }
  0x15   : > { %8777 = sst [smem:[#allocation28_spill]] %s7137_s14  ;;  %p8738_p1 = scmp.eq.s32.totalorder %s7237_s15, 0 }
  0x16   : > { %p256_p3 = scmp.eq.s32.totalorder %s8737_s16, 1  ;;  %p5641_p5 = scmp.ge.s32.totalorder %s7137_s14, 1 }
  0x17   : > { %p7248_p4 = por %p8738_p1, %p68_p0  ;;  %p319_p7 = scmp.lt.s32.totalorder %s7137_s14, 3 }
  0x18   : > { %p7253_p6 = por %p256_p3, %p68_p0  ;;  %s7139_s20 = smov [#allocation9]  }
  0x19   : > { %s8778_s17 = scalar_select %p7248_p4, 1, 0 }
  0x1a   : > { %s8779_s18 = scalar_select %p7253_p6, 1, 0 }
  0x1b   : > { %p7258_p8 = pnand %p5641_p5, %p319_p7  ;;  %s332_s21 = sshll.u32 %s7139_s20, 4  ;;  %s333_s21 = int_to_ptr.vmem [resolvable:$true] %s332_s21 }
  0x1c   : > { %8780 = sst [smem:[#allocation29_spill]] %s8779_s18  ;;  %s7140_s22 = smov [#allocation12]  }
  0x1d   : > { %s8781_s19 = scalar_select %p7258_p8, 1, 0 }
  0x1e   : > { %p6646_p10 = pneg %p7258_p8  ;;  %s353_s23 = sshll.u32 %s7140_s22, 4  ;;  %s7271_s23 = int_to_ptr.vmem [resolvable:$true] %s353_s23 }
  0x1f   : > { %s8783_s3 = sld [smem:[#allocation38_spill]] }
  0x20   : > { %p7267_p11 = pnand %p6646_p10, %p8738_p1 }
  0x22   : > { %s8782_s24 = scalar_select %p7267_p11, 1, 0 }
  0x23   : > { %p7281_p13 = pneg %p7267_p11 }
  0x25   : > { %s6781_s27 = scalar_lea.hbm %s8783_s3, 16 }
  0x26   : > { %p6782_p12 = scmp.ne.s32.totalorder %s8783_s3, %s6781_s27  ;;  %p6788_p5 = scmp.lt.u32.totalorder %s6781_s27, %s8783_s3 }
  0x27   : > { %s8784_s20 = scalar_select %p7281_p13, 1, 0 }
  0x28   : > { %p6784_p0 = pnand %p7281_p13, %p6782_p12 }
  0x2a   : > { %p6785_p3 = pneg %p6784_p0 }
  0x2c   : > { %p6790_p7 = pnand %p6788_p5, %p6785_p3 }
  0x2e   : > { %6793 = shalt.err (!%p6790_p7)
}
  0x2f   : > { %s6794_s25 = scalar_lea.vmem %s333_s21, 16  ;;  %s6801_s26 = scalar_lea.vmem %s333_s21, 32 }
  0x30   : > { %p6795_p10 = scmp.ne.s32.totalorder %s333_s21, %s6794_s25  ;;  %p6802_p2 = scmp.lt.s32.totalorder %s333_s21, %s333_s21 }
  0x31   : > { %p6803_p6 = scmp.lt.s32.totalorder %s6801_s26, %s6794_s25 }
  0x32   : > { %p6797_p9 = pnand %p6795_p10, %p7281_p13 }
  0x33   : > { %p6804_p4 = por %p6803_p6, %p6802_p2 }
  0x34   : > { %p6798_p1 = pneg %p6797_p9 }
  0x36   : > { %p6805_p8 = pnand %p6804_p4, %p6798_p1 }
  0x38   : > { %6808 = shalt.err (!%p6805_p8)
}
  0x39   : > { %6649 = dma.hbm_to_vmem [thread:$0]  (!%p7267_p11), %s8783_s3, 16, %s333_s21, [#allocation10]  }
  0x3a   : > { %s8785_s5 = sld [smem:[#allocation39_spill]] }
  0x40   : > { %s6809_s22 = scalar_lea.hbm %s8785_s5, 320 }
  0x41   : > { %p6810_p9 = scmp.ne.s32.totalorder %s8785_s5, %s6809_s22  ;;  %p6816_p1 = scmp.lt.u32.totalorder %s6809_s22, %s8785_s5 }
  0x43   : > { %p6812_p12 = pnand %p6810_p9, %p7281_p13 }
  0x45   : > { %p6813_p2 = pneg %p6812_p12 }
  0x47   : > { %p6818_p4 = pnand %p6816_p1, %p6813_p2 }
  0x49   : > { %6821 = shalt.err (!%p6818_p4)
}
  0x4a   : > { %s6822_s21 = scalar_lea.vmem %s7271_s23, 320  ;;  %p6830_p3 = scmp.lt.s32.totalorder %s7271_s23, %s7271_s23 }
  0x4b   : > { %p6823_p6 = scmp.ne.s32.totalorder %s7271_s23, %s6822_s21  ;;  %p6831_p5 = scmp.lt.s32.totalorder %s6822_s21, %s6822_s21 }
  0x4d   : > { %p6825_p8 = pnand %p6823_p6, %p7281_p13  ;;  %p6832_p7 = por %p6831_p5, %p6830_p3 }
  0x4f   : > { %p6826_p0 = pneg %p6825_p8 }
  0x51   : > { %p6833_p10 = pnand %p6832_p7, %p6826_p0 }
  0x53   : > { %6836 = shalt.err (!%p6833_p10)
}
  0x54   : > { %s7141_s30 = smov 64   ;;  %s7142_s18 = smov 4  }
  0x55   : > { %6655 = dma.hbm_to_vmem [thread:$0]  (!%p7267_p11), %s8785_s5, 320, %s7271_s23, [#allocation13], %s7141_s30, %s7141_s30, %s7142_s18  }
  0x56   : > { %s46_s16 = sadd.s32 1, %s7133_s13  ;;  %s55_s27 = sadd.s32 1, %s7125_s11 }
  0x57   : > { %p48_p9 = scmp.ge.s32.totalorder %s46_s16, 2  ;;  %p62_p12 = scmp.ne.s32.totalorder %s7125_s11, %s7121_s10 }
  0x58   : > { %p63_p2 = scmp.eq.s32.totalorder %s7137_s14, 0  ;;  %p6683_p1 = scmp.lt.s32.totalorder %s7137_s14, 2 }
  0x59   : > { %s8845_s16 = smov (%p48_p9, %s46_s16), 0  ;;  %p8787_p6 = scmp.eq.s32.totalorder %s7237_s15, 1 }
  0x5a   : > { %8786 = sst [smem:[#allocation30_spill]] %s8845_s16  ;;  %p64_p4 = por %p63_p2, %p62_p12 }
  0x5b   : > { %p7330_p8 = por %p8787_p6, %p62_p12  ;;  %s50_s25 = ssub.s32 %s7133_s13, %s8845_s16 }
  0x5c   : > { %s7337_s26 = sand.u32 1, %s7125_s11   ;;  %p53_p0 = scmp.eq.s32.totalorder %s50_s25, 0 }
  0x5d   : > { %s8788_s22 = scalar_select %p7330_p8, 1, 0 }
  0x5e   : > { %s7340_s23 = sshll.u32 %s7133_s13, 12  ;;  %p7342_p3 = pnand %p6683_p1, %p64_p4 }
  0x5f   : > { %8789 = sst [smem:[#allocation31_spill]] %s8788_s22  ;;  %s402_s18 = sand.u32 1, %s7137_s14  }
  0x60   : > { %s8790_s21 = scalar_select %p7342_p3, 1, 0 }
  0x61   : > { %s7347_s30 = scalar_select %p53_p0, %s7125_s11, %s55_s27  }
  0x62   : > { %s8745_s28 = sshll.u32 %s7337_s26, 4  ;;  %s8792_s1 = sld [smem:[#allocation37_spill]] }
  0x63   : > { %8791 = sst [smem:[#allocation32_spill]] %s7347_s30  ;;  %s406_s25 = scalar_lea.vmem [#allocation6], %s8745_s28 }
  0x64   : > { %s419_s16 = sshll.u32 %s406_s25, 4  ;;  %s7361_s13 = scalar_lea.sflag [#allocation7], %s402_s18  ;;  %s7359_s16 = int_to_ptr.vmem [resolvable:$true] %s419_s16 }
  0x65   : > { %p7367_p7 = pneg %p7342_p3 }
  0x67   : > { %s8793_s30 = scalar_select %p7367_p7, 1, 0 }
  0x68   : > { %s7355_s5 = scalar_lea.hbm %s8792_s1, %s7340_s23  ;;  %s6842_s28 = scalar_lea.hbm %s8792_s1, 8192 }
  0x69   : > { %s6837_s27 = scalar_lea.hbm %s7355_s5, 256  ;;  %p6843_p12 = scmp.lt.u32.totalorder %s7355_s5, %s8792_s1 }
  0x6a   : > { %p6838_p5 = scmp.ne.s32.totalorder %s7355_s5, %s6837_s27  ;;  %p6844_p2 = scmp.lt.u32.totalorder %s6842_s28, %s6837_s27 }
  0x6b   : > { %p6846_p4 = scmp.lt.u32.totalorder %s6837_s27, %s7355_s5 }
  0x6c   : > { %p6840_p10 = pnand %p7367_p7, %p6838_p5  ;;  %p6845_p1 = por %p6844_p2, %p6843_p12 }
  0x6e   : > { %p6841_p9 = pneg %p6840_p10  ;;  %p6847_p6 = por %p6846_p4, %p6845_p1 }
  0x70   : > { %p6848_p0 = pnand %p6847_p6, %p6841_p9 }
  0x72   : > { %6851 = shalt.err (!%p6848_p0)
}
  0x73   : > { %s6852_s18 = scalar_lea.vmem %s7359_s16, 256  ;;  %s7143_s3 = smov [#allocation6]  }
  0x74   : > { %p6853_p5 = scmp.ne.s32.totalorder %s7359_s16, %s6852_s18  ;;  %s6857_s29 = sshll.u32 %s7143_s3, 4  ;;  %s6858_s29 = int_to_ptr.vmem [resolvable:$false] %s6857_s29 }
  0x75   : > { %s6859_s11 = scalar_lea.vmem %s6858_s29, 512  ;;  %p6860_p11 = scmp.lt.s32.totalorder %s7359_s16, %s6858_s29 }
  0x76   : > { %p6855_p10 = pnand %p6853_p5, %p7367_p7  ;;  %p6861_p13 = scmp.lt.s32.totalorder %s6859_s11, %s6852_s18 }
  0x78   : > { %p6856_p8 = pneg %p6855_p10  ;;  %p6862_p12 = por %p6861_p13, %p6860_p11 }
  0x7a   : > { %p6863_p2 = pnand %p6862_p12, %p6856_p8 }
  0x7c   : > { %6866 = shalt.err (!%p6863_p2)
}
  0x7d   : > { %s8760_s28 = smov 128   ;;  %s7145_s27 = smov 8  }
  0x7e   : > { %6665 = dma.hbm_to_vmem [thread:$0]  (!%p7342_p3), %s7355_s5, 256, %s7359_s16, %s7361_s13, %s8760_s28, %s8760_s28, %s7145_s27  }
  0x7f   : > { %s8794_s25 = sshll.u32 %s7337_s26, 4  ;;  %s7146_s18 = smov [#allocation11]  }
  0x80   : > { %s433_s3 = scalar_lea.vmem [#allocation8], %s8794_s25  ;;  %s343_s11 = sshll.u32 %s7146_s18, 4  ;;  %s344_s11 = int_to_ptr.vmem [resolvable:$true] %s343_s11 }
  0x81   : > { %s446_s29 = sshll.u32 %s433_s3, 4  ;;  %s6867_s9 = scalar_lea.hbm %s8731_s4, 16  ;;  %s7396_s29 = int_to_ptr.vmem [resolvable:$true] %s446_s29 }
  0x82   : > { %p6868_p11 = scmp.ne.s32.totalorder %s8731_s4, %s6867_s9  ;;  %p8795_p13 = scmp.ne.s32.totalorder %s8784_s20, 0 }
  0x83   : > { %p6874_p1 = scmp.lt.u32.totalorder %s6867_s9, %s8731_s4 }
  0x84   : > { %p6870_p8 = pnand %p6868_p11, %p8795_p13 }
  0x86   : > { %p6871_p9 = pneg %p6870_p8 }
  0x88   : > { %p6876_p4 = pnand %p6874_p1, %p6871_p9 }
  0x8a   : > { %6879 = shalt.err (!%p6876_p4)
}
  0x8b   : > { %s6880_s25 = scalar_lea.vmem %s344_s11, 16  ;;  %s6887_s1 = scalar_lea.vmem %s344_s11, 32 }
  0x8c   : > { %p6881_p6 = scmp.ne.s32.totalorder %s344_s11, %s6880_s25  ;;  %p6888_p10 = scmp.lt.s32.totalorder %s344_s11, %s344_s11 }
  0x8d   : > { %p6889_p12 = scmp.lt.s32.totalorder %s6887_s1, %s6880_s25 }
  0x8e   : > { %p6883_p0 = pnand %p6881_p6, %p8795_p13 }
  0x8f   : > { %p6890_p2 = por %p6889_p12, %p6888_p10 }
  0x90   : > { %p6884_p5 = pneg %p6883_p0 }
  0x92   : > { %p6891_p3 = pnand %p6890_p2, %p6884_p5 }
  0x94   : > { %6894 = shalt.err (!%p6891_p3)
}
  0x95   : > { %p8796_p11 = scmp.ne.s32.totalorder %s8782_s24, 0  ;;  %s7147_s9 = smov [#allocation14]  }
  0x96   : > { %s367_s22 = sshll.u32 %s7147_s9, 4  ;;  %s5647_s3 = sshll.u32 %s7337_s26, 8  ;;  %s368_s22 = int_to_ptr.vmem [resolvable:$true] %s367_s22 }
  0x97   : > { %6652 = dma.hbm_to_vmem [thread:$0]  (!%p8796_p11), %s8731_s4, 16, %s344_s11, [#allocation10]  }
  0x98   : > { %s6895_s16 = scalar_lea.hbm %s8733_s6, 16 }
  0x99   : > { %p6896_p3 = scmp.ne.s32.totalorder %s8733_s6, %s6895_s16  ;;  %p6902_p1 = scmp.lt.u32.totalorder %s6895_s16, %s8733_s6 }
  0x9b   : > { %p6898_p8 = pnand %p6896_p3, %p8795_p13 }
  0x9d   : > { %p6899_p9 = pneg %p6898_p8 }
  0x9f   : > { %p6904_p4 = pnand %p6902_p1, %p6899_p9 }
  0xa1   : > { %6907 = shalt.err (!%p6904_p4)
}
  0xa2   : > { %s6908_s11 = scalar_lea.vmem %s368_s22, 16  ;;  %s6915_s14 = scalar_lea.vmem %s368_s22, 32 }
  0xa3   : > { %p6909_p6 = scmp.ne.s32.totalorder %s368_s22, %s6908_s11  ;;  %p6916_p10 = scmp.lt.s32.totalorder %s368_s22, %s368_s22 }
  0xa4   : > { %p6917_p12 = scmp.lt.s32.totalorder %s6915_s14, %s6908_s11 }
  0xa5   : > { %p6911_p0 = pnand %p6909_p6, %p8795_p13 }
  0xa6   : > { %p6918_p2 = por %p6917_p12, %p6916_p10 }
  0xa7   : > { %p6912_p5 = pneg %p6911_p0 }
  0xa9   : > { %p6919_p7 = pnand %p6918_p2, %p6912_p5 }
  0xab   : > { %6922 = shalt.err (!%p6919_p7)
}
  0xac   : > { %6658 = dma.hbm_to_vmem [thread:$0]  (!%p8796_p11), %s8733_s6, 16, %s368_s22, [#allocation13]  }
  0xad   : > { %s7439_s5 = scalar_lea.hbm %s8727_s0, %s7340_s23  ;;  %s382_s16 = scalar_lea.vmem [#allocation3], %s5647_s3 }
  0xae   : > { %s392_s25 = sshll.u32 %s382_s16, 4  ;;  %s5856_s24 = sadd.s32 3840, %s7340_s23  ;;  %s7442_s25 = int_to_ptr.vmem [resolvable:$true] %s392_s25 }
  0xaf   : > { %s7447_s11 = scalar_lea.hbm %s8729_s2, %s5856_s24  ;;  %s379_s22 = scalar_lea.sflag [#allocation4], %s7337_s26 }
  0xb0   : > { %s6923_s14 = scalar_lea.hbm %s7439_s5, 4096  ;;  %p8797_p13 = scmp.ne.s32.totalorder %s8793_s30, 0 }
  0xb1   : > { %p6924_p7 = scmp.ne.s32.totalorder %s7439_s5, %s6923_s14  ;;  %s6928_s28 = scalar_lea.hbm %s8727_s0, 8192 }
  0xb2   : > { %p6929_p8 = scmp.lt.u32.totalorder %s7439_s5, %s8727_s0  ;;  %p6930_p9 = scmp.lt.u32.totalorder %s6928_s28, %s6923_s14 }
  0xb3   : > { %p6926_p11 = pnand %p6924_p7, %p8797_p13  ;;  %p6932_p4 = scmp.lt.u32.totalorder %s6923_s14, %s7439_s5 }
  0xb4   : > { %p6931_p1 = por %p6930_p9, %p6929_p8 }
  0xb5   : > { %p6927_p3 = pneg %p6926_p11 }
  0xb6   : > { %p6933_p6 = por %p6932_p4, %p6931_p1 }
  0xb8   : > { %p6934_p0 = pnand %p6933_p6, %p6927_p3 }
  0xba   : > { %6937 = shalt.err (!%p6934_p0)
}
  0xbb   : > { %s6938_s23 = scalar_lea.vmem %s7442_s25, 4096  ;;  %s7148_s16 = smov [#allocation3]  }
  0xbc   : > { %p6939_p5 = scmp.ne.s32.totalorder %s7442_s25, %s6938_s23  ;;  %s6943_s24 = sshll.u32 %s7148_s16, 4  ;;  %s6944_s24 = int_to_ptr.vmem [resolvable:$false] %s6943_s24 }
  0xbd   : > { %s6945_s1 = scalar_lea.vmem %s6944_s24, 8192  ;;  %p6946_p2 = scmp.lt.s32.totalorder %s7442_s25, %s6944_s24 }
  0xbe   : > { %p6941_p10 = pnand %p6939_p5, %p8797_p13  ;;  %p6947_p7 = scmp.lt.s32.totalorder %s6945_s1, %s6938_s23 }
  0xc0   : > { %p6942_p12 = pneg %p6941_p10  ;;  %p6948_p11 = por %p6947_p7, %p6946_p2 }
  0xc2   : > { %p6949_p8 = pnand %p6948_p11, %p6942_p12 }
  0xc4   : > { %6952 = shalt.err (!%p6949_p8)
}
  0xc5   : > { %p8798_p3 = scmp.ne.s32.totalorder %s8790_s21, 0  ;;  %s8799_s8 = smov 128  }
  0xc6   : > { %s6953_s14 = scalar_lea.hbm %s7447_s11, 256  ;;  %s6958_s28 = scalar_lea.hbm %s8729_s2, 8192 }
  0xc7   : > { %6662 = dma.hbm_to_vmem [thread:$0]  (!%p8798_p3), %s7439_s5, 4096, %s7442_s25, %s379_s22, %s8799_s8, %s8799_s8, %s7145_s27  }
  0xc8   : > { %p6954_p9 = scmp.ne.s32.totalorder %s7447_s11, %s6953_s14  ;;  %p6959_p6 = scmp.lt.u32.totalorder %s7447_s11, %s8729_s2 }
  0xc9   : > { %p6960_p0 = scmp.lt.u32.totalorder %s6958_s28, %s6953_s14  ;;  %p6962_p10 = scmp.lt.u32.totalorder %s6953_s14, %s7447_s11 }
  0xca   : > { %p6956_p1 = pnand %p6954_p9, %p8797_p13 }
  0xcb   : > { %p6961_p5 = por %p6960_p0, %p6959_p6 }
  0xcc   : > { %p6957_p4 = pneg %p6956_p1 }
  0xcd   : > { %p6963_p12 = por %p6962_p10, %p6961_p5 }
  0xcf   : > { %p6964_p2 = pnand %p6963_p12, %p6957_p4 }
  0xd1   : > { %6967 = shalt.err (!%p6964_p2)
}
  0xd2   : > { %s6968_s26 = scalar_lea.vmem %s7396_s29, 256  ;;  %s7149_s5 = smov [#allocation8]  }
  0xd3   : > { %p6969_p7 = scmp.ne.s32.totalorder %s7396_s29, %s6968_s26  ;;  %s6973_s25 = sshll.u32 %s7149_s5, 4  ;;  %s6974_s25 = int_to_ptr.vmem [resolvable:$false] %s6973_s25 }
  0xd4   : > { %s6975_s22 = scalar_lea.vmem %s6974_s25, 512  ;;  %p6976_p9 = scmp.lt.s32.totalorder %s7396_s29, %s6974_s25 }
  0xd5   : > { %p6971_p11 = pnand %p6969_p7, %p8797_p13  ;;  %p6977_p1 = scmp.lt.s32.totalorder %s6975_s22, %s6968_s26 }
  0xd7   : > { %p6972_p8 = pneg %p6971_p11  ;;  %p6978_p6 = por %p6977_p1, %p6976_p9 }
  0xd9   : > { %p6979_p0 = pnand %p6978_p6, %p6972_p8 }
  0xdb   : > { %6982 = shalt.err (!%p6979_p0)
}
  0xdc   : > { %6668 = dma.hbm_to_vmem [thread:$0]  (!%p8798_p3), %s7447_s11, 256, %s7396_s29, %s7361_s13, %s8799_s8, %s8799_s8, %s7145_s27  }
  0xdd   : > { %p8800_p13 = scmp.ne.s32.totalorder %s8781_s19, 0 }
  0xdf   : > { %458 = sbr.rel (%p8800_p13) target bundleno = 880 (0x370), region = 48 }
  0xe6   : > { %s7504_s30 = sand.u32 1, %s7121_s10   ;;  %p8801_p4 = scmp.ne.s32.totalorder %s8778_s17, 0 }
  0xe7   : > { %s5657_s23 = sshll.u32 %s7504_s30, 8  ;;  %s461_s16 = scalar_lea.sflag [#allocation4], %s7504_s30 }
  0xe8   : > { %s7508_s24 = scalar_lea.vmem [#allocation3], %s5657_s23 }
  0xe9   : > { %7092 = dma.done.wait (%p8801_p4), %s461_s16, 4096  }
  0xea   : > { %7094 = vsyncadd (%p8801_p4), %s461_s16, 4294963200  ;;  %s469_s13 = sand.u32 1, %s7237_s15  }
  0xeb   : > { %s470_s19 = scalar_lea.sflag [#allocation7], %s469_s13 }
  0xec   : > { %7096 = dma.done.wait (%p8801_p4), %s470_s19, 512  }
  0xed   : > { %7098 = vsyncadd (%p8801_p4), %s470_s19, 4294966784  ;;  %p8802_p3 = scmp.eq.s32.totalorder %s7237_s15, 0 }
  0xef   : > { %7100 = dma.done.wait (%p8802_p3), [#allocation10], 32   ;;  %p8803_p5 = pmov %p8802_p3 }
  0xf0   : > { %p8804_p10 = pmov %p8802_p3 }
  0xf1   : > { %7102 = vsyncadd (%p8803_p5), [#allocation10], 4294967264 }
  0xf2   : > { %7104 = dma.done.wait (%p8804_p10), [#allocation13], 336   ;;  %p8805_p12 = pmov %p8802_p3 }
  0xf3   : > { %vm562_vm0 = vcmask 27648   ;;  %vm581_vm1 = vcmask 31748   ;;  %v7150_v0 = vmov 0   ;;  %vm1213_vm2 = vcmask 1041408   ;;  %v627_v3 = vld [vmem:[%s7508_s24] sm:$0xff]  ;;  %v628_v5 = vld [vmem:[%s7508_s24 + $0x8] sm:$0xff] }
  0xf4   : > { %7106 = vsyncadd (%p8805_p12), [#allocation13], 4294966960  ;;  %v617_v1 = vrot.slane %v7150_v0, 4  ;;  %563 = vst.msk [vmem:[#allocation2] sm:$0xf] %vm562_vm0, %v7150_v0  ;;  %v659_v9 = vpack.c.bf16 %v628_v5, %v627_v3  ;;  %v629_v10 = vld [vmem:[%s7508_s24 + $0x10] sm:$0xff] }
  0xf5   : > { %564 = vst.msk [vmem:[#allocation2 + $0x10] sm:$0xf] %vm562_vm0, %v7150_v0  ;;  %565 = vst.msk [vmem:[#allocation2 + $0x20] sm:$0xf] %vm562_vm0, %v7150_v0  ;;  %v2773_v4 = vld [vmem:[#allocation12 + $0x8] sm:$0x3] }
  0xf6   : > { %566 = vst.msk [vmem:[#allocation2 + $0x30] sm:$0xf] %vm562_vm0, %v7150_v0  ;;  %567 = vst.msk [vmem:[#allocation2 + $0x40] sm:$0xf] %vm562_vm0, %v7150_v0  ;;  %v1061_v6 = vld [vmem:[#allocation12] sm:$0x3]  ;;  %6612 = vmatprep.subr.msk.bf16.mxu0 %vm1213_vm2, %v2773_v4 }
  0xf7   : > { %568 = vst.msk [vmem:[#allocation2 + $0x50] sm:$0xf] %vm562_vm0, %v7150_v0  ;;  %569 = vst.msk [vmem:[#allocation2 + $0x60] sm:$0xf] %vm562_vm0, %v7150_v0  ;;  %v7573_v8 = vsel %vm1213_vm2, %v2773_v4, 0  ;;  %v630_v13 = vld [vmem:[%s7508_s24 + $0x18] sm:$0xff] }
  0xf8   : > { %570 = vst.msk [vmem:[#allocation2 + $0x70] sm:$0xf] %vm562_vm0, %v7150_v0  ;;  %571 = vst.msk [vmem:[#allocation2 + $0x80] sm:$0xf] %vm562_vm0, %v7150_v0  ;;  %6181 = vmatpush3.bf16.msra.mxu0 %v7573_v8  ;;  %vm1110_vm3 = vcmask 1043456   ;;  %v631_v16 = vld [vmem:[%s7508_s24 + $0x20] sm:$0xff]  ;;  %v660_v23 = vpack.c.bf16 %v630_v13, %v629_v10 }
  0xf9   : > { %572 = vst.msk [vmem:[#allocation2 + $0x90] sm:$0xf] %vm562_vm0, %v7150_v0  ;;  %573 = vst.msk [vmem:[#allocation2 + $0xa0] sm:$0xf] %vm562_vm0, %v7150_v0  ;;  %v632_v17 = vld [vmem:[%s7508_s24 + $0x28] sm:$0xff]  ;;  %vm1164_vm4 = vcmask 31744  }
  0xfa   : > { %574 = vst.msk [vmem:[#allocation2 + $0xb0] sm:$0xf] %vm562_vm0, %v7150_v0  ;;  %575 = vst.msk [vmem:[#allocation2 + $0xc0] sm:$0xf] %vm562_vm0, %v7150_v0  ;;  %v691_v19 = vrot.slane %v659_v9, 4  ;;  %v633_v20 = vld [vmem:[%s7508_s24 + $0x30] sm:$0xff]  ;;  %v661_v24 = vpack.c.bf16 %v632_v17, %v631_v16 }
  0xfb   : > { %576 = vst.msk [vmem:[#allocation2 + $0xd0] sm:$0xf] %vm562_vm0, %v7150_v0  ;;  %577 = vst.msk [vmem:[#allocation2 + $0xe0] sm:$0xf] %vm562_vm0, %v7150_v0  ;;  %v634_v21 = vld [vmem:[%s7508_s24 + $0x38] sm:$0xff]  ;;  %v635_v26 = vld [vmem:[%s7508_s24 + $0x40] sm:$0xff] }
  0xfc   : > { %578 = vst.msk [vmem:[#allocation2 + $0xf0] sm:$0xf] %vm562_vm0, %v7150_v0  ;;  %579 = vst.msk [vmem:[#allocation2 + $0x100] sm:$0xf] %vm562_vm0, %v7150_v0  ;;  %v662_v25 = vpack.c.bf16 %v634_v21, %v633_v20  ;;  %v636_v27 = vld [vmem:[%s7508_s24 + $0x48] sm:$0xff]  ;;  %v637_v31 = vld [vmem:[%s7508_s24 + $0x50] sm:$0xff] }
  0xfd   : > { %580 = vst.msk [vmem:[#allocation2 + $0x110] sm:$0xf] %vm562_vm0, %v7150_v0  ;;  %620 = vst.msk [vmem:[#allocation2 + $0x8] sm:$0xf] %vm562_vm0, %v617_v1  ;;  %v663_v30 = vpack.c.bf16 %v636_v27, %v635_v26  ;;  %v638_v32 = vld [vmem:[%s7508_s24 + $0x58] sm:$0xff]  ;;  %v639_v33 = vld [vmem:[%s7508_s24 + $0x60] sm:$0xff] }
  0xfe   : > { %582 = vst.msk [vmem:[#allocation2 + $0x8] sm:$0xf0] %vm581_vm1, %v7150_v0  ;;  %583 = vst.msk [vmem:[#allocation2 + $0x18] sm:$0xf0] %vm581_vm1, %v7150_v0  ;;  %v692_v35 = vrot.slane %v660_v23, 4  ;;  %v693_v36 = vrot.slane %v661_v24, 4  ;;  %v664_v42 = vpack.c.bf16 %v638_v32, %v637_v31 }
  0xff   : > { %584 = vst.msk [vmem:[#allocation2 + $0x28] sm:$0xf0] %vm581_vm1, %v7150_v0  ;;  %585 = vst.msk [vmem:[#allocation2 + $0x38] sm:$0xf0] %vm581_vm1, %v7150_v0  ;;  %v694_v37 = vrot.slane %v662_v25, 4  ;;  %v640_v38 = vld [vmem:[%s7508_s24 + $0x68] sm:$0xff] }
 0x100   : > { %586 = vst.msk [vmem:[#allocation2 + $0x48] sm:$0xf0] %vm581_vm1, %v7150_v0  ;;  %587 = vst.msk [vmem:[#allocation2 + $0x58] sm:$0xf0] %vm581_vm1, %v7150_v0  ;;  %v641_v39 = vld [vmem:[%s7508_s24 + $0x70] sm:$0xff]  ;;  %v695_v41 = vrot.slane %v663_v30, 4  ;;  %v665_v43 = vpack.c.bf16 %v640_v38, %v639_v33 }
 0x101   : > { %588 = vst.msk [vmem:[#allocation2 + $0x68] sm:$0xf0] %vm581_vm1, %v7150_v0  ;;  %589 = vst.msk [vmem:[#allocation2 + $0x78] sm:$0xf0] %vm581_vm1, %v7150_v0  ;;  %v642_v44 = vld [vmem:[%s7508_s24 + $0x78] sm:$0xff]  ;;  %v643_v45 = vld [vmem:[%s7508_s24 + $0x80] sm:$0xff] }
 0x102   : > { %590 = vst.msk [vmem:[#allocation2 + $0x88] sm:$0xf0] %vm581_vm1, %v7150_v0  ;;  %591 = vst.msk [vmem:[#allocation2 + $0x98] sm:$0xf0] %vm581_vm1, %v7150_v0  ;;  %v644_v46 = vld [vmem:[%s7508_s24 + $0x88] sm:$0xff]  ;;  %v1427_v47 = vsel %vm1213_vm2, %v1061_v6, 0  ;;  %v666_v48 = vpack.c.bf16 %v642_v44, %v641_v39 }
 0x103   : > { %592 = vst.msk [vmem:[#allocation2 + $0xa8] sm:$0xf0] %vm581_vm1, %v7150_v0  ;;  %593 = vst.msk [vmem:[#allocation2 + $0xb8] sm:$0xf0] %vm581_vm1, %v7150_v0  ;;  %v667_v49 = vpack.c.bf16 %v644_v46, %v643_v45  ;;  %v7615_v50 = vld [vmem:[#allocation12 + $0xc] sm:$0x3] }
 0x104   : > { %594 = vst.msk [vmem:[#allocation2 + $0xc8] sm:$0xf0] %vm581_vm1, %v7150_v0  ;;  %595 = vst.msk [vmem:[#allocation2 + $0xd8] sm:$0xf0] %vm581_vm1, %v7150_v0  ;;  %v7577_v11 = vld [vmem:[#allocation2 + $0x8] sm:$0xf] }
 0x105   : > { %596 = vst.msk [vmem:[#allocation2 + $0xe8] sm:$0xf0] %vm581_vm1, %v7150_v0  ;;  %597 = vst.msk [vmem:[#allocation2 + $0xf8] sm:$0xf0] %vm581_vm1, %v7150_v0  ;;  %v1112_v18 = vrot.slane %v7577_v11, 4  ;;  %v798_v28 = vshrl.u32 %v7577_v11, 16 }
 0x106   : > { %598 = vst.msk [vmem:[#allocation2 + $0x108] sm:$0xf0] %vm581_vm1, %v7150_v0  ;;  %599 = vst.msk [vmem:[#allocation2 + $0x118] sm:$0xf0] %vm581_vm1, %v7150_v0  ;;  %v801_v40 = vshll.u32 %v7577_v11, 16  ;;  %v645_v51 = vld [vmem:[%s7508_s24 + $0x90] sm:$0xff] }
 0x107   : > { %619 = vst.msk [vmem:[#allocation2] sm:$0xf0] %vm581_vm1, %v617_v1  ;;  %625 = vst.msk [vmem:[#allocation2 + $0x110] sm:$0xf0] %vm581_vm1, %v617_v1  ;;  %v646_v52 = vld [vmem:[%s7508_s24 + $0x98] sm:$0xff]  ;;  %v696_v54 = vrot.slane %v664_v42, 4 }
 0x108   : > { %626 = vst.msk [vmem:[#allocation2 + $0x118] sm:$0xf] %vm562_vm0, %v617_v1  ;;  %v6748_v2 = vld [vmem:[#allocation12] ss:$0 sps:$4 sm:$0xcc]   ;;  %8806 = vst [vmem:[#allocation33_spill] sm:$0xff] %v7573_v8  ;;  %v668_v56 = vpack.c.bf16 %v646_v52, %v645_v51 }
 0x109   : > { %v1163_v7 = vrot.slane %v6748_v2, 2  ;;  %v6749_v22 = vld [vmem:[#allocation12 + $0x8] ss:$0 sps:$4 sm:$0xcc]   ;;  %724 = vst.msk [vmem:[#allocation2 + $0x10] sm:$0xf0] %vm581_vm1, %v691_v19 }
 0x10a   : > { %725 = vst.msk [vmem:[#allocation2 + $0x18] sm:$0xf] %vm562_vm0, %v691_v19  ;;  %v3310_v34 = vrot.slane %v6749_v22, 2  ;;  %727 = vst.msk [vmem:[#allocation2 + $0x28] sm:$0xf] %vm562_vm0, %v692_v35  ;;  %v697_v55 = vrot.slane %v665_v43, 4 }
 0x10b   : > { %6608 = vmatprep.subr.msk.bf16.mxu1 %vm1213_vm2, %v1163_v7  ;;  %v1215_v14 = vsel %vm1213_vm2, %v1163_v7, 0  ;;  %726 = vst.msk [vmem:[#allocation2 + $0x20] sm:$0xf0] %vm581_vm1, %v692_v35  ;;  %728 = vst.msk [vmem:[#allocation2 + $0x30] sm:$0xf0] %vm581_vm1, %v693_v36  ;;  %v698_v58 = vrot.slane %v666_v48, 4 }
 0x10c   : > { %6045 = vmatpush3.bf16.msra.mxu1 %v1215_v14  ;;  %6614 = vmatprep.subr.msk.bf16.mxu0 %vm1213_vm2, %v3310_v34  ;;  %729 = vst.msk [vmem:[#allocation2 + $0x38] sm:$0xf] %vm562_vm0, %v693_v36  ;;  %731 = vst.msk [vmem:[#allocation2 + $0x48] sm:$0xf] %vm562_vm0, %v694_v37  ;;  %v699_v59 = vrot.slane %v667_v49, 4  ;;  %v7623_v60 = vrot.slane %v798_v28, 3 }
 0x10d   : > { %6609 = vmatprep.subr.msk.bf16.mxu1 %vm1213_vm2, %v1061_v6  ;;  %730 = vst.msk [vmem:[#allocation2 + $0x40] sm:$0xf0] %vm581_vm1, %v694_v37  ;;  %732 = vst.msk [vmem:[#allocation2 + $0x50] sm:$0xf0] %vm581_vm1, %v695_v41  ;;  %v7626_v61 = vsel %vm1213_vm2, %v3310_v34, 0  ;;  %v7634_v62 = vsel %vm1213_vm2, %v7615_v50, 0 }
 0x10e   : > { %v7579_v12 = vld [vmem:[#allocation2] sm:$0xf0]  ;;  %733 = vst.msk [vmem:[#allocation2 + $0x58] sm:$0xf] %vm562_vm0, %v695_v41  ;;  %735 = vst.msk [vmem:[#allocation2 + $0x68] sm:$0xf] %vm562_vm0, %v696_v54 }
 0x10f   : > { %v1111_v15 = vrot.slane %v7579_v12, 4  ;;  %734 = vst.msk [vmem:[#allocation2 + $0x60] sm:$0xf0] %vm581_vm1, %v696_v54  ;;  %736 = vst.msk [vmem:[#allocation2 + $0x70] sm:$0xf0] %vm581_vm1, %v697_v55  ;;  %v700_v63 = vrot.slane %v668_v56, 4 }
 0x110   : > { %737 = vst.msk [vmem:[#allocation2 + $0x78] sm:$0xf] %vm562_vm0, %v697_v55  ;;  %v7636_v0 = vrot.slane %v801_v40, 4  ;;  %v1063_v2 = vld [vmem:[#allocation2 + $0x10] sm:$0xf0]  ;;  %s5664_s17 = sshll.u32 %s7504_s30, 7 }
 0x111   : > { %v1113_v29 = vsel %vm1110_vm3, %v1111_v15, %v1112_v18  ;;  %v759_v1 = vld [vmem:[#allocation2 + $0x18] sm:$0xf]  ;;  %738 = vst.msk [vmem:[#allocation2 + $0x80] sm:$0xf0] %vm581_vm1, %v698_v58  ;;  %740 = vst.msk [vmem:[#allocation2 + $0x90] sm:$0xf0] %vm581_vm1, %v699_v59 }
 0x112   : > { %6046 = vmatprep.mubr.msk.bf16.mxu1 %vm1164_vm4, %v1113_v29  ;;  %v7638_v3 = vld [vmem:[#allocation2 + $0x18] sm:$0xf]  ;;  %739 = vst.msk [vmem:[#allocation2 + $0x88] sm:$0xf] %vm562_vm0, %v698_v58  ;;  %741 = vst.msk [vmem:[#allocation2 + $0x98] sm:$0xf] %vm562_vm0, %v699_v59 }
 0x113   : > { %8807 = vst [vmem:[#allocation34_spill] sm:$0xff] %v7638_v3  ;;  %v815_v4 = vshrl.u32 %v759_v1, 16  ;;  %v818_v5 = vshll.u32 %v759_v1, 16  ;;  %v1114_v6 = vrot.slane %v1063_v2, 4  ;;  %v1115_v7 = vrot.slane %v759_v1, 4  ;;  %s8432_s21 = scalar_lea.vmem [#allocation15], %s5664_s17 }
 0x114   : > { %v7644_v9 = vld [vmem:[#allocation2 + $0x10] sm:$0xf0]  ;;  %742 = vst.msk [vmem:[#allocation2 + $0xa0] sm:$0xf0] %vm581_vm1, %v700_v63  ;;  %v1625_v10 = vshrl.u32 %v1063_v2, 16  ;;  %v1628_v11 = vshll.u32 %v1063_v2, 16 }
 0x115   : > { %743 = vst.msk [vmem:[#allocation2 + $0xa8] sm:$0xf] %vm562_vm0, %v700_v63  ;;  %v7650_v15 = vrot.slane %v815_v4, 3  ;;  %v7652_v16 = vrot.slane %v818_v5, 4  ;;  %v1116_v17 = vsel %vm1110_vm3, %v1114_v6, %v1115_v7  ;;  %v2725_v18 = vrot.slane %v7644_v9, 4  ;;  %v7704_v7 = vld [vmem:[%s7508_s24 + $0xa0] sm:$0xff] }
 0x116   : > { %v2127_v19 = vld [vmem:[#allocation2 + $0x28] sm:$0xf]  ;;  %6047 = vmatmul.mubr.msk.bf16.vlgmr.msra.gmra.mrb[0].mxu1 %vm1164_vm4, %v1116_v17  ;;  %v7657_v20 = vrot.slane %v1625_v10, 4  ;;  %v7659_v21 = vrot.slane %v1628_v11, 5  ;;  %v2726_v22 = vrot.slane %v7638_v3, 4  ;;  %v3035_v23 = vshrl.u32 %v7644_v9, 16 }
 0x117   : > { %v2678_v24 = vld [vmem:[#allocation2 + $0x20] sm:$0xf0]  ;;  %v3038_v25 = vshll.u32 %v7644_v9, 16  ;;  %6079 = vmatpush3.bf16.msra.mxu1 %v1427_v47  ;;  %v2182_v26 = vshrl.u32 %v2127_v19, 16  ;;  %v2185_v27 = vshll.u32 %v2127_v19, 16  ;;  %v2729_v31 = vrot.slane %v2127_v19, 4 }
 0x118   : > { %8808 = vst [vmem:[#allocation35_spill] sm:$0xff] %v7657_v20  ;;  %8809 = vst [vmem:[#allocation36_spill] sm:$0xff] %v7659_v21  ;;  %v2728_v28 = vrot.slane %v2678_v24, 4  ;;  %v7664_v29 = vld [vmem:[#allocation2 + $0x28] sm:$0xf]  ;;  %v2727_v30 = vsel %vm1110_vm3, %v2725_v18, %v2726_v22  ;;  %v3052_v32 = vshrl.u32 %v2678_v24, 16 }
 0x119   : > { %v3055_v33 = vshll.u32 %v2678_v24, 16  ;;  %v1064_v34 = vld [vmem:[#allocation2 + $0x20] sm:$0xf0]  ;;  %6182 = vmatprep.mubr.msk.bf16.mxu0 %vm1164_vm4, %v2727_v30  ;;  %v7668_v35 = vrot.slane %v2182_v26, 3  ;;  %v7670_v36 = vrot.slane %v2185_v27, 4  ;;  %v1118_v38 = vrot.slane %v7664_v29, 4 }
 0x11a   : > { %v1117_v37 = vrot.slane %v1064_v34, 4  ;;  %v7673_v39 = vld [vmem:[#allocation2 + $0x38] sm:$0xf]  ;;  %v2730_v40 = vsel %vm1110_vm3, %v2728_v28, %v2729_v31  ;;  %v7676_v41 = vrot.slane %v3052_v32, 4  ;;  %v1065_v43 = vld [vmem:[#allocation2 + $0x30] sm:$0xf0] }
 0x11b   : > { %v7678_v42 = vrot.slane %v3055_v33, 5  ;;  %v1121_v44 = vrot.slane %v7673_v39, 4  ;;  %6183 = vmatmul.mubr.msk.bf16.vlgmr.msra.gmra.mrb[0].mxu0 %vm1164_vm4, %v2730_v40  ;;  %v1120_v46 = vrot.slane %v1065_v43, 4  ;;  %v2129_v47 = vld [vmem:[#allocation2 + $0x38] sm:$0xf]  ;;  %v7685_v49 = vrot.slane %v3035_v23, 4 }
 0x11c   : > { %v1119_v45 = vsel %vm1110_vm3, %v1117_v37, %v1118_v38  ;;  %v7683_v48 = vld [vmem:[#allocation2 + $0x30] sm:$0xf0]  ;;  %6215 = vmatpush3.bf16.msra.mxu0 %v7626_v61  ;;  %v2732_v52 = vrot.slane %v2129_v47, 4  ;;  %v2131_v54 = vld [vmem:[#allocation2 + $0x48] sm:$0xf]  ;;  %v7717_v22 = vld [vmem:[%s7508_s24 + $0xb8] sm:$0xff] }
 0x11d   : > { %6050 = vmatprep.mubr.msk.bf16.mxu1 %vm1164_vm4, %v1119_v45  ;;  %v2731_v51 = vrot.slane %v7683_v48, 4  ;;  %v7690_v55 = vld [vmem:[#allocation2 + $0x40] sm:$0xf0]  ;;  %v1122_v56 = vsel %vm1110_vm3, %v1120_v46, %v1121_v44  ;;  %v2735_v59 = vrot.slane %v2131_v54, 4  ;;  %v7694_v63 = vld [vmem:[#allocation2 + $0x48] sm:$0xf]  ;;  %6615 = vmatprep.subr.msk.bf16.mxu0 %vm1213_vm2, %v7615_v50 }
 0x11e   : > { %v2734_v58 = vrot.slane %v7690_v55, 4  ;;  %v1066_v1 = vld [vmem:[#allocation2 + $0x40] sm:$0xf0]  ;;  %6051 = vmatmul.mubr.msk.bf16.gmra.mrb[4].mxu1 %vm1164_vm4, %v1122_v56  ;;  %v1124_v4 = vrot.slane %v7694_v63, 4  ;;  %v7701_v5 = vld [vmem:[#allocation2 + $0x58] sm:$0xf] }
 0x11f   : > { %v2733_v61 = vsel %vm1110_vm3, %v2731_v51, %v2732_v52  ;;  %v1123_v2 = vrot.slane %v1066_v1, 4  ;;  %v1067_v6 = vld [vmem:[#allocation2 + $0x50] sm:$0xf0]  ;;  %v7707_v10 = vld [vmem:[%s7508_s24 + $0xa8] sm:$0xff]  ;;  %v1127_v11 = vrot.slane %v7701_v5, 4  ;;  %v7725_v31 = vld [vmem:[%s7508_s24 + $0xc0] sm:$0xff] }
 0x120   : > { %6186 = vmatprep.mubr.msk.bf16.mxu0 %vm1164_vm4, %v2733_v61  ;;  %v1126_v50 = vrot.slane %v1067_v6, 4  ;;  %v2133_v17 = vld [vmem:[#allocation2 + $0x58] sm:$0xf]  ;;  %v7711_v18 = vld [vmem:[#allocation2 + $0x50] sm:$0xf0]  ;;  %v2736_v23 = vsel %vm1110_vm3, %v2734_v58, %v2735_v59  ;;  %v7728_v32 = vld [vmem:[%s7508_s24 + $0xc8] sm:$0xff] }
 0x121   : > { %v7714_v19 = vld [vmem:[%s7508_s24 + $0xb0] sm:$0xff]  ;;  %v1125_v24 = vsel %vm1110_vm3, %v1123_v2, %v1124_v4  ;;  %v2737_v26 = vrot.slane %v7711_v18, 4  ;;  %v2738_v27 = vrot.slane %v2133_v17, 4  ;;  %v2135_v28 = vld [vmem:[#allocation2 + $0x68] sm:$0xf]  ;;  %v7734_v34 = vld [vmem:[%s7508_s24 + $0xd8] sm:$0xff] }
 0x122   : > { %v7722_v30 = vld [vmem:[#allocation2 + $0x60] sm:$0xf0]  ;;  %v7731_v33 = vld [vmem:[%s7508_s24 + $0xd0] sm:$0xff]  ;;  %6054 = vmatprep.mubr.msk.bf16.mxu1 %vm1164_vm4, %v1125_v24  ;;  %v2741_v38 = vrot.slane %v2135_v28, 4  ;;  %v7738_v40 = vld [vmem:[#allocation2 + $0x68] sm:$0xf]  ;;  %v1128_v1 = vsel %vm1110_vm3, %v1126_v50, %v1127_v11  ;;  %v669_v24 = vpack.c.bf16 %v7707_v10, %v7704_v7 }
 0x123   : > { %v2740_v37 = vrot.slane %v7722_v30, 4  ;;  %v1068_v43 = vld [vmem:[#allocation2 + $0x60] sm:$0xf0]  ;;  %v7744_v45 = vld [vmem:[%s7508_s24 + $0xe8] sm:$0xff]  ;;  %v7747_v46 = vld [vmem:[%s7508_s24 + $0xf0] sm:$0xff]  ;;  %v2739_v51 = vsel %vm1110_vm3, %v2737_v26, %v2738_v27  ;;  %v1130_v54 = vrot.slane %v7738_v40, 4  ;;  %6187 = vmatmul.mubr.msk.bf16.gmra.mrb[4].mxu0 %vm1164_vm4, %v2736_v23 }
 0x124   : > { %v7741_v44 = vld [vmem:[%s7508_s24 + $0xe0] sm:$0xff]  ;;  %v7750_v47 = vld [vmem:[%s7508_s24 + $0xf8] sm:$0xff]  ;;  %v1129_v52 = vrot.slane %v1068_v43, 4  ;;  %v1069_v58 = vld [vmem:[#allocation2 + $0x70] sm:$0xf0]  ;;  %6190 = vmatprep.mubr.msk.bf16.mxu0 %vm1164_vm4, %v2739_v51  ;;  %vm5150_vm7 = vcmask 60416  }
 0x125   : > { %v7754_v56 = vld [vmem:[#allocation2 + $0x78] sm:$0xf]  ;;  %v1132_v61 = vrot.slane %v1069_v58, 4  ;;  %v7761_v6 = vld [vmem:[#allocation2 + $0x70] sm:$0xf0]  ;;  %vm5183_vm8 = vcmask 64512  }
 0x126   : > { %v1133_v2 = vrot.slane %v7754_v56, 4  ;;  %v2137_v4 = vld [vmem:[#allocation2 + $0x78] sm:$0xf]  ;;  %v1131_v26 = vsel %vm1110_vm3, %v1129_v52, %v1130_v54  ;;  %v2743_v27 = vrot.slane %v7761_v6, 4  ;;  %v2139_v23 = vld [vmem:[#allocation2 + $0x88] sm:$0xf]  ;;  %6055 = vmatmul.mubr.msk.bf16.gmra.mrb[8].mxu1 %vm1164_vm4, %v1128_v1 }
 0x127   : > { %v3018_v17 = vld [vmem:[#allocation2 + $0x18] sm:$0x1f]  ;;  %v2744_v28 = vrot.slane %v2137_v4, 4  ;;  %v7768_v43 = vld [vmem:[#allocation2 + $0x80] sm:$0xf0]  ;;  %v2747_v58 = vrot.slane %v2139_v23, 4  ;;  %v2742_v23 = vsel %vm1110_vm3, %v2740_v37, %v2741_v38  ;;  %6058 = vmatprep.mubr.msk.bf16.mxu1 %vm1164_vm4, %v1131_v26 }
 0x128   : > { %v2746_v11 = vrot.slane %v7768_v43, 4  ;;  %v7773_v14 = vld [vmem:[#allocation2 + $0x88] sm:$0xf]  ;;  %v1070_v13 = vld [vmem:[#allocation2 + $0x80] sm:$0xf0]  ;;  %v1134_v57 = vsel %vm1110_vm3, %v1132_v61, %v1133_v2  ;;  %v3043_v51 = vshrl.u32 %v3018_v17, 16 }
 0x129   : > { %vm1606_vm5 = vsmask.f32 3328  ;;  %v1135_v1 = vrot.slane %v1070_v13, 4  ;;  %v1071_v53 = vld [vmem:[#allocation2 + $0x90] sm:$0xf0]  ;;  %v1136_v52 = vrot.slane %v7773_v14, 4  ;;  %v2745_v50 = vsel %vm1110_vm3, %v2743_v27, %v2744_v28 }
 0x12a   : > { %v3019_v59 = vld [vmem:[#allocation2 + $0x28] sm:$0x1f]  ;;  %v3046_v7 = vshll.u32 %v3018_v17, 16  ;;  %v2748_v4 = vsel %vm1110_vm3, %v2746_v11, %v2747_v58  ;;  %v7796_v37 = vld [vmem:[#allocation2 + $0x98] sm:$0xf]  ;;  %v3040_v38 = vrot.slane %v3038_v25, 5 }
 0x12b   : > { %v3060_v54 = vshrl.u32 %v3019_v59, 16  ;;  %v3063_v13 = vshll.u32 %v3019_v59, 16  ;;  %v3020_v61 = vld [vmem:[#allocation2 + $0x38] sm:$0x1f]  ;;  %v1138_v2 = vrot.slane %v1071_v53, 4  ;;  %v3045_v26 = vrot.slane %v3043_v51, 4  ;;  %6191 = vmatmul.mubr.msk.bf16.gmra.mrb[8].mxu0 %vm1164_vm4, %v2742_v23 }
 0x12c   : > { %v3048_v8 = vrot.slane %v3046_v7, 5  ;;  %v7800_v3 = vld [vmem:[#allocation2 + $0xa8] sm:$0xf]  ;;  %v1072_v20 = vld [vmem:[#allocation2 + $0xa0] sm:$0xf0]  ;;  %v701_v27 = vrot.slane %v669_v24, 4  ;;  %6194 = vmatprep.mubr.msk.bf16.mxu0 %vm1164_vm4, %v2745_v50  ;;  %v1137_v9 = vsel %vm1110_vm3, %v1135_v1, %v1136_v52  ;;  %v3041_v7 = vor.u32 %v3040_v38, %v7685_v49 }
 0x12d   : > { %v3062_v10 = vrot.slane %v3060_v54, 4  ;;  %v3065_v17 = vrot.slane %v3063_v13, 5  ;;  %v3069_v28 = vshrl.u32 %v7683_v48, 16  ;;  %v3072_v11 = vshll.u32 %v7683_v48, 16  ;;  %v3021_v58 = vld [vmem:[#allocation2 + $0x48] sm:$0x1f] }
 0x12e   : > { %v1139_v53 = vrot.slane %v7796_v37, 4  ;;  %v3077_v25 = vshrl.u32 %v3020_v61, 16  ;;  %v3080_v59 = vshll.u32 %v3020_v61, 16  ;;  %v3049_v51 = vor.u32 %v3048_v8, %v3045_v26  ;;  %744 = vst.msk [vmem:[#allocation2 + $0xb0] sm:$0xf0] %vm581_vm1, %v701_v27  ;;  %6059 = vmatmul.mubr.msk.bf16.gmra.mrb[12].mxu1 %vm1164_vm4, %v1134_v57  ;;  %s5889_s27 = sshll.u32 %s7129_s12, 11 }
 0x12f   : > { %v1142_v54 = vrot.slane %v7800_v3, 4  ;;  %745 = vst.msk [vmem:[#allocation2 + $0xb8] sm:$0xf] %vm562_vm0, %v701_v27  ;;  %v3086_v48 = vshrl.u32 %v7690_v55, 16  ;;  %v3066_v24 = vor.u32 %v3065_v17, %v3062_v10  ;;  %v1141_v50 = vrot.slane %v1072_v20, 4  ;;  %6062 = vmatprep.mubr.msk.bf16.mxu1 %vm1164_vm4, %v1137_v9  ;;  %s5382_s29 = sshll.u32 %s8432_s21, 4  ;;  %s8590_s8 = scalar_lea.hbm %s8734_s7, %s5889_s27  ;;  %s8592_s29 = int_to_ptr.vmem [resolvable:$true] %s5382_s29 }
 0x130   : > { %v3071_v52 = vrot.slane %v3069_v28, 4  ;;  %v3089_v23 = vshll.u32 %v7690_v55, 16  ;;  %v3022_v1 = vld [vmem:[#allocation2 + $0x58] sm:$0x1f]  ;;  %v3074_v49 = vrot.slane %v3072_v11, 5  ;;  %v3079_v8 = vrot.slane %v3077_v25, 4 }
 0x131   : > { %v3082_v38 = vrot.slane %v3080_v59, 5  ;;  %v3094_v13 = vshrl.u32 %v3021_v58, 16  ;;  %v7816_v61 = vld [vmem:[#allocation12 + $0x4] sm:$0x3]  ;;  %v3088_v26 = vrot.slane %v3086_v48, 4  ;;  %v3097_v21 = vshll.u32 %v3021_v58, 16 }
 0x132   : > { %v3091_v27 = vrot.slane %v3089_v23, 5  ;;  %v8810_v57 = vpack.c.bf16 %v7717_v22, %v7714_v19  ;;  %6610 = vmatprep.subr.msk.bf16.mxu1 %vm1213_vm2, %v7816_v61  ;;  %v3050_v20 = vsel %vm1606_vm5, %v3041_v7, %v3049_v51  ;;  %v8811_v55 = vpack.c.bf16 %v7728_v32, %v7725_v31  ;;  %s8827_s14 = sld [smem:[#allocation31_spill]]  ;;  %s5358_s9 = scalar_lea.sflag [#allocation5], %s7504_s30 }
 0x133   : > { %v3103_v28 = vshrl.u32 %v7711_v18, 16  ;;  %v3106_v11 = vshll.u32 %v7711_v18, 16  ;;  %v1140_v9 = vsel %vm1110_vm3, %v1138_v2, %v1139_v53  ;;  %v3096_v25 = vrot.slane %v3094_v13, 4  ;;  %6195 = vmatmul.mubr.msk.bf16.gmra.mrb[12].mxu0 %vm1164_vm4, %v2748_v4  ;;  %s6983_s18 = scalar_lea.vmem %s8592_s29, 2048  ;;  %s7151_s28 = smov [#allocation15]  }
 0x134   : > { %v702_v10 = vrot.slane %v8810_v57, 4  ;;  %v703_v17 = vrot.slane %v8811_v55, 4  ;;  %v3099_v59 = vrot.slane %v3097_v21, 5  ;;  %v3111_v19 = vshrl.u32 %v3022_v1, 16  ;;  %v3023_v21 = vld [vmem:[#allocation2 + $0x68] sm:$0x1f]  ;;  %6216 = vmatprep.mubr.msk.bf16.mxu0 %vm1164_vm4, %v3050_v20  ;;  %p6984_p2 = scmp.ne.s32.totalorder %s8592_s29, %s6983_s18 }
 0x135   : > { %v8812_v22 = vor.u32 %v7678_v42, %v7676_v41  ;;  %v1143_v32 = vsel %vm1110_vm3, %v1141_v50, %v1142_v54  ;;  %v3114_v18 = vshll.u32 %v3022_v1, 16  ;;  %v3120_v2 = vshrl.u32 %v7722_v30, 16  ;;  %v1073_v4 = vld [vmem:[#allocation2 + $0xb0] sm:$0xf0]  ;;  %v3024_v20 = vld [vmem:[#allocation2 + $0x78] sm:$0x1f] }
 0x136   : > { %746 = vst.msk [vmem:[#allocation2 + $0xc0] sm:$0xf0] %vm581_vm1, %v702_v10  ;;  %748 = vst.msk [vmem:[#allocation2 + $0xd0] sm:$0xf0] %vm581_vm1, %v703_v17  ;;  %v7842_v53 = vld [vmem:[#allocation2 + $0xb8] sm:$0xf]  ;;  %v3075_v58 = vor.u32 %v3074_v49, %v3071_v52  ;;  %v3083_v7 = vor.u32 %v3082_v38, %v3079_v8  ;;  %v3092_v41 = vor.u32 %v3091_v27, %v3088_v26  ;;  %6063 = vmatmul.mubr.msk.bf16.gmra.mrb[16].mxu1 %vm1164_vm4, %v1140_v9 }
 0x137   : > { %747 = vst.msk [vmem:[#allocation2 + $0xc8] sm:$0xf] %vm562_vm0, %v702_v10  ;;  %v3067_v31 = vsel %vm1606_vm5, %v8812_v22, %v3066_v24  ;;  %749 = vst.msk [vmem:[#allocation2 + $0xd8] sm:$0xf] %vm562_vm0, %v703_v17  ;;  %v3123_v42 = vshll.u32 %v7722_v30, 16  ;;  %v3105_v51 = vrot.slane %v3103_v28, 4  ;;  %v3100_v1 = vor.u32 %v3099_v59, %v3096_v25  ;;  %6066 = vmatprep.mubr.msk.bf16.mxu1 %vm1164_vm4, %v1143_v32 }
 0x138   : > { %v3108_v54 = vrot.slane %v3106_v11, 5  ;;  %v3113_v48 = vrot.slane %v3111_v19, 4  ;;  %v3116_v24 = vrot.slane %v3114_v18, 5  ;;  %v1144_v50 = vrot.slane %v1073_v4, 4  ;;  %p8828_p7 = scmp.ne.s32.totalorder %s8827_s14, 0  ;;  %s6987_s3 = sshll.u32 %s7151_s28, 4  ;;  %s6988_s3 = int_to_ptr.vmem [resolvable:$false] %s6987_s3 }
 0x139   : > { %v1145_v23 = vrot.slane %v7842_v53, 4  ;;  %v3128_v13 = vshrl.u32 %v3023_v21, 16  ;;  %v7848_v57 = vrot.slane %v3120_v2, 4  ;;  %v3125_v52 = vrot.slane %v3123_v42, 5  ;;  %v3025_v2 = vld [vmem:[#allocation2 + $0x88] sm:$0x1f]  ;;  %p6990_p9 = scmp.lt.s32.totalorder %s8592_s29, %s6988_s3 }
 0x13a   : > { %v3131_v49 = vshll.u32 %v3023_v21, 16  ;;  %v8813_v30 = vpack.c.bf16 %v7734_v34, %v7731_v33  ;;  %v3084_v38 = vsel %vm1606_vm5, %v3075_v58, %v3083_v7  ;;  %v8814_v27 = vpack.c.bf16 %v7744_v45, %v7741_v44  ;;  %v756_v42 = vld [vmem:[#allocation2] sm:$0xf8]  ;;  %p6985_p11 = pnand %p6984_p2, %p8828_p7  ;;  %s6989_s20 = scalar_lea.vmem %s6988_s3, 4096 }
 0x13b   : > { %v3130_v26 = vrot.slane %v3128_v13, 4  ;;  %v3137_v55 = vshrl.u32 %v7761_v6, 16  ;;  %v3109_v11 = vor.u32 %v3108_v54, %v3105_v51  ;;  %v3117_v9 = vor.u32 %v3116_v24, %v3113_v48  ;;  %6217 = vmatmul.mubr.msk.bf16.vlgmr.msra.gmra.mrb[0].mxu0 %vm1164_vm4, %v3067_v31  ;;  %p6991_p1 = scmp.lt.s32.totalorder %s6989_s20, %s6983_s18 }
 0x13c   : > { %v704_v8 = vrot.slane %v8813_v30, 4  ;;  %v705_v10 = vrot.slane %v8814_v27, 4  ;;  %v3133_v25 = vrot.slane %v3131_v49, 5  ;;  %v3140_v33 = vshll.u32 %v7761_v6, 16  ;;  %6249 = vmatpush3.bf16.msra.mxu0 %v7634_v62  ;;  %6220 = vmatprep.mubr.msk.bf16.mxu0 %vm1164_vm4, %v3084_v38  ;;  %v2685_v30 = vld [vmem:[#allocation2 + $0x90] sm:$0xf0]  ;;  %p6986_p8 = pneg %p6985_p11 }
 0x13d   : > { %v1074_v28 = vld [vmem:[#allocation2 + $0xc0] sm:$0xf0]  ;;  %v1146_v34 = vsel %vm1110_vm3, %v1144_v50, %v1145_v23  ;;  %v3101_v44 = vsel %vm1606_vm5, %v3092_v41, %v3100_v1  ;;  %v1075_v22 = vld [vmem:[#allocation2 + $0xd0] sm:$0xf0]  ;;  %v3126_v6 = vor.u32 %v3125_v52, %v7848_v57  ;;  %v3139_v21 = vrot.slane %v3137_v55, 4  ;;  %p6992_p6 = por %p6991_p1, %p6990_p9 }
 0x13e   : > { %v7858_v17 = vld [vmem:[#allocation2 + $0xc8] sm:$0xf]  ;;  %750 = vst.msk [vmem:[#allocation2 + $0xe0] sm:$0xf0] %vm581_vm1, %v704_v8  ;;  %v1147_v45 = vrot.slane %v1074_v28, 4  ;;  %v1150_v32 = vrot.slane %v1075_v22, 4  ;;  %v3118_v31 = vsel %vm1606_vm5, %v3109_v11, %v3117_v9  ;;  %v3134_v51 = vor.u32 %v3133_v25, %v3130_v26  ;;  %6067 = vmatmul.mubr.msk.bf16.gmra.mrb[20].mxu1 %vm1164_vm4, %v1146_v34 }
 0x13f   : > { %751 = vst.msk [vmem:[#allocation2 + $0xe8] sm:$0xf] %vm562_vm0, %v704_v8  ;;  %v1148_v59 = vrot.slane %v7858_v17, 4  ;;  %v7866_v19 = vld [vmem:[#allocation2 + $0xd8] sm:$0xf]  ;;  %v3142_v58 = vrot.slane %v3140_v33, 5  ;;  %p6993_p0 = pnand %p6992_p6, %p6986_p8 }
 0x140   : > { %752 = vst.msk [vmem:[#allocation2 + $0xf0] sm:$0xf0] %vm581_vm1, %v705_v10  ;;  %v1151_v18 = vrot.slane %v7866_v19, 4  ;;  %v3145_v7 = vshrl.u32 %v3024_v20, 16  ;;  %v3148_v41 = vshll.u32 %v3024_v20, 16  ;;  %v3154_v54 = vshrl.u32 %v7768_v43, 16 }
 0x141   : > { %753 = vst.msk [vmem:[#allocation2 + $0xf8] sm:$0xf] %vm562_vm0, %v705_v10  ;;  %v1149_v4 = vsel %vm1110_vm3, %v1147_v45, %v1148_v59  ;;  %vm788_vm6 = vsmask.f32 4352  ;;  %v3157_v48 = vshll.u32 %v7768_v43, 16  ;;  %v3143_v24 = vor.u32 %v3142_v58, %v3139_v21 }
 0x142   : > { %v3147_v62 = vrot.slane %v3145_v7, 4  ;;  %v3150_v50 = vrot.slane %v3148_v41, 5  ;;  %v3162_v23 = vshrl.u32 %v3025_v2, 16  ;;  %v758_v1 = vld [vmem:[#allocation2 + $0x10] sm:$0xf8]  ;;  %6070 = vmatprep.mubr.msk.bf16.mxu1 %vm1164_vm4, %v1149_v4  ;;  %v3156_v13 = vrot.slane %v3154_v54, 4 }
 0x143   : > { %v3159_v57 = vrot.slane %v3157_v48, 5  ;;  %v3165_v52 = vshll.u32 %v3025_v2, 16  ;;  %v790_v49 = vshrl.u32 %v756_v42, 16  ;;  %v1152_v8 = vsel %vm1110_vm3, %v1150_v32, %v1151_v18  ;;  %v3026_v22 = vld [vmem:[#allocation2 + $0x98] sm:$0x1f]  ;;  %6221 = vmatmul.mubr.msk.bf16.gmra.mrb[4].mxu0 %vm1164_vm4, %v3101_v44 }
 0x144   : > { %v3151_v43 = vor.u32 %v3150_v50, %v3147_v62  ;;  %v3164_v27 = vrot.slane %v3162_v23, 4  ;;  %v793_v10 = vshll.u32 %v756_v42, 16  ;;  %v3135_v20 = vsel %vm1606_vm5, %v3126_v6, %v3134_v51  ;;  %6224 = vmatprep.mubr.msk.bf16.mxu0 %vm1164_vm4, %v3118_v31  ;;  %v2686_v41 = vld [vmem:[#allocation2 + $0xa0] sm:$0xf0] }
 0x145   : > { %v1076_v26 = vld [vmem:[#allocation2 + $0xe0] sm:$0xf0]  ;;  %v3160_v25 = vor.u32 %v3159_v57, %v3156_v13  ;;  %v3167_v59 = vrot.slane %v3165_v52, 5  ;;  %v792_v18 = vrot.slane %v790_v49, 3  ;;  %v807_v21 = vshrl.u32 %v758_v1, 16 }
 0x146   : > { %v7882_v38 = vld [vmem:[#allocation2 + $0xe8] sm:$0xf]  ;;  %v1153_v55 = vrot.slane %v1076_v26, 4  ;;  %v3152_v45 = vsel %vm1606_vm5, %v3143_v24, %v3151_v43  ;;  %v795_v6 = vrot.slane %v793_v10, 4  ;;  %v810_v58 = vshll.u32 %v758_v1, 16  ;;  %6071 = vmatmul.mubr.msk.bf16.gmra.mrb[24].mxu1 %vm1164_vm4, %v1152_v8 }
 0x147   : > { %v1154_v28 = vrot.slane %v7882_v38, 4  ;;  %v1077_v9 = vld [vmem:[#allocation2 + $0xf0] sm:$0xf0]  ;;  %v3168_v4 = vor.u32 %v3167_v59, %v3164_v27  ;;  %v3171_v7 = vshrl.u32 %v2685_v30, 16  ;;  %v809_v51 = vrot.slane %v807_v21, 3 }
 0x148   : > { %v7886_v11 = vld [vmem:[#allocation2 + $0xf8] sm:$0xf]  ;;  %v1156_v33 = vrot.slane %v1077_v9, 4  ;;  %v796_v42 = vor.u32 %v795_v6, %v792_v18  ;;  %v3174_v54 = vshll.u32 %v2685_v30, 16  ;;  %v3179_v48 = vshrl.u32 %v3026_v22, 16 }
 0x149   : > { %v1157_v34 = vrot.slane %v7886_v11, 4  ;;  %v1155_v32 = vsel %vm1110_vm3, %v1153_v55, %v1154_v28  ;;  %v3027_v24 = vld [vmem:[#allocation2 + $0xa8] sm:$0x1f]  ;;  %v7896_v44 = vsel %vm1606_vm5, %v3160_v25, %v3168_v4  ;;  %v812_v62 = vrot.slane %v810_v58, 4  ;;  %v760_v31 = vld [vmem:[#allocation2 + $0x20] sm:$0xf8] }
 0x14a   : > { %v3173_v50 = vrot.slane %v3171_v7, 4  ;;  %v3182_v23 = vshll.u32 %v3026_v22, 16  ;;  %6074 = vmatprep.mubr.msk.bf16.mxu1 %vm1164_vm4, %v1155_v32  ;;  %v8815_v1 = vor.u32 %v7636_v0, %v7623_v60  ;;  %v3176_v57 = vrot.slane %v3174_v54, 5  ;;  %v3028_v54 = vld [vmem:[#allocation2 + $0xb8] sm:$0x1f] }
 0x14b   : > { %v1158_v2 = vsel %vm1110_vm3, %v1156_v33, %v1157_v34  ;;  %v3181_v52 = vrot.slane %v3179_v48, 4  ;;  %v7905_v49 = vsel %vm1213_vm2, %v7816_v61, 0  ;;  %v813_v30 = vor.u32 %v812_v62, %v809_v51  ;;  %v762_v34 = vld [vmem:[#allocation2 + $0x30] sm:$0xf8]  ;;  %6225 = vmatmul.mubr.msk.bf16.gmra.mrb[8].mxu0 %vm1164_vm4, %v3135_v20 }
 0x14c   : > { %v805_v13 = vsel %vm788_vm6, %v796_v42, %v8815_v1  ;;  %v3184_v8 = vrot.slane %v3182_v23, 5  ;;  %v3188_v26 = vshrl.u32 %v2686_v41, 16  ;;  %v3191_v43 = vshll.u32 %v2686_v41, 16  ;;  %6228 = vmatprep.mubr.msk.bf16.mxu0 %vm1164_vm4, %v3152_v45  ;;  %v2687_v41 = vld [vmem:[#allocation2 + $0xb0] sm:$0xf0] }
 0x14d   : > { %v3177_v27 = vor.u32 %v3176_v57, %v3173_v50  ;;  %v3196_v10 = vshrl.u32 %v3027_v24, 16  ;;  %v3199_v55 = vshll.u32 %v3027_v24, 16  ;;  %v824_v28 = vshrl.u32 %v760_v31, 16  ;;  %v2688_v50 = vld [vmem:[#allocation2 + $0xc0] sm:$0xf0] }
 0x14e   : > { %v8816_v9 = vor.u32 %v7652_v16, %v7650_v15  ;;  %v3185_v0 = vor.u32 %v3184_v8, %v3181_v52  ;;  %v3190_v25 = vrot.slane %v3188_v26, 4  ;;  %v3193_v33 = vrot.slane %v3191_v43, 5  ;;  %6075 = vmatmul.mubr.msk.bf16.gmra.mrb[28].mxu1 %vm1164_vm4, %v1158_v2  ;;  %v3029_v26 = vld [vmem:[#allocation2 + $0xc8] sm:$0x1f] }
 0x14f   : > { %v3198_v61 = vrot.slane %v3196_v10, 4  ;;  %v3201_v59 = vrot.slane %v3199_v55, 5  ;;  %v826_v22 = vrot.slane %v824_v28, 3  ;;  %v827_v32 = vshll.u32 %v760_v31, 16  ;;  %6080 = vmatprep.mubr.msk.bf16.mxu1 %vm1164_vm4, %v805_v13  ;;  %v764_v10 = vld [vmem:[#allocation2 + $0x40] sm:$0xf8] }
 0x150   : > { %v822_v60 = vsel %vm788_vm6, %v813_v30, %v8816_v9  ;;  %v3186_v18 = vsel %vm1606_vm5, %v3177_v27, %v3185_v0  ;;  %v3194_v6 = vor.u32 %v3193_v33, %v3190_v25  ;;  %v832_v21 = vshrl.u32 %v7664_v29, 16 }
 0x151   : > { %v835_v15 = vshll.u32 %v7664_v29, 16  ;;  %v3202_v16 = vor.u32 %v3201_v59, %v3198_v61  ;;  %v829_v4 = vrot.slane %v827_v32, 4  ;;  %v841_v58 = vshrl.u32 %v762_v34, 16 }
 0x152   : > { %v844_v7 = vshll.u32 %v762_v34, 16  ;;  %v834_v20 = vrot.slane %v832_v21, 3  ;;  %v849_v51 = vshrl.u32 %v7673_v39, 16  ;;  %v852_v45 = vshll.u32 %v7673_v39, 16  ;;  %v766_v21 = vld [vmem:[#allocation2 + $0x50] sm:$0xf8] }
 0x153   : > { %v837_v42 = vrot.slane %v835_v15, 4  ;;  %v3203_v48 = vsel %vm1606_vm5, %v3194_v6, %v3202_v16  ;;  %v830_v24 = vor.u32 %v829_v4, %v826_v22  ;;  %v843_v29 = vrot.slane %v841_v58, 3  ;;  %6229 = vmatmul.mubr.msk.bf16.gmra.mrb[12].mxu0 %vm1164_vm4, %v7896_v44 }
 0x154   : > { %v846_v62 = vrot.slane %v844_v7, 4  ;;  %v851_v31 = vrot.slane %v849_v51, 3  ;;  %v854_v1 = vrot.slane %v852_v45, 4  ;;  %v3205_v57 = vshrl.u32 %v2687_v41, 16  ;;  %6232 = vmatprep.mubr.msk.bf16.mxu0 %vm1164_vm4, %v3186_v18 }
 0x155   : > { %v838_v23 = vor.u32 %v837_v42, %v834_v20  ;;  %v3208_v52 = vshll.u32 %v2687_v41, 16  ;;  %v3213_v30 = vshrl.u32 %v3028_v54, 16  ;;  %v3216_v8 = vshll.u32 %v3028_v54, 16  ;;  %v2689_v20 = vld [vmem:[#allocation2 + $0xd0] sm:$0xf0] }
 0x156   : > { %v847_v2 = vor.u32 %v846_v62, %v843_v29  ;;  %v855_v43 = vor.u32 %v854_v1, %v851_v31  ;;  %v3207_v27 = vrot.slane %v3205_v57, 4  ;;  %v3222_v13 = vshrl.u32 %v2688_v50, 16  ;;  %6081 = vmatmul.mubr.msk.bf16.vlgmr.msra.gmra.mrb[0].mxu1 %vm1164_vm4, %v822_v60  ;;  %v2690_v57 = vld [vmem:[#allocation2 + $0xe0] sm:$0xf0] }
 0x157   : > { %v839_v39 = vsel %vm788_vm6, %v830_v24, %v838_v23  ;;  %v3210_v55 = vrot.slane %v3208_v52, 5  ;;  %v3215_v28 = vrot.slane %v3213_v30, 4  ;;  %v3218_v9 = vrot.slane %v3216_v8, 5  ;;  %6113 = vmatpush3.bf16.msra.mxu1 %v7905_v49  ;;  %v3030_v49 = vld [vmem:[#allocation2 + $0xd8] sm:$0x1f] }
 0x158   : > { %v3225_v0 = vshll.u32 %v2688_v50, 16  ;;  %v856_v25 = vsel %vm788_vm6, %v847_v2, %v855_v43  ;;  %v3224_v33 = vrot.slane %v3222_v13, 4  ;;  %v3230_v34 = vshrl.u32 %v3029_v26, 16  ;;  %6084 = vmatprep.mubr.msk.bf16.mxu1 %vm1164_vm4, %v839_v39 }
 0x159   : > { %v3233_v61 = vshll.u32 %v3029_v26, 16  ;;  %v3211_v59 = vor.u32 %v3210_v55, %v3207_v27  ;;  %v3219_v22 = vor.u32 %v3218_v9, %v3215_v28  ;;  %v858_v6 = vshrl.u32 %v764_v10, 16  ;;  %v768_v28 = vld [vmem:[#allocation2 + $0x60] sm:$0xf8] }
 0x15a   : > { %v3227_v32 = vrot.slane %v3225_v0, 5  ;;  %v3232_v15 = vrot.slane %v3230_v34, 4  ;;  %v861_v16 = vshll.u32 %v764_v10, 16  ;;  %v866_v4 = vshrl.u32 %v7694_v63, 16 }
 0x15b   : > { %v3235_v44 = vrot.slane %v3233_v61, 5  ;;  %v3220_v18 = vsel %vm1606_vm5, %v3211_v59, %v3219_v22  ;;  %v860_v7 = vrot.slane %v858_v6, 3  ;;  %v869_v41 = vshll.u32 %v7694_v63, 16  ;;  %6233 = vmatmul.mubr.msk.bf16.gmra.mrb[16].mxu0 %vm1164_vm4, %v3203_v48 }
 0x15c   : > { %v3228_v58 = vor.u32 %v3227_v32, %v3224_v33  ;;  %v863_v51 = vrot.slane %v861_v16, 4  ;;  %v868_v45 = vrot.slane %v866_v4, 3  ;;  %v875_v60 = vshrl.u32 %v766_v21, 16  ;;  %6236 = vmatprep.mubr.msk.bf16.mxu0 %vm1164_vm4, %v3220_v18 }
 0x15d   : > { %v3236_v42 = vor.u32 %v3235_v44, %v3232_v15  ;;  %v871_v54 = vrot.slane %v869_v41, 4  ;;  %v878_v24 = vshll.u32 %v766_v21, 16  ;;  %v883_v29 = vshrl.u32 %v7701_v5, 16  ;;  %v770_v44 = vld [vmem:[#allocation2 + $0x70] sm:$0xf8] }
 0x15e   : > { %v886_v62 = vshll.u32 %v7701_v5, 16  ;;  %v864_v23 = vor.u32 %v863_v51, %v860_v7  ;;  %v877_v31 = vrot.slane %v875_v60, 3  ;;  %v3239_v1 = vshrl.u32 %v2689_v20, 16  ;;  %v3031_v5 = vld [vmem:[#allocation2 + $0xe8] sm:$0x1f]  ;;  %6085 = vmatmul.mubr.msk.bf16.gmra.mrb[4].mxu1 %vm1164_vm4, %v856_v25 }
 0x15f   : > { %v3237_v50 = vsel %vm1606_vm5, %v3228_v58, %v3236_v42  ;;  %v872_v63 = vor.u32 %v871_v54, %v868_v45  ;;  %v880_v2 = vrot.slane %v878_v24, 4  ;;  %v885_v52 = vrot.slane %v883_v29, 3  ;;  %v2691_v42 = vld [vmem:[#allocation2 + $0xf0] sm:$0xf0] }
 0x160   : > { %v888_v30 = vrot.slane %v886_v62, 4  ;;  %v3241_v8 = vrot.slane %v3239_v1, 4  ;;  %v3242_v26 = vshll.u32 %v2689_v20, 16  ;;  %v3247_v39 = vshrl.u32 %v3030_v49, 16 }
 0x161   : > { %v3250_v43 = vshll.u32 %v3030_v49, 16  ;;  %v873_v27 = vsel %vm788_vm6, %v864_v23, %v872_v63  ;;  %v881_v13 = vor.u32 %v880_v2, %v877_v31  ;;  %v3256_v55 = vshrl.u32 %v2690_v57, 16  ;;  %v3032_v23 = vld [vmem:[#allocation2 + $0xf8] sm:$0x1f] }
 0x162   : > { %v889_v10 = vor.u32 %v888_v30, %v885_v52  ;;  %v3244_v48 = vrot.slane %v3242_v26, 5  ;;  %v3249_v9 = vrot.slane %v3247_v39, 4  ;;  %v3259_v33 = vshll.u32 %v2690_v57, 16  ;;  %6088 = vmatprep.mubr.msk.bf16.mxu1 %vm1164_vm4, %v873_v27  ;;  %v772_v30 = vld [vmem:[#allocation2 + $0x80] sm:$0xf8] }
 0x163   : > { %v3252_v0 = vrot.slane %v3250_v43, 5  ;;  %v3258_v61 = vrot.slane %v3256_v55, 4  ;;  %v3264_v59 = vshrl.u32 %v3031_v5, 16  ;;  %v3267_v22 = vshll.u32 %v3031_v5, 16  ;;  %6237 = vmatmul.mubr.msk.bf16.gmra.mrb[20].mxu0 %vm1164_vm4, %v3237_v50  ;;  %v774_v55 = vld [vmem:[#allocation2 + $0x90] sm:$0xf8] }
 0x164   : > { %v890_v34 = vsel %vm788_vm6, %v881_v13, %v889_v10  ;;  %v3245_v32 = vor.u32 %v3244_v48, %v3241_v8  ;;  %v3261_v21 = vrot.slane %v3259_v33, 5  ;;  %v892_v15 = vshrl.u32 %v768_v28, 16 }
 0x165   : > { %v3253_v6 = vor.u32 %v3252_v0, %v3249_v9  ;;  %v3266_v16 = vrot.slane %v3264_v59, 4  ;;  %v3269_v4 = vrot.slane %v3267_v22, 5  ;;  %v895_v18 = vshll.u32 %v768_v28, 16 }
 0x166   : > { %v900_v25 = vshrl.u32 %v7738_v40, 16  ;;  %v3262_v7 = vor.u32 %v3261_v21, %v3258_v61  ;;  %v894_v41 = vrot.slane %v892_v15, 3  ;;  %v903_v20 = vshll.u32 %v7738_v40, 16  ;;  %6089 = vmatmul.mubr.msk.bf16.gmra.mrb[8].mxu1 %vm1164_vm4, %v890_v34 }
 0x167   : > { %v3254_v58 = vsel %vm1606_vm5, %v3245_v32, %v3253_v6  ;;  %v3270_v51 = vor.u32 %v3269_v4, %v3266_v16  ;;  %v897_v45 = vrot.slane %v895_v18, 4  ;;  %v909_v54 = vshrl.u32 %v770_v44, 16  ;;  %v3556_v6 = vld [vmem:[#allocation2 + $0x20] sm:$0xf8]  ;;  %v7961_v4 = vld [vmem:[#allocation2 + $0x28] sm:$0xf] }
 0x168   : > { %v902_v60 = vrot.slane %v900_v25, 3  ;;  %6240 = vmatprep.mubr.msk.bf16.mxu0 %vm1164_vm4, %v3254_v58  ;;  %v905_v24 = vrot.slane %v903_v20, 4  ;;  %v912_v29 = vshll.u32 %v770_v44, 16  ;;  %v917_v62 = vshrl.u32 %v7754_v56, 16 }
 0x169   : > { %v920_v49 = vshll.u32 %v7754_v56, 16  ;;  %v3271_v31 = vsel %vm1606_vm5, %v3262_v7, %v3270_v51  ;;  %v898_v1 = vor.u32 %v897_v45, %v894_v41  ;;  %v911_v40 = vrot.slane %v909_v54, 3  ;;  %v6750_v51 = vld [vmem:[#allocation12 + $0xc] ss:$0 sps:$4 sm:$0xcc]  }
 0x16a   : > { %v3273_v57 = vshrl.u32 %v2691_v42, 16  ;;  %v906_v50 = vor.u32 %v905_v24, %v902_v60  ;;  %v914_v63 = vrot.slane %v912_v29, 4  ;;  %v919_v2 = vrot.slane %v917_v62, 3 }
 0x16b   : > { %v922_v52 = vrot.slane %v920_v49, 4  ;;  %v3276_v26 = vshll.u32 %v2691_v42, 16  ;;  %v3281_v39 = vshrl.u32 %v3032_v23, 16  ;;  %v3284_v43 = vshll.u32 %v3032_v23, 16  ;;  %6241 = vmatmul.mubr.msk.bf16.gmra.mrb[24].mxu0 %vm1164_vm4, %v3271_v31  ;;  %v3558_v23 = vld [vmem:[#allocation2 + $0x30] sm:$0xf8] }
 0x16c   : > { %v3275_v8 = vrot.slane %v3273_v57, 4  ;;  %v907_v5 = vsel %vm788_vm6, %v898_v1, %v906_v50  ;;  %v915_v56 = vor.u32 %v914_v63, %v911_v40  ;;  %v8817_v13 = vpack.c.bf16 %v7750_v47, %v7747_v46 }
 0x16d   : > { %v923_v27 = vor.u32 %v922_v52, %v919_v2  ;;  %6092 = vmatprep.mubr.msk.bf16.mxu1 %vm1164_vm4, %v907_v5  ;;  %v3278_v28 = vrot.slane %v3276_v26, 5  ;;  %v3283_v48 = vrot.slane %v3281_v39, 4  ;;  %v3286_v9 = vrot.slane %v3284_v43, 5  ;;  %v7974_v26 = vld [vmem:[#allocation2 + $0x38] sm:$0xf] }
 0x16e   : > { %v706_v10 = vrot.slane %v8817_v13, 4  ;;  %v926_v0 = vshrl.u32 %v772_v30, 16  ;;  %v929_v34 = vshll.u32 %v772_v30, 16  ;;  %v934_v61 = vshrl.u32 %v7773_v14, 16 }
 0x16f   : > { %v924_v33 = vsel %vm788_vm6, %v915_v56, %v923_v27  ;;  %v937_v59 = vshll.u32 %v7773_v14, 16  ;;  %v3279_v46 = vor.u32 %v3278_v28, %v3275_v8  ;;  %v3287_v47 = vor.u32 %v3286_v9, %v3283_v48 }
 0x170   : > { %754 = vst.msk [vmem:[#allocation2 + $0x100] sm:$0xf0] %vm581_vm1, %v706_v10  ;;  %v928_v22 = vrot.slane %v926_v0, 3  ;;  %v943_v32 = vshrl.u32 %v774_v55, 16  ;;  %v931_v21 = vrot.slane %v929_v34, 4  ;;  %v936_v15 = vrot.slane %v934_v61, 3  ;;  %6093 = vmatmul.mubr.msk.bf16.gmra.mrb[12].mxu1 %vm1164_vm4, %v924_v33 }
 0x171   : > { %755 = vst.msk [vmem:[#allocation2 + $0x108] sm:$0xf] %vm562_vm0, %v706_v10  ;;  %v939_v44 = vrot.slane %v937_v59, 4  ;;  %v946_v16 = vshll.u32 %v774_v55, 16  ;;  %v3288_v18 = vsel %vm1606_vm5, %v3279_v46, %v3287_v47  ;;  %v951_v58 = vshrl.u32 %v7796_v37, 16 }
 0x172   : > { %v945_v25 = vrot.slane %v943_v32, 3  ;;  %v954_v14 = vshll.u32 %v7796_v37, 16  ;;  %6244 = vmatprep.mubr.msk.bf16.mxu0 %vm1164_vm4, %v3288_v18  ;;  %v932_v7 = vor.u32 %v931_v21, %v928_v22  ;;  %v3589_v42 = vshrl.u32 %v3556_v6, 16  ;;  %v776_v33 = vld [vmem:[#allocation2 + $0xa0] sm:$0xf8] }
 0x173   : > { %v940_v41 = vor.u32 %v939_v44, %v936_v15  ;;  %v948_v20 = vrot.slane %v946_v16, 4  ;;  %v953_v45 = vrot.slane %v951_v58, 3  ;;  %v3592_v54 = vshll.u32 %v3556_v6, 16  ;;  %v778_v47 = vld [vmem:[#allocation2 + $0xb0] sm:$0xf8] }
 0x174   : > { %v956_v60 = vrot.slane %v954_v14, 4  ;;  %v3597_v24 = vshrl.u32 %v7961_v4, 16  ;;  %v3591_v49 = vrot.slane %v3589_v42, 3  ;;  %v3600_v37 = vshll.u32 %v7961_v4, 16 }
 0x175   : > { %v941_v29 = vsel %vm788_vm6, %v932_v7, %v940_v41  ;;  %v949_v62 = vor.u32 %v948_v20, %v945_v25  ;;  %v3594_v57 = vrot.slane %v3592_v54, 4  ;;  %v2188_v63 = vor.u32 %v7670_v36, %v7668_v35 }
 0x176   : > { %6096 = vmatprep.mubr.msk.bf16.mxu1 %vm1164_vm4, %v941_v29  ;;  %v957_v40 = vor.u32 %v956_v60, %v953_v45  ;;  %v3599_v50 = vrot.slane %v3597_v24, 3  ;;  %v3602_v5 = vrot.slane %v3600_v37, 4  ;;  %v4205_v56 = vrot.slane %v6750_v51, 2  ;;  %v3560_v45 = vld [vmem:[#allocation2 + $0x40] sm:$0xf8] }
 0x177   : > { %v2692_v31 = vld [vmem:[#allocation2 + $0x100] sm:$0xf0]  ;;  %v3595_v43 = vor.u32 %v3594_v57, %v3591_v49  ;;  %v3606_v48 = vshrl.u32 %v3558_v23, 16  ;;  %v3609_v9 = vshll.u32 %v3558_v23, 16  ;;  %v3614_v0 = vshrl.u32 %v7974_v26, 16 }
 0x178   : > { %v3033_v1 = vld [vmem:[#allocation2 + $0x108] sm:$0x1f]  ;;  %v3290_v2 = vshrl.u32 %v2692_v31, 16  ;;  %v3293_v52 = vshll.u32 %v2692_v31, 16  ;;  %v958_v39 = vsel %vm788_vm6, %v949_v62, %v957_v40  ;;  %v3603_v28 = vor.u32 %v3602_v5, %v3599_v50  ;;  %6616 = vmatprep.subr.msk.bf16.mxu0 %vm1213_vm2, %v4205_v56  ;;  %v3562_v31 = vld [vmem:[#allocation2 + $0x50] sm:$0xf8] }
 0x179   : > { %v3298_v30 = vshrl.u32 %v3033_v1, 16  ;;  %v3301_v8 = vshll.u32 %v3033_v1, 16  ;;  %6097 = vmatmul.mubr.msk.bf16.gmra.mrb[16].mxu1 %vm1164_vm4, %v958_v39  ;;  %v3617_v59 = vshll.u32 %v7974_v26, 16  ;;  %v4255_v46 = vsel %vm1213_vm2, %v4205_v56, 0  ;;  %v7989_v62 = vld [vmem:[#allocation2 + $0x48] sm:$0xf] }
 0x17a   : > { %v3292_v27 = vrot.slane %v3290_v2, 4  ;;  %v3295_v13 = vrot.slane %v3293_v52, 5  ;;  %v3604_v22 = vsel %vm788_vm6, %v3595_v43, %v3603_v28  ;;  %v3608_v32 = vrot.slane %v3606_v48, 3  ;;  %v7995_v39 = vld [vmem:[#allocation2 + $0x58] sm:$0xf] }
 0x17b   : > { %v3300_v10 = vrot.slane %v3298_v30, 4  ;;  %v3303_v55 = vrot.slane %v3301_v8, 5  ;;  %v3611_v6 = vrot.slane %v3609_v9, 4  ;;  %v3616_v21 = vrot.slane %v3614_v0, 3  ;;  %v7999_v48 = vld [vmem:[#allocation12 + $0x10] sm:$0x3] }
 0x17c   : > { %v3296_v34 = vor.u32 %v3295_v13, %v3292_v27  ;;  %v3619_v44 = vrot.slane %v3617_v59, 4  ;;  %v960_v16 = vshrl.u32 %v776_v33, 16  ;;  %v963_v18 = vshll.u32 %v776_v33, 16  ;;  %v780_v13 = vld [vmem:[#allocation2 + $0xc0] sm:$0xf8] }
 0x17d   : > { %v3304_v61 = vor.u32 %v3303_v55, %v3300_v10  ;;  %v3612_v25 = vor.u32 %v3611_v6, %v3608_v32  ;;  %v968_v58 = vshrl.u32 %v7800_v3, 16  ;;  %v971_v14 = vshll.u32 %v7800_v3, 16  ;;  %v782_v32 = vld [vmem:[#allocation2 + $0xd0] sm:$0xf8] }
 0x17e   : > { %v977_v7 = vshrl.u32 %v778_v47, 16  ;;  %v3620_v41 = vor.u32 %v3619_v44, %v3616_v21  ;;  %v962_v20 = vrot.slane %v960_v16, 3  ;;  %v965_v42 = vrot.slane %v963_v18, 4 }
 0x17f   : > { %v3305_v15 = vsel %vm1606_vm5, %v3296_v34, %v3304_v61  ;;  %v980_v51 = vshll.u32 %v778_v47, 16  ;;  %v970_v60 = vrot.slane %v968_v58, 3  ;;  %v973_v54 = vrot.slane %v971_v14, 4  ;;  %v3564_v58 = vld [vmem:[#allocation2 + $0x60] sm:$0xf8] }
 0x180   : > { %6245 = vmatmul.mubr.msk.bf16.gmra.mrb[28].mxu0 %vm1164_vm4, %v3305_v15  ;;  %v979_v24 = vrot.slane %v977_v7, 3  ;;  %v985_v29 = vshrl.u32 %v7842_v53, 16  ;;  %v3621_v49 = vsel %vm788_vm6, %v3612_v25, %v3620_v41  ;;  %v966_v37 = vor.u32 %v965_v42, %v962_v20 }
 0x181   : > { %6250 = vmatprep.mubr.msk.bf16.mxu0 %vm1164_vm4, %v3604_v22  ;;  %v982_v23 = vrot.slane %v980_v51, 4  ;;  %v988_v3 = vshll.u32 %v7842_v53, 16  ;;  %v974_v1 = vor.u32 %v973_v54, %v970_v60  ;;  %v3623_v57 = vshrl.u32 %v3560_v45, 16  ;;  %v8014_v54 = vld [vmem:[#allocation2 + $0x68] sm:$0xf] }
 0x182   : > { %v987_v40 = vrot.slane %v985_v29, 3  ;;  %v3626_v50 = vshll.u32 %v3560_v45, 16  ;;  %v3631_v30 = vshrl.u32 %v7989_v62, 16  ;;  %v3634_v8 = vshll.u32 %v7989_v62, 16 }
 0x183   : > { %v983_v2 = vor.u32 %v982_v23, %v979_v24  ;;  %v990_v52 = vrot.slane %v988_v3, 4  ;;  %v975_v43 = vsel %vm788_vm6, %v966_v37, %v974_v1  ;;  %v3625_v5 = vrot.slane %v3623_v57, 3  ;;  %v3566_v37 = vld [vmem:[#allocation2 + $0x70] sm:$0xf8] }
 0x184   : > { %v3628_v56 = vrot.slane %v3626_v50, 4  ;;  %v3640_v27 = vshrl.u32 %v3562_v31, 16  ;;  %6100 = vmatprep.mubr.msk.bf16.mxu1 %vm1164_vm4, %v975_v43  ;;  %v3633_v10 = vrot.slane %v3631_v30, 3  ;;  %v3636_v55 = vrot.slane %v3634_v8, 4 }
 0x185   : > { %v991_v53 = vor.u32 %v990_v52, %v987_v40  ;;  %v3643_v28 = vshll.u32 %v3562_v31, 16  ;;  %v3648_v33 = vshrl.u32 %v7995_v39, 16  ;;  %v3651_v34 = vshll.u32 %v7995_v39, 16 }
 0x186   : > { %v3629_v9 = vor.u32 %v3628_v56, %v3625_v5  ;;  %v3642_v0 = vrot.slane %v3640_v27, 3  ;;  %v3637_v59 = vor.u32 %v3636_v55, %v3633_v10  ;;  %v994_v22 = vshrl.u32 %v780_v13, 16  ;;  %v784_v5 = vld [vmem:[#allocation2 + $0xe0] sm:$0xf8] }
 0x187   : > { %v992_v61 = vsel %vm788_vm6, %v983_v2, %v991_v53  ;;  %v3645_v47 = vrot.slane %v3643_v28, 4  ;;  %v3650_v6 = vrot.slane %v3648_v33, 3  ;;  %v3653_v21 = vrot.slane %v3651_v34, 4  ;;  %v8020_v2 = vld [vmem:[#allocation2 + $0x78] sm:$0xf] }
 0x188   : > { %6251 = vmatmul.mubr.msk.bf16.vlgmr.msra.gmra.mrb[0].mxu0 %vm1164_vm4, %v3621_v49  ;;  %6101 = vmatmul.mubr.msk.bf16.gmra.mrb[20].mxu1 %vm1164_vm4, %v992_v61  ;;  %v997_v15 = vshll.u32 %v780_v13, 16  ;;  %v1002_v44 = vshrl.u32 %v7858_v17, 16  ;;  %v3638_v16 = vsel %vm788_vm6, %v3629_v9, %v3637_v59  ;;  %v1005_v25 = vshll.u32 %v7858_v17, 16  ;;  %v786_v59 = vld [vmem:[#allocation2 + $0xf0] sm:$0xf8] }
 0x189   : > { %6283 = vmatpush3.bf16.msra.mxu0 %v4255_v46  ;;  %v3646_v18 = vor.u32 %v3645_v47, %v3642_v0  ;;  %v996_v46 = vrot.slane %v994_v22, 3  ;;  %6254 = vmatprep.mubr.msk.bf16.mxu0 %vm1164_vm4, %v3638_v16  ;;  %v3654_v14 = vor.u32 %v3653_v21, %v3650_v6  ;;  %v1011_v20 = vshrl.u32 %v782_v32, 16 }
 0x18a   : > { %6617 = vmatprep.subr.msk.bf16.mxu0 %vm1213_vm2, %v7999_v48  ;;  %v999_v7 = vrot.slane %v997_v15, 4  ;;  %v1004_v41 = vrot.slane %v1002_v44, 3  ;;  %v1007_v42 = vrot.slane %v1005_v25, 4  ;;  %v1014_v51 = vshll.u32 %v782_v32, 16 }
 0x18b   : > { %v1019_v45 = vshrl.u32 %v7866_v19, 16  ;;  %v1022_v60 = vshll.u32 %v7866_v19, 16  ;;  %v3655_v24 = vsel %vm788_vm6, %v3646_v18, %v3654_v14  ;;  %v1013_v49 = vrot.slane %v1011_v20, 3  ;;  %v3568_v18 = vld [vmem:[#allocation2 + $0x80] sm:$0xf8] }
 0x18c   : > { %v1000_v29 = vor.u32 %v999_v7, %v996_v46  ;;  %v3657_v17 = vshrl.u32 %v3564_v58, 16  ;;  %v1008_v23 = vor.u32 %v1007_v42, %v1004_v41  ;;  %v1016_v3 = vrot.slane %v1014_v51, 4  ;;  %v8034_v51 = vld [vmem:[#allocation2 + $0x88] sm:$0xf] }
 0x18d   : > { %v1021_v31 = vrot.slane %v1019_v45, 3  ;;  %v1024_v1 = vrot.slane %v1022_v60, 4  ;;  %v3660_v57 = vshll.u32 %v3564_v58, 16  ;;  %v3665_v50 = vshrl.u32 %v8014_v54, 16 }
 0x18e   : > { %v3659_v40 = vrot.slane %v3657_v17, 3  ;;  %v3668_v19 = vshll.u32 %v8014_v54, 16  ;;  %v1009_v52 = vsel %vm788_vm6, %v1000_v29, %v1008_v23  ;;  %v1017_v30 = vor.u32 %v1016_v3, %v1013_v49  ;;  %v3570_v29 = vld [vmem:[#allocation2 + $0x90] sm:$0xf8] }
 0x18f   : > { %v1025_v8 = vor.u32 %v1024_v1, %v1021_v31  ;;  %v3674_v43 = vshrl.u32 %v3566_v37, 16  ;;  %6104 = vmatprep.mubr.msk.bf16.mxu1 %vm1164_vm4, %v1009_v52  ;;  %v3662_v56 = vrot.slane %v3660_v57, 4  ;;  %v3667_v27 = vrot.slane %v3665_v50, 3 }
 0x190   : > { %6255 = vmatmul.mubr.msk.bf16.gmra.mrb[4].mxu0 %vm1164_vm4, %v3655_v24  ;;  %v3670_v13 = vrot.slane %v3668_v19, 4  ;;  %v3677_v53 = vshll.u32 %v3566_v37, 16  ;;  %v3682_v28 = vshrl.u32 %v8020_v2, 16  ;;  %v3685_v9 = vshll.u32 %v8020_v2, 16 }
 0x191   : > { %v1026_v10 = vsel %vm788_vm6, %v1017_v30, %v1025_v8  ;;  %v3676_v55 = vrot.slane %v3674_v43, 3  ;;  %v3663_v0 = vor.u32 %v3662_v56, %v3659_v40  ;;  %v1028_v61 = vshrl.u32 %v784_v5, 16  ;;  %v8040_v40 = vld [vmem:[#allocation2 + $0x98] sm:$0xf]  ;;  %v1590_v56 = vld [vmem:[#allocation2 + $0x8] sm:$0x1f] }
 0x192   : > { %6105 = vmatmul.mubr.msk.bf16.gmra.mrb[24].mxu1 %vm1164_vm4, %v1026_v10  ;;  %v3671_v33 = vor.u32 %v3670_v13, %v3667_v27  ;;  %v3679_v34 = vrot.slane %v3677_v53, 4  ;;  %v3684_v47 = vrot.slane %v3682_v28, 3  ;;  %v3687_v22 = vrot.slane %v3685_v9, 4 }
 0x193   : > { %v1031_v32 = vshll.u32 %v784_v5, 16  ;;  %v1036_v6 = vshrl.u32 %v7882_v38, 16  ;;  %v1030_v44 = vrot.slane %v1028_v61, 3  ;;  %v1039_v16 = vshll.u32 %v7882_v38, 16 }
 0x194   : > { %v3672_v21 = vsel %vm788_vm6, %v3663_v0, %v3671_v33  ;;  %v3680_v15 = vor.u32 %v3679_v34, %v3676_v55  ;;  %v3688_v46 = vor.u32 %v3687_v22, %v3684_v47  ;;  %v1045_v14 = vshrl.u32 %v786_v59, 16  ;;  %v1591_v55 = vld [vmem:[#allocation2 + $0x18] sm:$0x1f]  ;;  %v6751_v61 = vld [vmem:[#allocation12 + $0x4] ss:$0 sps:$4 sm:$0xcc]  }
 0x195   : > { %6258 = vmatprep.mubr.msk.bf16.mxu0 %vm1164_vm4, %v3672_v21  ;;  %v1033_v25 = vrot.slane %v1031_v32, 4  ;;  %v1038_v58 = vrot.slane %v1036_v6, 3  ;;  %v1041_v7 = vrot.slane %v1039_v16, 4  ;;  %v1048_v41 = vshll.u32 %v786_v59, 16  ;;  %v3572_v21 = vld [vmem:[#allocation2 + $0xa0] sm:$0xf8] }
 0x196   : > { %v1053_v20 = vshrl.u32 %v7886_v11, 16  ;;  %v1056_v42 = vshll.u32 %v7886_v11, 16  ;;  %v3689_v45 = vsel %vm788_vm6, %v3680_v15, %v3688_v46  ;;  %v1047_v24 = vrot.slane %v1045_v14, 3  ;;  %v8053_v46 = vld [vmem:[#allocation2 + $0xa8] sm:$0xf] }
 0x197   : > { %v1034_v60 = vor.u32 %v1033_v25, %v1030_v44  ;;  %v3691_v38 = vshrl.u32 %v3568_v18, 16  ;;  %v1042_v49 = vor.u32 %v1041_v7, %v1038_v58  ;;  %v1050_v17 = vrot.slane %v1048_v41, 4 }
 0x198   : > { %6259 = vmatmul.mubr.msk.bf16.gmra.mrb[8].mxu0 %vm1164_vm4, %v3689_v45  ;;  %v1055_v37 = vrot.slane %v1053_v20, 3  ;;  %v1058_v23 = vrot.slane %v1056_v42, 4  ;;  %v3694_v31 = vshll.u32 %v3568_v18, 16  ;;  %v3699_v1 = vshrl.u32 %v8034_v51, 16  ;;  %v3574_v45 = vld [vmem:[#allocation2 + $0xb0] sm:$0xf8] }
 0x199   : > { %v3693_v3 = vrot.slane %v3691_v38, 3  ;;  %v3702_v11 = vshll.u32 %v8034_v51, 16  ;;  %v1043_v57 = vsel %vm788_vm6, %v1034_v60, %v1042_v49  ;;  %v1051_v50 = vor.u32 %v1050_v17, %v1047_v24  ;;  %v8058_v49 = vld [vmem:[#allocation2 + $0xb8] sm:$0xf] }
 0x19a   : > { %v1059_v19 = vor.u32 %v1058_v23, %v1055_v37  ;;  %v3708_v52 = vshrl.u32 %v3570_v29, 16  ;;  %6108 = vmatprep.mubr.msk.bf16.mxu1 %vm1164_vm4, %v1043_v57  ;;  %v3696_v30 = vrot.slane %v3694_v31, 4  ;;  %v3701_v8 = vrot.slane %v3699_v1, 3 }
 0x19b   : > { %v3704_v43 = vrot.slane %v3702_v11, 4  ;;  %v3711_v5 = vshll.u32 %v3570_v29, 16  ;;  %v3716_v53 = vshrl.u32 %v8040_v40, 16  ;;  %v3719_v10 = vshll.u32 %v8040_v40, 16 }
 0x19c   : > { %v1060_v27 = vsel %vm788_vm6, %v1051_v50, %v1059_v19  ;;  %v3710_v13 = vrot.slane %v3708_v52, 3  ;;  %v3697_v28 = vor.u32 %v3696_v30, %v3693_v3  ;;  %v8818_v33 = vshrl.u32 %v7579_v12, 16 }
 0x19d   : > { %6109 = vmatmul.mubr.msk.bf16.gmra.mrb[28].mxu1 %vm1164_vm4, %v1060_v27  ;;  %v3705_v9 = vor.u32 %v3704_v43, %v3701_v8  ;;  %v3713_v0 = vrot.slane %v3711_v5, 4  ;;  %v3718_v59 = vrot.slane %v3716_v53, 3  ;;  %v3721_v47 = vrot.slane %v3719_v10, 4  ;;  %v1592_v8 = vld [vmem:[#allocation2 + $0x28] sm:$0x1f]  ;;  %v8820_v43 = vld [vmem:[#allocation36_spill] sm:$0xff] }
 0x19e   : > { %v1610_v34 = vrot.slane %v8818_v33, 4  ;;  %v8819_v22 = vshll.u32 %v7579_v12, 16  ;;  %v1616_v6 = vshrl.u32 %v1590_v56, 16  ;;  %v1619_v16 = vshll.u32 %v1590_v56, 16  ;;  %v8821_v5 = vld [vmem:[#allocation35_spill] sm:$0xff] }
 0x19f   : > { %v3706_v15 = vsel %vm788_vm6, %v3697_v28, %v3705_v9  ;;  %v3714_v44 = vor.u32 %v3713_v0, %v3710_v13  ;;  %v1633_v18 = vshrl.u32 %v1591_v55, 16  ;;  %v3722_v25 = vor.u32 %v3721_v47, %v3718_v59  ;;  %v6752_v0 = vld [vmem:[#allocation2 + $0x20] sm:$0xf0] }
 0x1a0   : > { %v1613_v32 = vrot.slane %v8819_v22, 5  ;;  %6262 = vmatprep.mubr.msk.bf16.mxu0 %vm1164_vm4, %v3706_v15  ;;  %v1618_v14 = vrot.slane %v1616_v6, 4  ;;  %v1636_v7 = vshll.u32 %v1591_v55, 16  ;;  %v1621_v41 = vrot.slane %v1619_v16, 5  ;;  %v1593_v22 = vld [vmem:[#allocation2 + $0x38] sm:$0x1f] }
 0x1a1   : > { %v1635_v20 = vrot.slane %v1633_v18, 4  ;;  %v2432_v42 = vrot.slane %v6751_v61, 2  ;;  %v3725_v12 = vshrl.u32 %v3572_v21, 16  ;;  %v3723_v60 = vsel %vm788_vm6, %v3714_v44, %v3722_v25  ;;  %v6753_v15 = vld [vmem:[#allocation2 + $0x30] sm:$0xf0] }
 0x1a2   : > { %v1614_v58 = vor.u32 %v1613_v32, %v1610_v34  ;;  %v1638_v24 = vrot.slane %v1636_v7, 5  ;;  %v3728_v38 = vshll.u32 %v3572_v21, 16  ;;  %v3733_v29 = vshrl.u32 %v8053_v46, 16  ;;  %6263 = vmatmul.mubr.msk.bf16.gmra.mrb[12].mxu0 %vm1164_vm4, %v3723_v60  ;;  %v3576_v16 = vld [vmem:[#allocation2 + $0xc0] sm:$0xf8] }
 0x1a3   : > { %v1622_v17 = vor.u32 %v1621_v41, %v1618_v14  ;;  %6611 = vmatprep.subr.msk.bf16.mxu1 %vm1213_vm2, %v2432_v42  ;;  %v3727_v37 = vrot.slane %v3725_v12, 3  ;;  %v3736_v23 = vshll.u32 %v8053_v46, 16  ;;  %v2482_v3 = vsel %vm1213_vm2, %v2432_v42, 0  ;;  %v6754_v18 = vld [vmem:[#allocation12 + $0x8] sm:$0x3] }
 0x1a4   : > { %v1639_v31 = vor.u32 %v1638_v24, %v1635_v20  ;;  %v3730_v1 = vrot.slane %v3728_v38, 4  ;;  %v3735_v11 = vrot.slane %v3733_v29, 3  ;;  %v3742_v57 = vshrl.u32 %v3574_v45, 16 }
 0x1a5   : > { %v1623_v50 = vsel %vm1606_vm5, %v1614_v58, %v1622_v17  ;;  %v3738_v19 = vrot.slane %v3736_v23, 4  ;;  %v3745_v52 = vshll.u32 %v3574_v45, 16  ;;  %v3750_v30 = vshrl.u32 %v8058_v49, 16  ;;  %v8076_v45 = vld [vmem:[#allocation2 + $0xc8] sm:$0xf] }
 0x1a6   : > { %6114 = vmatprep.mubr.msk.bf16.mxu1 %vm1164_vm4, %v1623_v50  ;;  %v8822_v56 = vor.u32 %v8820_v43, %v8821_v5  ;;  %v3731_v13 = vor.u32 %v3730_v1, %v3727_v37  ;;  %v3744_v53 = vrot.slane %v3742_v57, 3  ;;  %v3753_v10 = vshll.u32 %v8058_v49, 16  ;;  %v3578_v17 = vld [vmem:[#allocation2 + $0xd0] sm:$0xf8]  ;;  %v8080_v1 = vld [vmem:[#allocation2 + $0xd8] sm:$0xf] }
 0x1a7   : > { %v3739_v55 = vor.u32 %v3738_v19, %v3735_v11  ;;  %v3747_v28 = vrot.slane %v3745_v52, 4  ;;  %v3752_v9 = vrot.slane %v3750_v30, 3  ;;  %v1642_v33 = vshrl.u32 %v6752_v0, 16 }
 0x1a8   : > { %v1640_v27 = vsel %vm1606_vm5, %v8822_v56, %v1639_v31  ;;  %v3755_v34 = vrot.slane %v3753_v10, 4  ;;  %v1645_v61 = vshll.u32 %v6752_v0, 16  ;;  %v1650_v59 = vshrl.u32 %v1592_v8, 16 }
 0x1a9   : > { %6115 = vmatmul.mubr.msk.bf16.vlgmr.msra.gmra.mrb[0].mxu1 %vm1164_vm4, %v1640_v27  ;;  %v1653_v47 = vshll.u32 %v1592_v8, 16  ;;  %v3740_v32 = vsel %vm788_vm6, %v3731_v13, %v3739_v55  ;;  %v3748_v6 = vor.u32 %v3747_v28, %v3744_v53  ;;  %v1644_v21 = vrot.slane %v1642_v33, 4  ;;  %v1594_v53 = vld [vmem:[#allocation2 + $0x48] sm:$0x1f] }
 0x1aa   : > { %6147 = vmatpush3.bf16.msra.mxu1 %v2482_v3  ;;  %v1659_v44 = vshrl.u32 %v6753_v15, 16  ;;  %6266 = vmatprep.mubr.msk.bf16.mxu0 %vm1164_vm4, %v3740_v32  ;;  %v3756_v25 = vor.u32 %v3755_v34, %v3752_v9  ;;  %v1647_v58 = vrot.slane %v1645_v61, 5  ;;  %v1652_v14 = vrot.slane %v1650_v59, 4  ;;  %v6755_v61 = vld [vmem:[#allocation2 + $0x40] sm:$0xf0] }
 0x1ab   : > { %6613 = vmatprep.subr.msk.bf16.mxu1 %vm1213_vm2, %v6754_v18  ;;  %v1655_v7 = vrot.slane %v1653_v47, 5  ;;  %v1662_v20 = vshll.u32 %v6753_v15, 16  ;;  %v1667_v42 = vshrl.u32 %v1593_v22, 16  ;;  %v1670_v12 = vshll.u32 %v1593_v22, 16  ;;  %v6756_v18 = vld [vmem:[#allocation2 + $0x50] sm:$0xf0] }
 0x1ac   : > { %v1661_v41 = vrot.slane %v1659_v44, 4  ;;  %v3757_v60 = vsel %vm788_vm6, %v3748_v6, %v3756_v25  ;;  %v1648_v24 = vor.u32 %v1647_v58, %v1644_v21  ;;  %v3759_v29 = vshrl.u32 %v3576_v16, 16  ;;  %v1595_v21 = vld [vmem:[#allocation2 + $0x58] sm:$0x1f]  ;;  %v3580_v58 = vld [vmem:[#allocation2 + $0xe0] sm:$0xf8] }
 0x1ad   : > { %v1656_v38 = vor.u32 %v1655_v7, %v1652_v14  ;;  %6267 = vmatmul.mubr.msk.bf16.gmra.mrb[16].mxu0 %vm1164_vm4, %v3757_v60  ;;  %v1664_v37 = vrot.slane %v1662_v20, 5  ;;  %v1669_v23 = vrot.slane %v1667_v42, 4  ;;  %v1672_v3 = vrot.slane %v1670_v12, 5 }
 0x1ae   : > { %v3762_v31 = vshll.u32 %v3576_v16, 16  ;;  %v3761_v57 = vrot.slane %v3759_v29, 3  ;;  %v3767_v50 = vshrl.u32 %v8076_v45, 16  ;;  %v3770_v19 = vshll.u32 %v8076_v45, 16 }
 0x1af   : > { %v1657_v11 = vsel %vm1606_vm5, %v1648_v24, %v1656_v38  ;;  %v1665_v52 = vor.u32 %v1664_v37, %v1661_v41  ;;  %v1673_v30 = vor.u32 %v1672_v3, %v1669_v23  ;;  %v3776_v43 = vshrl.u32 %v3578_v17, 16  ;;  %v8092_v38 = vld [vmem:[#allocation2 + $0xe8] sm:$0xf]  ;;  %v3582_v3 = vld [vmem:[#allocation2 + $0xf0] sm:$0xf8] }
 0x1b0   : > { %6118 = vmatprep.mubr.msk.bf16.mxu1 %vm1164_vm4, %v1657_v11  ;;  %v3764_v8 = vrot.slane %v3762_v31, 4  ;;  %v3769_v5 = vrot.slane %v3767_v50, 3  ;;  %v3772_v56 = vrot.slane %v3770_v19, 4  ;;  %v3779_v27 = vshll.u32 %v3578_v17, 16  ;;  %v8096_v19 = vld [vmem:[#allocation2 + $0xf8] sm:$0xf] }
 0x1b1   : > { %v3784_v13 = vshrl.u32 %v8080_v1, 16  ;;  %v1674_v10 = vsel %vm1606_vm5, %v1665_v52, %v1673_v30  ;;  %v3778_v28 = vrot.slane %v3776_v43, 3  ;;  %v3787_v9 = vshll.u32 %v8080_v1, 16 }
 0x1b2   : > { %v3765_v55 = vor.u32 %v3764_v8, %v3761_v57  ;;  %6119 = vmatmul.mubr.msk.bf16.gmra.mrb[4].mxu1 %vm1164_vm4, %v1674_v10  ;;  %v3773_v0 = vor.u32 %v3772_v56, %v3769_v5  ;;  %v3781_v33 = vrot.slane %v3779_v27, 4  ;;  %v1676_v59 = vshrl.u32 %v6755_v61, 16 }
 0x1b3   : > { %v3786_v34 = vrot.slane %v3784_v13, 3  ;;  %v3789_v47 = vrot.slane %v3787_v9, 4  ;;  %v1679_v22 = vshll.u32 %v6755_v61, 16  ;;  %v1684_v32 = vshrl.u32 %v1594_v53, 16  ;;  %v1596_v9 = vld [vmem:[#allocation2 + $0x68] sm:$0x1f] }
 0x1b4   : > { %v1687_v6 = vshll.u32 %v1594_v53, 16  ;;  %v3774_v15 = vsel %vm788_vm6, %v3765_v55, %v3773_v0  ;;  %v3782_v44 = vor.u32 %v3781_v33, %v3778_v28  ;;  %v1678_v16 = vrot.slane %v1676_v59, 4 }
 0x1b5   : > { %v1693_v25 = vshrl.u32 %v6756_v18, 16  ;;  %6270 = vmatprep.mubr.msk.bf16.mxu0 %vm1164_vm4, %v3774_v15  ;;  %v3790_v14 = vor.u32 %v3789_v47, %v3786_v34  ;;  %v1681_v7 = vrot.slane %v1679_v22, 5  ;;  %v1686_v41 = vrot.slane %v1684_v32, 4  ;;  %v6757_v32 = vld [vmem:[#allocation2 + $0x60] sm:$0xf0] }
 0x1b6   : > { %v1689_v20 = vrot.slane %v1687_v6, 5  ;;  %v1696_v12 = vshll.u32 %v6756_v18, 16  ;;  %v1701_v60 = vshrl.u32 %v1595_v21, 16  ;;  %v1704_v24 = vshll.u32 %v1595_v21, 16  ;;  %v1597_v18 = vld [vmem:[#allocation2 + $0x78] sm:$0x1f] }
 0x1b7   : > { %v1695_v42 = vrot.slane %v1693_v25, 4  ;;  %v3791_v29 = vsel %vm788_vm6, %v3782_v44, %v3790_v14  ;;  %v1682_v17 = vor.u32 %v1681_v7, %v1678_v16  ;;  %v3793_v23 = vshrl.u32 %v3580_v58, 16  ;;  %v6758_v7 = vld [vmem:[#allocation2 + $0x70] sm:$0xf0] }
 0x1b8   : > { %v1690_v37 = vor.u32 %v1689_v20, %v1686_v41  ;;  %6271 = vmatmul.mubr.msk.bf16.gmra.mrb[20].mxu0 %vm1164_vm4, %v3791_v29  ;;  %v1698_v31 = vrot.slane %v1696_v12, 5  ;;  %v1703_v11 = vrot.slane %v1701_v60, 4  ;;  %v1706_v57 = vrot.slane %v1704_v24, 5  ;;  %v3584_v20 = vld [vmem:[#allocation2 + $0x100] sm:$0xf8] }
 0x1b9   : > { %v3796_v50 = vshll.u32 %v3580_v58, 16  ;;  %v3795_v30 = vrot.slane %v3793_v23, 3  ;;  %v3801_v8 = vshrl.u32 %v8092_v38, 16  ;;  %v3804_v43 = vshll.u32 %v8092_v38, 16 }
 0x1ba   : > { %v1691_v52 = vsel %vm1606_vm5, %v1682_v17, %v1690_v37  ;;  %v1699_v5 = vor.u32 %v1698_v31, %v1695_v42  ;;  %v1707_v56 = vor.u32 %v1706_v57, %v1703_v11  ;;  %v3810_v13 = vshrl.u32 %v3582_v3, 16 }
 0x1bb   : > { %6122 = vmatprep.mubr.msk.bf16.mxu1 %vm1164_vm4, %v1691_v52  ;;  %v3798_v27 = vrot.slane %v3796_v50, 4  ;;  %v3803_v53 = vrot.slane %v3801_v8, 3  ;;  %v3806_v10 = vrot.slane %v3804_v43, 4  ;;  %v3813_v55 = vshll.u32 %v3582_v3, 16  ;;  %v8108_v3 = vld [vmem:[#allocation2 + $0x108] sm:$0xf] }
 0x1bc   : > { %v3818_v28 = vshrl.u32 %v8096_v19, 16  ;;  %v1708_v0 = vsel %vm1606_vm5, %v1699_v5, %v1707_v56  ;;  %v3812_v34 = vrot.slane %v3810_v13, 3  ;;  %v3821_v61 = vshll.u32 %v8096_v19, 16  ;;  %v3586_v52 = vld [vmem:[#allocation2 + $0x110] sm:$0xf8] }
 0x1bd   : > { %v3799_v33 = vor.u32 %v3798_v27, %v3795_v30  ;;  %6123 = vmatmul.mubr.msk.bf16.gmra.mrb[8].mxu1 %vm1164_vm4, %v1708_v0  ;;  %v3807_v59 = vor.u32 %v3806_v10, %v3803_v53  ;;  %v3815_v47 = vrot.slane %v3813_v55, 4  ;;  %v1710_v6 = vshrl.u32 %v6757_v32, 16  ;;  %v8112_v56 = vld [vmem:[#allocation2 + $0x118] sm:$0xf] }
 0x1be   : > { %v3820_v22 = vrot.slane %v3818_v28, 3  ;;  %v3823_v21 = vrot.slane %v3821_v61, 4  ;;  %v1713_v15 = vshll.u32 %v6757_v32, 16  ;;  %v1718_v44 = vshrl.u32 %v1596_v9, 16 }
 0x1bf   : > { %v1721_v16 = vshll.u32 %v1596_v9, 16  ;;  %v3808_v25 = vsel %vm788_vm6, %v3799_v33, %v3807_v59  ;;  %v3816_v58 = vor.u32 %v3815_v47, %v3812_v34  ;;  %v1712_v14 = vrot.slane %v1710_v6, 4  ;;  %v1598_v47 = vld [vmem:[#allocation2 + $0x88] sm:$0x1f] }
 0x1c0   : > { %v1727_v41 = vshrl.u32 %v6758_v7, 16  ;;  %6274 = vmatprep.mubr.msk.bf16.mxu0 %vm1164_vm4, %v3808_v25  ;;  %v3824_v42 = vor.u32 %v3823_v21, %v3820_v22  ;;  %v1715_v12 = vrot.slane %v1713_v15, 5  ;;  %v1720_v60 = vrot.slane %v1718_v44, 4 }
 0x1c1   : > { %v1723_v24 = vrot.slane %v1721_v16, 5  ;;  %v1730_v17 = vshll.u32 %v6758_v7, 16  ;;  %v1735_v37 = vshrl.u32 %v1597_v18, 16  ;;  %v1738_v23 = vshll.u32 %v1597_v18, 16  ;;  %v6759_v18 = vld [vmem:[#allocation2 + $0x80] sm:$0xf0] }
 0x1c2   : > { %v1729_v29 = vrot.slane %v1727_v41, 4  ;;  %v3825_v31 = vsel %vm788_vm6, %v3816_v58, %v3824_v42  ;;  %v1716_v11 = vor.u32 %v1715_v12, %v1712_v14  ;;  %v3827_v50 = vshrl.u32 %v3584_v20, 16 }
 0x1c3   : > { %v1724_v57 = vor.u32 %v1723_v24, %v1720_v60  ;;  %6275 = vmatmul.mubr.msk.bf16.gmra.mrb[24].mxu0 %vm1164_vm4, %v3825_v31  ;;  %v1732_v30 = vrot.slane %v1730_v17, 5  ;;  %v1737_v8 = vrot.slane %v1735_v37, 4  ;;  %v1740_v43 = vrot.slane %v1738_v23, 5  ;;  %v6760_v24 = vld [vmem:[#allocation2 + $0x90] sm:$0xf0] }
 0x1c4   : > { %v3830_v5 = vshll.u32 %v3584_v20, 16  ;;  %v3829_v13 = vrot.slane %v3827_v50, 3  ;;  %v3835_v53 = vshrl.u32 %v8108_v3, 16  ;;  %v3838_v10 = vshll.u32 %v8108_v3, 16  ;;  %v1599_v20 = vld [vmem:[#allocation2 + $0x98] sm:$0x1f] }
 0x1c5   : > { %v1725_v27 = vsel %vm1606_vm5, %v1716_v11, %v1724_v57  ;;  %v1733_v55 = vor.u32 %v1732_v30, %v1729_v29  ;;  %v1741_v28 = vor.u32 %v1740_v43, %v1737_v8  ;;  %v3844_v0 = vshrl.u32 %v3586_v52, 16  ;;  %v8123_v17 = vld [vmem:[#allocation2 + $0x20] sm:$0xf0]  ;;  %v8126_v8 = vld [vmem:[#allocation2 + $0x30] sm:$0xf0] }
 0x1c6   : > { %6126 = vmatprep.mubr.msk.bf16.mxu1 %vm1164_vm4, %v1725_v27  ;;  %v3832_v9 = vrot.slane %v3830_v5, 4  ;;  %v3837_v33 = vrot.slane %v3835_v53, 3  ;;  %v3840_v34 = vrot.slane %v3838_v10, 4  ;;  %v3847_v61 = vshll.u32 %v3586_v52, 16 }
 0x1c7   : > { %v3852_v59 = vshrl.u32 %v8112_v56, 16  ;;  %v1742_v22 = vsel %vm1606_vm5, %v1733_v55, %v1741_v28  ;;  %v3846_v6 = vrot.slane %v3844_v0, 3  ;;  %v3855_v21 = vshll.u32 %v8112_v56, 16 }
 0x1c8   : > { %v3833_v32 = vor.u32 %v3832_v9, %v3829_v13  ;;  %6127 = vmatmul.mubr.msk.bf16.gmra.mrb[12].mxu1 %vm1164_vm4, %v1742_v22  ;;  %v3841_v15 = vor.u32 %v3840_v34, %v3837_v33  ;;  %v3849_v44 = vrot.slane %v3847_v61, 4  ;;  %v1744_v25 = vshrl.u32 %v6759_v18, 16  ;;  %v1600_v9 = vld [vmem:[#allocation2 + $0xa8] sm:$0x1f] }
 0x1c9   : > { %v3854_v16 = vrot.slane %v3852_v59, 3  ;;  %v3857_v58 = vrot.slane %v3855_v21, 4  ;;  %v1747_v14 = vshll.u32 %v6759_v18, 16  ;;  %v1752_v7 = vshrl.u32 %v1598_v47, 16  ;;  %v1601_v21 = vld [vmem:[#allocation2 + $0xb8] sm:$0x1f] }
 0x1ca   : > { %v1755_v41 = vshll.u32 %v1598_v47, 16  ;;  %v3842_v42 = vsel %vm788_vm6, %v3833_v32, %v3841_v15  ;;  %v3850_v12 = vor.u32 %v3849_v44, %v3846_v6  ;;  %v1746_v60 = vrot.slane %v1744_v25, 4  ;;  %v6761_v32 = vld [vmem:[#allocation2 + $0xa0] sm:$0xf0]  ;;  %v6762_v25 = vld [vmem:[#allocation2 + $0xb0] sm:$0xf0] }
 0x1cb   : > { %v1761_v29 = vshrl.u32 %v6760_v24, 16  ;;  %6278 = vmatprep.mubr.msk.bf16.mxu0 %vm1164_vm4, %v3842_v42  ;;  %v3858_v37 = vor.u32 %v3857_v58, %v3854_v16  ;;  %v1749_v23 = vrot.slane %v1747_v14, 5  ;;  %v1754_v31 = vrot.slane %v1752_v7, 4 }
 0x1cc   : > { %v1757_v11 = vrot.slane %v1755_v41, 5  ;;  %v1764_v50 = vshll.u32 %v6760_v24, 16  ;;  %v1769_v52 = vshrl.u32 %v1599_v20, 16  ;;  %v1772_v30 = vshll.u32 %v1599_v20, 16 }
 0x1cd   : > { %v1763_v57 = vrot.slane %v1761_v29, 4  ;;  %v3859_v43 = vsel %vm788_vm6, %v3850_v12, %v3858_v37  ;;  %v1750_v5 = vor.u32 %v1749_v23, %v1746_v60  ;;  %v4153_v13 = vrot.slane %v8123_v17, 4  ;;  %v8145_v12 = vld [vmem:[#allocation2 + $0x50] sm:$0xf0] }
 0x1ce   : > { %v1758_v27 = vor.u32 %v1757_v11, %v1754_v31  ;;  %6279 = vmatmul.mubr.msk.bf16.gmra.mrb[28].mxu0 %vm1164_vm4, %v3859_v43  ;;  %v1766_v53 = vrot.slane %v1764_v50, 5  ;;  %v1771_v10 = vrot.slane %v1769_v52, 4  ;;  %v1774_v55 = vrot.slane %v1772_v30, 5  ;;  %v1602_v50 = vld [vmem:[#allocation2 + $0xc8] sm:$0x1f] }
 0x1cf   : > { %v4154_v28 = vrot.slane %v7961_v4, 4  ;;  %v4156_v33 = vrot.slane %v8126_v8, 4  ;;  %v4157_v34 = vrot.slane %v7974_v26, 4  ;;  %v4788_v61 = vsel %vm1213_vm2, %v7999_v48, 0  ;;  %v8141_v26 = vld [vmem:[#allocation2 + $0x40] sm:$0xf0] }
 0x1d0   : > { %v1759_v0 = vsel %vm1606_vm5, %v1750_v5, %v1758_v27  ;;  %v1767_v59 = vor.u32 %v1766_v53, %v1763_v57  ;;  %v1775_v47 = vor.u32 %v1774_v55, %v1771_v10  ;;  %v1778_v6 = vshrl.u32 %v6761_v32, 16  ;;  %v6763_v53 = vld [vmem:[#allocation2 + $0xc0] sm:$0xf0] }
 0x1d1   : > { %6130 = vmatprep.mubr.msk.bf16.mxu1 %vm1164_vm4, %v1759_v0  ;;  %v4155_v22 = vsel %vm1110_vm3, %v4153_v13, %v4154_v28  ;;  %v4158_v4 = vsel %vm1110_vm3, %v4156_v33, %v4157_v34  ;;  %v1781_v15 = vshll.u32 %v6761_v32, 16  ;;  %v1786_v44 = vshrl.u32 %v1600_v9, 16  ;;  %v1603_v28 = vld [vmem:[#allocation2 + $0xd8] sm:$0x1f] }
 0x1d2   : > { %6284 = vmatprep.mubr.msk.bf16.mxu0 %vm1164_vm4, %v4155_v22  ;;  %v1789_v16 = vshll.u32 %v1600_v9, 16  ;;  %v1776_v48 = vsel %vm1606_vm5, %v1767_v59, %v1775_v47  ;;  %v1780_v18 = vrot.slane %v1778_v6, 4  ;;  %v1795_v58 = vshrl.u32 %v6762_v25, 16  ;;  %v8157_v22 = vld [vmem:[#allocation2 + $0x60] sm:$0xf0] }
 0x1d3   : > { %v1798_v14 = vshll.u32 %v6762_v25, 16  ;;  %6131 = vmatmul.mubr.msk.bf16.gmra.mrb[16].mxu1 %vm1164_vm4, %v1776_v48  ;;  %v1783_v7 = vrot.slane %v1781_v15, 5  ;;  %v1788_v41 = vrot.slane %v1786_v44, 4  ;;  %v1803_v42 = vshrl.u32 %v1601_v21, 16  ;;  %v8160_v15 = vld [vmem:[#allocation2 + $0x70] sm:$0xf0] }
 0x1d4   : > { %v1791_v20 = vrot.slane %v1789_v16, 5  ;;  %v1797_v60 = vrot.slane %v1795_v58, 4  ;;  %v1806_v29 = vshll.u32 %v1601_v21, 16  ;;  %v4159_v37 = vrot.slane %v8141_v26, 4 }
 0x1d5   : > { %v1800_v24 = vrot.slane %v1798_v14, 5  ;;  %v1784_v23 = vor.u32 %v1783_v7, %v1780_v18  ;;  %v1805_v11 = vrot.slane %v1803_v42, 4  ;;  %v4160_v57 = vrot.slane %v7989_v62, 4 }
 0x1d6   : > { %v1792_v31 = vor.u32 %v1791_v20, %v1788_v41  ;;  %6285 = vmatmul.mubr.msk.bf16.vlgmr.msra.gmra.mrb[0].mxu0 %vm1164_vm4, %v4158_v4  ;;  %v1808_v30 = vrot.slane %v1806_v29, 5  ;;  %v4162_v43 = vrot.slane %v8145_v12, 4  ;;  %v4163_v5 = vrot.slane %v7995_v39, 4  ;;  %v1604_v41 = vld [vmem:[#allocation2 + $0xe8] sm:$0x1f] }
 0x1d7   : > { %v1801_v52 = vor.u32 %v1800_v24, %v1797_v60  ;;  %6317 = vmatpush3.bf16.msra.mxu0 %v4788_v61  ;;  %v4161_v13 = vsel %vm1110_vm3, %v4159_v37, %v4160_v57  ;;  %v1812_v10 = vshrl.u32 %v6763_v53, 16  ;;  %v1815_v55 = vshll.u32 %v6763_v53, 16  ;;  %v6764_v61 = vld [vmem:[#allocation2 + $0xd0] sm:$0xf0]  ;;  %v1605_v57 = vld [vmem:[#allocation2 + $0xf8] sm:$0x1f] }
 0x1d8   : > { %v1793_v27 = vsel %vm1606_vm5, %v1784_v23, %v1792_v31  ;;  %v1809_v62 = vor.u32 %v1808_v30, %v1805_v11  ;;  %6288 = vmatprep.mubr.msk.bf16.mxu0 %vm1164_vm4, %v4161_v13  ;;  %v4164_v9 = vsel %vm1110_vm3, %v4162_v43, %v4163_v5  ;;  %v1820_v0 = vshrl.u32 %v1602_v50, 16  ;;  %v6765_v23 = vld [vmem:[#allocation2 + $0xe0] sm:$0xf0]  ;;  %v6766_v5 = vld [vmem:[#allocation2 + $0xf0] sm:$0xf0] }
 0x1d9   : > { %6134 = vmatprep.mubr.msk.bf16.mxu1 %vm1164_vm4, %v1793_v27  ;;  %v1823_v33 = vshll.u32 %v1602_v50, 16  ;;  %v1814_v34 = vrot.slane %v1812_v10, 4  ;;  %v1817_v39 = vrot.slane %v1815_v55, 5  ;;  %v1829_v59 = vshrl.u32 %v6764_v61, 16  ;;  %v8173_v53 = vld [vmem:[#allocation2 + $0x80] sm:$0xf0] }
 0x1da   : > { %v1832_v47 = vshll.u32 %v6764_v61, 16  ;;  %v1810_v32 = vsel %vm1606_vm5, %v1801_v52, %v1809_v62  ;;  %v1822_v6 = vrot.slane %v1820_v0, 4  ;;  %v1837_v4 = vshrl.u32 %v1603_v28, 16  ;;  %v2124_v61 = vld [vmem:[#allocation2 + $0x10] sm:$0xf8] }
 0x1db   : > { %v1825_v21 = vrot.slane %v1823_v33, 5  ;;  %6135 = vmatmul.mubr.msk.bf16.gmra.mrb[20].mxu1 %vm1164_vm4, %v1810_v32  ;;  %v1818_v44 = vor.u32 %v1817_v39, %v1814_v34  ;;  %v1831_v16 = vrot.slane %v1829_v59, 4  ;;  %v1840_v18 = vshll.u32 %v1603_v28, 16 }
 0x1dc   : > { %v1834_v48 = vrot.slane %v1832_v47, 5  ;;  %v1839_v58 = vrot.slane %v1837_v4, 4  ;;  %v4165_v14 = vrot.slane %v8157_v22, 4  ;;  %v4166_v7 = vrot.slane %v8014_v54, 4 }
 0x1dd   : > { %v1826_v25 = vor.u32 %v1825_v21, %v1822_v6  ;;  %v1842_v42 = vrot.slane %v1840_v18, 5  ;;  %v4168_v60 = vrot.slane %v8160_v15, 4  ;;  %v4169_v24 = vrot.slane %v8020_v2, 4 }
 0x1de   : > { %v1835_v20 = vor.u32 %v1834_v48, %v1831_v16  ;;  %6289 = vmatmul.mubr.msk.bf16.gmra.mrb[4].mxu0 %vm1164_vm4, %v4164_v9  ;;  %v4167_v37 = vsel %vm1110_vm3, %v4165_v14, %v4166_v7  ;;  %v1846_v31 = vshrl.u32 %v6765_v23, 16  ;;  %v1849_v11 = vshll.u32 %v6765_v23, 16  ;;  %v8176_v9 = vld [vmem:[#allocation2 + $0x90] sm:$0xf0]  ;;  %v2126_v48 = vld [vmem:[#allocation2 + $0x20] sm:$0xf8] }
 0x1df   : > { %v1827_v29 = vsel %vm1606_vm5, %v1818_v44, %v1826_v25  ;;  %v1843_v54 = vor.u32 %v1842_v42, %v1839_v58  ;;  %6292 = vmatprep.mubr.msk.bf16.mxu0 %vm1164_vm4, %v4167_v37  ;;  %v4170_v50 = vsel %vm1110_vm3, %v4168_v60, %v4169_v24  ;;  %v1854_v52 = vshrl.u32 %v1604_v41, 16  ;;  %v8185_v7 = vld [vmem:[#allocation2 + $0xa0] sm:$0xf0] }
 0x1e0   : > { %6138 = vmatprep.mubr.msk.bf16.mxu1 %vm1164_vm4, %v1827_v29  ;;  %v1857_v30 = vshll.u32 %v1604_v41, 16  ;;  %v1848_v2 = vrot.slane %v1846_v31, 4  ;;  %v1851_v43 = vrot.slane %v1849_v11, 5  ;;  %v1863_v27 = vshrl.u32 %v6766_v5, 16  ;;  %v8194_v29 = vld [vmem:[#allocation2 + $0xb0] sm:$0xf0] }
 0x1e1   : > { %v1866_v13 = vshll.u32 %v6766_v5, 16  ;;  %v1844_v10 = vsel %vm1606_vm5, %v1835_v20, %v1843_v54  ;;  %v1856_v55 = vrot.slane %v1854_v52, 4  ;;  %v1871_v62 = vshrl.u32 %v1605_v57, 16  ;;  %v8823_v20 = vld [vmem:[#allocation34_spill] sm:$0xff] }
 0x1e2   : > { %v1859_v28 = vrot.slane %v1857_v30, 5  ;;  %v1852_v0 = vor.u32 %v1851_v43, %v1848_v2  ;;  %v1865_v33 = vrot.slane %v1863_v27, 4  ;;  %v1874_v39 = vshll.u32 %v1605_v57, 16  ;;  %v2128_v57 = vld [vmem:[#allocation2 + $0x30] sm:$0xf8] }
 0x1e3   : > { %v1868_v34 = vrot.slane %v1866_v13, 5  ;;  %6139 = vmatmul.mubr.msk.bf16.gmra.mrb[24].mxu1 %vm1164_vm4, %v1844_v10  ;;  %v1873_v47 = vrot.slane %v1871_v62, 4  ;;  %v4171_v32 = vrot.slane %v8173_v53, 4  ;;  %v4172_v6 = vrot.slane %v8034_v51, 4  ;;  %v2130_v13 = vld [vmem:[#allocation2 + $0x40] sm:$0xf8] }
 0x1e4   : > { %v1860_v59 = vor.u32 %v1859_v28, %v1856_v55  ;;  %v1876_v4 = vrot.slane %v1874_v39, 5  ;;  %v4174_v44 = vrot.slane %v8176_v9, 4  ;;  %v4175_v16 = vrot.slane %v8040_v40, 4 }
 0x1e5   : > { %v1869_v21 = vor.u32 %v1868_v34, %v1865_v33  ;;  %v4173_v25 = vsel %vm1110_vm3, %v4171_v32, %v4172_v6  ;;  %v2157_v58 = vshrl.u32 %v2124_v61, 16  ;;  %v2160_v14 = vshll.u32 %v2124_v61, 16  ;;  %v6767_v34 = vld [vmem:[#allocation2 + $0x38] sm:$0xf]  ;;  %v8207_v6 = vld [vmem:[#allocation2 + $0xc0] sm:$0xf0] }
 0x1e6   : > { %v1861_v18 = vsel %vm1606_vm5, %v1852_v0, %v1860_v59  ;;  %6293 = vmatmul.mubr.msk.bf16.gmra.mrb[8].mxu0 %vm1164_vm4, %v4170_v50  ;;  %v1877_v51 = vor.u32 %v1876_v4, %v1873_v47  ;;  %v4176_v41 = vsel %vm1110_vm3, %v4174_v44, %v4175_v16  ;;  %v8824_v42 = vshrl.u32 %v8823_v20, 16  ;;  %v8213_v16 = vld [vmem:[#allocation2 + $0xd0] sm:$0xf0] }
 0x1e7   : > { %6142 = vmatprep.mubr.msk.bf16.mxu1 %vm1164_vm4, %v1861_v18  ;;  %v8825_v40 = vshll.u32 %v8823_v20, 16  ;;  %6296 = vmatprep.mubr.msk.bf16.mxu0 %vm1164_vm4, %v4173_v25  ;;  %v2159_v37 = vrot.slane %v2157_v58, 3  ;;  %v2162_v23 = vrot.slane %v2160_v14, 4  ;;  %v2174_v31 = vshrl.u32 %v2126_v48, 16  ;;  %v6768_v25 = vld [vmem:[#allocation2 + $0x48] sm:$0xf] }
 0x1e8   : > { %v2167_v60 = vrot.slane %v8824_v42, 3  ;;  %v2177_v11 = vshll.u32 %v2126_v48, 16  ;;  %v1878_v54 = vsel %vm1606_vm5, %v1869_v21, %v1877_v51  ;;  %v4177_v52 = vrot.slane %v8185_v7, 4  ;;  %v2132_v51 = vld [vmem:[#allocation2 + $0x50] sm:$0xf8] }
 0x1e9   : > { %v2170_v24 = vrot.slane %v8825_v40, 4  ;;  %v4178_v30 = vrot.slane %v8053_v46, 4  ;;  %v2163_v2 = vor.u32 %v2162_v23, %v2159_v37  ;;  %v2176_v43 = vrot.slane %v2174_v31, 3 }
 0x1ea   : > { %v2179_v5 = vrot.slane %v2177_v11, 4  ;;  %v4180_v27 = vrot.slane %v8194_v29, 4  ;;  %v4181_v55 = vrot.slane %v8058_v49, 4  ;;  %v2191_v28 = vshrl.u32 %v2128_v57, 16 }
 0x1eb   : > { %v2171_v50 = vor.u32 %v2170_v24, %v2167_v60  ;;  %v4179_v10 = vsel %vm1110_vm3, %v4177_v52, %v4178_v30  ;;  %v2194_v62 = vshll.u32 %v2128_v57, 16  ;;  %6143 = vmatmul.mubr.msk.bf16.gmra.mrb[28].mxu1 %vm1164_vm4, %v1878_v54  ;;  %v2199_v39 = vshrl.u32 %v6767_v34, 16  ;;  %v2134_v24 = vld [vmem:[#allocation2 + $0x60] sm:$0xf8]  ;;  %v6769_v52 = vld [vmem:[#allocation2 + $0x58] sm:$0xf] }
 0x1ec   : > { %v2180_v33 = vor.u32 %v2179_v5, %v2176_v43  ;;  %v2202_v46 = vshll.u32 %v6767_v34, 16  ;;  %v4182_v61 = vsel %vm1110_vm3, %v4180_v27, %v4181_v55  ;;  %v2193_v59 = vrot.slane %v2191_v28, 3  ;;  %v8227_v5 = vld [vmem:[#allocation2 + $0xe0] sm:$0xf0]  ;;  %v6770_v28 = vld [vmem:[#allocation2 + $0x68] sm:$0xf] }
 0x1ed   : > { %v2172_v0 = vsel %vm788_vm6, %v2163_v2, %v2171_v50  ;;  %v2196_v47 = vrot.slane %v2194_v62, 4  ;;  %v2208_v32 = vshrl.u32 %v2130_v13, 16  ;;  %v2201_v21 = vrot.slane %v2199_v39, 3  ;;  %v8826_v27 = vld [vmem:[#allocation33_spill] sm:$0xff] }
 0x1ee   : > { %6148 = vmatprep.mubr.msk.bf16.mxu1 %vm1164_vm4, %v2172_v0  ;;  %v2189_v49 = vsel %vm788_vm6, %v2180_v33, %v2188_v63  ;;  %v2204_v4 = vrot.slane %v2202_v46, 4  ;;  %v2211_v44 = vshll.u32 %v2130_v13, 16  ;;  %6297 = vmatmul.mubr.msk.bf16.gmra.mrb[12].mxu0 %vm1164_vm4, %v4176_v41  ;;  %v2216_v58 = vshrl.u32 %v6768_v25, 16  ;;  %v8232_v0 = vld [vmem:[#allocation2 + $0xf0] sm:$0xf0] }
 0x1ef   : > { %v2197_v48 = vor.u32 %v2196_v47, %v2193_v59  ;;  %v2210_v18 = vrot.slane %v2208_v32, 3  ;;  %v2219_v14 = vshll.u32 %v6768_v25, 16  ;;  %6300 = vmatprep.mubr.msk.bf16.mxu0 %vm1164_vm4, %v4179_v10  ;;  %v4183_v35 = vrot.slane %v8207_v6, 4  ;;  %v2136_v59 = vld [vmem:[#allocation2 + $0x70] sm:$0xf8] }
 0x1f0   : > { %v2205_v20 = vor.u32 %v2204_v4, %v2201_v21  ;;  %v2213_v42 = vrot.slane %v2211_v44, 4  ;;  %v4184_v36 = vrot.slane %v8076_v45, 4  ;;  %v2218_v63 = vrot.slane %v2216_v58, 3  ;;  %v2138_v25 = vld [vmem:[#allocation2 + $0x80] sm:$0xf8] }
 0x1f1   : > { %v2221_v60 = vrot.slane %v2219_v14, 4  ;;  %v4186_v40 = vrot.slane %v8213_v16, 4  ;;  %v4187_v41 = vrot.slane %v8080_v1, 4  ;;  %v2225_v11 = vshrl.u32 %v2132_v51, 16 }
 0x1f2   : > { %v2206_v37 = vsel %vm788_vm6, %v2197_v48, %v2205_v20  ;;  %v2214_v23 = vor.u32 %v2213_v42, %v2210_v18  ;;  %v4185_v31 = vsel %vm1110_vm3, %v4183_v35, %v4184_v36  ;;  %v2228_v50 = vshll.u32 %v2132_v51, 16  ;;  %v6771_v35 = vld [vmem:[#allocation2 + $0x78] sm:$0xf] }
 0x1f3   : > { %v2222_v57 = vor.u32 %v2221_v60, %v2218_v63  ;;  %v8224_v54 = vsel %vm1110_vm3, %v4186_v40, %v4187_v41  ;;  %v2233_v45 = vshrl.u32 %v6769_v52, 16  ;;  %6149 = vmatmul.mubr.msk.bf16.vlgmr.msra.gmra.mrb[0].mxu1 %vm1164_vm4, %v2189_v49  ;;  %v2227_v30 = vrot.slane %v2225_v11, 3  ;;  %v8249_v11 = vld [vmem:[#allocation2 + $0x110] sm:$0xf0] }
 0x1f4   : > { %v2236_v2 = vshll.u32 %v6769_v52, 16  ;;  %v2242_v43 = vshrl.u32 %v2134_v24, 16  ;;  %v2245_v1 = vshll.u32 %v2134_v24, 16  ;;  %6351 = vmatpush3.bf16.msra.mxu1 %v8826_v27  ;;  %6152 = vmatprep.mubr.msk.bf16.mxu1 %vm1164_vm4, %v2206_v37  ;;  %v2230_v10 = vrot.slane %v2228_v50, 4  ;;  %v8245_v24 = vld [vmem:[#allocation2 + $0x100] sm:$0xf0] }
 0x1f5   : > { %v2223_v13 = vsel %vm788_vm6, %v2214_v23, %v2222_v57  ;;  %v2235_v55 = vrot.slane %v2233_v45, 3  ;;  %v2250_v62 = vshrl.u32 %v6770_v28, 16  ;;  %v2253_v46 = vshll.u32 %v6770_v28, 16  ;;  %v6772_v52 = vld [vmem:[#allocation2 + $0x88] sm:$0xf] }
 0x1f6   : > { %v2238_v33 = vrot.slane %v2236_v2, 4  ;;  %v2244_v34 = vrot.slane %v2242_v43, 3  ;;  %v2247_v39 = vrot.slane %v2245_v1, 4  ;;  %6301 = vmatmul.mubr.msk.bf16.gmra.mrb[16].mxu0 %vm1164_vm4, %v4182_v61  ;;  %v2231_v47 = vor.u32 %v2230_v10, %v2227_v30  ;;  %v2140_v2 = vld [vmem:[#allocation2 + $0x90] sm:$0xf8] }
 0x1f7   : > { %v2252_v32 = vrot.slane %v2250_v62, 3  ;;  %v4189_v49 = vrot.slane %v8227_v5, 4  ;;  %v4190_v21 = vrot.slane %v8092_v38, 4  ;;  %6304 = vmatprep.mubr.msk.bf16.mxu0 %vm1164_vm4, %v4185_v31  ;;  %v2255_v48 = vrot.slane %v2253_v46, 4  ;;  %v8254_v10 = vld [vmem:[#allocation2 + $0x98] sm:$0xf] }
 0x1f8   : > { %v2239_v4 = vor.u32 %v2238_v33, %v2235_v55  ;;  %v2248_v44 = vor.u32 %v2247_v39, %v2244_v34  ;;  %v4192_v18 = vrot.slane %v8232_v0, 4  ;;  %v4193_v14 = vrot.slane %v8096_v19, 4  ;;  %v2142_v34 = vld [vmem:[#allocation2 + $0xa0] sm:$0xf8] }
 0x1f9   : > { %v4191_v58 = vsel %vm1110_vm3, %v4189_v49, %v4190_v21  ;;  %v2259_v51 = vshrl.u32 %v2136_v59, 16  ;;  %v2262_v61 = vshll.u32 %v2136_v59, 16  ;;  %v2256_v42 = vor.u32 %v2255_v48, %v2252_v32 }
 0x1fa   : > { %v2240_v20 = vsel %vm788_vm6, %v2231_v47, %v2239_v4  ;;  %v2267_v36 = vshrl.u32 %v6771_v35, 16  ;;  %v2270_v38 = vshll.u32 %v6771_v35, 16  ;;  %v8243_v63 = vsel %vm1110_vm3, %v4192_v18, %v4193_v14  ;;  %v8263_v47 = vld [vmem:[#allocation2 + $0xa8] sm:$0xf] }
 0x1fb   : > { %v2261_v60 = vrot.slane %v2259_v51, 3  ;;  %v2264_v40 = vrot.slane %v2262_v61, 4  ;;  %v2276_v41 = vshrl.u32 %v2138_v25, 16  ;;  %6153 = vmatmul.mubr.msk.bf16.gmra.mrb[4].mxu1 %vm1164_vm4, %v2223_v13  ;;  %v2257_v19 = vsel %vm788_vm6, %v2248_v44, %v2256_v42  ;;  %v4450_v51 = vld [vmem:[#allocation2 + $0x28] sm:$0x1f] }
 0x1fc   : > { %v2269_v37 = vrot.slane %v2267_v36, 3  ;;  %v2272_v23 = vrot.slane %v2270_v38, 4  ;;  %v2279_v31 = vshll.u32 %v2138_v25, 16  ;;  %6156 = vmatprep.mubr.msk.bf16.mxu1 %vm1164_vm4, %v2240_v20  ;;  %v2284_v45 = vshrl.u32 %v6772_v52, 16 }
 0x1fd   : > { %v2265_v57 = vor.u32 %v2264_v40, %v2261_v60  ;;  %v2278_v50 = vrot.slane %v2276_v41, 3  ;;  %v2287_v30 = vshll.u32 %v6772_v52, 16  ;;  %v4195_v27 = vrot.slane %v8245_v24, 4 }
 0x1fe   : > { %v2273_v43 = vor.u32 %v2272_v23, %v2269_v37  ;;  %v2281_v1 = vrot.slane %v2279_v31, 4  ;;  %v4196_v13 = vrot.slane %v8108_v3, 4  ;;  %6305 = vmatmul.mubr.msk.bf16.gmra.mrb[20].mxu0 %vm1164_vm4, %v8224_v54  ;;  %v2286_v55 = vrot.slane %v2284_v45, 3 }
 0x1ff   : > { %v2289_v28 = vrot.slane %v2287_v30, 4  ;;  %v4198_v62 = vrot.slane %v8249_v11, 4  ;;  %v4199_v33 = vrot.slane %v8112_v56, 4  ;;  %6308 = vmatprep.mubr.msk.bf16.mxu0 %vm1164_vm4, %v4191_v58  ;;  %v2293_v3 = vshrl.u32 %v2140_v2, 16  ;;  %v2144_v30 = vld [vmem:[#allocation2 + $0xb0] sm:$0xf8] }
 0x200   : > { %v2274_v39 = vsel %vm788_vm6, %v2265_v57, %v2273_v43  ;;  %v2282_v46 = vor.u32 %v2281_v1, %v2278_v50  ;;  %v4197_v59 = vsel %vm1110_vm3, %v4195_v27, %v4196_v13  ;;  %v2296_v49 = vshll.u32 %v2140_v2, 16  ;;  %v4451_v57 = vld [vmem:[#allocation2 + $0x38] sm:$0x1f] }
 0x201   : > { %v2290_v32 = vor.u32 %v2289_v28, %v2286_v55  ;;  %v8266_v54 = vsel %vm1110_vm3, %v4198_v62, %v4199_v33  ;;  %v2301_v21 = vshrl.u32 %v8254_v10, 16  ;;  %v2295_v4 = vrot.slane %v2293_v3, 3  ;;  %v8283_v27 = vld [vmem:[#allocation2 + $0xb8] sm:$0xf] }
 0x202   : > { %v2304_v56 = vshll.u32 %v8254_v10, 16  ;;  %v2310_v44 = vshrl.u32 %v2142_v34, 16  ;;  %v2313_v48 = vshll.u32 %v2142_v34, 16  ;;  %v2298_v25 = vrot.slane %v2296_v49, 4 }
 0x203   : > { %v2291_v18 = vsel %vm788_vm6, %v2282_v46, %v2290_v32  ;;  %v2303_v58 = vrot.slane %v2301_v21, 3  ;;  %v2318_v14 = vshrl.u32 %v8263_v47, 16  ;;  %6157 = vmatmul.mubr.msk.bf16.gmra.mrb[8].mxu1 %vm1164_vm4, %v2257_v19  ;;  %v2321_v35 = vshll.u32 %v8263_v47, 16  ;;  %v2146_v46 = vld [vmem:[#allocation2 + $0xc0] sm:$0xf8] }
 0x204   : > { %v2306_v61 = vrot.slane %v2304_v56, 4  ;;  %v2312_v20 = vrot.slane %v2310_v44, 3  ;;  %v2315_v42 = vrot.slane %v2313_v48, 4  ;;  %6160 = vmatprep.mubr.msk.bf16.mxu1 %vm1164_vm4, %v2274_v39  ;;  %v2299_v36 = vor.u32 %v2298_v25, %v2295_v4  ;;  %v8287_v21 = vld [vmem:[#allocation2 + $0xc8] sm:$0xf] }
 0x205   : > { %v2320_v38 = vrot.slane %v2318_v14, 3  ;;  %v4467_v60 = vshrl.u32 %v8123_v17, 16  ;;  %v4470_v40 = vshll.u32 %v8123_v17, 16  ;;  %v2323_v23 = vrot.slane %v2321_v35, 4  ;;  %v4452_v35 = vld [vmem:[#allocation2 + $0x48] sm:$0x1f] }
 0x206   : > { %v2307_v41 = vor.u32 %v2306_v61, %v2303_v58  ;;  %v2316_v37 = vor.u32 %v2315_v42, %v2312_v20  ;;  %v4475_v31 = vshrl.u32 %v4450_v51, 16  ;;  %6309 = vmatmul.mubr.msk.bf16.gmra.mrb[24].mxu0 %vm1164_vm4, %v8243_v63  ;;  %v4478_v52 = vshll.u32 %v4450_v51, 16 }
 0x207   : > { %v4469_v19 = vrot.slane %v4467_v60, 4  ;;  %v4472_v50 = vrot.slane %v4470_v40, 5  ;;  %v4484_v45 = vshrl.u32 %v8126_v8, 16  ;;  %6312 = vmatprep.mubr.msk.bf16.mxu0 %vm1164_vm4, %v4197_v59  ;;  %v2324_v43 = vor.u32 %v2323_v23, %v2320_v38 }
 0x208   : > { %v2308_v2 = vsel %vm788_vm6, %v2299_v36, %v2307_v41  ;;  %v4477_v17 = vrot.slane %v4475_v31, 4  ;;  %v4487_v1 = vshll.u32 %v8126_v8, 16  ;;  %v4480_v55 = vrot.slane %v4478_v52, 5  ;;  %v4453_v52 = vld [vmem:[#allocation2 + $0x58] sm:$0x1f] }
 0x209   : > { %v4473_v13 = vor.u32 %v4472_v50, %v4469_v19  ;;  %v4486_v28 = vrot.slane %v4484_v45, 4  ;;  %v4492_v63 = vshrl.u32 %v4451_v57, 16  ;;  %v2325_v62 = vsel %vm788_vm6, %v2316_v37, %v2324_v43  ;;  %v2148_v43 = vld [vmem:[#allocation2 + $0xd0] sm:$0xf8] }
 0x20a   : > { %v4489_v33 = vrot.slane %v4487_v1, 5  ;;  %v4495_v34 = vshll.u32 %v4451_v57, 16  ;;  %v2327_v39 = vshrl.u32 %v2144_v30, 16  ;;  %v4481_v3 = vor.u32 %v4480_v55, %v4477_v17 }
 0x20b   : > { %v4494_v59 = vrot.slane %v4492_v63, 4  ;;  %v2330_v32 = vshll.u32 %v2144_v30, 16  ;;  %v2335_v49 = vshrl.u32 %v8283_v27, 16  ;;  %6161 = vmatmul.mubr.msk.bf16.gmra.mrb[12].mxu1 %vm1164_vm4, %v2291_v18  ;;  %v2338_v44 = vshll.u32 %v8283_v27, 16 }
 0x20c   : > { %v4490_v8 = vor.u32 %v4489_v33, %v4486_v28  ;;  %v4497_v4 = vrot.slane %v4495_v34, 5  ;;  %v2329_v56 = vrot.slane %v2327_v39, 3  ;;  %6164 = vmatprep.mubr.msk.bf16.mxu1 %vm1164_vm4, %v2308_v2  ;;  %v4482_v48 = vsel %vm1606_vm5, %v4473_v13, %v4481_v3  ;;  %v8305_v34 = vld [vmem:[#allocation2 + $0xd8] sm:$0xf] }
 0x20d   : > { %v2332_v25 = vrot.slane %v2330_v32, 4  ;;  %v2337_v58 = vrot.slane %v2335_v49, 3  ;;  %v2344_v14 = vshrl.u32 %v2146_v46, 16  ;;  %v2340_v61 = vrot.slane %v2338_v44, 4  ;;  %v2150_v32 = vld [vmem:[#allocation2 + $0xe0] sm:$0xf8] }
 0x20e   : > { %v4498_v51 = vor.u32 %v4497_v4, %v4494_v59  ;;  %v2347_v20 = vshll.u32 %v2146_v46, 16  ;;  %v2352_v42 = vshrl.u32 %v8287_v21, 16  ;;  %6313 = vmatmul.mubr.msk.bf16.gmra.mrb[28].mxu0 %vm1164_vm4, %v8266_v54  ;;  %v2355_v38 = vshll.u32 %v8287_v21, 16 }
 0x20f   : > { %v2333_v18 = vor.u32 %v2332_v25, %v2329_v56  ;;  %v2346_v36 = vrot.slane %v2344_v14, 3  ;;  %v4501_v60 = vshrl.u32 %v8141_v26, 16  ;;  %6318 = vmatprep.mubr.msk.bf16.mxu0 %vm1164_vm4, %v4482_v48  ;;  %v2341_v41 = vor.u32 %v2340_v61, %v2337_v58  ;;  %v8309_v56 = vld [vmem:[#allocation2 + $0xe8] sm:$0xf] }
 0x210   : > { %v4499_v40 = vsel %vm1606_vm5, %v4490_v8, %v4498_v51  ;;  %v2349_v37 = vrot.slane %v2347_v20, 4  ;;  %v2354_v23 = vrot.slane %v2352_v42, 3  ;;  %v2357_v31 = vrot.slane %v2355_v38, 4 }
 0x211   : > { %v4503_v57 = vrot.slane %v4501_v60, 4  ;;  %v4504_v19 = vshll.u32 %v8141_v26, 16  ;;  %v4509_v50 = vshrl.u32 %v4452_v35, 16  ;;  %v2342_v54 = vsel %vm788_vm6, %v2333_v18, %v2341_v41 }
 0x212   : > { %v2350_v45 = vor.u32 %v2349_v37, %v2346_v36  ;;  %v4512_v30 = vshll.u32 %v4452_v35, 16  ;;  %v4518_v2 = vshrl.u32 %v8145_v12, 16  ;;  %v2358_v17 = vor.u32 %v2357_v31, %v2354_v23  ;;  %v4454_v36 = vld [vmem:[#allocation2 + $0x68] sm:$0x1f] }
 0x213   : > { %v4506_v1 = vrot.slane %v4504_v19, 5  ;;  %v4511_v13 = vrot.slane %v4509_v50, 4  ;;  %v4521_v55 = vshll.u32 %v8145_v12, 16  ;;  %6165 = vmatmul.mubr.msk.bf16.gmra.mrb[16].mxu1 %vm1164_vm4, %v2325_v62  ;;  %v4526_v33 = vshrl.u32 %v4453_v52, 16 }
 0x214   : > { %v4514_v28 = vrot.slane %v4512_v30, 5  ;;  %v4520_v63 = vrot.slane %v4518_v2, 4  ;;  %v4529_v26 = vshll.u32 %v4453_v52, 16  ;;  %6168 = vmatprep.mubr.msk.bf16.mxu1 %vm1164_vm4, %v2342_v54  ;;  %v2359_v39 = vsel %vm788_vm6, %v2350_v45, %v2358_v17  ;;  %v4455_v45 = vld [vmem:[#allocation2 + $0x78] sm:$0x1f] }
 0x215   : > { %v4507_v46 = vor.u32 %v4506_v1, %v4503_v57  ;;  %v4523_v3 = vrot.slane %v4521_v55, 5  ;;  %v2361_v59 = vshrl.u32 %v2148_v43, 16  ;;  %v4528_v8 = vrot.slane %v4526_v33, 4  ;;  %v2152_v1 = vld [vmem:[#allocation2 + $0xf0] sm:$0xf8] }
 0x216   : > { %v4515_v49 = vor.u32 %v4514_v28, %v4511_v13  ;;  %v4531_v4 = vrot.slane %v4529_v26, 5  ;;  %v2364_v12 = vshll.u32 %v2148_v43, 16  ;;  %6319 = vmatmul.mubr.msk.bf16.vlgmr.msra.gmra.mrb[0].mxu0 %vm1164_vm4, %v4499_v40  ;;  %v2369_v48 = vshrl.u32 %v8305_v34, 16 }
 0x217   : > { %v4524_v62 = vor.u32 %v4523_v3, %v4520_v63  ;;  %v2363_v44 = vrot.slane %v2361_v59, 3  ;;  %v2372_v25 = vshll.u32 %v8305_v34, 16  ;;  %v2378_v61 = vshrl.u32 %v2150_v32, 16 }
 0x218   : > { %v4516_v58 = vsel %vm1606_vm5, %v4507_v46, %v4515_v49  ;;  %v4532_v14 = vor.u32 %v4531_v4, %v4528_v8  ;;  %v2366_v51 = vrot.slane %v2364_v12, 4  ;;  %v2371_v20 = vrot.slane %v2369_v48, 3  ;;  %v8327_v46 = vld [vmem:[#allocation2 + $0xf8] sm:$0xf]  ;;  %v2154_v8 = vld [vmem:[#allocation2 + $0x100] sm:$0xf8] }
 0x219   : > { %6322 = vmatprep.mubr.msk.bf16.mxu0 %vm1164_vm4, %v4516_v58  ;;  %v2374_v42 = vrot.slane %v2372_v25, 4  ;;  %v2381_v35 = vshll.u32 %v2150_v32, 16  ;;  %v2386_v18 = vshrl.u32 %v8309_v56, 16  ;;  %v2380_v40 = vrot.slane %v2378_v61, 3  ;;  %v8330_v48 = vld [vmem:[#allocation2 + $0x108] sm:$0xf] }
 0x21a   : > { %v4533_v38 = vsel %vm1606_vm5, %v4524_v62, %v4532_v14  ;;  %v2367_v60 = vor.u32 %v2366_v51, %v2363_v44  ;;  %v2389_v41 = vshll.u32 %v8309_v56, 16  ;;  %v4535_v57 = vshrl.u32 %v8157_v22, 16 }
 0x21b   : > { %v2375_v37 = vor.u32 %v2374_v42, %v2371_v20  ;;  %v2383_v23 = vrot.slane %v2381_v35, 4  ;;  %v2388_v31 = vrot.slane %v2386_v18, 3  ;;  %6169 = vmatmul.mubr.msk.bf16.gmra.mrb[20].mxu1 %vm1164_vm4, %v2359_v39  ;;  %v4538_v50 = vshll.u32 %v8157_v22, 16 }
 0x21c   : > { %v2391_v19 = vrot.slane %v2389_v41, 4  ;;  %v4543_v52 = vshrl.u32 %v4454_v36, 16  ;;  %v4546_v54 = vshll.u32 %v4454_v36, 16  ;;  %v4537_v43 = vrot.slane %v4535_v57, 4 }
 0x21d   : > { %v2376_v30 = vsel %vm788_vm6, %v2367_v60, %v2375_v37  ;;  %v2384_v2 = vor.u32 %v2383_v23, %v2380_v40  ;;  %v4552_v17 = vshrl.u32 %v8160_v15, 16  ;;  %v4540_v55 = vrot.slane %v4538_v50, 5  ;;  %v4456_v60 = vld [vmem:[#allocation2 + $0x88] sm:$0x1f] }
 0x21e   : > { %6172 = vmatprep.mubr.msk.bf16.mxu1 %vm1164_vm4, %v2376_v30  ;;  %v2392_v13 = vor.u32 %v2391_v19, %v2388_v31  ;;  %v4545_v28 = vrot.slane %v4543_v52, 4  ;;  %v4548_v63 = vrot.slane %v4546_v54, 5  ;;  %6323 = vmatmul.mubr.msk.bf16.gmra.mrb[4].mxu0 %vm1164_vm4, %v4533_v38  ;;  %v4555_v22 = vshll.u32 %v8160_v15, 16 }
 0x21f   : > { %v4554_v33 = vrot.slane %v4552_v17, 4  ;;  %v4560_v26 = vshrl.u32 %v4455_v45, 16  ;;  %v4563_v39 = vshll.u32 %v4455_v45, 16  ;;  %v4541_v59 = vor.u32 %v4540_v55, %v4537_v43 }
 0x220   : > { %v2393_v3 = vsel %vm788_vm6, %v2384_v2, %v2392_v13  ;;  %v4549_v32 = vor.u32 %v4548_v63, %v4545_v28  ;;  %v2395_v49 = vshrl.u32 %v2152_v1, 16  ;;  %v4557_v4 = vrot.slane %v4555_v22, 5  ;;  %v4457_v2 = vld [vmem:[#allocation2 + $0x98] sm:$0x1f] }
 0x221   : > { %v4562_v12 = vrot.slane %v4560_v26, 4  ;;  %v4565_v62 = vrot.slane %v4563_v39, 5  ;;  %v2398_v44 = vshll.u32 %v2152_v1, 16  ;;  %v2403_v15 = vshrl.u32 %v8327_v46, 16 }
 0x222   : > { %v4550_v25 = vsel %vm1606_vm5, %v4541_v59, %v4549_v32  ;;  %v2397_v58 = vrot.slane %v2395_v49, 3  ;;  %v2406_v14 = vshll.u32 %v8327_v46, 16  ;;  %v4558_v51 = vor.u32 %v4557_v4, %v4554_v33  ;;  %v6773_v49 = vld [vmem:[#allocation2 + $0x90] sm:$0xf0] }
 0x223   : > { %6326 = vmatprep.mubr.msk.bf16.mxu0 %vm1164_vm4, %v4550_v25  ;;  %v4566_v61 = vor.u32 %v4565_v62, %v4562_v12  ;;  %v2400_v20 = vrot.slane %v2398_v44, 4  ;;  %v2412_v42 = vshrl.u32 %v2154_v8, 16  ;;  %6173 = vmatmul.mubr.msk.bf16.gmra.mrb[24].mxu1 %vm1164_vm4, %v2393_v3  ;;  %v2405_v35 = vrot.slane %v2403_v15, 3  ;;  %v4458_v25 = vld [vmem:[#allocation2 + $0xa8] sm:$0x1f] }
 0x224   : > { %v2408_v18 = vrot.slane %v2406_v14, 4  ;;  %v2415_v36 = vshll.u32 %v2154_v8, 16  ;;  %v2420_v38 = vshrl.u32 %v8330_v48, 16  ;;  %v2423_v23 = vshll.u32 %v8330_v48, 16  ;;  %v6774_v15 = vld [vmem:[#allocation2 + $0xa0] sm:$0xf0] }
 0x225   : > { %v4567_v40 = vsel %vm1606_vm5, %v4558_v51, %v4566_v61  ;;  %v2401_v41 = vor.u32 %v2400_v20, %v2397_v58  ;;  %v2414_v37 = vrot.slane %v2412_v42, 3  ;;  %v4569_v50 = vshrl.u32 %v8173_v53, 16 }
 0x226   : > { %v2409_v31 = vor.u32 %v2408_v18, %v2405_v35  ;;  %v2417_v57 = vrot.slane %v2415_v36, 4  ;;  %v2422_v19 = vrot.slane %v2420_v38, 3  ;;  %6327 = vmatmul.mubr.msk.bf16.gmra.mrb[8].mxu0 %vm1164_vm4, %v4567_v40  ;;  %v2425_v52 = vrot.slane %v2423_v23, 4  ;;  %v4459_v18 = vld [vmem:[#allocation2 + $0xb8] sm:$0x1f] }
 0x227   : > { %v4572_v54 = vshll.u32 %v8173_v53, 16  ;;  %v4577_v45 = vshrl.u32 %v4456_v60, 16  ;;  %v4580_v30 = vshll.u32 %v4456_v60, 16  ;;  %v4571_v1 = vrot.slane %v4569_v50, 4 }
 0x228   : > { %v2410_v43 = vsel %vm788_vm6, %v2401_v41, %v2409_v31  ;;  %v2418_v17 = vor.u32 %v2417_v57, %v2414_v37  ;;  %v4586_v13 = vshrl.u32 %v8176_v9, 16  ;;  %v2426_v55 = vor.u32 %v2425_v52, %v2422_v19 }
 0x229   : > { %6176 = vmatprep.mubr.msk.bf16.mxu1 %vm1164_vm4, %v2410_v43  ;;  %v4574_v28 = vrot.slane %v4572_v54, 5  ;;  %v4579_v63 = vrot.slane %v4577_v45, 4  ;;  %v4582_v33 = vrot.slane %v4580_v30, 5  ;;  %v4589_v26 = vshll.u32 %v8176_v9, 16  ;;  %v6775_v54 = vld [vmem:[#allocation2 + $0xb0] sm:$0xf0] }
 0x22a   : > { %v4588_v22 = vrot.slane %v4586_v13, 4  ;;  %v4594_v39 = vshrl.u32 %v4457_v2, 16  ;;  %v4597_v53 = vshll.u32 %v4457_v2, 16  ;;  %v2427_v3 = vsel %vm788_vm6, %v2418_v17, %v2426_v55  ;;  %v6776_v13 = vld [vmem:[#allocation2 + $0xc0] sm:$0xf0] }
 0x22b   : > { %v4575_v59 = vor.u32 %v4574_v28, %v4571_v1  ;;  %v4583_v32 = vor.u32 %v4582_v33, %v4579_v63  ;;  %v2749_v8 = vrot.slane %v6773_v49, 4  ;;  %6177 = vmatmul.mubr.msk.bf16.gmra.mrb[28].mxu1 %vm1164_vm4, %v2427_v3  ;;  %v4591_v4 = vrot.slane %v4589_v26, 5  ;;  %v4460_v1 = vld [vmem:[#allocation2 + $0xc8] sm:$0x1f] }
 0x22c   : > { %v4596_v12 = vrot.slane %v4594_v39, 4  ;;  %v4599_v62 = vrot.slane %v4597_v53, 5  ;;  %v2750_v44 = vrot.slane %v8254_v10, 4  ;;  %v2752_v9 = vrot.slane %v6774_v15, 4  ;;  %v4461_v53 = vld [vmem:[#allocation2 + $0xd8] sm:$0x1f] }
 0x22d   : > { %v4584_v58 = vsel %vm1606_vm5, %v4575_v59, %v4583_v32  ;;  %v2753_v14 = vrot.slane %v8263_v47, 4  ;;  %v4603_v51 = vshrl.u32 %v8185_v7, 16  ;;  %v4592_v61 = vor.u32 %v4591_v4, %v4588_v22 }
 0x22e   : > { %6330 = vmatprep.mubr.msk.bf16.mxu0 %vm1164_vm4, %v4584_v58  ;;  %v4600_v20 = vor.u32 %v4599_v62, %v4596_v12  ;;  %v2751_v42 = vsel %vm1110_vm3, %v2749_v8, %v2750_v44  ;;  %v4606_v35 = vshll.u32 %v8185_v7, 16  ;;  %v4611_v38 = vshrl.u32 %v4458_v25, 16 }
 0x22f   : > { %6198 = vmatprep.mubr.msk.bf16.mxu1 %vm1164_vm4, %v2751_v42  ;;  %v2754_v10 = vsel %vm1110_vm3, %v2752_v9, %v2753_v14  ;;  %v4605_v36 = vrot.slane %v4603_v51, 4  ;;  %v4614_v60 = vshll.u32 %v4458_v25, 16  ;;  %v4620_v41 = vshrl.u32 %v8194_v29, 16  ;;  %v6777_v9 = vld [vmem:[#allocation2 + $0xd0] sm:$0xf0] }
 0x230   : > { %v4601_v47 = vsel %vm1606_vm5, %v4592_v61, %v4600_v20  ;;  %v4608_v40 = vrot.slane %v4606_v35, 5  ;;  %v4623_v37 = vshll.u32 %v8194_v29, 16  ;;  %v4613_v23 = vrot.slane %v4611_v38, 4  ;;  %v4462_v35 = vld [vmem:[#allocation2 + $0xe8] sm:$0x1f] }
 0x231   : > { %6331 = vmatmul.mubr.msk.bf16.gmra.mrb[12].mxu0 %vm1164_vm4, %v4601_v47  ;;  %v4616_v31 = vrot.slane %v4614_v60, 5  ;;  %v4628_v7 = vshrl.u32 %v4459_v18, 16  ;;  %v4631_v57 = vshll.u32 %v4459_v18, 16  ;;  %v4622_v50 = vrot.slane %v4620_v41, 4 }
 0x232   : > { %v4609_v19 = vor.u32 %v4608_v40, %v4605_v36  ;;  %v4625_v52 = vrot.slane %v4623_v37, 5  ;;  %v2755_v45 = vrot.slane %v6775_v54, 4  ;;  %v2756_v17 = vrot.slane %v8283_v27, 4  ;;  %v4463_v37 = vld [vmem:[#allocation2 + $0xf8] sm:$0x1f] }
 0x233   : > { %v4617_v30 = vor.u32 %v4616_v31, %v4613_v23  ;;  %v4630_v2 = vrot.slane %v4628_v7, 4  ;;  %v4633_v43 = vrot.slane %v4631_v57, 5  ;;  %6199 = vmatmul.mubr.msk.bf16.vlgmr.msra.gmra.mrb[16].mxu1 %vm1164_vm4, %v2754_v10  ;;  %v2758_v55 = vrot.slane %v6776_v13, 4  ;;  %v6778_v10 = vld [vmem:[#allocation2 + $0xe0] sm:$0xf0] }
 0x234   : > { %v4626_v29 = vor.u32 %v4625_v52, %v4622_v50  ;;  %v2759_v28 = vrot.slane %v8287_v21, 4  ;;  %v4637_v63 = vshrl.u32 %v8207_v6, 16  ;;  %v2757_v26 = vsel %vm1110_vm3, %v2755_v45, %v2756_v17  ;;  %v6779_v17 = vld [vmem:[#allocation2 + $0xf0] sm:$0xf0] }
 0x235   : > { %v4618_v33 = vsel %vm1606_vm5, %v4609_v19, %v4617_v30  ;;  %v4634_v22 = vor.u32 %v4633_v43, %v4630_v2  ;;  %v4640_v39 = vshll.u32 %v8207_v6, 16  ;;  %6202 = vmatprep.mubr.msk.bf16.mxu1 %vm1164_vm4, %v2757_v26  ;;  %v4645_v59 = vshrl.u32 %v4460_v1, 16 }
 0x236   : > { %6334 = vmatprep.mubr.msk.bf16.mxu0 %vm1164_vm4, %v4618_v33  ;;  %v2760_v27 = vsel %vm1110_vm3, %v2758_v55, %v2759_v28  ;;  %v4639_v3 = vrot.slane %v4637_v63, 4  ;;  %v4648_v32 = vshll.u32 %v4460_v1, 16  ;;  %v4654_v8 = vshrl.u32 %v8213_v16, 16  ;;  %v4464_v63 = vld [vmem:[#allocation2 + $0x108] sm:$0x1f] }
 0x237   : > { %v4635_v21 = vsel %vm1606_vm5, %v4626_v29, %v4634_v22  ;;  %v4642_v49 = vrot.slane %v4640_v39, 5  ;;  %v4657_v4 = vshll.u32 %v8213_v16, 16  ;;  %v4647_v12 = vrot.slane %v4645_v59, 4  ;;  %v6780_v22 = vld [vmem:[#allocation2 + $0x100] sm:$0xf0] }
 0x238   : > { %v4650_v62 = vrot.slane %v4648_v32, 5  ;;  %v4662_v6 = vshrl.u32 %v4461_v53, 16  ;;  %v4665_v44 = vshll.u32 %v4461_v53, 16  ;;  %v4656_v58 = vrot.slane %v4654_v8, 4  ;;  %v4465_v59 = vld [vmem:[#allocation2 + $0x118] sm:$0x1f] }
 0x239   : > { %6335 = vmatmul.mubr.msk.bf16.gmra.mrb[16].mxu0 %vm1164_vm4, %v4635_v21  ;;  %v4643_v25 = vor.u32 %v4642_v49, %v4639_v3  ;;  %v4659_v15 = vrot.slane %v4657_v4, 5  ;;  %v2761_v14 = vrot.slane %v6777_v9, 4  ;;  %v2762_v42 = vrot.slane %v8305_v34, 4 }
 0x23a   : > { %v4651_v51 = vor.u32 %v4650_v62, %v4647_v12  ;;  %v4664_v61 = vrot.slane %v4662_v6, 4  ;;  %v4667_v20 = vrot.slane %v4665_v44, 5  ;;  %v2764_v16 = vrot.slane %v6778_v10, 4 }
 0x23b   : > { %v4660_v18 = vor.u32 %v4659_v15, %v4656_v58  ;;  %v2765_v36 = vrot.slane %v8309_v56, 4  ;;  %v4671_v38 = vshrl.u32 %v8227_v5, 16  ;;  %6203 = vmatmul.mubr.msk.bf16.gmra.mrb[20].mxu1 %vm1164_vm4, %v2760_v27  ;;  %v2763_v40 = vsel %vm1110_vm3, %v2761_v14, %v2762_v42 }
 0x23c   : > { %v4652_v60 = vsel %vm1606_vm5, %v4643_v25, %v4651_v51  ;;  %v4668_v47 = vor.u32 %v4667_v20, %v4664_v61  ;;  %v4674_v41 = vshll.u32 %v8227_v5, 16  ;;  %6206 = vmatprep.mubr.msk.bf16.mxu1 %vm1164_vm4, %v2763_v40  ;;  %v4679_v56 = vshrl.u32 %v4462_v35, 16 }
 0x23d   : > { %6338 = vmatprep.mubr.msk.bf16.mxu0 %vm1164_vm4, %v4652_v60  ;;  %v2766_v34 = vsel %vm1110_vm3, %v2764_v16, %v2765_v36  ;;  %v4673_v23 = vrot.slane %v4671_v38, 4  ;;  %v4682_v31 = vshll.u32 %v4462_v35, 16  ;;  %v4688_v19 = vshrl.u32 %v8232_v0, 16 }
 0x23e   : > { %v4669_v7 = vsel %vm1606_vm5, %v4660_v18, %v4668_v47  ;;  %v4676_v57 = vrot.slane %v4674_v41, 5  ;;  %v4691_v50 = vshll.u32 %v8232_v0, 16  ;;  %v4681_v52 = vrot.slane %v4679_v56, 4 }
 0x23f   : > { %v4684_v54 = vrot.slane %v4682_v31, 5  ;;  %v4696_v5 = vshrl.u32 %v4463_v37, 16  ;;  %v4699_v45 = vshll.u32 %v4463_v37, 16  ;;  %v4690_v2 = vrot.slane %v4688_v19, 4 }
 0x240   : > { %v4677_v30 = vor.u32 %v4676_v57, %v4673_v23  ;;  %v4693_v43 = vrot.slane %v4691_v50, 5  ;;  %v2767_v1 = vrot.slane %v6779_v17, 4  ;;  %v2768_v28 = vrot.slane %v8327_v46, 4  ;;  %v8425_v50 = vld [vmem:[#allocation14] ss:$0 sm:$0xff] }
 0x241   : > { %6339 = vmatmul.mubr.msk.bf16.gmra.mrb[20].mxu0 %vm1164_vm4, %v4669_v7  ;;  %v4685_v29 = vor.u32 %v4684_v54, %v4681_v52  ;;  %v4698_v13 = vrot.slane %v4696_v5, 4  ;;  %v4701_v55 = vrot.slane %v4699_v45, 5  ;;  %v2770_v0 = vrot.slane %v6780_v22, 4 }
 0x242   : > { %v4694_v33 = vor.u32 %v4693_v43, %v4690_v2  ;;  %v4705_v26 = vshrl.u32 %v8245_v24, 16  ;;  %v2769_v27 = vsel %vm1110_vm3, %v2767_v1, %v2768_v28  ;;  %v4708_v3 = vshll.u32 %v8245_v24, 16 }
 0x243   : > { %v4686_v39 = vsel %vm1606_vm5, %v4677_v30, %v4685_v29  ;;  %v4702_v53 = vor.u32 %v4701_v55, %v4698_v13  ;;  %6207 = vmatmul.mubr.msk.bf16.gmra.mrb[24].mxu1 %vm1164_vm4, %v2766_v34  ;;  %v2771_v46 = vrot.slane %v8330_v48, 4  ;;  %v4713_v21 = vshrl.u32 %v4464_v63, 16 }
 0x244   : > { %6342 = vmatprep.mubr.msk.bf16.mxu0 %vm1164_vm4, %v4686_v39  ;;  %v4707_v32 = vrot.slane %v4705_v26, 4  ;;  %v4716_v49 = vshll.u32 %v4464_v63, 16  ;;  %6210 = vmatprep.mubr.msk.bf16.mxu1 %vm1164_vm4, %v2769_v27  ;;  %v4710_v4 = vrot.slane %v4708_v3, 5  ;;  %v4722_v12 = vshrl.u32 %v8249_v11, 16 }
 0x245   : > { %v4703_v8 = vsel %vm1606_vm5, %v4694_v33, %v4702_v53  ;;  %v4725_v62 = vshll.u32 %v8249_v11, 16  ;;  %v4715_v24 = vrot.slane %v4713_v21, 4  ;;  %v4730_v44 = vshrl.u32 %v4465_v59, 16 }
 0x246   : > { %v4718_v6 = vrot.slane %v4716_v49, 5  ;;  %v4733_v25 = vshll.u32 %v4465_v59, 16  ;;  %v4711_v58 = vor.u32 %v4710_v4, %v4707_v32  ;;  %v4724_v15 = vrot.slane %v4722_v12, 4 }
 0x247   : > { %v4727_v9 = vrot.slane %v4725_v62, 5  ;;  %v4732_v14 = vrot.slane %v4730_v44, 4  ;;  %v2772_v61 = vsel %vm1110_vm3, %v2770_v0, %v2771_v46 }
 0x248   : > { %v4719_v48 = vor.u32 %v4718_v6, %v4715_v24  ;;  %v4735_v51 = vrot.slane %v4733_v25, 5 }
 0x249   : > { %6343 = vmatmul.mubr.msk.bf16.gmra.mrb[24].mxu0 %vm1164_vm4, %v4703_v8  ;;  %v4728_v42 = vor.u32 %v4727_v9, %v4724_v15 }
 0x24a   : > { %v4720_v20 = vsel %vm1606_vm5, %v4711_v58, %v4719_v48  ;;  %v4736_v35 = vor.u32 %v4735_v51, %v4732_v14 }
 0x24b   : > { %6346 = vmatprep.mubr.msk.bf16.mxu0 %vm1164_vm4, %v4720_v20  ;;  %6211 = vmatmul.mubr.msk.bf16.gmra.mrb[28].mxu1 %vm1164_vm4, %v2772_v61 }
 0x24c   : > { %v4737_v11 = vsel %vm1606_vm5, %v4728_v42, %v4736_v35 }
 0x251   : > { %6347 = vmatmul.mubr.msk.bf16.gmra.mrb[28].mxu0 %vm1164_vm4, %v4737_v11 }
 0x2c6   : > { %v6150_v18 = vpop.f32.mrb[0].mxu1 }
 0x2c7   : > { %v2518_v10 = vpop.f32.mrb[1].mxu1 }
 0x2c8   : > { %v6151_v16 = vpop.f32.mrb[2].mxu1 }
 0x2c9   : > { %v2521_v36 = vpop.f32.mrb[3].mxu1 }
 0x2ce   : > { %v6154_v38 = vpop.f32.mrb[4].mxu1 }
 0x2cf   : > { %v2534_v60 = vpop.f32.mrb[5].mxu1 }
 0x2d0   : > { %v6155_v47 = vpop.f32.mrb[6].mxu1 }
 0x2d1   : > { %v2537_v40 = vpop.f32.mrb[7].mxu1 }
 0x2d6   : > { %v8409_v41 = vpop.f32.mrb[8].mxu1 }
 0x2d7   : > { %v8411_v37 = vpop.f32.mrb[9].mxu1 }
 0x2d8   : > { %v8413_v34 = vpop.f32.mrb[10].mxu1 }
 0x2d9   : > { %v8415_v23 = vpop.f32.mrb[11].mxu1 }
 0x2de   : > { %v8417_v56 = vpop.f32.mrb[12].mxu1 }
 0x2df   : > { %v8419_v31 = vpop.f32.mrb[13].mxu1 }
 0x2e0   : > { %v8421_v7 = vpop.f32.mrb[14].mxu1 }
 0x2e1   : > { %v8423_v57 = vpop.f32.mrb[15].mxu1 }
 0x2e9   : > { %v6320_v19 = vpop.f32.mrb[0].mxu0 }
 0x2ea   : > { %v6352_v52 = vadd.f32 %v6320_v19, %v6150_v18  ;;  %v4824_v54 = vpop.f32.mrb[1].mxu0 }
 0x2eb   : > { %v6353_v5 = vadd.f32 %v4824_v54, %v2518_v10  ;;  %v6321_v45 = vpop.f32.mrb[2].mxu0 }
 0x2ec   : > { %v4992_v30 = vadd.f32 %v6352_v52, %v8425_v50  ;;  %v6354_v2 = vadd.f32 %v6321_v45, %v6151_v16  ;;  %v4827_v43 = vpop.f32.mrb[3].mxu0 }
 0x2ed   : > { %v4990_v17 = vadd.f32 %v6353_v5, %v8425_v50  ;;  %v6355_v1 = vadd.f32 %v4827_v43, %v2521_v36 }
 0x2ee   : > { %v5859_v29 = vpack.c.bf16 %v4992_v30, %v4992_v30  ;;  %v4993_v13 = vadd.f32 %v6354_v2, %v8425_v50  ;;  %v5257_v33 = vmul.f32 %v4992_v30, %v4992_v30  ;;  %v5187_v21 = vsel %vm5183_vm8, %v4992_v30, 0.0 }
 0x2ef   : > { %v5857_v55 = vpack.c.bf16 %v4990_v17, %v4990_v17  ;;  %v5255_v28 = vmul.f32 %v4990_v17, %v4990_v17  ;;  %v4991_v63 = vadd.f32 %v6355_v1, %v8425_v50  ;;  %v5184_v0 = vsel %vm5183_vm8, %v4990_v17, 0.0 }
 0x2f0   : > { %5153 = vst.msk [vmem:[%s8432_s21 + $0x8] sm:$0xf] %vm5150_vm7, %v5859_v29  ;;  %v5860_v22 = vpack.c.bf16 %v4993_v13, %v4993_v13  ;;  %v5258_v3 = vmul.f32 %v4993_v13, %v4993_v13  ;;  %v5290_v58 = vsel %vm5183_vm8, %v5257_v33, 0.0  ;;  %v5189_v48 = vsel %vm5183_vm8, %v4993_v13, 0.0 }
 0x2f1   : > { %5151 = vst.msk [vmem:[%s8432_s21] sm:$0xf] %vm5150_vm7, %v5857_v55  ;;  %v5858_v26 = vpack.c.bf16 %v4991_v63, %v4991_v63  ;;  %v5185_v39 = vsel %vm5183_vm8, %v4991_v63, 0.0  ;;  %v5256_v53 = vmul.f32 %v4991_v63, %v4991_v63  ;;  %v6324_v27 = vpop.f32.mrb[4].mxu0  ;;  %v5287_v49 = vsel %vm5183_vm8, %v5255_v28, 0.0 }
 0x2f2   : > { %5154 = vst.msk [vmem:[%s8432_s21 + $0xc] sm:$0xf] %vm5150_vm7, %v5860_v22  ;;  %v5186_v59 = vadd.f32 %v5185_v39, %v5184_v0  ;;  %v6356_v46 = vadd.f32 %v6324_v27, %v6154_v38  ;;  %v4840_v32 = vpop.f32.mrb[5].mxu0  ;;  %v5292_v14 = vsel %vm5183_vm8, %v5258_v3, 0.0 }
 0x2f3   : > { %5152 = vst.msk [vmem:[%s8432_s21 + $0x4] sm:$0xf] %vm5150_vm7, %v5858_v26  ;;  %v5288_v8 = vsel %vm5183_vm8, %v5256_v53, 0.0  ;;  %v6357_v4 = vadd.f32 %v4840_v32, %v2534_v60  ;;  %v6325_v12 = vpop.f32.mrb[6].mxu0 }
 0x2f4   : > { %v5188_v62 = vadd.f32 %v5187_v21, %v5186_v59  ;;  %v5289_v24 = vadd.f32 %v5288_v8, %v5287_v49  ;;  %v4996_v6 = vadd.f32 %v6356_v46, %v8425_v50  ;;  %v6358_v44 = vadd.f32 %v6325_v12, %v6155_v47  ;;  %v4843_v25 = vpop.f32.mrb[7].mxu0 }
 0x2f5   : > { %v4994_v15 = vadd.f32 %v6357_v4, %v8425_v50  ;;  %v6359_v9 = vadd.f32 %v4843_v25, %v2537_v40 }
 0x2f6   : > { %v5291_v51 = vadd.f32 %v5290_v58, %v5289_v24  ;;  %v5863_v61 = vpack.c.bf16 %v4996_v6, %v4996_v6  ;;  %v5190_v42 = vadd.f32 %v5189_v48, %v5188_v62  ;;  %v4997_v10 = vadd.f32 %v6358_v44, %v8425_v50 }
 0x2f7   : > { %v5861_v20 = vpack.c.bf16 %v4994_v15, %v4994_v15  ;;  %v5191_v35 = vsel %vm5183_vm8, %v4994_v15, 0.0  ;;  %v5259_v11 = vmul.f32 %v4994_v15, %v4994_v15  ;;  %v4995_v16 = vadd.f32 %v6359_v9, %v8425_v50 }
 0x2f8   : > { %5157 = vst.msk [vmem:[%s8432_s21 + $0x18] sm:$0xf] %vm5150_vm7, %v5863_v61  ;;  %v5293_v18 = vadd.f32 %v5292_v14, %v5291_v51  ;;  %v5192_v36 = vadd.f32 %v5191_v35, %v5190_v42  ;;  %v5261_v47 = vmul.f32 %v4996_v6, %v4996_v6  ;;  %v5864_v19 = vpack.c.bf16 %v4997_v10, %v4997_v10 }
 0x2f9   : > { %5155 = vst.msk [vmem:[%s8432_s21 + $0x10] sm:$0xf] %vm5150_vm7, %v5861_v20  ;;  %v5294_v38 = vsel %vm5183_vm8, %v5259_v11, 0.0  ;;  %v6328_v60 = vpop.f32.mrb[8].mxu0  ;;  %v5862_v54 = vpack.c.bf16 %v4995_v16, %v4995_v16  ;;  %v5193_v5 = vsel %vm5183_vm8, %v4995_v16, 0.0  ;;  %v5260_v45 = vmul.f32 %v4995_v16, %v4995_v16 }
 0x2fa   : > { %v5295_v40 = vadd.f32 %v5294_v38, %v5293_v18  ;;  %v4856_v52 = vpop.f32.mrb[9].mxu0  ;;  %v6360_v30 = vadd.f32 %v6328_v60, %v8409_v41  ;;  %v5195_v43 = vsel %vm5183_vm8, %v4996_v6, 0.0  ;;  %5158 = vst.msk [vmem:[%s8432_s21 + $0x1c] sm:$0xf] %vm5150_vm7, %v5864_v19  ;;  %v5194_v17 = vadd.f32 %v5193_v5, %v5192_v36 }
 0x2fb   : > { %v6329_v2 = vpop.f32.mrb[10].mxu0  ;;  %v6361_v1 = vadd.f32 %v4856_v52, %v8411_v37  ;;  %v5262_v55 = vmul.f32 %v4997_v10, %v4997_v10  ;;  %5156 = vst.msk [vmem:[%s8432_s21 + $0x14] sm:$0xf] %vm5150_vm7, %v5862_v54  ;;  %v5296_v28 = vsel %vm5183_vm8, %v5260_v45, 0.0  ;;  %v5197_v26 = vsel %vm5183_vm8, %v4997_v10, 0.0 }
 0x2fc   : > { %v6362_v29 = vadd.f32 %v6329_v2, %v8413_v34  ;;  %v4859_v13 = vpop.f32.mrb[11].mxu0  ;;  %v5000_v63 = vadd.f32 %v6360_v30, %v8425_v50  ;;  %v5196_v33 = vadd.f32 %v5195_v43, %v5194_v17  ;;  %v5297_v22 = vadd.f32 %v5296_v28, %v5295_v40 }
 0x2fd   : > { %v6363_v41 = vadd.f32 %v4859_v13, %v8415_v23  ;;  %v4998_v0 = vadd.f32 %v6361_v1, %v8425_v50  ;;  %v5298_v34 = vsel %vm5183_vm8, %v5261_v47, 0.0  ;;  %v5300_v46 = vsel %vm5183_vm8, %v5262_v55, 0.0 }
 0x2fe   : > { %v5001_v37 = vadd.f32 %v6362_v29, %v8425_v50  ;;  %v5867_v39 = vpack.c.bf16 %v5000_v63, %v5000_v63  ;;  %v5299_v27 = vadd.f32 %v5298_v34, %v5297_v22  ;;  %v5198_v59 = vadd.f32 %v5197_v26, %v5196_v33 }
 0x2ff   : > { %v4999_v53 = vadd.f32 %v6363_v41, %v8425_v50  ;;  %v5865_v3 = vpack.c.bf16 %v4998_v0, %v4998_v0  ;;  %v5199_v23 = vsel %vm5183_vm8, %v4998_v0, 0.0  ;;  %v5263_v32 = vmul.f32 %v4998_v0, %v4998_v0 }
 0x300   : > { %5161 = vst.msk [vmem:[%s8432_s21 + $0x28] sm:$0xf] %vm5150_vm7, %v5867_v39  ;;  %v5868_v21 = vpack.c.bf16 %v5001_v37, %v5001_v37  ;;  %v5200_v49 = vadd.f32 %v5199_v23, %v5198_v59  ;;  %v5301_v8 = vadd.f32 %v5300_v46, %v5299_v27  ;;  %v5265_v12 = vmul.f32 %v5000_v63, %v5000_v63 }
 0x301   : > { %5159 = vst.msk [vmem:[%s8432_s21 + $0x20] sm:$0xf] %vm5150_vm7, %v5865_v3  ;;  %v5866_v4 = vpack.c.bf16 %v4999_v53, %v4999_v53  ;;  %v5302_v62 = vsel %vm5183_vm8, %v5263_v32, 0.0  ;;  %v5201_v24 = vsel %vm5183_vm8, %v4999_v53, 0.0  ;;  %v5264_v6 = vmul.f32 %v4999_v53, %v4999_v53 }
 0x302   : > { %5162 = vst.msk [vmem:[%s8432_s21 + $0x2c] sm:$0xf] %vm5150_vm7, %v5868_v21  ;;  %v5303_v25 = vadd.f32 %v5302_v62, %v5301_v8  ;;  %v5266_v58 = vmul.f32 %v5001_v37, %v5001_v37  ;;  %v5202_v15 = vadd.f32 %v5201_v24, %v5200_v49  ;;  %v5203_v14 = vsel %vm5183_vm8, %v5000_v63, 0.0 }
 0x303   : > { %5160 = vst.msk [vmem:[%s8432_s21 + $0x24] sm:$0xf] %vm5150_vm7, %v5866_v4  ;;  %v5304_v51 = vsel %vm5183_vm8, %v5264_v6, 0.0  ;;  %v5306_v36 = vsel %vm5183_vm8, %v5265_v12, 0.0 }
 0x304   : > { %v6332_v44 = vpop.f32.mrb[12].mxu0  ;;  %v5204_v42 = vadd.f32 %v5203_v14, %v5202_v15  ;;  %v5305_v35 = vadd.f32 %v5304_v51, %v5303_v25  ;;  %v5308_v47 = vsel %vm5183_vm8, %v5266_v58, 0.0 }
 0x305   : > { %v6364_v9 = vadd.f32 %v6332_v44, %v8417_v56  ;;  %v4872_v48 = vpop.f32.mrb[13].mxu0 }
 0x306   : > { %v6365_v61 = vadd.f32 %v4872_v48, %v8419_v31  ;;  %v6333_v20 = vpop.f32.mrb[14].mxu0  ;;  %v6200_v16 = vpop.f32.mrb[16].mxu1  ;;  %v5205_v31 = vsel %vm5183_vm8, %v5001_v37, 0.0  ;;  %v5307_v40 = vadd.f32 %v5306_v36, %v5305_v35 }
 0x307   : > { %v5004_v11 = vadd.f32 %v6364_v9, %v8425_v50  ;;  %v6366_v18 = vadd.f32 %v6333_v20, %v8421_v7  ;;  %v4875_v10 = vpop.f32.mrb[15].mxu0  ;;  %v2923_v60 = vpop.f32.mrb[17].mxu1  ;;  %v5206_v7 = vadd.f32 %v5205_v31, %v5204_v42 }
 0x308   : > { %v5002_v56 = vadd.f32 %v6365_v61, %v8425_v50  ;;  %v6367_v38 = vadd.f32 %v4875_v10, %v8423_v57  ;;  %v6201_v52 = vpop.f32.mrb[18].mxu1  ;;  %v5309_v2 = vadd.f32 %v5308_v47, %v5307_v40 }
 0x309   : > { %v5871_v19 = vpack.c.bf16 %v5004_v11, %v5004_v11  ;;  %v2926_v30 = vpop.f32.mrb[19].mxu1  ;;  %v5005_v57 = vadd.f32 %v6366_v18, %v8425_v50  ;;  %v5269_v13 = vmul.f32 %v5004_v11, %v5004_v11  ;;  %v5211_v34 = vsel %vm5183_vm8, %v5004_v11, 0.0 }
 0x30a   : > { %v5869_v54 = vpack.c.bf16 %v5002_v56, %v5002_v56  ;;  %v5207_v5 = vsel %vm5183_vm8, %v5002_v56, 0.0  ;;  %v5267_v45 = vmul.f32 %v5002_v56, %v5002_v56  ;;  %v5003_v43 = vadd.f32 %v6367_v38, %v8425_v50 }
 0x30b   : > { %5165 = vst.msk [vmem:[%s8432_s21 + $0x38] sm:$0xf] %vm5150_vm7, %v5871_v19  ;;  %v5208_v17 = vadd.f32 %v5207_v5, %v5206_v7  ;;  %v5872_v28 = vpack.c.bf16 %v5005_v57, %v5005_v57  ;;  %v5270_v59 = vmul.f32 %v5005_v57, %v5005_v57  ;;  %v5314_v24 = vsel %vm5183_vm8, %v5269_v13, 0.0 }
 0x30c   : > { %5163 = vst.msk [vmem:[%s8432_s21 + $0x30] sm:$0xf] %vm5150_vm7, %v5869_v54  ;;  %v5310_v1 = vsel %vm5183_vm8, %v5267_v45, 0.0  ;;  %v6336_v29 = vpop.f32.mrb[16].mxu0  ;;  %v5870_v41 = vpack.c.bf16 %v5003_v43, %v5003_v43  ;;  %v5209_v33 = vsel %vm5183_vm8, %v5003_v43, 0.0  ;;  %v5268_v22 = vmul.f32 %v5003_v43, %v5003_v43 }
 0x30d   : > { %v5311_v55 = vadd.f32 %v5310_v1, %v5309_v2  ;;  %v4888_v63 = vpop.f32.mrb[17].mxu0  ;;  %v6368_v0 = vadd.f32 %v6336_v29, %v6200_v16  ;;  %5166 = vst.msk [vmem:[%s8432_s21 + $0x3c] sm:$0xf] %vm5150_vm7, %v5872_v28  ;;  %v5210_v26 = vadd.f32 %v5209_v33, %v5208_v17  ;;  %v5213_v6 = vsel %vm5183_vm8, %v5005_v57, 0.0 }
 0x30e   : > { %v6337_v37 = vpop.f32.mrb[18].mxu0  ;;  %v6369_v39 = vadd.f32 %v4888_v63, %v2923_v60  ;;  %v6204_v3 = vpop.f32.mrb[20].mxu1  ;;  %5164 = vst.msk [vmem:[%s8432_s21 + $0x34] sm:$0xf] %vm5150_vm7, %v5870_v41  ;;  %v5312_v23 = vsel %vm5183_vm8, %v5268_v22, 0.0  ;;  %v5316_v51 = vsel %vm5183_vm8, %v5270_v59, 0.0 }
 0x30f   : > { %v6370_v53 = vadd.f32 %v6337_v37, %v6201_v52  ;;  %v4891_v27 = vpop.f32.mrb[19].mxu0  ;;  %v5008_v46 = vadd.f32 %v6368_v0, %v8425_v50  ;;  %v2939_v21 = vpop.f32.mrb[21].mxu1  ;;  %v5212_v49 = vadd.f32 %v5211_v34, %v5210_v26  ;;  %v5313_v8 = vadd.f32 %v5312_v23, %v5311_v55 }
 0x310   : > { %v6371_v32 = vadd.f32 %v4891_v27, %v2926_v30  ;;  %v5006_v4 = vadd.f32 %v6369_v39, %v8425_v50  ;;  %v6205_v62 = vpop.f32.mrb[22].mxu1 }
 0x311   : > { %v5009_v12 = vadd.f32 %v6370_v53, %v8425_v50  ;;  %v5875_v44 = vpack.c.bf16 %v5008_v46, %v5008_v46  ;;  %v2942_v58 = vpop.f32.mrb[23].mxu1  ;;  %v5315_v15 = vadd.f32 %v5314_v24, %v5313_v8  ;;  %v5214_v48 = vadd.f32 %v5213_v6, %v5212_v49 }
 0x312   : > { %v5007_v25 = vadd.f32 %v6371_v32, %v8425_v50  ;;  %v5873_v9 = vpack.c.bf16 %v5006_v4, %v5006_v4  ;;  %v5215_v14 = vsel %vm5183_vm8, %v5006_v4, 0.0  ;;  %v5219_v61 = vsel %vm5183_vm8, %v5008_v46, 0.0 }
 0x313   : > { %5169 = vst.msk [vmem:[%s8432_s21 + $0x48] sm:$0xf] %vm5150_vm7, %v5875_v44  ;;  %v5271_v20 = vmul.f32 %v5006_v4, %v5006_v4  ;;  %v5876_v42 = vpack.c.bf16 %v5009_v12, %v5009_v12  ;;  %v5273_v11 = vmul.f32 %v5008_v46, %v5008_v46  ;;  %v5216_v18 = vadd.f32 %v5215_v14, %v5214_v48 }
 0x314   : > { %v6340_v35 = vpop.f32.mrb[20].mxu0  ;;  %5167 = vst.msk [vmem:[%s8432_s21 + $0x40] sm:$0xf] %vm5150_vm7, %v5873_v9  ;;  %v5317_v10 = vadd.f32 %v5316_v51, %v5315_v15  ;;  %v5874_v16 = vpack.c.bf16 %v5007_v25, %v5007_v25  ;;  %v5217_v38 = vsel %vm5183_vm8, %v5007_v25, 0.0  ;;  %v5272_v60 = vmul.f32 %v5007_v25, %v5007_v25 }
 0x315   : > { %v4904_v36 = vpop.f32.mrb[21].mxu0  ;;  %v5318_v56 = vsel %vm5183_vm8, %v5271_v20, 0.0  ;;  %5170 = vst.msk [vmem:[%s8432_s21 + $0x4c] sm:$0xf] %vm5150_vm7, %v5876_v42  ;;  %v6372_v31 = vadd.f32 %v6340_v35, %v6204_v3  ;;  %v5274_v19 = vmul.f32 %v5009_v12, %v5009_v12  ;;  %v5218_v52 = vadd.f32 %v5217_v38, %v5216_v18 }
 0x316   : > { %v6341_v47 = vpop.f32.mrb[22].mxu0  ;;  %v5319_v40 = vadd.f32 %v5318_v56, %v5317_v10  ;;  %5168 = vst.msk [vmem:[%s8432_s21 + $0x44] sm:$0xf] %vm5150_vm7, %v5874_v16  ;;  %v6373_v54 = vadd.f32 %v4904_v36, %v2939_v21  ;;  %v6208_v5 = vpop.f32.mrb[24].mxu1  ;;  %v5320_v45 = vsel %vm5183_vm8, %v5272_v60, 0.0  ;;  %v5322_v55 = vsel %vm5183_vm8, %v5273_v11, 0.0 }
 0x317   : > { %v4907_v7 = vpop.f32.mrb[23].mxu0  ;;  %v5012_v30 = vadd.f32 %v6372_v31, %v8425_v50  ;;  %v6374_v2 = vadd.f32 %v6341_v47, %v6205_v62  ;;  %v2955_v43 = vpop.f32.mrb[25].mxu1  ;;  %v5220_v17 = vadd.f32 %v5219_v61, %v5218_v52  ;;  %v5221_v28 = vsel %vm5183_vm8, %v5009_v12, 0.0 }
 0x318   : > { %v6375_v57 = vadd.f32 %v4907_v7, %v2942_v58  ;;  %v5321_v1 = vadd.f32 %v5320_v45, %v5319_v40  ;;  %v5010_v29 = vadd.f32 %v6373_v54, %v8425_v50  ;;  %v6209_v13 = vpop.f32.mrb[26].mxu1  ;;  %v5324_v26 = vsel %vm5183_vm8, %v5274_v19, 0.0 }
 0x319   : > { %v5879_v63 = vpack.c.bf16 %v5012_v30, %v5012_v30  ;;  %v5013_v41 = vadd.f32 %v6374_v2, %v8425_v50  ;;  %v2958_v33 = vpop.f32.mrb[27].mxu1  ;;  %v5222_v37 = vadd.f32 %v5221_v28, %v5220_v17  ;;  %v5277_v3 = vmul.f32 %v5012_v30, %v5012_v30 }
 0x31a   : > { %v5323_v22 = vadd.f32 %v5322_v55, %v5321_v1  ;;  %v5877_v0 = vpack.c.bf16 %v5010_v29, %v5010_v29  ;;  %v5223_v34 = vsel %vm5183_vm8, %v5010_v29, 0.0  ;;  %v5275_v39 = vmul.f32 %v5010_v29, %v5010_v29 }
 0x31b   : > { %5173 = vst.msk [vmem:[%s8432_s21 + $0x58] sm:$0xf] %vm5150_vm7, %v5879_v63  ;;  %v5880_v53 = vpack.c.bf16 %v5013_v41, %v5013_v41  ;;  %v5224_v59 = vadd.f32 %v5223_v34, %v5222_v37  ;;  %v5011_v46 = vadd.f32 %v6375_v57, %v8425_v50  ;;  %v5227_v14 = vsel %vm5183_vm8, %v5012_v30, 0.0 }
 0x31c   : > { %v6344_v27 = vpop.f32.mrb[24].mxu0  ;;  %5171 = vst.msk [vmem:[%s8432_s21 + $0x50] sm:$0xf] %vm5150_vm7, %v5877_v0  ;;  %v5325_v23 = vadd.f32 %v5324_v26, %v5323_v22  ;;  %v5326_v21 = vsel %vm5183_vm8, %v5275_v39, 0.0  ;;  %v5330_v51 = vsel %vm5183_vm8, %v5277_v3, 0.0  ;;  %v5278_v35 = vmul.f32 %v5013_v41, %v5013_v41 }
 0x31d   : > { %v4920_v32 = vpop.f32.mrb[25].mxu0  ;;  %5174 = vst.msk [vmem:[%s8432_s21 + $0x5c] sm:$0xf] %vm5150_vm7, %v5880_v53  ;;  %v6376_v49 = vadd.f32 %v6344_v27, %v6208_v5  ;;  %v5878_v62 = vpack.c.bf16 %v5011_v46, %v5011_v46  ;;  %v5225_v24 = vsel %vm5183_vm8, %v5011_v46, 0.0  ;;  %v5276_v58 = vmul.f32 %v5011_v46, %v5011_v46 }
 0x31e   : > { %v6377_v8 = vadd.f32 %v4920_v32, %v2955_v43  ;;  %v6345_v4 = vpop.f32.mrb[26].mxu0  ;;  %v5327_v12 = vadd.f32 %v5326_v21, %v5325_v23  ;;  %v6212_v44 = vpop.f32.mrb[28].mxu1  ;;  %v5226_v25 = vadd.f32 %v5225_v24, %v5224_v59  ;;  %v5229_v36 = vsel %vm5183_vm8, %v5013_v41, 0.0 }
 0x31f   : > { %v4923_v6 = vpop.f32.mrb[27].mxu0  ;;  %v5016_v15 = vadd.f32 %v6376_v49, %v8425_v50  ;;  %v2971_v48 = vpop.f32.mrb[29].mxu1  ;;  %5172 = vst.msk [vmem:[%s8432_s21 + $0x54] sm:$0xf] %vm5150_vm7, %v5878_v62  ;;  %v6378_v61 = vadd.f32 %v6345_v4, %v6209_v13  ;;  %v5328_v18 = vsel %vm5183_vm8, %v5276_v58, 0.0  ;;  %v5332_v45 = vsel %vm5183_vm8, %v5278_v35, 0.0 }
 0x320   : > { %v5014_v9 = vadd.f32 %v6377_v8, %v8425_v50  ;;  %v6379_v20 = vadd.f32 %v4923_v6, %v2958_v33  ;;  %v6213_v42 = vpop.f32.mrb[30].mxu1  ;;  %v5228_v11 = vadd.f32 %v5227_v14, %v5226_v25  ;;  %v5329_v56 = vadd.f32 %v5328_v18, %v5327_v12 }
 0x321   : > { %v5883_v10 = vpack.c.bf16 %v5016_v15, %v5016_v15  ;;  %v2974_v16 = vpop.f32.mrb[31].mxu1  ;;  %v5017_v40 = vadd.f32 %v6378_v61, %v8425_v50  ;;  %v5281_v17 = vmul.f32 %v5016_v15, %v5016_v15  ;;  %v5235_v22 = vsel %vm5183_vm8, %v5016_v15, 0.0 }
 0x322   : > { %v5881_v38 = vpack.c.bf16 %v5014_v9, %v5014_v9  ;;  %v5231_v60 = vsel %vm5183_vm8, %v5014_v9, 0.0  ;;  %v5230_v31 = vadd.f32 %v5229_v36, %v5228_v11  ;;  %v5279_v47 = vmul.f32 %v5014_v9, %v5014_v9 }
 0x323   : > { %5177 = vst.msk [vmem:[%s8432_s21 + $0x68] sm:$0xf] %vm5150_vm7, %v5883_v10  ;;  %v5015_v19 = vadd.f32 %v6379_v20, %v8425_v50  ;;  %v5331_v54 = vadd.f32 %v5330_v51, %v5329_v56  ;;  %v5884_v57 = vpack.c.bf16 %v5017_v40, %v5017_v40  ;;  %v5282_v26 = vmul.f32 %v5017_v40, %v5017_v40 }
 0x324   : > { %v6348_v52 = vpop.f32.mrb[28].mxu0  ;;  %5175 = vst.msk [vmem:[%s8432_s21 + $0x60] sm:$0xf] %vm5150_vm7, %v5881_v38  ;;  %v5232_v30 = vadd.f32 %v5231_v60, %v5230_v31  ;;  %v5334_v2 = vsel %vm5183_vm8, %v5279_v47, 0.0  ;;  %v5237_v3 = vsel %vm5183_vm8, %v5017_v40, 0.0  ;;  %v5338_v32 = vsel %vm5183_vm8, %v5281_v17, 0.0 }
 0x325   : > { %v6380_v7 = vadd.f32 %v6348_v52, %v6212_v44  ;;  %v4936_v5 = vpop.f32.mrb[29].mxu0  ;;  %v5333_v1 = vadd.f32 %v5332_v45, %v5331_v54  ;;  %v5882_v29 = vpack.c.bf16 %v5015_v19, %v5015_v19  ;;  %v5233_v13 = vsel %vm5183_vm8, %v5015_v19, 0.0  ;;  %5178 = vst.msk [vmem:[%s8432_s21 + $0x6c] sm:$0xf] %vm5150_vm7, %v5884_v57 }
 0x326   : > { %v6349_v43 = vpop.f32.mrb[30].mxu0  ;;  %v5234_v28 = vadd.f32 %v5233_v13, %v5232_v30  ;;  %v5280_v63 = vmul.f32 %v5015_v19, %v5015_v19  ;;  %v6381_v33 = vadd.f32 %v4936_v5, %v2971_v48  ;;  %v5340_v62 = vsel %vm5183_vm8, %v5282_v26, 0.0 }
 0x327   : > { %v4939_v55 = vpop.f32.mrb[31].mxu0  ;;  %v5020_v41 = vadd.f32 %v6380_v7, %v8425_v50  ;;  %v5335_v0 = vadd.f32 %v5334_v2, %v5333_v1  ;;  %5176 = vst.msk [vmem:[%s8432_s21 + $0x64] sm:$0xf] %vm5150_vm7, %v5882_v29  ;;  %v6382_v37 = vadd.f32 %v6349_v43, %v6213_v42 }
 0x328   : > { %v6383_v34 = vadd.f32 %v4939_v55, %v2974_v16  ;;  %v5236_v39 = vadd.f32 %v5235_v22, %v5234_v28  ;;  %v5336_v53 = vsel %vm5183_vm8, %v5280_v63, 0.0  ;;  %v5018_v23 = vadd.f32 %v6381_v33, %v8425_v50 }
 0x329   : > { %v5887_v27 = vpack.c.bf16 %v5020_v41, %v5020_v41  ;;  %v5337_v59 = vadd.f32 %v5336_v53, %v5335_v0  ;;  %v5021_v46 = vadd.f32 %v6382_v37, %v8425_v50  ;;  %v5285_v15 = vmul.f32 %v5020_v41, %v5020_v41 }
 0x32a   : > { %v5238_v21 = vadd.f32 %v5237_v3, %v5236_v39  ;;  %v5019_v49 = vadd.f32 %v6383_v34, %v8425_v50  ;;  %v5885_v4 = vpack.c.bf16 %v5018_v23, %v5018_v23  ;;  %v5239_v12 = vsel %vm5183_vm8, %v5018_v23, 0.0 }
 0x32b   : > { %5181 = vst.msk [vmem:[%s8432_s21 + $0x78] sm:$0xf] %vm5150_vm7, %v5887_v27  ;;  %v5339_v8 = vadd.f32 %v5338_v32, %v5337_v59  ;;  %v5283_v6 = vmul.f32 %v5018_v23, %v5018_v23  ;;  %v5888_v44 = vpack.c.bf16 %v5021_v46, %v5021_v46  ;;  %v5243_v51 = vsel %vm5183_vm8, %v5020_v41, 0.0 }
 0x32c   : > { %v5240_v24 = vadd.f32 %v5239_v12, %v5238_v21  ;;  %5179 = vst.msk [vmem:[%s8432_s21 + $0x70] sm:$0xf] %vm5150_vm7, %v5885_v4  ;;  %v5886_v25 = vpack.c.bf16 %v5019_v49, %v5019_v49  ;;  %v5241_v58 = vsel %vm5183_vm8, %v5019_v49, 0.0  ;;  %v5284_v14 = vmul.f32 %v5019_v49, %v5019_v49 }
 0x32d   : > { %v5341_v50 = vadd.f32 %v5340_v62, %v5339_v8  ;;  %v5342_v9 = vsel %vm5183_vm8, %v5283_v6, 0.0  ;;  %5182 = vst.msk [vmem:[%s8432_s21 + $0x7c] sm:$0xf] %vm5150_vm7, %v5888_v44  ;;  %v5286_v20 = vmul.f32 %v5021_v46, %v5021_v46 }
 0x32e   : > { %v5242_v48 = vadd.f32 %v5241_v58, %v5240_v24  ;;  %5180 = vst.msk [vmem:[%s8432_s21 + $0x74] sm:$0xf] %vm5150_vm7, %v5886_v25  ;;  %v5344_v35 = vsel %vm5183_vm8, %v5284_v14, 0.0 }
 0x32f   : > { %v5343_v61 = vadd.f32 %v5342_v9, %v5341_v50 }
 0x330   : > { %v5244_v42 = vadd.f32 %v5243_v51, %v5242_v48 }
 0x331   : > { %6996 = shalt.err (!%p6993_p0)
}
 0x332   : > { %s6997_s26 = scalar_lea.hbm %s8590_s8, 2048  ;;  %s7001_s22 = scalar_lea.hbm %s8734_s7, 4096 }
 0x333   : > { %p6998_p13 = scmp.ne.s32.totalorder %s8590_s8, %s6997_s26  ;;  %p7002_p5 = scmp.lt.u32.totalorder %s8590_s8, %s8734_s7 }
 0x334   : > { %p7003_p10 = scmp.lt.u32.totalorder %s7001_s22, %s6997_s26  ;;  %p7005_p2 = scmp.lt.u32.totalorder %s6997_s26, %s8590_s8 }
 0x335   : > { %p6999_p4 = pnand %p6998_p13, %p8828_p7 }
 0x336   : > { %p7004_p12 = por %p7003_p10, %p7002_p5 }
 0x337   : > { %p7000_p3 = pneg %p6999_p4 }
 0x338   : > { %p7006_p11 = por %p7005_p2, %p7004_p12 }
 0x33a   : > { %p7007_p8 = pnand %p7006_p11, %p7000_p3 }
 0x33c   : > { %7010 = shalt.err (!%p7007_p8)
}
 0x33d   : > { %s7152_s24 = smov 64   ;;  %s7153_s19 = smov 4   ;;  %v5245_v11 = vsel %vm5183_vm8, %v5021_v46, 0.0  ;;  %v5345_v18 = vadd.f32 %v5344_v35, %v5343_v61  ;;  %v5346_v10 = vsel %vm5183_vm8, %v5285_v15, 0.0  ;;  %v5348_v56 = vsel %vm5183_vm8, %v5286_v20, 0.0 }
 0x33e   : > { %6640 = dma.vmem_to_hbm [thread:$0]  (%p8828_p7), %s8592_s29, 2048, %s8590_s8, %s5358_s9, %s7152_s24, %s7152_s24, %s7153_s19   ;;  %v5246_v16 = vadd.f32 %v5245_v11, %v5244_v42  ;;  %vm5253_vm9 = vcmask 57344  }
 0x33f   : > { %v5347_v36 = vadd.f32 %v5346_v10, %v5345_v18  ;;  %s5849_s17 = sshll.u32 %s7129_s12, 4  ;;  %s544_s21 = scalar_lea.vmem [#allocation16], %s7504_s30 }
 0x340   : > { %v5247_v38 = vrot.slane %v5246_v16, 4  ;;  %s5399_s27 = sshll.u32 %s544_s21, 4  ;;  %s550_s29 = scalar_lea.vmem [#allocation18], %s7504_s30  ;;  %s8641_s27 = int_to_ptr.vmem [resolvable:$true] %s5399_s27 }
 0x341   : > { %v5349_v60 = vadd.f32 %v5348_v56, %v5347_v36  ;;  %s5413_s11 = sshll.u32 %s550_s29, 4  ;;  %s8829_s9 = sld [smem:[#allocation40_spill]]  ;;  %s8649_s11 = int_to_ptr.vmem [resolvable:$true] %s5413_s11 }
 0x342   : > { %v5248_v31 = vadd.f32 %v5247_v38, %v5246_v16  ;;  %s8830_s3 = sld [smem:[#allocation41_spill]]  ;;  %s8653_s26 = scalar_lea.sflag [#allocation17], %s469_s13 }
 0x343   : > { %v5350_v47 = vrot.slane %v5349_v60, 4  ;;  %s7011_s5 = scalar_lea.vmem %s8641_s27, 16  ;;  %s7154_s25 = smov [#allocation16]  }
 0x344   : > { %v5249_v40 = vrot.slane %v5248_v31, 2  ;;  %p7012_p9 = scmp.ne.s32.totalorder %s8641_s27, %s7011_s5  ;;  %s7015_s22 = sshll.u32 %s7154_s25, 4  ;;  %s7016_s22 = int_to_ptr.vmem [resolvable:$false] %s7015_s22 }
 0x345   : > { %v5351_v19 = vadd.f32 %v5350_v47, %v5349_v60  ;;  %s7017_s23 = scalar_lea.vmem %s7016_s22, 32  ;;  %p7018_p0 = scmp.lt.s32.totalorder %s8641_s27, %s7016_s22 }
 0x346   : > { %v5250_v52 = vadd.f32 %v5249_v40, %v5248_v31  ;;  %p7013_p1 = pnand %p7012_p9, %p8828_p7  ;;  %p7019_p13 = scmp.lt.s32.totalorder %s7017_s23, %s7011_s5 }
 0x347   : > { %v5352_v54 = vrot.slane %v5351_v19, 2  ;;  %s8639_s18 = scalar_lea.hbm %s8829_s9, %s5849_s17 }
 0x348   : > { %v5251_v7 = vrot.slane %v5250_v52, 1  ;;  %s8647_s20 = scalar_lea.hbm %s8830_s3, %s5849_s17  ;;  %p7014_p6 = pneg %p7013_p1 }
 0x349   : > { %v5353_v5 = vadd.f32 %v5352_v54, %v5351_v19  ;;  %p7020_p4 = por %p7019_p13, %p7018_p0 }
 0x34a   : > { %v5252_v45 = vadd.f32 %v5251_v7, %v5250_v52 }
 0x34b   : > { %v5354_v30 = vrot.slane %v5353_v5, 1  ;;  %p7021_p3 = pnand %p7020_p4, %p7014_p6 }
 0x34c   : > { %5254 = vst.msk [vmem:[%s544_s21] sm:$0x1] %vm5253_vm9, %v5252_v45 }
 0x34d   : > { %7024 = shalt.err (!%p7021_p3)
}
 0x34e   : > { %s7025_s15 = scalar_lea.hbm %s8639_s18, 16  ;;  %s7029_s24 = scalar_lea.hbm %s8829_s9, 32 }
 0x34f   : > { %p7026_p5 = scmp.ne.s32.totalorder %s8639_s18, %s7025_s15  ;;  %p7030_p2 = scmp.lt.u32.totalorder %s8639_s18, %s8829_s9 }
 0x350   : > { %p7031_p11 = scmp.lt.u32.totalorder %s7029_s24, %s7025_s15  ;;  %p7033_p9 = scmp.lt.u32.totalorder %s7025_s15, %s8639_s18 }
 0x351   : > { %p7027_p10 = pnand %p7026_p5, %p8828_p7 }
 0x352   : > { %p7032_p8 = por %p7031_p11, %p7030_p2 }
 0x353   : > { %p7028_p12 = pneg %p7027_p10 }
 0x354   : > { %p7034_p1 = por %p7033_p9, %p7032_p8 }
 0x356   : > { %p7035_p6 = pnand %p7034_p1, %p7028_p12 }
 0x358   : > { %7038 = shalt.err (!%p7035_p6)
}
 0x359   : > { %6641 = dma.vmem_to_hbm [thread:$0]  (%p8828_p7), %s8641_s27, 16, %s8639_s18, %s8653_s26   ;;  %v5355_v2 = vadd.f32 %v5354_v30, %v5353_v5 }
 0x35a   : > { %s7039_s21 = scalar_lea.vmem %s8649_s11, 16  ;;  %s7155_s1 = smov [#allocation18]  }
 0x35b   : > { %5356 = vst.msk [vmem:[%s550_s29] sm:$0x1] %vm5253_vm9, %v5355_v2  ;;  %p7040_p0 = scmp.ne.s32.totalorder %s8649_s11, %s7039_s21  ;;  %s7043_s8 = sshll.u32 %s7155_s1, 4  ;;  %s7044_s8 = int_to_ptr.vmem [resolvable:$false] %s7043_s8 }
 0x35c   : > { %s7045_s12 = scalar_lea.vmem %s7044_s8, 32  ;;  %p7046_p3 = scmp.lt.s32.totalorder %s8649_s11, %s7044_s8 }
 0x35d   : > { %p7041_p13 = pnand %p7040_p0, %p8828_p7  ;;  %p7047_p5 = scmp.lt.s32.totalorder %s7045_s12, %s7039_s21 }
 0x35f   : > { %p7042_p4 = pneg %p7041_p13  ;;  %p7048_p10 = por %p7047_p5, %p7046_p3 }
 0x361   : > { %p7049_p12 = pnand %p7048_p10, %p7042_p4 }
 0x363   : > { %7052 = shalt.err (!%p7049_p12)
}
 0x364   : > { %s7053_s30 = scalar_lea.hbm %s8647_s20, 16  ;;  %s7057_s18 = scalar_lea.hbm %s8830_s3, 32 }
 0x365   : > { %p7054_p2 = scmp.ne.s32.totalorder %s8647_s20, %s7053_s30  ;;  %p7058_p9 = scmp.lt.u32.totalorder %s8647_s20, %s8830_s3 }
 0x366   : > { %p7059_p1 = scmp.lt.u32.totalorder %s7057_s18, %s7053_s30  ;;  %p7061_p0 = scmp.lt.u32.totalorder %s7053_s30, %s8647_s20 }
 0x367   : > { %p7055_p11 = pnand %p7054_p2, %p8828_p7 }
 0x368   : > { %p7060_p6 = por %p7059_p1, %p7058_p9 }
 0x369   : > { %p7056_p8 = pneg %p7055_p11 }
 0x36a   : > { %p7062_p13 = por %p7061_p0, %p7060_p6 }
 0x36c   : > { %p7063_p4 = pnand %p7062_p13, %p7056_p8 }
 0x36e   : > { %7066 = shalt.err (!%p7063_p4)
}
 0x36f   : > { %6642 = dma.vmem_to_hbm [thread:$0]  (%p8828_p7), %s8649_s11, 16, %s8647_s20, %s8653_s26  }
 0x370 PF: > { %s8831_s25 = sld [smem:[#allocation25_spill]]  ;;  %s8832_s22 = sld [smem:[#allocation29_spill]] }
 0x371   : > { %s8833_s23 = sld [smem:[#allocation28_spill]] }
 0x376   : > { %s5425_s15 = sand.u32 1, %s8831_s25   ;;  %p8834_p3 = scmp.ne.s32.totalorder %s8832_s22, 0 }
 0x377   : > { %p8835_p5 = scmp.ge.s32.totalorder %s8833_s23, 2  ;;  %s5426_s13 = scalar_lea.sflag [#allocation5], %s5425_s15 }
 0x379   : > { %p6670_p10 = pnand %p8835_p5, %p8834_p3 }
 0x37b   : > { %7108 = dma.done.wait (!%p6670_p10), %s5426_s13, 2048  }
 0x37c   : > { %7110 = vsyncadd (!%p6670_p10), %s5426_s13, 4294965248  ;;  %s8836_s16 = sadd.s32 4294967294, %s8833_s23  }
 0x37d   : > { %s5434_s24 = sand.u32 1, %s8836_s16  }
 0x37e   : > { %s5435_s19 = scalar_lea.sflag [#allocation17], %s5434_s24 }
 0x37f   : > { %7112 = dma.done.wait (!%p6670_p10), %s5435_s19, 32  }
 0x380   : > { %7114 = vsyncadd (!%p6670_p10), %s5435_s19, 4294967264  ;;  %s34_s14 = sadd.s32 1, %s8833_s23   ;;  %s8837_s11 = sld [smem:[#allocation26_spill]] }
 0x381   : > { %p31_p7 = scmp.ge.s32.totalorder %s34_s14, 4   ;;  %s8838_s20 = sld [smem:[#allocation32_spill]] }
 0x382   : > { %s8839_s12 = sld [smem:[#allocation27_spill]]  ;;  %s8840_s13 = sld [smem:[#allocation30_spill]] }
 0x383   : > { %s8841_s30 = smov %s7121_s10  ;;  %33 = sbr.rel (!%p31_p7) target bundleno = 18 (0x12), region = 168 }
 0x386   : > { %s8842_s10 = smov %s8837_s11 }
 0x387   : > { %s8843_s11 = smov %s8838_s20 }
 0x38a   :  { %5447 = vsyncpa [#allocation4], 1 }
 0x38b   :  { %5449 = vsyncpa [#allocation4 + $0x1], 1 }
 0x38c   :  { %5450 = vsyncpa [#allocation7], 1 }
 0x38d   :  { %5452 = vsyncpa [#allocation7 + $0x1], 1 }
 0x38e   :  { %5453 = vsyncpa [#allocation10], 1 }
 0x38f   :  { %5454 = vsyncpa [#allocation13], 1 }
 0x390   :  { %5455 = vsyncpa [#allocation5], 1 }
 0x391   :  { %5457 = vsyncpa [#allocation5 + $0x1], 1 }
 0x392   :  { %5458 = vsyncpa [#allocation17], 1 }
 0x393   :  { %5460 = vsyncpa [#allocation17 + $0x1], 1 }

</bundles_post_ra>
